<compile_context>
chip_gen: v7x
topology: tpu7x:2x2x1
jax: 0.10.0
libtpu: 0.0.40
codegen_flags: <defaults>
</compile_context>

<pallas_src>
import math

import jax
import jax.numpy as jnp
from jax.experimental import pallas as pl
from jax.experimental.pallas import tpu as pltpu


def _round_up(x, m):
    return ((x + m - 1) // m) * m


def _sublane_multiple(dtype):
    itemsize = jnp.dtype(dtype).itemsize
    return {4: 8, 2: 16, 1: 32}.get(itemsize, 8)


def _i32_const(v):
    """int32 constant from a u32 literal (two's-complement wrap)."""
    v &= 0xFFFFFFFF
    if v >= 1 << 31:
        v -= 1 << 32
    return jnp.int32(v)


def _lsr(x, k):
    """Logical right shift of an int32 array by a static amount k."""
    return jnp.bitwise_and(jnp.right_shift(x, k), (1 << (32 - k)) - 1)


def _mix32(x):
    """lowbias32 finalizer: well-avalanched int32 hash (mul wraps mod 2**32)."""
    x = jnp.bitwise_xor(x, _lsr(x, 16))
    x = x * _i32_const(0x7FEB352D)
    x = jnp.bitwise_xor(x, _lsr(x, 15))
    x = x * _i32_const(0x846CA68B)
    x = jnp.bitwise_xor(x, _lsr(x, 16))
    return x


def _uniform_open01(h):
    """int32 hash -> float32 uniform strictly inside (0, 1), 24-bit resolution."""
    return (_lsr(h, 8).astype(jnp.float32) + 0.5) * jnp.float32(1.0 / 16777216.0)


def _gaussian_noise_kernel(seed_ref, x_ref, o_ref, *, sigma, n_cols):
    tm, tn = x_ref.shape
    half = tm // 2  # tm is a multiple of 2*sublane -> half is sublane-aligned

    base_row = pl.program_id(0) * tm
    base_col = pl.program_id(1) * tn

    # Global element coordinates of the TOP half of the tile.  Top-half element
    # (r, c) is Box-Muller-paired with bottom-half element (r + half, c), so we
    # hash exactly one 32-bit counter per output element.
    rows = jax.lax.broadcasted_iota(jnp.int32, (half, tn), 0) + base_row
    cols = jax.lax.broadcasted_iota(jnp.int32, (half, tn), 1) + base_col
    cnt = rows * _i32_const(n_cols) + cols           # == flat element index

    seed = seed_ref[0]
    salt1 = seed * _i32_const(0x9E3779B9) + _i32_const(0x85EBCA6B)
    salt2 = seed * _i32_const(0x9E3779B9) + _i32_const(0xC2B2AE35)
    u1 = _uniform_open01(_mix32(cnt + salt1))        # (0, 1): log() stays finite
    u2 = _uniform_open01(_mix32(cnt + salt2))        # (0, 1)

    # Box-Muller, both outputs used; sigma folded into the radius so the
    # per-element epilogue is a single multiply-add against x.
    r = jnp.float32(sigma) * jnp.sqrt(-2.0 * jnp.log(u1))
    theta = jnp.float32(2.0 * math.pi) * u2
    n_top = r * jnp.cos(theta)
    n_bot = r * jnp.sin(theta)

    # out = x * (1 + sigma * n)   (relative noise; detach only affects grads)
    x_top = x_ref[:half, :].astype(jnp.float32)
    x_bot = x_ref[half:, :].astype(jnp.float32)
    o_ref[:half, :] = (x_top * (1.0 + n_top)).astype(o_ref.dtype)
    o_ref[half:, :] = (x_bot * (1.0 + n_bot)).astype(o_ref.dtype)


def _choose_2d_view(shape):
    """Row-major re-view of the flat buffer as a lane-dense (rows, cols) slab."""
    total = int(math.prod(shape)) if len(shape) > 0 else 1
    last = int(shape[-1]) if len(shape) > 0 else 1
    if last % 128 == 0:
        return total // last, last
    for cols in (1024, 512, 256, 128):                # lane-dense re-view if possible
        if total % cols == 0:
            return total // cols, cols
    return total // last, last                        # fallback: masked edge lanes


def gaussian_noise(x, seed, *, sigma=1.0, training=True,
                   block_m=512, block_n=512):
    """Pallas implementation of GaussianNoise.forward.

    x:     any-rank float array
    seed:  python int / int32 seed for the counter-based RNG
    """
    if (not training) or sigma == 0:
        return x

    orig_shape = x.shape
    m, n = _choose_2d_view(orig_shape)
    x2 = x.reshape(m, n)                              # contiguous re-view: free in XLA

    sub = _sublane_multiple(x2.dtype)                 # 8 (f32) / 16 (bf16) / 32 (8-bit)
    block_m = _round_up(block_m, 2 * sub)
    block_n = _round_up(block_n, 128)

    # Aligned tiles; boundary blocks handled by Pallas (no pad/crop HBM passes).
    tm = block_m if m > block_m else _round_up(m, 2 * sub)
    tn = block_n if n > block_n else _round_up(n, 128)
    grid_m = pl.cdiv(m, tm)
    grid_n = pl.cdiv(n, tn)

    # Keep >= 2 blocks along a "parallel" axis whenever there is enough work
    # (v7x dual TensorCore / megacore sharding; also gives the pipeline steps).
    if grid_m * grid_n < 2:
        if m >= 4 * sub:
            tm = _round_up(pl.cdiv(m, 2), 2 * sub)
            grid_m = pl.cdiv(m, tm)
        elif n >= 2 * 128:
            tn = _round_up(pl.cdiv(n, 2), 128)
            grid_n = pl.cdiv(n, tn)

    seed_arr = jnp.asarray([seed], dtype=jnp.int32)

    kernel = lambda s, xr, orr: _gaussian_noise_kernel(
        s, xr, orr, sigma=float(sigma), n_cols=n)

    n_elems = m * n
    cost = pl.CostEstimate(
        flops=30 * n_elems,                           # hash + Box-Muller + scale
        transcendentals=2 * n_elems,                  # (log+sqrt)/pair + sin|cos
        bytes_accessed=2 * n_elems * x2.dtype.itemsize,
    )

    out = pl.pallas_call(
        kernel,
        out_shape=jax.ShapeDtypeStruct((m, n), x2.dtype),
        grid_spec=pltpu.PrefetchScalarGridSpec(
            num_scalar_prefetch=1,
            grid=(grid_m, grid_n),
            in_specs=[pl.BlockSpec((tm, tn), lambda i, j, seed: (i, j))],
            out_specs=pl.BlockSpec((tm, tn), lambda i, j, seed: (i, j)),
        ),
        compiler_params=pltpu.CompilerParams(
            dimension_semantics=("parallel", "parallel")),
        cost_estimate=cost,
    )(seed_arr, x2)

    return out.reshape(orig_shape)


if __name__ == "__main__":
    key = jax.random.PRNGKey(0)
    k1, k2 = jax.random.split(key)

    # Node-feature matrix, as used around GaussianNoise in a graph autoencoder.
    # Values kept away from 0 so the implied-noise statistics check below
    # ((out/x - 1)/sigma) is well-conditioned.
    x = jax.random.uniform(k1, (256, 384), jnp.float32, minval=0.5, maxval=1.5)
    sigma = 0.7

    out = gaussian_noise(x, seed=1234, sigma=sigma, training=True)
    jax.block_until_ready(out)
    assert out.shape == x.shape and out.dtype == x.dtype
    assert bool(jnp.all(jnp.isfinite(out)))

    # Implied noise n = (out/x - 1)/sigma must look standard normal.
    n_hat = (out / x - 1.0) / sigma
    mean = float(jnp.mean(n_hat))
    std = float(jnp.std(n_hat))
    assert abs(mean) < 0.05, mean
    assert abs(std - 1.0) < 0.05, std

    # Higher-rank, narrow last dim: exercises the lane-dense re-view and
    # partial edge blocks (no pad/crop passes).
    x_r = jax.random.normal(k2, (2, 4, 16, 32), jnp.float32)
    out_r = gaussian_noise(x_r, seed=7, sigma=1.0, training=True)
    jax.block_until_ready(out_r)
    assert out_r.shape == x_r.shape and out_r.dtype == x_r.dtype
    assert bool(jnp.all(jnp.isfinite(out_r)))

    # Eval mode (or sigma == 0) is the identity, exactly as in the module.
    out_eval = gaussian_noise(x, seed=0, sigma=sigma, training=False)
    assert bool(jnp.all(out_eval == x))
    out_zero = gaussian_noise(x, seed=0, sigma=0.0, training=True)
    assert bool(jnp.all(out_zero == x))

    # TODO(synk): is_relative_detach only changes gradient flow (detach on the
    # scale); this forward-only kernel produces identical forward values.
    print("KERNEL_OK")
</pallas_src>

<mosaic_0001>
module attributes {stable_mosaic.version = 11 : i64} {
  func.func @_lambda_(%arg0: i32, %arg1: i32, %arg2: memref<1xi32, #tpu.memory_space<smem>>, %arg3: memref<128x384xf32, #tpu.memory_space<vmem>>, %arg4: memref<128x384xf32, #tpu.memory_space<vmem>>) attributes {dimension_semantics = [#tpu.dimension_semantics<parallel>, #tpu.dimension_semantics<parallel>], iteration_bounds = array<i64: 2, 1>, scalar_prefetch = 1 : i64, scratch_operands = 0 : i64, tpu.core_type = #tpu.core_type<tc>, window_params = [{transform_indices = @transform_0, window_bounds = array<i64: 128, 384>}, {transform_indices = @transform_1, window_bounds = array<i64: 128, 384>}]} {
    %c128_i32 = arith.constant 128 : i32
    %0 = arith.muli %arg0, %c128_i32 : i32
    %c384_i32 = arith.constant 384 : i32
    %1 = arith.muli %arg1, %c384_i32 : i32
    %2 = tpu.iota {dimensions = array<i32: 0>} : vector<64x384xi32>
    %3 = vector.broadcast %0 : i32 to vector<64x384xi32>
    %4 = arith.addi %2, %3 : vector<64x384xi32>
    %5 = tpu.iota {dimensions = array<i32: 1>} : vector<64x384xi32>
    %6 = vector.broadcast %1 : i32 to vector<64x384xi32>
    %7 = arith.addi %5, %6 : vector<64x384xi32>
    %c384_i32_0 = arith.constant 384 : i32
    %8 = vector.broadcast %c384_i32_0 : i32 to vector<64x384xi32>
    %9 = arith.muli %4, %8 : vector<64x384xi32>
    %10 = arith.addi %9, %7 : vector<64x384xi32>
    %c0 = arith.constant 0 : index
    %11 = memref.load %arg2[%c0] : memref<1xi32, #tpu.memory_space<smem>>
    %c-1640531527_i32 = arith.constant -1640531527 : i32
    %12 = arith.muli %11, %c-1640531527_i32 : i32
    %c-2048144789_i32 = arith.constant -2048144789 : i32
    %13 = arith.addi %12, %c-2048144789_i32 : i32
    %c-1640531527_i32_1 = arith.constant -1640531527 : i32
    %14 = arith.muli %11, %c-1640531527_i32_1 : i32
    %c-1028477387_i32 = arith.constant -1028477387 : i32
    %15 = arith.addi %14, %c-1028477387_i32 : i32
    %16 = vector.broadcast %13 : i32 to vector<64x384xi32>
    %17 = arith.addi %10, %16 : vector<64x384xi32>
    %c16_i32 = arith.constant 16 : i32
    %18 = vector.broadcast %c16_i32 : i32 to vector<64x384xi32>
    %19 = arith.shrsi %17, %18 : vector<64x384xi32>
    %c65535_i32 = arith.constant 65535 : i32
    %20 = vector.broadcast %c65535_i32 : i32 to vector<64x384xi32>
    %21 = arith.andi %19, %20 : vector<64x384xi32>
    %22 = arith.xori %17, %21 : vector<64x384xi32>
    %c2146121005_i32 = arith.constant 2146121005 : i32
    %23 = vector.broadcast %c2146121005_i32 : i32 to vector<64x384xi32>
    %24 = arith.muli %22, %23 : vector<64x384xi32>
    %c15_i32 = arith.constant 15 : i32
    %25 = vector.broadcast %c15_i32 : i32 to vector<64x384xi32>
    %26 = arith.shrsi %24, %25 : vector<64x384xi32>
    %c131071_i32 = arith.constant 131071 : i32
    %27 = vector.broadcast %c131071_i32 : i32 to vector<64x384xi32>
    %28 = arith.andi %26, %27 : vector<64x384xi32>
    %29 = arith.xori %24, %28 : vector<64x384xi32>
    %c-2073254261_i32 = arith.constant -2073254261 : i32
    %30 = vector.broadcast %c-2073254261_i32 : i32 to vector<64x384xi32>
    %31 = arith.muli %29, %30 : vector<64x384xi32>
    %c16_i32_2 = arith.constant 16 : i32
    %32 = vector.broadcast %c16_i32_2 : i32 to vector<64x384xi32>
    %33 = arith.shrsi %31, %32 : vector<64x384xi32>
    %c65535_i32_3 = arith.constant 65535 : i32
    %34 = vector.broadcast %c65535_i32_3 : i32 to vector<64x384xi32>
    %35 = arith.andi %33, %34 : vector<64x384xi32>
    %36 = arith.xori %31, %35 : vector<64x384xi32>
    %c8_i32 = arith.constant 8 : i32
    %37 = vector.broadcast %c8_i32 : i32 to vector<64x384xi32>
    %38 = arith.shrsi %36, %37 : vector<64x384xi32>
    %c16777215_i32 = arith.constant 16777215 : i32
    %39 = vector.broadcast %c16777215_i32 : i32 to vector<64x384xi32>
    %40 = arith.andi %38, %39 : vector<64x384xi32>
    %41 = arith.sitofp %40 : vector<64x384xi32> to vector<64x384xf32>
    %cst = arith.constant 5.000000e-01 : f32
    %42 = vector.broadcast %cst : f32 to vector<64x384xf32>
    %43 = arith.addf %41, %42 : vector<64x384xf32>
    %cst_4 = arith.constant 5.96046448E-8 : f32
    %44 = vector.broadcast %cst_4 : f32 to vector<64x384xf32>
    %45 = arith.mulf %43, %44 : vector<64x384xf32>
    %46 = vector.broadcast %15 : i32 to vector<64x384xi32>
    %47 = arith.addi %10, %46 : vector<64x384xi32>
    %c16_i32_5 = arith.constant 16 : i32
    %48 = vector.broadcast %c16_i32_5 : i32 to vector<64x384xi32>
    %49 = arith.shrsi %47, %48 : vector<64x384xi32>
    %c65535_i32_6 = arith.constant 65535 : i32
    %50 = vector.broadcast %c65535_i32_6 : i32 to vector<64x384xi32>
    %51 = arith.andi %49, %50 : vector<64x384xi32>
    %52 = arith.xori %47, %51 : vector<64x384xi32>
    %c2146121005_i32_7 = arith.constant 2146121005 : i32
    %53 = vector.broadcast %c2146121005_i32_7 : i32 to vector<64x384xi32>
    %54 = arith.muli %52, %53 : vector<64x384xi32>
    %c15_i32_8 = arith.constant 15 : i32
    %55 = vector.broadcast %c15_i32_8 : i32 to vector<64x384xi32>
    %56 = arith.shrsi %54, %55 : vector<64x384xi32>
    %c131071_i32_9 = arith.constant 131071 : i32
    %57 = vector.broadcast %c131071_i32_9 : i32 to vector<64x384xi32>
    %58 = arith.andi %56, %57 : vector<64x384xi32>
    %59 = arith.xori %54, %58 : vector<64x384xi32>
    %c-2073254261_i32_10 = arith.constant -2073254261 : i32
    %60 = vector.broadcast %c-2073254261_i32_10 : i32 to vector<64x384xi32>
    %61 = arith.muli %59, %60 : vector<64x384xi32>
    %c16_i32_11 = arith.constant 16 : i32
    %62 = vector.broadcast %c16_i32_11 : i32 to vector<64x384xi32>
    %63 = arith.shrsi %61, %62 : vector<64x384xi32>
    %c65535_i32_12 = arith.constant 65535 : i32
    %64 = vector.broadcast %c65535_i32_12 : i32 to vector<64x384xi32>
    %65 = arith.andi %63, %64 : vector<64x384xi32>
    %66 = arith.xori %61, %65 : vector<64x384xi32>
    %c8_i32_13 = arith.constant 8 : i32
    %67 = vector.broadcast %c8_i32_13 : i32 to vector<64x384xi32>
    %68 = arith.shrsi %66, %67 : vector<64x384xi32>
    %c16777215_i32_14 = arith.constant 16777215 : i32
    %69 = vector.broadcast %c16777215_i32_14 : i32 to vector<64x384xi32>
    %70 = arith.andi %68, %69 : vector<64x384xi32>
    %71 = arith.sitofp %70 : vector<64x384xi32> to vector<64x384xf32>
    %cst_15 = arith.constant 5.000000e-01 : f32
    %72 = vector.broadcast %cst_15 : f32 to vector<64x384xf32>
    %73 = arith.addf %71, %72 : vector<64x384xf32>
    %cst_16 = arith.constant 5.96046448E-8 : f32
    %74 = vector.broadcast %cst_16 : f32 to vector<64x384xf32>
    %75 = arith.mulf %73, %74 : vector<64x384xf32>
    %76 = math.log %45 : vector<64x384xf32>
    %cst_17 = arith.constant -2.000000e+00 : f32
    %77 = vector.broadcast %cst_17 : f32 to vector<64x384xf32>
    %78 = arith.mulf %77, %76 : vector<64x384xf32>
    %79 = math.sqrt %78 : vector<64x384xf32>
    %cst_18 = arith.constant 0.699999988 : f32
    %80 = vector.broadcast %cst_18 : f32 to vector<64x384xf32>
    %81 = arith.mulf %80, %79 : vector<64x384xf32>
    %cst_19 = arith.constant 6.28318548 : f32
    %82 = vector.broadcast %cst_19 : f32 to vector<64x384xf32>
    %83 = arith.mulf %82, %75 : vector<64x384xf32>
    %84 = math.cos %83 : vector<64x384xf32>
    %85 = arith.mulf %81, %84 : vector<64x384xf32>
    %86 = math.sin %83 : vector<64x384xf32>
    %87 = arith.mulf %81, %86 : vector<64x384xf32>
    %c0_20 = arith.constant 0 : index
    %c0_21 = arith.constant 0 : index
    %88 = vector.load %arg3[%c0_20, %c0_21] : memref<128x384xf32, #tpu.memory_space<vmem>>, vector<64x384xf32>
    %c64 = arith.constant 64 : index
    %c0_22 = arith.constant 0 : index
    %89 = vector.load %arg3[%c64, %c0_22] : memref<128x384xf32, #tpu.memory_space<vmem>>, vector<64x384xf32>
    %cst_23 = arith.constant 1.000000e+00 : f32
    %90 = vector.broadcast %cst_23 : f32 to vector<64x384xf32>
    %91 = arith.addf %90, %85 : vector<64x384xf32>
    %92 = arith.mulf %88, %91 : vector<64x384xf32>
    %c0_24 = arith.constant 0 : index
    %c0_25 = arith.constant 0 : index
    %93 = vector.load %arg4[%c0_24, %c0_25] : memref<128x384xf32, #tpu.memory_space<vmem>>, vector<64x384xf32>
    tpu.vector_store %arg4[%c0_24, %c0_25], %92 {strides = array<i32>} : memref<128x384xf32, #tpu.memory_space<vmem>>, vector<64x384xf32>,
    %cst_26 = arith.constant 1.000000e+00 : f32
    %94 = vector.broadcast %cst_26 : f32 to vector<64x384xf32>
    %95 = arith.addf %94, %87 : vector<64x384xf32>
    %96 = arith.mulf %89, %95 : vector<64x384xf32>
    %c64_27 = arith.constant 64 : index
    %c0_28 = arith.constant 0 : index
    %97 = vector.load %arg4[%c64_27, %c0_28] : memref<128x384xf32, #tpu.memory_space<vmem>>, vector<64x384xf32>
    tpu.vector_store %arg4[%c64_27, %c0_28], %96 {strides = array<i32>} : memref<128x384xf32, #tpu.memory_space<vmem>>, vector<64x384xf32>,
    return
  }
  func.func @transform_0(%arg0: i32, %arg1: i32, %arg2: memref<1xi32, #tpu.memory_space<smem>>) -> (i32, i32) {
    %c0_i32 = arith.constant 0 : i32
    return %arg0, %arg1 : i32, i32
  }
  func.func @transform_1(%arg0: i32, %arg1: i32, %arg2: memref<1xi32, #tpu.memory_space<smem>>) -> (i32, i32) {
    %c0_i32 = arith.constant 0 : i32
    return %arg0, %arg1 : i32, i32
  }
}

</mosaic_0001>

<bundles_post_ra>
// kernel: tpu_custom_call.1
= control target key start
LH: loop header
LB: loop body
LE: loop exit
PB: predicated region body
PF: predicated region fallthrough
CT: control target
= control target key end

     0   :  { %s12212_s0 = inlined_call_operand.<no memory space> [shape: s32[1], index: 0, kind: input, shape index: {}]   ;;  %s12213_s1 = inlined_call_operand.hbm [shape: f32[256,384], index: 1, kind: input, shape index: {}]   ;;  %s12214_s2 = inlined_call_operand.hbm [shape: f32[256,384], index: 2, kind: output, shape index: {}]  }
   0x1   :  { %7 = sst [smem:[#allocation3]] %s12212_s0 }
   0x2   :  { %8 = vsyncpa [#allocation5], 0 }
   0x3   :  { %10 = vsyncpa [#allocation5 + $0x1], 0 }
   0x4   :  { %11 = vsyncpa [#allocation6], 0 }
   0x5   :  { %13 = vsyncpa [#allocation6 + $0x1], 0  ;;  %s7548_s11 = smov 0   ;;  %s7550_s12 = smov 0  }
   0x6   :  { %s7552_s13 = smov 0   ;;  %s7554_s14 = smov 0  }
   0x7   :  { %s7556_s15 = smov 0   ;;  %s7558_s16 = smov 0  }
   0x8 LB: > { %s6642_s0 = sadd.s32 4294967295, %s7516_s16   ;;  %s6643_s17 = sadd.s32 4294967294, %s7516_s16   ;;  %s7516_s16 = sphi %s7558_s16, %s19_s16   ;;  %s7512_s15 = sphi %s7556_s15, %s13156_s15   ;;  %s7508_s14 = sphi %s7554_s14, %s13155_s14   ;;  %s7504_s13 = sphi %s7552_s13, %s13154_s13   ;;  %s7500_s12 = sphi %s7550_s12, %s13153_s12   ;;  %s7496_s11 = sphi %s7548_s11, %s13152_s11  }
   0x9   : > { %s31_s18 = sadd.s32 1, %s7512_s15  ;;  %s40_s19 = sadd.s32 1, %s7504_s13 }
   0xa   : > { %p33_p0 = scmp.ge.s32.totalorder %s31_s18, 2  ;;  %p47_p1 = scmp.ne.s32.totalorder %s7504_s13, %s7500_s12 }
   0xb   : > { %p48_p2 = scmp.eq.s32.totalorder %s7516_s16, 0  ;;  %p53_p3 = scmp.ne.s32.totalorder %s7500_s12, %s7496_s11 }
   0xc   : > { %s13158_s18 = smov (%p33_p0, %s31_s18), 0  ;;  %p54_p5 = scmp.eq.s32.totalorder %s6642_s0, 0 }
   0xd   : > { %p7589_p4 = por %p48_p2, %p47_p1  ;;  %s35_s21 = ssub.s32 %s7512_s15, %s13158_s18 }
   0xe   : > { %p79_p6 = scmp.eq.s32.totalorder %s6642_s0, 1  ;;  %p38_p7 = scmp.eq.s32.totalorder %s35_s21, 0 }
   0xf   : > { %p7595_p8 = por %p54_p5, %p53_p3  ;;  %p85_p10 = scmp.eq.s32.totalorder %s6643_s17, 1 }
  0x10   : > { %p7599_p9 = por %p79_p6, %p47_p1  ;;  %p7152_p13 = scmp.lt.s32.totalorder %s7516_s16, 2 }
  0x11   : > { %s7604_s24 = scalar_select %p38_p7, %s7504_s13, %s40_s19  }
  0x12   : > { %s12502_s23 = scalar_select %p7599_p9, 1, 0 }
  0x13   : > { %p7606_p11 = por %p85_p10, %p53_p3  ;;  %s105_s26 = sand.u32 1, %s7504_s13  }
  0x14   : > { %s7040_s27 = smul.u32 384, %s105_s26  ;;  %p7616_p0 = pnand %p7152_p13, %p7589_p4 }
  0x15   : > { %s12503_s25 = scalar_select %p7606_p11, 1, 0 }
  0x16   : > { %s7041_s28 = smul.u32 6144, %s7512_s15  ;;  %s109_s5 = scalar_lea.vmem [#allocation4], %s7040_s27 }
  0x17   : > { %s119_s6 = sshll.u32 %s109_s5, 4  ;;  %s7628_s7 = scalar_lea.sflag [#allocation5], %s105_s26  ;;  %s7625_s6 = int_to_ptr.vmem [resolvable:$true] %s119_s6 }
  0x18   : > { %s7623_s4 = scalar_lea.hbm %s12213_s1, %s7041_s28  ;;  %p7406_p3 = pneg %p7616_p0 }
  0x19   : > { %s7404_s8 = scalar_lea.hbm %s7623_s4, 6144  ;;  %s7409_s0 = scalar_lea.hbm %s12213_s1, 12288 }
  0x1a   : > { %p7405_p2 = scmp.ne.s32.totalorder %s7623_s4, %s7404_s8  ;;  %p7410_p6 = scmp.lt.u32.totalorder %s7623_s4, %s12213_s1 }
  0x1b   : > { %p7411_p7 = scmp.lt.u32.totalorder %s7409_s0, %s7404_s8  ;;  %p7413_p13 = scmp.lt.u32.totalorder %s7404_s8, %s7623_s4 }
  0x1c   : > { %p7407_p4 = pnand %p7406_p3, %p7405_p2 }
  0x1d   : > { %p7412_p10 = por %p7411_p7, %p7410_p6 }
  0x1e   : > { %p7408_p5 = pneg %p7407_p4 }
  0x1f   : > { %p7414_p12 = por %p7413_p13, %p7412_p10 }
  0x21   : > { %p7415_p1 = pnand %p7414_p12, %p7408_p5 }
  0x23   : > { %7418 = shalt.err (!%p7415_p1)
}
  0x24   : > { %s7419_s20 = scalar_lea.vmem %s7625_s6, 6144  ;;  %s7518_s21 = smov [#allocation4]  }
  0x25   : > { %p7420_p2 = scmp.ne.s32.totalorder %s7625_s6, %s7419_s20  ;;  %s7424_s26 = sshll.u32 %s7518_s21, 4  ;;  %s7425_s26 = int_to_ptr.vmem [resolvable:$false] %s7424_s26 }
  0x26   : > { %s7426_s27 = scalar_lea.vmem %s7425_s26, 12288  ;;  %p7427_p9 = scmp.lt.s32.totalorder %s7625_s6, %s7425_s26 }
  0x27   : > { %p7422_p4 = pnand %p7420_p2, %p7406_p3  ;;  %p7428_p6 = scmp.lt.s32.totalorder %s7426_s27, %s7419_s20 }
  0x29   : > { %p7423_p11 = pneg %p7422_p4  ;;  %p7429_p7 = por %p7428_p6, %p7427_p9 }
  0x2b   : > { %p7430_p10 = pnand %p7429_p7, %p7423_p11 }
  0x2d   : > { %7433 = shalt.err (!%p7430_p10)
}
  0x2e   : > { %s7519_s28 = smov 384   ;;  %s7520_s30 = smov 24  }
  0x2f   : > { %7147 = dma.hbm_to_vmem [thread:$0]  (!%p7616_p0), %s7623_s4, 6144, %s7625_s6, %s7628_s7, %s7519_s28, %s7519_s28, %s7520_s30  }
  0x30   : > { %p127_p12 = scmp.lt.s32.totalorder %s7516_s16, 3  ;;  %p12505_p1 = scmp.ge.s32.totalorder %s7516_s16, 1 }
  0x32   : > { %p128_p3 = pnand %p12505_p1, %p127_p12 }
  0x34   : > { %131 = sbr.rel (%p128_p3) target bundleno = 1042 (0x412), region = 24 }
  0x3b   : > { %s7660_s3 = sand.u32 1, %s7500_s12  }
  0x3c   : > { %s7042_s5 = smul.u32 384, %s7660_s3  ;;  %s134_s8 = scalar_lea.sflag [#allocation5], %s7660_s3 }
  0x3e   : > { %s7666_s9 = scalar_lea.vmem [#allocation4], %s7042_s5 }
  0x3f   : > { %7487 = dma.done.wait (%p7595_p8), %s134_s8, 6144  }
  0x40   : > { %7489 = vsyncadd (%p7595_p8), %s134_s8, 4294961152  ;;  %v162_v0 = vlaneseq  ;;  %s6650_s29 = sshll.u32 %s7508_s14, 7  ;;  %s7673_s4 = sld [smem:[#allocation3]] }
  0x41   : > { %v171_v2 = vstv %s6650_s29  ;;  %s12054_s10 = scalar_lea.vmem [#allocation7], %s7042_s5  ;;  %s7139_s0 = smul.u32 6144, %s7508_s14 }
  0x42   : > { %v163_v1 = vshrl.u32 %v162_v0, 7  ;;  %v181_v11 = vand.u32 127, %v162_v0  ;;  %s6555_s17 = sshll.u32 %s12054_s10, 4  ;;  %s6539_s14 = scalar_lea.sflag [#allocation6], %s7660_s3  ;;  %s12151_s17 = int_to_ptr.vmem [resolvable:$true] %s6555_s17 }
  0x43   : > { %s12147_s21 = scalar_lea.hbm %s12214_s2, %s7139_s0  ;;  %s7434_s26 = scalar_lea.vmem %s12151_s17, 6144 }
  0x44   : > { %v164_v3 = vadd.s32 8, %v163_v1  ;;  %v165_v4 = vadd.s32 16, %v163_v1  ;;  %v166_v5 = vadd.s32 24, %v163_v1  ;;  %v167_v6 = vadd.s32 32, %v163_v1  ;;  %p7435_p8 = scmp.ne.s32.totalorder %s12151_s17, %s7434_s26  ;;  %p13149_p9 = scmp.ne.s32.totalorder %s12502_s23, 0 }
  0x45   : > { %v168_v7 = vadd.s32 40, %v163_v1  ;;  %v172_v8 = vadd.s32 %v171_v2, %v163_v1  ;;  %v169_v9 = vadd.s32 48, %v163_v1  ;;  %v170_v10 = vadd.s32 56, %v163_v1  ;;  %s7527_s27 = smov [#allocation7]  }
  0x46   : > { %v173_v12 = vadd.s32 %v171_v2, %v164_v3  ;;  %v174_v13 = vadd.s32 %v171_v2, %v165_v4  ;;  %v175_v14 = vadd.s32 %v171_v2, %v166_v5  ;;  %v176_v15 = vadd.s32 %v171_v2, %v167_v6  ;;  %s221_s22 = smul.u32 2654435769, %s7673_s4  ;;  %p7436_p11 = pnand %p7435_p8, %p13149_p9 }
  0x47   : > { %v177_v16 = vadd.s32 %v171_v2, %v168_v7  ;;  %v188_v17 = vmul.u32 384, %v172_v8  ;;  %v178_v18 = vadd.s32 %v171_v2, %v169_v9  ;;  %v179_v19 = vadd.s32 %v171_v2, %v170_v10  ;;  %s7438_s28 = sshll.u32 %s7527_s27, 4  ;;  %s7439_s28 = int_to_ptr.vmem [resolvable:$false] %s7438_s28 }
  0x48   : > { %v182_v20 = vadd.s32 128, %v181_v11  ;;  %v183_v21 = vadd.s32 256, %v181_v11  ;;  %v189_v22 = vmul.u32 384, %v173_v12  ;;  %v190_v23 = vmul.u32 384, %v174_v13  ;;  %s222_s6 = sadd.s32 2246822507, %s221_s22  ;;  %p7437_p0 = pneg %p7436_p11 }
  0x49   : > { %v191_v24 = vmul.u32 384, %v175_v14  ;;  %v192_v25 = vmul.u32 384, %v176_v15  ;;  %v7676_v27 = vadd.s32 %v188_v17, %v181_v11  ;;  %s223_s7 = sadd.s32 3266489909, %s221_s22  ;;  %v224_v43 = vstv %s222_s6  ;;  %s7440_s30 = scalar_lea.vmem %s7439_s28, 12288 }
  0x4a   : > { %v193_v26 = vmul.u32 384, %v177_v16  ;;  %v194_v28 = vmul.u32 384, %v178_v18  ;;  %v7678_v30 = vadd.s32 %v188_v17, %v182_v20  ;;  %v7680_v31 = vadd.s32 %v188_v17, %v183_v21  ;;  %p7441_p5 = scmp.lt.s32.totalorder %s12151_s17, %s7439_s28  ;;  %p7442_p13 = scmp.lt.s32.totalorder %s7440_s30, %s7434_s26 }
  0x4b   : > { %v195_v29 = vmul.u32 384, %v179_v19  ;;  %v7682_v32 = vadd.s32 %v189_v22, %v181_v11  ;;  %v7684_v33 = vadd.s32 %v189_v22, %v182_v20  ;;  %v7686_v34 = vadd.s32 %v189_v22, %v183_v21 }
  0x4c   : > { %v7688_v35 = vadd.s32 %v190_v23, %v181_v11  ;;  %v7690_v36 = vadd.s32 %v190_v23, %v182_v20  ;;  %v7692_v37 = vadd.s32 %v190_v23, %v183_v21  ;;  %v7694_v38 = vadd.s32 %v191_v24, %v181_v11  ;;  %p7443_p2 = por %p7442_p13, %p7441_p5 }
  0x4d   : > { %12506 = vst [vmem:[#allocation10_spill] sm:$0xff] %v7686_v34  ;;  %v7696_v39 = vadd.s32 %v191_v24, %v182_v20  ;;  %v7698_v40 = vadd.s32 %v191_v24, %v183_v21  ;;  %v7700_v41 = vadd.s32 %v192_v25, %v181_v11  ;;  %v7702_v42 = vadd.s32 %v192_v25, %v182_v20 }
  0x4e   : > { %12507 = vst [vmem:[#allocation11_spill] sm:$0xff] %v7688_v35  ;;  %12508 = vst [vmem:[#allocation12_spill] sm:$0xff] %v7690_v36  ;;  %v7704_v44 = vadd.s32 %v192_v25, %v183_v21  ;;  %v7706_v45 = vadd.s32 %v193_v26, %v181_v11  ;;  %v7708_v46 = vadd.s32 %v193_v26, %v182_v20  ;;  %v7725_v55 = vstv %s223_s7  ;;  %p7444_p4 = pnand %p7443_p2, %p7437_p0 }
  0x4f   : > { %12509 = vst [vmem:[#allocation13_spill] sm:$0xff] %v7692_v37  ;;  %12510 = vst [vmem:[#allocation14_spill] sm:$0xff] %v7694_v38  ;;  %v7710_v47 = vadd.s32 %v193_v26, %v183_v21  ;;  %v7712_v48 = vadd.s32 %v194_v28, %v181_v11  ;;  %v7714_v49 = vadd.s32 %v194_v28, %v182_v20 }
  0x50   : > { %12511 = vst [vmem:[#allocation15_spill] sm:$0xff] %v7696_v39  ;;  %12512 = vst [vmem:[#allocation16_spill] sm:$0xff] %v7698_v40  ;;  %v7716_v50 = vadd.s32 %v194_v28, %v183_v21  ;;  %v7718_v51 = vadd.s32 %v195_v29, %v181_v11  ;;  %v7720_v52 = vadd.s32 %v195_v29, %v182_v20 }
  0x51   : > { %12513 = vst [vmem:[#allocation17_spill] sm:$0xff] %v7700_v41  ;;  %12514 = vst [vmem:[#allocation18_spill] sm:$0xff] %v7702_v42  ;;  %v7722_v53 = vadd.s32 %v195_v29, %v183_v21  ;;  %v225_v54 = vadd.s32 %v224_v43, %v7676_v27  ;;  %v226_v56 = vadd.s32 %v224_v43, %v7678_v30 }
  0x52   : > { %12515 = vst [vmem:[#allocation19_spill] sm:$0xff] %v7704_v44  ;;  %12516 = vst [vmem:[#allocation20_spill] sm:$0xff] %v7706_v45  ;;  %v227_v57 = vadd.s32 %v224_v43, %v7680_v31  ;;  %v228_v58 = vadd.s32 %v224_v43, %v7682_v32  ;;  %v229_v59 = vadd.s32 %v224_v43, %v7684_v33 }
  0x53   : > { %12517 = vst [vmem:[#allocation21_spill] sm:$0xff] %v7708_v46  ;;  %12518 = vst [vmem:[#allocation22_spill] sm:$0xff] %v7710_v47  ;;  %v230_v60 = vadd.s32 %v224_v43, %v7686_v34  ;;  %v231_v61 = vadd.s32 %v224_v43, %v7688_v35  ;;  %v232_v62 = vadd.s32 %v224_v43, %v7690_v36  ;;  %v6651_v15 = vshrl.u32 %v225_v54, 16 }
  0x54   : > { %12519 = vst [vmem:[#allocation23_spill] sm:$0xff] %v7712_v48  ;;  %12520 = vst [vmem:[#allocation24_spill] sm:$0xff] %v7714_v49  ;;  %v233_v63 = vadd.s32 %v224_v43, %v7692_v37  ;;  %v234_v0 = vadd.s32 %v224_v43, %v7694_v38  ;;  %v235_v1 = vadd.s32 %v224_v43, %v7696_v39  ;;  %v6652_v16 = vshrl.u32 %v226_v56, 16 }
  0x55   : > { %12521 = vst [vmem:[#allocation25_spill] sm:$0xff] %v7716_v50  ;;  %12522 = vst [vmem:[#allocation26_spill] sm:$0xff] %v7718_v51  ;;  %v236_v2 = vadd.s32 %v224_v43, %v7698_v40  ;;  %v237_v3 = vadd.s32 %v224_v43, %v7700_v41  ;;  %v238_v4 = vadd.s32 %v224_v43, %v7702_v42  ;;  %v6653_v17 = vshrl.u32 %v227_v57, 16 }
  0x56   : > { %12523 = vst [vmem:[#allocation27_spill] sm:$0xff] %v7720_v52  ;;  %12524 = vst [vmem:[#allocation28_spill] sm:$0xff] %v7722_v53  ;;  %v239_v5 = vadd.s32 %v224_v43, %v7704_v44  ;;  %v240_v6 = vadd.s32 %v224_v43, %v7706_v45  ;;  %v241_v7 = vadd.s32 %v224_v43, %v7708_v46  ;;  %v6654_v18 = vshrl.u32 %v228_v58, 16 }
  0x57   : > { %12525 = vst [vmem:[#allocation29_spill] sm:$0xff] %v7725_v55  ;;  %v242_v8 = vadd.s32 %v224_v43, %v7710_v47  ;;  %v243_v9 = vadd.s32 %v224_v43, %v7712_v48  ;;  %v244_v10 = vadd.s32 %v224_v43, %v7714_v49  ;;  %v245_v11 = vadd.s32 %v224_v43, %v7716_v50 }
  0x58   : > { %v246_v12 = vadd.s32 %v224_v43, %v7718_v51  ;;  %v247_v13 = vadd.s32 %v224_v43, %v7720_v52  ;;  %v248_v14 = vadd.s32 %v224_v43, %v7722_v53  ;;  %v6655_v19 = vshrl.u32 %v229_v59, 16 }
  0x59   : > { %v6656_v20 = vshrl.u32 %v230_v60, 16  ;;  %v6657_v21 = vshrl.u32 %v231_v61, 16  ;;  %v6658_v22 = vshrl.u32 %v232_v62, 16  ;;  %v6659_v23 = vshrl.u32 %v233_v63, 16 }
  0x5a   : > { %v6660_v24 = vshrl.u32 %v234_v0, 16  ;;  %v6661_v25 = vshrl.u32 %v235_v1, 16  ;;  %v6662_v26 = vshrl.u32 %v236_v2, 16  ;;  %v6663_v28 = vshrl.u32 %v237_v3, 16 }
  0x5b   : > { %v6664_v29 = vshrl.u32 %v238_v4, 16  ;;  %v6665_v50 = vshrl.u32 %v239_v5, 16  ;;  %v6666_v51 = vshrl.u32 %v240_v6, 16  ;;  %v6667_v49 = vshrl.u32 %v241_v7, 16 }
  0x5c   : > { %v6668_v52 = vshrl.u32 %v242_v8, 16  ;;  %v6669_v48 = vshrl.u32 %v243_v9, 16  ;;  %v6670_v43 = vshrl.u32 %v244_v10, 16  ;;  %v6671_v53 = vshrl.u32 %v245_v11, 16 }
  0x5d   : > { %v6672_v47 = vshrl.u32 %v246_v12, 16  ;;  %v6673_v46 = vshrl.u32 %v247_v13, 16  ;;  %v6674_v45 = vshrl.u32 %v248_v14, 16  ;;  %v7750_v44 = vxor.u32 %v6651_v15, %v225_v54 }
  0x5e   : > { %v7752_v42 = vxor.u32 %v6652_v16, %v226_v56  ;;  %v7754_v41 = vxor.u32 %v6653_v17, %v227_v57  ;;  %v7756_v40 = vxor.u32 %v6654_v18, %v228_v58  ;;  %v7758_v39 = vxor.u32 %v6655_v19, %v229_v59 }
  0x5f   : > { %v7760_v38 = vxor.u32 %v6656_v20, %v230_v60  ;;  %v7762_v37 = vxor.u32 %v6657_v21, %v231_v61  ;;  %v7764_v36 = vxor.u32 %v6658_v22, %v232_v62  ;;  %v7766_v35 = vxor.u32 %v6659_v23, %v233_v63 }
  0x60   : > { %v7768_v34 = vxor.u32 %v6660_v24, %v234_v0  ;;  %v7770_v54 = vxor.u32 %v6661_v25, %v235_v1  ;;  %v7772_v56 = vxor.u32 %v6662_v26, %v236_v2  ;;  %v7774_v57 = vxor.u32 %v6663_v28, %v237_v3 }
  0x61   : > { %v7776_v58 = vxor.u32 %v6664_v29, %v238_v4  ;;  %v7778_v59 = vxor.u32 %v6665_v50, %v239_v5  ;;  %v7780_v60 = vxor.u32 %v6666_v51, %v240_v6  ;;  %v321_v61 = vmul.u32 2146121005, %v7750_v44 }
  0x62   : > { %v7783_v62 = vxor.u32 %v6667_v49, %v241_v7  ;;  %v7785_v63 = vxor.u32 %v6668_v52, %v242_v8  ;;  %v322_v0 = vmul.u32 2146121005, %v7752_v42  ;;  %v323_v1 = vmul.u32 2146121005, %v7754_v41 }
  0x63   : > { %v7789_v2 = vxor.u32 %v6669_v48, %v243_v9  ;;  %v7791_v3 = vxor.u32 %v6670_v43, %v244_v10  ;;  %v324_v4 = vmul.u32 2146121005, %v7756_v40  ;;  %v325_v50 = vmul.u32 2146121005, %v7758_v39 }
  0x64   : > { %v7795_v51 = vxor.u32 %v6671_v53, %v245_v11  ;;  %v7797_v5 = vxor.u32 %v6672_v47, %v246_v12  ;;  %v326_v44 = vmul.u32 2146121005, %v7760_v38  ;;  %v327_v49 = vmul.u32 2146121005, %v7762_v37 }
  0x65   : > { %v7801_v52 = vxor.u32 %v6673_v46, %v247_v13  ;;  %v7803_v42 = vxor.u32 %v6674_v45, %v248_v14  ;;  %v328_v41 = vmul.u32 2146121005, %v7764_v36  ;;  %v329_v48 = vmul.u32 2146121005, %v7766_v35 }
  0x66   : > { %v330_v40 = vmul.u32 2146121005, %v7768_v34  ;;  %v331_v39 = vmul.u32 2146121005, %v7770_v54  ;;  %v7811_v47 = vadd.s32 %v7725_v55, %v7676_v27  ;;  %v7815_v38 = vadd.s32 %v7725_v55, %v7678_v30 }
  0x67   : > { %v332_v37 = vmul.u32 2146121005, %v7772_v56  ;;  %v333_v45 = vmul.u32 2146121005, %v7774_v57  ;;  %v7821_v36 = vadd.s32 %v7725_v55, %v7680_v31  ;;  %v7825_v34 = vadd.s32 %v7725_v55, %v7682_v32 }
  0x68   : > { %12526 = vst [vmem:[#allocation30_spill] sm:$0xff] %v7811_v47  ;;  %12527 = vst [vmem:[#allocation31_spill] sm:$0xff] %v7815_v38  ;;  %v334_v35 = vmul.u32 2146121005, %v7776_v58  ;;  %v335_v27 = vmul.u32 2146121005, %v7778_v59 }
  0x69   : > { %12528 = vst [vmem:[#allocation32_spill] sm:$0xff] %v7821_v36  ;;  %12529 = vst [vmem:[#allocation33_spill] sm:$0xff] %v7825_v34  ;;  %v6675_v46 = vshrl.u32 %v321_v61, 15  ;;  %v6676_v53 = vshrl.u32 %v322_v0, 15  ;;  %v336_v30 = vmul.u32 2146121005, %v7780_v60 }
  0x6a   : > { %v337_v6 = vmul.u32 2146121005, %v7783_v62  ;;  %v6677_v7 = vshrl.u32 %v323_v1, 15  ;;  %v6678_v8 = vshrl.u32 %v324_v4, 15  ;;  %v338_v9 = vmul.u32 2146121005, %v7785_v63 }
  0x6b   : > { %v339_v31 = vmul.u32 2146121005, %v7789_v2  ;;  %v6679_v10 = vshrl.u32 %v325_v50, 15  ;;  %v6680_v11 = vshrl.u32 %v326_v44, 15  ;;  %v340_v32 = vmul.u32 2146121005, %v7791_v3 }
  0x6c   : > { %v341_v12 = vmul.u32 2146121005, %v7795_v51  ;;  %v6681_v13 = vshrl.u32 %v327_v49, 15  ;;  %v6682_v14 = vshrl.u32 %v328_v41, 15  ;;  %v342_v15 = vmul.u32 2146121005, %v7797_v5 }
  0x6d   : > { %v343_v16 = vmul.u32 2146121005, %v7801_v52  ;;  %v6683_v17 = vshrl.u32 %v329_v48, 15  ;;  %v6684_v18 = vshrl.u32 %v330_v40, 15  ;;  %v344_v19 = vmul.u32 2146121005, %v7803_v42 }
  0x6e   : > { %v6685_v20 = vshrl.u32 %v331_v39, 15  ;;  %v6686_v21 = vshrl.u32 %v332_v37, 15  ;;  %v6687_v22 = vshrl.u32 %v333_v45, 15  ;;  %v6688_v23 = vshrl.u32 %v334_v35, 15 }
  0x6f   : > { %v6689_v24 = vshrl.u32 %v335_v27, 15  ;;  %v6690_v25 = vshrl.u32 %v336_v30, 15  ;;  %v6691_v26 = vshrl.u32 %v337_v6, 15  ;;  %v6692_v28 = vshrl.u32 %v338_v9, 15 }
  0x70   : > { %v6693_v29 = vshrl.u32 %v339_v31, 15  ;;  %v6694_v43 = vshrl.u32 %v340_v32, 15  ;;  %v6695_v54 = vshrl.u32 %v341_v12, 15  ;;  %v6696_v56 = vshrl.u32 %v342_v15, 15 }
  0x71   : > { %v6697_v57 = vshrl.u32 %v343_v16, 15  ;;  %v7838_v58 = vxor.u32 %v6675_v46, %v321_v61  ;;  %v7840_v59 = vxor.u32 %v6676_v53, %v322_v0  ;;  %v6698_v60 = vshrl.u32 %v344_v19, 15 }
  0x72   : > { %v7842_v62 = vxor.u32 %v6677_v7, %v323_v1  ;;  %v7844_v63 = vxor.u32 %v6678_v8, %v324_v4  ;;  %v7846_v2 = vxor.u32 %v6679_v10, %v325_v50  ;;  %v7848_v3 = vxor.u32 %v6680_v11, %v326_v44 }
  0x73   : > { %v7850_v51 = vxor.u32 %v6681_v13, %v327_v49  ;;  %v7852_v5 = vxor.u32 %v6682_v14, %v328_v41  ;;  %v7854_v52 = vxor.u32 %v6683_v17, %v329_v48  ;;  %v7856_v42 = vxor.u32 %v6684_v18, %v330_v40  ;;  %v12535_v18 = vld [vmem:[#allocation12_spill] sm:$0xff] }
  0x74   : > { %v7858_v61 = vxor.u32 %v6685_v20, %v331_v39  ;;  %v7860_v0 = vxor.u32 %v6686_v21, %v332_v37  ;;  %v7862_v1 = vxor.u32 %v6687_v22, %v333_v45  ;;  %v7864_v4 = vxor.u32 %v6688_v23, %v334_v35 }
  0x75   : > { %v7866_v50 = vxor.u32 %v6689_v24, %v335_v27  ;;  %v7868_v44 = vxor.u32 %v6690_v25, %v336_v30  ;;  %v417_v49 = vmul.u32 2221713035, %v7838_v58  ;;  %v7871_v41 = vxor.u32 %v6691_v26, %v337_v6 }
  0x76   : > { %v7873_v48 = vxor.u32 %v6692_v28, %v338_v9  ;;  %v418_v40 = vmul.u32 2221713035, %v7840_v59  ;;  %v419_v39 = vmul.u32 2221713035, %v7842_v62  ;;  %v7877_v37 = vxor.u32 %v6693_v29, %v339_v31 }
  0x77   : > { %v7879_v45 = vxor.u32 %v6694_v43, %v340_v32  ;;  %v420_v35 = vmul.u32 2221713035, %v7844_v63  ;;  %v421_v27 = vmul.u32 2221713035, %v7846_v2  ;;  %v7883_v46 = vxor.u32 %v6695_v54, %v341_v12  ;;  %v12531_v12 = vld [vmem:[#allocation10_spill] sm:$0xff] }
  0x78   : > { %v7885_v53 = vxor.u32 %v6696_v56, %v342_v15  ;;  %v422_v30 = vmul.u32 2221713035, %v7848_v3  ;;  %v423_v6 = vmul.u32 2221713035, %v7850_v51  ;;  %v7889_v7 = vxor.u32 %v6697_v57, %v343_v16  ;;  %v12533_v16 = vld [vmem:[#allocation11_spill] sm:$0xff] }
  0x79   : > { %v7891_v8 = vxor.u32 %v6698_v60, %v344_v19  ;;  %v424_v9 = vmul.u32 2221713035, %v7852_v5  ;;  %v425_v31 = vmul.u32 2221713035, %v7854_v52  ;;  %v7899_v32 = vadd.s32 %v7725_v55, %v7684_v33 }
  0x7a   : > { %v426_v10 = vmul.u32 2221713035, %v7856_v42  ;;  %v427_v11 = vmul.u32 2221713035, %v7858_v61  ;;  %v7903_v13 = vadd.s32 %v7725_v55, %v12531_v12  ;;  %v7909_v17 = vadd.s32 %v7725_v55, %v12533_v16 }
  0x7b   : > { %12530 = vst [vmem:[#allocation34_spill] sm:$0xff] %v7899_v32  ;;  %v428_v14 = vmul.u32 2221713035, %v7860_v0  ;;  %v429_v15 = vmul.u32 2221713035, %v7862_v1  ;;  %v7913_v19 = vadd.s32 %v7725_v55, %v12535_v18  ;;  %v6699_v21 = vshrl.u32 %v417_v49, 16 }
  0x7c   : > { %12532 = vst [vmem:[#allocation10_spill] sm:$0xff] %v7903_v13  ;;  %12534 = vst [vmem:[#allocation11_spill] sm:$0xff] %v7909_v17  ;;  %v430_v20 = vmul.u32 2221713035, %v7864_v4  ;;  %v431_v33 = vmul.u32 2221713035, %v7866_v50 }
  0x7d   : > { %12536 = vst [vmem:[#allocation12_spill] sm:$0xff] %v7913_v19  ;;  %v6700_v22 = vshrl.u32 %v418_v40, 16  ;;  %v432_v23 = vmul.u32 2221713035, %v7868_v44  ;;  %v433_v24 = vmul.u32 2221713035, %v7871_v41 }
  0x7e   : > { %v6701_v25 = vshrl.u32 %v419_v39, 16  ;;  %v6702_v26 = vshrl.u32 %v420_v35, 16  ;;  %v434_v28 = vmul.u32 2221713035, %v7873_v48  ;;  %v435_v29 = vmul.u32 2221713035, %v7877_v37 }
  0x7f   : > { %v6703_v43 = vshrl.u32 %v421_v27, 16  ;;  %v6704_v54 = vshrl.u32 %v422_v30, 16  ;;  %v436_v56 = vmul.u32 2221713035, %v7879_v45  ;;  %v437_v57 = vmul.u32 2221713035, %v7883_v46 }
  0x80   : > { %v6705_v58 = vshrl.u32 %v423_v6, 16  ;;  %v6706_v59 = vshrl.u32 %v424_v9, 16  ;;  %v438_v60 = vmul.u32 2221713035, %v7885_v53  ;;  %v439_v62 = vmul.u32 2221713035, %v7889_v7 }
  0x81   : > { %v6707_v63 = vshrl.u32 %v425_v31, 16  ;;  %v6708_v2 = vshrl.u32 %v426_v10, 16  ;;  %v440_v3 = vmul.u32 2221713035, %v7891_v8  ;;  %v6709_v51 = vshrl.u32 %v427_v11, 16 }
  0x82   : > { %v6710_v5 = vshrl.u32 %v428_v14, 16  ;;  %v6711_v52 = vshrl.u32 %v429_v15, 16  ;;  %v6712_v42 = vshrl.u32 %v430_v20, 16  ;;  %v6713_v61 = vshrl.u32 %v431_v33, 16 }
  0x83   : > { %v6714_v0 = vshrl.u32 %v432_v23, 16  ;;  %v6715_v1 = vshrl.u32 %v433_v24, 16  ;;  %v6716_v4 = vshrl.u32 %v434_v28, 16  ;;  %v6717_v50 = vshrl.u32 %v435_v29, 16 }
  0x84   : > { %v6718_v44 = vshrl.u32 %v436_v56, 16  ;;  %v6719_v41 = vshrl.u32 %v437_v57, 16  ;;  %v6720_v48 = vshrl.u32 %v438_v60, 16  ;;  %v6721_v37 = vshrl.u32 %v439_v62, 16 }
  0x85   : > { %v489_v45 = vxor.u32 %v6699_v21, %v417_v49  ;;  %v490_v46 = vxor.u32 %v6700_v22, %v418_v40  ;;  %v6722_v53 = vshrl.u32 %v440_v3, 16  ;;  %v491_v7 = vxor.u32 %v6701_v25, %v419_v39 }
  0x86   : > { %v492_v12 = vxor.u32 %v6702_v26, %v420_v35  ;;  %v493_v16 = vxor.u32 %v6703_v43, %v421_v27  ;;  %v494_v8 = vxor.u32 %v6704_v54, %v422_v30  ;;  %v495_v18 = vxor.u32 %v6705_v58, %v423_v6 }
  0x87   : > { %v496_v19 = vxor.u32 %v6706_v59, %v424_v9  ;;  %v497_v17 = vxor.u32 %v6707_v63, %v425_v31  ;;  %v498_v13 = vxor.u32 %v6708_v2, %v426_v10  ;;  %v499_v32 = vxor.u32 %v6709_v51, %v427_v11 }
  0x88   : > { %v500_v34 = vxor.u32 %v6710_v5, %v428_v14  ;;  %v501_v36 = vxor.u32 %v6711_v52, %v429_v15  ;;  %v502_v38 = vxor.u32 %v6712_v42, %v430_v20  ;;  %v503_v47 = vxor.u32 %v6713_v61, %v431_v33 }
  0x89   : > { %v504_v55 = vxor.u32 %v6714_v0, %v432_v23  ;;  %v505_v21 = vxor.u32 %v6715_v1, %v433_v24  ;;  %v506_v49 = vxor.u32 %v6716_v4, %v434_v28  ;;  %v507_v22 = vxor.u32 %v6717_v50, %v435_v29 }
  0x8a   : > { %v508_v40 = vxor.u32 %v6718_v44, %v436_v56  ;;  %v509_v25 = vxor.u32 %v6719_v41, %v437_v57  ;;  %v510_v39 = vxor.u32 %v6720_v48, %v438_v60  ;;  %v511_v26 = vxor.u32 %v6721_v37, %v439_v62 }
  0x8b   : > { %v512_v35 = vxor.u32 %v6722_v53, %v440_v3  ;;  %v6723_v27 = vshrl.u32 %v489_v45, 8  ;;  %v6724_v30 = vshrl.u32 %v490_v46, 8  ;;  %v6725_v6 = vshrl.u32 %v491_v7, 8 }
  0x8c   : > { %v6726_v9 = vshrl.u32 %v492_v12, 8  ;;  %v6727_v31 = vshrl.u32 %v493_v16, 8  ;;  %v6728_v10 = vshrl.u32 %v494_v8, 8  ;;  %v6729_v11 = vshrl.u32 %v495_v18, 8 }
  0x8d   : > { %v6730_v14 = vshrl.u32 %v496_v19, 8  ;;  %v6731_v15 = vshrl.u32 %v497_v17, 8  ;;  %v6732_v20 = vshrl.u32 %v498_v13, 8  ;;  %v6733_v33 = vshrl.u32 %v499_v32, 8 }
  0x8e   : > { %v6734_v23 = vshrl.u32 %v500_v34, 8  ;;  %v6735_v24 = vshrl.u32 %v501_v36, 8  ;;  %v6736_v28 = vshrl.u32 %v502_v38, 8  ;;  %v6737_v29 = vshrl.u32 %v503_v47, 8 }
  0x8f   : > { %v6738_v43 = vshrl.u32 %v504_v55, 8  ;;  %v6739_v54 = vshrl.u32 %v505_v21, 8  ;;  %v6740_v56 = vshrl.u32 %v506_v49, 8  ;;  %v6741_v57 = vshrl.u32 %v507_v22, 8 }
  0x90   : > { %v6742_v58 = vshrl.u32 %v508_v40, 8  ;;  %v6743_v59 = vshrl.u32 %v509_v25, 8  ;;  %v6744_v60 = vshrl.u32 %v510_v39, 8  ;;  %v6745_v62 = vshrl.u32 %v511_v26, 8 }
  0x91   : > { %v6746_v63 = vshrl.u32 %v512_v35, 8  ;;  %v561_v2 = vcvt.s32.f32 %v6723_v27  ;;  %v562_v3 = vcvt.s32.f32 %v6724_v30  ;;  %v563_v51 = vcvt.s32.f32 %v6725_v6 }
  0x92   : > { %v564_v19 = vcvt.s32.f32 %v6726_v9  ;;  %v565_v17 = vcvt.s32.f32 %v6727_v31  ;;  %v566_v13 = vcvt.s32.f32 %v6728_v10  ;;  %v567_v32 = vcvt.s32.f32 %v6729_v11 }
  0x93   : > { %v568_v34 = vcvt.s32.f32 %v6730_v14  ;;  %v569_v36 = vcvt.s32.f32 %v6731_v15  ;;  %v570_v38 = vcvt.s32.f32 %v6732_v20  ;;  %v571_v47 = vcvt.s32.f32 %v6733_v33 }
  0x94   : > { %v572_v55 = vcvt.s32.f32 %v6734_v23  ;;  %v573_v5 = vcvt.s32.f32 %v6735_v24  ;;  %v574_v52 = vcvt.s32.f32 %v6736_v28  ;;  %v575_v42 = vcvt.s32.f32 %v6737_v29 }
  0x95   : > { %v576_v61 = vcvt.s32.f32 %v6738_v43  ;;  %v577_v0 = vcvt.s32.f32 %v6739_v54  ;;  %v578_v1 = vcvt.s32.f32 %v6740_v56  ;;  %v579_v4 = vcvt.s32.f32 %v6741_v57 }
  0x96   : > { %v580_v50 = vcvt.s32.f32 %v6742_v58  ;;  %v581_v44 = vcvt.s32.f32 %v6743_v59  ;;  %v582_v41 = vcvt.s32.f32 %v6744_v60  ;;  %v583_v48 = vcvt.s32.f32 %v6745_v62 }
  0x97   : > { %v584_v37 = vcvt.s32.f32 %v6746_v63  ;;  %v585_v45 = vadd.f32 0.5, %v561_v2  ;;  %v586_v46 = vadd.f32 0.5, %v562_v3  ;;  %v587_v53 = vadd.f32 0.5, %v563_v51 }
  0x98   : > { %v588_v7 = vadd.f32 0.5, %v564_v19  ;;  %v589_v12 = vadd.f32 0.5, %v565_v17  ;;  %v590_v16 = vadd.f32 0.5, %v566_v13  ;;  %v591_v8 = vadd.f32 0.5, %v567_v32 }
  0x99   : > { %v592_v18 = vadd.f32 0.5, %v568_v34  ;;  %v593_v21 = vadd.f32 0.5, %v569_v36  ;;  %v594_v49 = vadd.f32 0.5, %v570_v38  ;;  %v595_v22 = vadd.f32 0.5, %v571_v47  ;;  %v12557_v36 = vld [vmem:[#allocation13_spill] sm:$0xff] }
  0x9a   : > { %v596_v40 = vadd.f32 0.5, %v572_v55  ;;  %v597_v25 = vadd.f32 0.5, %v573_v5  ;;  %v598_v39 = vadd.f32 0.5, %v574_v52  ;;  %v599_v26 = vadd.f32 0.5, %v575_v42  ;;  %v12558_v38 = vld [vmem:[#allocation29_spill] sm:$0xff]  ;;  %v12559_v55 = vld [vmem:[#allocation14_spill] sm:$0xff] }
  0x9b   : > { %v600_v35 = vadd.f32 0.5, %v576_v61  ;;  %v601_v27 = vadd.f32 0.5, %v577_v0  ;;  %v602_v30 = vadd.f32 0.5, %v578_v1  ;;  %v603_v6 = vadd.f32 0.5, %v579_v4  ;;  %v12560_v52 = vld [vmem:[#allocation15_spill] sm:$0xff]  ;;  %v12561_v61 = vld [vmem:[#allocation16_spill] sm:$0xff] }
  0x9c   : > { %v604_v9 = vadd.f32 0.5, %v580_v50  ;;  %v605_v31 = vadd.f32 0.5, %v581_v44  ;;  %v606_v10 = vadd.f32 0.5, %v582_v41  ;;  %v607_v11 = vadd.f32 0.5, %v583_v48  ;;  %v12562_v1 = vld [vmem:[#allocation17_spill] sm:$0xff]  ;;  %v12563_v50 = vld [vmem:[#allocation18_spill] sm:$0xff] }
  0x9d   : > { %v608_v14 = vadd.f32 0.5, %v584_v37  ;;  %v7926_v15 = vmul.f32 5.9604645e-08, %v585_v45  ;;  %v7928_v20 = vmul.f32 5.9604645e-08, %v586_v46  ;;  %v7930_v33 = vmul.f32 5.9604645e-08, %v587_v53  ;;  %v12564_v41 = vld [vmem:[#allocation19_spill] sm:$0xff]  ;;  %v12565_v37 = vld [vmem:[#allocation20_spill] sm:$0xff] }
  0x9e   : > { %v7932_v23 = vmul.f32 5.9604645e-08, %v588_v7  ;;  %v7934_v24 = vmul.f32 5.9604645e-08, %v589_v12  ;;  %v7936_v28 = vmul.f32 5.9604645e-08, %v590_v16  ;;  %v7938_v29 = vmul.f32 5.9604645e-08, %v591_v8  ;;  %v12566_v46 = vld [vmem:[#allocation21_spill] sm:$0xff]  ;;  %v12567_v7 = vld [vmem:[#allocation22_spill] sm:$0xff] }
  0x9f   : > { %v7940_v43 = vmul.f32 5.9604645e-08, %v592_v18  ;;  %v7942_v54 = vmul.f32 5.9604645e-08, %v593_v21  ;;  %v7944_v56 = vmul.f32 5.9604645e-08, %v594_v49  ;;  %v7946_v57 = vmul.f32 5.9604645e-08, %v595_v22  ;;  %v12568_v16 = vld [vmem:[#allocation23_spill] sm:$0xff]  ;;  %v12569_v18 = vld [vmem:[#allocation24_spill] sm:$0xff] }
  0xa0   : > { %12537 = vst [vmem:[#allocation35_spill] sm:$0xff] %v7934_v24  ;;  %12538 = vst [vmem:[#allocation36_spill] sm:$0xff] %v7936_v28  ;;  %v7948_v58 = vmul.f32 5.9604645e-08, %v596_v40  ;;  %v7950_v59 = vmul.f32 5.9604645e-08, %v597_v25  ;;  %v7952_v60 = vmul.f32 5.9604645e-08, %v598_v39  ;;  %v7954_v62 = vmul.f32 5.9604645e-08, %v599_v26 }
  0xa1   : > { %12539 = vst [vmem:[#allocation37_spill] sm:$0xff] %v7938_v29  ;;  %12540 = vst [vmem:[#allocation38_spill] sm:$0xff] %v7940_v43  ;;  %v7956_v63 = vmul.f32 5.9604645e-08, %v600_v35  ;;  %v7958_v2 = vmul.f32 5.9604645e-08, %v601_v27  ;;  %v7960_v3 = vmul.f32 5.9604645e-08, %v602_v30  ;;  %v7962_v51 = vmul.f32 5.9604645e-08, %v603_v6 }
  0xa2   : > { %12541 = vst [vmem:[#allocation39_spill] sm:$0xff] %v7942_v54  ;;  %12542 = vst [vmem:[#allocation40_spill] sm:$0xff] %v7944_v56  ;;  %v7964_v19 = vmul.f32 5.9604645e-08, %v604_v9  ;;  %v7966_v17 = vmul.f32 5.9604645e-08, %v605_v31  ;;  %v7968_v13 = vmul.f32 5.9604645e-08, %v606_v10  ;;  %v7970_v32 = vmul.f32 5.9604645e-08, %v607_v11 }
  0xa3   : > { %12543 = vst [vmem:[#allocation41_spill] sm:$0xff] %v7946_v57  ;;  %12544 = vst [vmem:[#allocation42_spill] sm:$0xff] %v7948_v58  ;;  %v7972_v34 = vmul.f32 5.9604645e-08, %v608_v14  ;;  %v642_v47 = vadd.s32 %v12558_v38, %v12557_v36  ;;  %v643_v5 = vadd.s32 %v12558_v38, %v12559_v55  ;;  %v644_v42 = vadd.s32 %v12558_v38, %v12560_v52  ;;  %v12570_v49 = vld [vmem:[#allocation25_spill] sm:$0xff]  ;;  %v12571_v40 = vld [vmem:[#allocation26_spill] sm:$0xff] }
  0xa4   : > { %12545 = vst [vmem:[#allocation43_spill] sm:$0xff] %v7950_v59  ;;  %12546 = vst [vmem:[#allocation44_spill] sm:$0xff] %v7952_v60  ;;  %v645_v0 = vadd.s32 %v12558_v38, %v12561_v61  ;;  %v646_v4 = vadd.s32 %v12558_v38, %v12562_v1  ;;  %v647_v44 = vadd.s32 %v12558_v38, %v12563_v50  ;;  %v12572_v39 = vld [vmem:[#allocation27_spill] sm:$0xff]  ;;  %v12573_v35 = vld [vmem:[#allocation28_spill] sm:$0xff]  ;;  %7212 = vlog2.f32 %v7926_v15 }
  0xa5   : > { %12547 = vst [vmem:[#allocation45_spill] sm:$0xff] %v7954_v62  ;;  %12548 = vst [vmem:[#allocation46_spill] sm:$0xff] %v7956_v63  ;;  %v648_v48 = vadd.s32 %v12558_v38, %v12564_v41  ;;  %v649_v45 = vadd.s32 %v12558_v38, %v12565_v37  ;;  %v650_v53 = vadd.s32 %v12558_v38, %v12566_v46  ;;  %v12574_v30 = vld [vmem:[#allocation30_spill] sm:$0xff]  ;;  %v12575_v9 = vld [vmem:[#allocation31_spill] sm:$0xff]  ;;  %7214 = vlog2.f32 %v7928_v20 }
  0xa6   : > { %12549 = vst [vmem:[#allocation47_spill] sm:$0xff] %v7958_v2  ;;  %12550 = vst [vmem:[#allocation48_spill] sm:$0xff] %v7960_v3  ;;  %v651_v12 = vadd.s32 %v12558_v38, %v12567_v7  ;;  %v652_v8 = vadd.s32 %v12558_v38, %v12568_v16  ;;  %v653_v21 = vadd.s32 %v12558_v38, %v12569_v18  ;;  %v6747_v6 = vshrl.u32 %v12574_v30, 16  ;;  %v12576_v10 = vld [vmem:[#allocation32_spill] sm:$0xff]  ;;  %v12577_v14 = vld [vmem:[#allocation33_spill] sm:$0xff] }
  0xa7   : > { %12551 = vst [vmem:[#allocation49_spill] sm:$0xff] %v7962_v51  ;;  %12552 = vst [vmem:[#allocation50_spill] sm:$0xff] %v7964_v19  ;;  %v654_v22 = vadd.s32 %v12558_v38, %v12570_v49  ;;  %v655_v25 = vadd.s32 %v12558_v38, %v12571_v40  ;;  %v656_v26 = vadd.s32 %v12558_v38, %v12572_v39  ;;  %v6748_v31 = vshrl.u32 %v12575_v9, 16  ;;  %v12578_v55 = vld [vmem:[#allocation34_spill] sm:$0xff]  ;;  %v12580_v50 = vld [vmem:[#allocation11_spill] sm:$0xff] }
  0xa8   : > { %12553 = vst [vmem:[#allocation51_spill] sm:$0xff] %v7966_v17  ;;  %12554 = vst [vmem:[#allocation52_spill] sm:$0xff] %v7968_v13  ;;  %v657_v27 = vadd.s32 %v12558_v38, %v12573_v35  ;;  %v6749_v11 = vshrl.u32 %v12576_v10, 16  ;;  %v6750_v36 = vshrl.u32 %v12577_v14, 16  ;;  %v6751_v52 = vshrl.u32 %v12578_v55, 16  ;;  %v12579_v61 = vld [vmem:[#allocation10_spill] sm:$0xff] }
  0xa9   : > { %12555 = vst [vmem:[#allocation53_spill] sm:$0xff] %v7970_v32  ;;  %12556 = vst [vmem:[#allocation54_spill] sm:$0xff] %v7972_v34  ;;  %v6752_v1 = vshrl.u32 %v12579_v61, 16  ;;  %v6753_v41 = vshrl.u32 %v12580_v50, 16  ;;  %v12581_v37 = vld [vmem:[#allocation12_spill] sm:$0xff]  ;;  %v6755_v7 = vshrl.u32 %v642_v47, 16  ;;  %v8015_v2 = vxor.u32 %v6747_v6, %v12574_v30 }
  0xaa   : > { %v6754_v46 = vshrl.u32 %v12581_v37, 16  ;;  %v6756_v16 = vshrl.u32 %v643_v5, 16  ;;  %v6757_v18 = vshrl.u32 %v644_v42, 16  ;;  %v6758_v38 = vshrl.u32 %v645_v0, 16 }
  0xab   : > { %v6759_v49 = vshrl.u32 %v646_v4, 16  ;;  %v6760_v40 = vshrl.u32 %v647_v44, 16  ;;  %v6761_v39 = vshrl.u32 %v648_v48, 16  ;;  %v6762_v35 = vshrl.u32 %v649_v45, 16 }
  0xac   : > { %v6763_v34 = vshrl.u32 %v650_v53, 16  ;;  %v6764_v32 = vshrl.u32 %v651_v12, 16  ;;  %v6765_v13 = vshrl.u32 %v652_v8, 16  ;;  %v6766_v17 = vshrl.u32 %v653_v21, 16 }
  0xad   : > { %v6767_v19 = vshrl.u32 %v654_v22, 16  ;;  %v6768_v51 = vshrl.u32 %v655_v25, 16  ;;  %v6769_v3 = vshrl.u32 %v656_v26, 16  ;;  %v8018_v63 = vxor.u32 %v6748_v31, %v12575_v9 }
  0xae   : > { %v6770_v62 = vshrl.u32 %v657_v27, 16  ;;  %v8021_v60 = vxor.u32 %v6749_v11, %v12576_v10  ;;  %v8024_v59 = vxor.u32 %v6750_v36, %v12577_v14  ;;  %v8027_v58 = vxor.u32 %v6751_v52, %v12578_v55 }
  0xaf   : > { %v8030_v57 = vxor.u32 %v6752_v1, %v12579_v61  ;;  %v8033_v56 = vxor.u32 %v6753_v41, %v12580_v50  ;;  %v8036_v30 = vxor.u32 %v6754_v46, %v12581_v37  ;;  %v8038_v6 = vxor.u32 %v6755_v7, %v642_v47 }
  0xb0   : > { %v8040_v9 = vxor.u32 %v6756_v16, %v643_v5  ;;  %v8042_v31 = vxor.u32 %v6757_v18, %v644_v42  ;;  %v8044_v10 = vxor.u32 %v6758_v38, %v645_v0  ;;  %v8046_v11 = vxor.u32 %v6759_v49, %v646_v4 }
  0xb1   : > { %v8048_v14 = vxor.u32 %v6760_v40, %v647_v44  ;;  %v8050_v36 = vxor.u32 %v6761_v39, %v648_v48  ;;  %v730_v55 = vmul.u32 2146121005, %v8015_v2  ;;  %v731_v52 = vmul.u32 2146121005, %v8018_v63 }
  0xb2   : > { %v8054_v61 = vxor.u32 %v6762_v35, %v649_v45  ;;  %v8056_v47 = vxor.u32 %v6763_v34, %v650_v53  ;;  %v732_v5 = vmul.u32 2146121005, %v8021_v60  ;;  %v733_v42 = vmul.u32 2146121005, %v8024_v59 }
  0xb3   : > { %v8060_v0 = vxor.u32 %v6764_v32, %v651_v12  ;;  %v8062_v4 = vxor.u32 %v6765_v13, %v652_v8  ;;  %v734_v44 = vmul.u32 2146121005, %v8027_v58  ;;  %v735_v48 = vmul.u32 2146121005, %v8030_v57 }
  0xb4   : > { %v8066_v1 = vxor.u32 %v6766_v17, %v653_v21  ;;  %v8068_v2 = vxor.u32 %v6767_v19, %v654_v22  ;;  %v736_v63 = vmul.u32 2146121005, %v8033_v56  ;;  %v737_v34 = vmul.u32 2146121005, %v8036_v30 }
  0xb5   : > { %v8072_v45 = vxor.u32 %v6768_v51, %v655_v25  ;;  %v8074_v60 = vxor.u32 %v6769_v3, %v656_v26  ;;  %v738_v59 = vmul.u32 2146121005, %v8038_v6  ;;  %v739_v13 = vmul.u32 2146121005, %v8040_v9 }
  0xb6   : > { %v8078_v32 = vxor.u32 %v6770_v62, %v657_v27  ;;  %v740_v57 = vmul.u32 2146121005, %v8042_v31  ;;  %v741_v58 = vmul.u32 2146121005, %v8044_v10  ;;  %v6771_v51 = vshrl.u32 %v730_v55, 15 }
  0xb7   : > { %v742_v56 = vmul.u32 2146121005, %v8046_v11  ;;  %v743_v19 = vmul.u32 2146121005, %v8048_v14  ;;  %v6772_v53 = vshrl.u32 %v731_v52, 15  ;;  %v6773_v62 = vshrl.u32 %v732_v5, 15 }
  0xb8   : > { %v744_v3 = vmul.u32 2146121005, %v8050_v36  ;;  %v745_v17 = vmul.u32 2146121005, %v8054_v61  ;;  %v6774_v21 = vshrl.u32 %v733_v42, 15  ;;  %v6775_v22 = vshrl.u32 %v734_v44, 15  ;;  %v7213_v36 = vpop.eup %7212 }
  0xb9   : > { %v746_v12 = vmul.u32 2146121005, %v8056_v47  ;;  %v747_v8 = vmul.u32 2146121005, %v8060_v0  ;;  %v6776_v26 = vshrl.u32 %v735_v48, 15  ;;  %v6777_v27 = vshrl.u32 %v736_v63, 15 }
  0xba   : > { %v748_v15 = vmul.u32 2146121005, %v8062_v4  ;;  %v749_v25 = vmul.u32 2146121005, %v8066_v1  ;;  %v6778_v41 = vshrl.u32 %v737_v34, 15  ;;  %v6779_v37 = vshrl.u32 %v738_v59, 15  ;;  %v7215_v1 = vpop.eup %7214 }
  0xbb   : > { %v750_v20 = vmul.u32 2146121005, %v8068_v2  ;;  %v751_v50 = vmul.u32 2146121005, %v8072_v45  ;;  %v6780_v16 = vshrl.u32 %v739_v13, 15  ;;  %v6781_v18 = vshrl.u32 %v740_v57, 15 }
  0xbc   : > { %v752_v46 = vmul.u32 2146121005, %v8074_v60  ;;  %v753_v7 = vmul.u32 2146121005, %v8078_v32  ;;  %v6782_v38 = vshrl.u32 %v741_v58, 15  ;;  %v6783_v49 = vshrl.u32 %v742_v56, 15 }
  0xbd   : > { %v6784_v40 = vshrl.u32 %v743_v19, 15  ;;  %v6785_v39 = vshrl.u32 %v744_v3, 15  ;;  %v6786_v35 = vshrl.u32 %v745_v17, 15  ;;  %v6787_v30 = vshrl.u32 %v746_v12, 15 }
  0xbe   : > { %v6788_v6 = vshrl.u32 %v747_v8, 15  ;;  %v6789_v9 = vshrl.u32 %v748_v15, 15  ;;  %v6790_v31 = vshrl.u32 %v749_v25, 15  ;;  %v6791_v10 = vshrl.u32 %v750_v20, 15 }
  0xbf   : > { %v6792_v11 = vshrl.u32 %v751_v50, 15  ;;  %v8096_v14 = vxor.u32 %v6771_v51, %v730_v55  ;;  %v6793_v61 = vshrl.u32 %v752_v46, 15  ;;  %v6794_v47 = vshrl.u32 %v753_v7, 15 }
  0xc0   : > { %v8098_v0 = vxor.u32 %v6772_v53, %v731_v52  ;;  %v8100_v4 = vxor.u32 %v6773_v62, %v732_v5  ;;  %v8102_v2 = vxor.u32 %v6774_v21, %v733_v42  ;;  %v8104_v45 = vxor.u32 %v6775_v22, %v734_v44 }
  0xc1   : > { %v8106_v60 = vxor.u32 %v6776_v26, %v735_v48  ;;  %v8108_v32 = vxor.u32 %v6777_v27, %v736_v63  ;;  %v8110_v54 = vxor.u32 %v6778_v41, %v737_v34  ;;  %v8112_v55 = vxor.u32 %v6779_v37, %v738_v59 }
  0xc2   : > { %v8114_v51 = vxor.u32 %v6780_v16, %v739_v13  ;;  %v8116_v43 = vxor.u32 %v6781_v18, %v740_v57  ;;  %v8118_v52 = vxor.u32 %v6782_v38, %v741_v58  ;;  %v8120_v5 = vxor.u32 %v6783_v49, %v742_v56 }
  0xc3   : > { %v8122_v42 = vxor.u32 %v6784_v40, %v743_v19  ;;  %v8124_v44 = vxor.u32 %v6785_v39, %v744_v3  ;;  %v8126_v48 = vxor.u32 %v6786_v35, %v745_v17  ;;  %v8128_v63 = vxor.u32 %v6787_v30, %v746_v12 }
  0xc4   : > { %v826_v34 = vmul.u32 2221713035, %v8096_v14  ;;  %v827_v59 = vmul.u32 2221713035, %v8098_v0  ;;  %v8132_v13 = vxor.u32 %v6788_v6, %v747_v8  ;;  %v8134_v57 = vxor.u32 %v6789_v9, %v748_v15 }
  0xc5   : > { %v828_v58 = vmul.u32 2221713035, %v8100_v4  ;;  %v829_v56 = vmul.u32 2221713035, %v8102_v2  ;;  %v8138_v19 = vxor.u32 %v6790_v31, %v749_v25  ;;  %v8140_v3 = vxor.u32 %v6791_v10, %v750_v20 }
  0xc6   : > { %v830_v17 = vmul.u32 2221713035, %v8104_v45  ;;  %v831_v53 = vmul.u32 2221713035, %v8106_v60  ;;  %v8144_v62 = vxor.u32 %v6792_v11, %v751_v50  ;;  %v8146_v12 = vxor.u32 %v6793_v61, %v752_v46 }
  0xc7   : > { %v832_v8 = vmul.u32 2221713035, %v8108_v32  ;;  %v833_v21 = vmul.u32 2221713035, %v8110_v54  ;;  %v8150_v22 = vxor.u32 %v6794_v47, %v753_v7  ;;  %v8154_v26 = vmul.f32 0.6931472, %v7213_v36 }
  0xc8   : > { %v834_v15 = vmul.u32 2221713035, %v8112_v55  ;;  %v835_v25 = vmul.u32 2221713035, %v8114_v51  ;;  %v8158_v50 = vmul.f32 0.6931472, %v7215_v1  ;;  %7216 = vlog2.f32 %v7930_v33 }
  0xc9   : > { %12582 = vst [vmem:[#allocation13_spill] sm:$0xff] %v8154_v26  ;;  %v836_v27 = vmul.u32 2221713035, %v8116_v43  ;;  %v837_v20 = vmul.u32 2221713035, %v8118_v52  ;;  %v6795_v37 = vshrl.u32 %v826_v34, 16  ;;  %7218 = vlog2.f32 %v7932_v23 }
  0xca   : > { %12583 = vst [vmem:[#allocation29_spill] sm:$0xff] %v8158_v50  ;;  %v838_v41 = vmul.u32 2221713035, %v8120_v5  ;;  %v839_v54 = vmul.u32 2221713035, %v8122_v42  ;;  %v6796_v16 = vshrl.u32 %v827_v59, 16 }
  0xcb   : > { %v840_v46 = vmul.u32 2221713035, %v8124_v44  ;;  %v841_v7 = vmul.u32 2221713035, %v8126_v48  ;;  %v6797_v18 = vshrl.u32 %v828_v58, 16  ;;  %v6798_v49 = vshrl.u32 %v829_v56, 16 }
  0xcc   : > { %v842_v43 = vmul.u32 2221713035, %v8128_v63  ;;  %v843_v38 = vmul.u32 2221713035, %v8132_v13  ;;  %v6799_v40 = vshrl.u32 %v830_v17, 16  ;;  %v6800_v35 = vshrl.u32 %v831_v53, 16 }
  0xcd   : > { %v844_v33 = vmul.u32 2221713035, %v8134_v57  ;;  %v845_v39 = vmul.u32 2221713035, %v8138_v19  ;;  %v6801_v30 = vshrl.u32 %v832_v8, 16  ;;  %v6802_v9 = vshrl.u32 %v833_v21, 16 }
  0xce   : > { %v846_v23 = vmul.u32 2221713035, %v8140_v3  ;;  %v847_v6 = vmul.u32 2221713035, %v8144_v62  ;;  %v6803_v31 = vshrl.u32 %v834_v15, 16  ;;  %v6804_v14 = vshrl.u32 %v835_v25, 16 }
  0xcf   : > { %v848_v10 = vmul.u32 2221713035, %v8146_v12  ;;  %v849_v11 = vmul.u32 2221713035, %v8150_v22  ;;  %v6805_v36 = vshrl.u32 %v836_v27, 16  ;;  %v6806_v61 = vshrl.u32 %v837_v20, 16 }
  0xd0   : > { %v6807_v47 = vshrl.u32 %v838_v41, 16  ;;  %v6808_v0 = vshrl.u32 %v839_v54, 16  ;;  %v6809_v4 = vshrl.u32 %v840_v46, 16  ;;  %v6810_v1 = vshrl.u32 %v841_v7, 16 }
  0xd1   : > { %v6811_v2 = vshrl.u32 %v842_v43, 16  ;;  %v6812_v45 = vshrl.u32 %v843_v38, 16  ;;  %v6813_v60 = vshrl.u32 %v844_v33, 16  ;;  %v6814_v32 = vshrl.u32 %v845_v39, 16 }
  0xd2   : > { %v6815_v55 = vshrl.u32 %v846_v23, 16  ;;  %v6816_v51 = vshrl.u32 %v847_v6, 16  ;;  %v898_v52 = vxor.u32 %v6795_v37, %v826_v34  ;;  %v8174_v5 = vpop.eup %7216  ;;  %v6817_v42 = vshrl.u32 %v848_v10, 16 }
  0xd3   : > { %12584 = vst [vmem:[#allocation14_spill] sm:$0xff] %v8174_v5  ;;  %v6818_v44 = vshrl.u32 %v849_v11, 16  ;;  %v899_v48 = vxor.u32 %v6796_v16, %v827_v59  ;;  %v900_v63 = vxor.u32 %v6797_v18, %v828_v58  ;;  %v8176_v13 = vpop.eup %7218  ;;  %v901_v57 = vxor.u32 %v6798_v49, %v829_v56 }
  0xd4   : > { %12585 = vst [vmem:[#allocation15_spill] sm:$0xff] %v8176_v13  ;;  %v902_v19 = vxor.u32 %v6799_v40, %v830_v17  ;;  %v903_v3 = vxor.u32 %v6800_v35, %v831_v53  ;;  %v904_v62 = vxor.u32 %v6801_v30, %v832_v8  ;;  %v905_v12 = vxor.u32 %v6802_v9, %v833_v21 }
  0xd5   : > { %v906_v22 = vxor.u32 %v6803_v31, %v834_v15  ;;  %v907_v50 = vxor.u32 %v6804_v14, %v835_v25  ;;  %v908_v26 = vxor.u32 %v6805_v36, %v836_v27  ;;  %v909_v29 = vxor.u32 %v6806_v61, %v837_v20 }
  0xd6   : > { %v910_v28 = vxor.u32 %v6807_v47, %v838_v41  ;;  %v911_v24 = vxor.u32 %v6808_v0, %v839_v54  ;;  %v912_v34 = vxor.u32 %v6809_v4, %v840_v46  ;;  %v913_v37 = vxor.u32 %v6810_v1, %v841_v7 }
  0xd7   : > { %v914_v5 = vxor.u32 %v6811_v2, %v842_v43  ;;  %v915_v16 = vxor.u32 %v6812_v45, %v843_v38  ;;  %v916_v59 = vxor.u32 %v6813_v60, %v844_v33  ;;  %v917_v18 = vxor.u32 %v6814_v32, %v845_v39 }
  0xd8   : > { %v918_v58 = vxor.u32 %v6815_v55, %v846_v23  ;;  %v919_v13 = vxor.u32 %v6816_v51, %v847_v6  ;;  %v920_v49 = vxor.u32 %v6817_v42, %v848_v10  ;;  %v921_v56 = vxor.u32 %v6818_v44, %v849_v11 }
  0xd9   : > { %v6819_v17 = vshrl.u32 %v898_v52, 8  ;;  %v6820_v53 = vshrl.u32 %v899_v48, 8  ;;  %v6821_v8 = vshrl.u32 %v900_v63, 8  ;;  %v6822_v21 = vshrl.u32 %v901_v57, 8 }
  0xda   : > { %v6823_v15 = vshrl.u32 %v902_v19, 8  ;;  %v6824_v25 = vshrl.u32 %v903_v3, 8  ;;  %v6825_v27 = vshrl.u32 %v904_v62, 8  ;;  %v6826_v20 = vshrl.u32 %v905_v12, 8 }
  0xdb   : > { %v6827_v41 = vshrl.u32 %v906_v22, 8  ;;  %v6828_v54 = vshrl.u32 %v907_v50, 8  ;;  %v6829_v46 = vshrl.u32 %v908_v26, 8  ;;  %v6830_v7 = vshrl.u32 %v909_v29, 8 }
  0xdc   : > { %v6831_v43 = vshrl.u32 %v910_v28, 8  ;;  %v6832_v38 = vshrl.u32 %v911_v24, 8  ;;  %v6833_v40 = vshrl.u32 %v912_v34, 8  ;;  %v6834_v33 = vshrl.u32 %v913_v37, 8 }
  0xdd   : > { %v6835_v39 = vshrl.u32 %v914_v5, 8  ;;  %v6836_v35 = vshrl.u32 %v915_v16, 8  ;;  %v6837_v30 = vshrl.u32 %v916_v59, 8  ;;  %v6838_v23 = vshrl.u32 %v917_v18, 8  ;;  %v12586_v16 = vld [vmem:[#allocation35_spill] sm:$0xff] }
  0xde   : > { %v6839_v6 = vshrl.u32 %v918_v58, 8  ;;  %v6840_v9 = vshrl.u32 %v919_v13, 8  ;;  %v6841_v31 = vshrl.u32 %v920_v49, 8  ;;  %v6842_v10 = vshrl.u32 %v921_v56, 8  ;;  %v12587_v49 = vld [vmem:[#allocation36_spill] sm:$0xff] }
  0xdf   : > { %v970_v11 = vcvt.s32.f32 %v6819_v17  ;;  %v971_v14 = vcvt.s32.f32 %v6820_v53  ;;  %v972_v36 = vcvt.s32.f32 %v6821_v8  ;;  %v973_v61 = vcvt.s32.f32 %v6822_v21  ;;  %v12588_v8 = vld [vmem:[#allocation37_spill] sm:$0xff] }
  0xe0   : > { %v974_v47 = vcvt.s32.f32 %v6823_v15  ;;  %v975_v50 = vcvt.s32.f32 %v6824_v25  ;;  %v976_v26 = vcvt.s32.f32 %v6825_v27  ;;  %v977_v29 = vcvt.s32.f32 %v6826_v20  ;;  %v12589_v27 = vld [vmem:[#allocation38_spill] sm:$0xff] }
  0xe1   : > { %v978_v28 = vcvt.s32.f32 %v6827_v41  ;;  %v979_v24 = vcvt.s32.f32 %v6828_v54  ;;  %v980_v0 = vcvt.s32.f32 %v6829_v46  ;;  %v981_v4 = vcvt.s32.f32 %v6830_v7  ;;  %v12590_v46 = vld [vmem:[#allocation39_spill] sm:$0xff] }
  0xe2   : > { %v982_v1 = vcvt.s32.f32 %v6831_v43  ;;  %v983_v2 = vcvt.s32.f32 %v6832_v38  ;;  %v984_v45 = vcvt.s32.f32 %v6833_v40  ;;  %v985_v60 = vcvt.s32.f32 %v6834_v33  ;;  %v12591_v40 = vld [vmem:[#allocation40_spill] sm:$0xff] }
  0xe3   : > { %v986_v32 = vcvt.s32.f32 %v6835_v39  ;;  %v987_v55 = vcvt.s32.f32 %v6836_v35  ;;  %v988_v51 = vcvt.s32.f32 %v6837_v30  ;;  %v989_v52 = vcvt.s32.f32 %v6838_v23  ;;  %v12592_v30 = vld [vmem:[#allocation41_spill] sm:$0xff] }
  0xe4   : > { %v990_v5 = vcvt.s32.f32 %v6839_v6  ;;  %v991_v42 = vcvt.s32.f32 %v6840_v9  ;;  %v992_v44 = vcvt.s32.f32 %v6841_v31  ;;  %v993_v48 = vcvt.s32.f32 %v6842_v10  ;;  %v12593_v31 = vld [vmem:[#allocation42_spill] sm:$0xff] }
  0xe5   : > { %v994_v63 = vadd.f32 0.5, %v970_v11  ;;  %v995_v13 = vadd.f32 0.5, %v971_v14  ;;  %v996_v57 = vadd.f32 0.5, %v972_v36  ;;  %v997_v19 = vadd.f32 0.5, %v973_v61  ;;  %v12594_v36 = vld [vmem:[#allocation43_spill] sm:$0xff] }
  0xe6   : > { %v998_v3 = vadd.f32 0.5, %v974_v47  ;;  %v999_v62 = vadd.f32 0.5, %v975_v50  ;;  %v1000_v12 = vadd.f32 0.5, %v976_v26  ;;  %v1001_v22 = vadd.f32 0.5, %v977_v29  ;;  %v12595_v26 = vld [vmem:[#allocation44_spill] sm:$0xff] }
  0xe7   : > { %v1002_v34 = vadd.f32 0.5, %v978_v28  ;;  %v1003_v37 = vadd.f32 0.5, %v979_v24  ;;  %7220 = vlog2.f32 %v12586_v16  ;;  %v1004_v59 = vadd.f32 0.5, %v980_v0  ;;  %v12607_v16 = vld [vmem:[#allocation29_spill] sm:$0xff] }
  0xe8   : > { %v1005_v18 = vadd.f32 0.5, %v981_v4  ;;  %v1006_v58 = vadd.f32 0.5, %v982_v1  ;;  %7222 = vlog2.f32 %v12587_v49  ;;  %v1007_v56 = vadd.f32 0.5, %v983_v2  ;;  %v12596_v4 = vld [vmem:[#allocation45_spill] sm:$0xff] }
  0xe9   : > { %v1008_v17 = vadd.f32 0.5, %v984_v45  ;;  %v1009_v53 = vadd.f32 0.5, %v985_v60  ;;  %7224 = vlog2.f32 %v12588_v8  ;;  %v1010_v21 = vadd.f32 0.5, %v986_v32  ;;  %v12597_v60 = vld [vmem:[#allocation14_spill] sm:$0xff] }
  0xea   : > { %v1011_v15 = vadd.f32 0.5, %v987_v55  ;;  %v1012_v25 = vadd.f32 0.5, %v988_v51  ;;  %7226 = vlog2.f32 %v12589_v27  ;;  %v1013_v20 = vadd.f32 0.5, %v989_v52  ;;  %v12598_v55 = vld [vmem:[#allocation46_spill] sm:$0xff] }
  0xeb   : > { %v1014_v41 = vadd.f32 0.5, %v990_v5  ;;  %v1015_v54 = vadd.f32 0.5, %v991_v42  ;;  %7228 = vlog2.f32 %v12590_v46  ;;  %v1016_v7 = vadd.f32 0.5, %v992_v44  ;;  %v12599_v42 = vld [vmem:[#allocation15_spill] sm:$0xff] }
  0xec   : > { %v1017_v43 = vadd.f32 0.5, %v993_v48  ;;  %v1018_v38 = vmul.f32 5.9604645e-08, %v994_v63  ;;  %7230 = vlog2.f32 %v12591_v40  ;;  %v1019_v33 = vmul.f32 5.9604645e-08, %v995_v13  ;;  %v12600_v48 = vld [vmem:[#allocation47_spill] sm:$0xff] }
  0xed   : > { %v1020_v39 = vmul.f32 5.9604645e-08, %v996_v57  ;;  %v1021_v35 = vmul.f32 5.9604645e-08, %v997_v19  ;;  %7232 = vlog2.f32 %v12592_v30  ;;  %v1022_v23 = vmul.f32 5.9604645e-08, %v998_v3  ;;  %v12603_v3 = vld [vmem:[#allocation48_spill] sm:$0xff] }
  0xee   : > { %v1023_v6 = vmul.f32 5.9604645e-08, %v999_v62  ;;  %v1024_v9 = vmul.f32 5.9604645e-08, %v1000_v12  ;;  %7234 = vlog2.f32 %v12593_v31  ;;  %v1025_v10 = vmul.f32 5.9604645e-08, %v1001_v22  ;;  %v12605_v22 = vld [vmem:[#allocation49_spill] sm:$0xff] }
  0xef   : > { %v8186_v11 = vmul.f32 5.9604645e-08, %v1002_v34  ;;  %v8188_v14 = vmul.f32 5.9604645e-08, %v1003_v37  ;;  %7236 = vlog2.f32 %v12594_v36  ;;  %v8191_v61 = vmul.f32 5.9604645e-08, %v1004_v59  ;;  %v12606_v34 = vld [vmem:[#allocation13_spill] sm:$0xff]  ;;  %v12616_v36 = vld [vmem:[#allocation54_spill] sm:$0xff] }
  0xf0   : > { %v8193_v47 = vmul.f32 5.9604645e-08, %v1005_v18  ;;  %v8195_v50 = vmul.f32 5.9604645e-08, %v1006_v58  ;;  %7238 = vlog2.f32 %v12595_v26  ;;  %v8198_v28 = vmul.f32 5.9604645e-08, %v1007_v56  ;;  %v12608_v58 = vld [vmem:[#allocation50_spill] sm:$0xff] }
  0xf1   : > { %v7221_v29 = vpop.eup %7220  ;;  %v8200_v24 = vmul.f32 5.9604645e-08, %v1008_v17  ;;  %v8202_v0 = vmul.f32 5.9604645e-08, %v1009_v53  ;;  %7240 = vlog2.f32 %v12596_v4  ;;  %v8205_v2 = vmul.f32 5.9604645e-08, %v1010_v21  ;;  %v12611_v21 = vld [vmem:[#allocation51_spill] sm:$0xff] }
  0xf2   : > { %v7223_v1 = vpop.eup %7222  ;;  %v8207_v45 = vmul.f32 5.9604645e-08, %v1011_v15  ;;  %v1047_v32 = vmul.f32 0.6931472, %v12597_v60  ;;  %7242 = vlog2.f32 %v12598_v55  ;;  %v8211_v52 = vmul.f32 5.9604645e-08, %v1012_v25 }
  0xf3   : > { %v7225_v51 = vpop.eup %7224  ;;  %v8213_v5 = vmul.f32 5.9604645e-08, %v1013_v20  ;;  %v1049_v44 = vmul.f32 0.6931472, %v12599_v42  ;;  %7244 = vlog2.f32 %v12600_v48  ;;  %v8217_v13 = vmul.f32 5.9604645e-08, %v1014_v41  ;;  %v12612_v41 = vld [vmem:[#allocation52_spill] sm:$0xff] }
  0xf4   : > { %v7227_v63 = vpop.eup %7226  ;;  %v8219_v57 = vmul.f32 5.9604645e-08, %v1015_v54  ;;  %v8221_v19 = vmul.f32 5.9604645e-08, %v1016_v7  ;;  %7246 = vlog2.f32 %v12603_v3  ;;  %v8224_v12 = vmul.f32 5.9604645e-08, %v1017_v43 }
  0xf5   : > { %v7229_v62 = vpop.eup %7228  ;;  %7248 = vlog2.f32 %v12605_v22  ;;  %v8228_v37 = vmul.f32 -2.0, %v12606_v34  ;;  %v8231_v59 = vmul.f32 -2.0, %v12607_v16  ;;  %v8234_v49 = vmul.f32 -2.0, %v1047_v32 }
  0xf6   : > { %12601 = vst [vmem:[#allocation16_spill] sm:$0xff] %v8219_v57  ;;  %12602 = vst [vmem:[#allocation17_spill] sm:$0xff] %v8221_v19  ;;  %v7231_v18 = vpop.eup %7230  ;;  %7250 = vlog2.f32 %v12608_v58  ;;  %v8236_v56 = vmul.f32 6.2831855, %v1018_v38  ;;  %v8238_v17 = vmul.f32 6.2831855, %v1019_v33 }
  0xf7   : > { %12604 = vst [vmem:[#allocation18_spill] sm:$0xff] %v8224_v12  ;;  %v7233_v53 = vpop.eup %7232  ;;  %v1051_v8 = vmul.f32 0.6931472, %v7221_v29  ;;  %7252 = vlog2.f32 %v12611_v21  ;;  %v8241_v15 = vmul.f32 -2.0, %v1049_v44  ;;  %v1053_v20 = vmul.f32 0.6931472, %v7223_v1 }
  0xf8   : > { %12609 = vst [vmem:[#allocation19_spill] sm:$0xff] %v8236_v56  ;;  %12610 = vst [vmem:[#allocation20_spill] sm:$0xff] %v8238_v17  ;;  %v7235_v27 = vpop.eup %7234  ;;  %7254 = vlog2.f32 %v12612_v41  ;;  %v1055_v43 = vmul.f32 0.6931472, %v7225_v51  ;;  %v12613_v38 = vld [vmem:[#allocation53_spill] sm:$0xff]  ;;  %vm1116_vm0 = vcmp.eq.f32.partialorder %v8228_v37, inf }
  0xf9   : > { %v7237_v7 = vpop.eup %7236  ;;  %7256 = vlog2.f32 %v12613_v38  ;;  %v8248_v40 = vmul.f32 6.2831855, %v1020_v39  ;;  %v8250_v33 = vmul.f32 6.2831855, %v1021_v35  ;;  %v1057_v31 = vmul.f32 0.6931472, %v7227_v63 }
  0xfa   : > { %v7239_v30 = vpop.eup %7238  ;;  %7258 = vlog2.f32 %v12616_v36  ;;  %v8253_v26 = vmul.f32 6.2831855, %v1022_v23  ;;  %v8255_v29 = vmul.f32 6.2831855, %v1023_v6  ;;  %v8257_v1 = vmul.f32 -2.0, %v1051_v8 }
  0xfb   : > { %12614 = vst [vmem:[#allocation21_spill] sm:$0xff] %v8248_v40  ;;  %12615 = vst [vmem:[#allocation22_spill] sm:$0xff] %v8250_v33  ;;  %v7241_v4 = vpop.eup %7240  ;;  %7260 = vrsqrt.f32 %v8228_v37  ;;  %v8260_v60 = vmul.f32 6.2831855, %v1024_v9  ;;  %v8262_v32 = vmul.f32 6.2831855, %v1025_v10 }
  0xfc   : > { %12617 = vst [vmem:[#allocation23_spill] sm:$0xff] %v8253_v26  ;;  %12618 = vst [vmem:[#allocation24_spill] sm:$0xff] %v8255_v29  ;;  %v7243_v39 = vpop.eup %7242  ;;  %v1059_v35 = vmul.f32 0.6931472, %v7229_v62  ;;  %v8264_v55 = vmul.f32 -2.0, %v1053_v20  ;;  %7262 = vrsqrt.f32 %v8231_v59  ;;  %v8270_v51 = vmul.f32 -2.0, %v1055_v43 }
  0xfd   : > { %12619 = vst [vmem:[#allocation25_spill] sm:$0xff] %v8260_v60  ;;  %12620 = vst [vmem:[#allocation26_spill] sm:$0xff] %v8262_v32  ;;  %v8268_v23 = vmul.f32 6.2831855, %v8186_v11  ;;  %v7245_v6 = vpop.eup %7244  ;;  %7264 = vrsqrt.f32 %v8234_v49  ;;  %v8274_v42 = vmul.f32 6.2831855, %v8188_v14 }
  0xfe   : > { %v8277_v9 = vmul.f32 6.2831855, %v8191_v61  ;;  %v7247_v10 = vpop.eup %7246  ;;  %v8279_v44 = vmul.f32 -2.0, %v1057_v31  ;;  %7266 = vrsqrt.f32 %v8241_v15  ;;  %v8283_v48 = vmul.f32 6.2831855, %v8193_v47 }
  0xff   : > { %12621 = vst [vmem:[#allocation27_spill] sm:$0xff] %v8268_v23  ;;  %12622 = vst [vmem:[#allocation28_spill] sm:$0xff] %v8274_v42  ;;  %v8286_v11 = vmul.f32 6.2831855, %v8195_v50  ;;  %v7249_v63 = vpop.eup %7248  ;;  %v1061_v3 = vmul.f32 0.6931472, %v7231_v18  ;;  %7268 = vrsqrt.f32 %v8257_v1 }
 0x100   : > { %12623 = vst [vmem:[#allocation30_spill] sm:$0xff] %v8277_v9  ;;  %12624 = vst [vmem:[#allocation31_spill] sm:$0xff] %v8283_v48  ;;  %v8290_v14 = vmul.f32 6.2831855, %v8198_v28  ;;  %v8293_v61 = vmul.f32 6.2831855, %v8200_v24  ;;  %v7251_v62 = vpop.eup %7250  ;;  %7270 = vrsqrt.f32 %v8264_v55 }
 0x101   : > { %12625 = vst [vmem:[#allocation32_spill] sm:$0xff] %v8286_v11  ;;  %v1063_v22 = vmul.f32 0.6931472, %v7233_v53  ;;  %v8295_v34 = vmul.f32 -2.0, %v1059_v35  ;;  %v8299_v47 = vmul.f32 6.2831855, %v8202_v0  ;;  %v7253_v50 = vpop.eup %7252  ;;  %7272 = vrsqrt.f32 %v8270_v51 }
 0x102   : > { %12626 = vst [vmem:[#allocation33_spill] sm:$0xff] %v8290_v14  ;;  %12627 = vst [vmem:[#allocation34_spill] sm:$0xff] %v8293_v61  ;;  %v1065_v16 = vmul.f32 0.6931472, %v7235_v27  ;;  %v8303_v18 = vmul.f32 6.2831855, %v8205_v2  ;;  %v7255_v24 = vpop.eup %7254  ;;  %7274 = vrsqrt.f32 %v8279_v44 }
 0x103   : > { %12628 = vst [vmem:[#allocation10_spill] sm:$0xff] %v8299_v47  ;;  %v8306_v28 = vmul.f32 6.2831855, %v8207_v45  ;;  %v1067_v58 = vmul.f32 0.6931472, %v7237_v7  ;;  %v7257_v0 = vpop.eup %7256  ;;  %v8310_v21 = vmul.f32 -2.0, %v1061_v3  ;;  %7276 = vrsqrt.f32 %v8295_v34 }
 0x104   : > { %12629 = vst [vmem:[#allocation11_spill] sm:$0xff] %v8303_v18  ;;  %v1069_v53 = vmul.f32 0.6931472, %v7239_v30  ;;  %v1071_v8 = vmul.f32 0.6931472, %v7241_v4  ;;  %vm1123_vm1 = vcmp.eq.f32.partialorder %v8231_v59, inf  ;;  %v7259_v20 = vpop.eup %7258 }
 0x105   : > { %12630 = vst [vmem:[#allocation12_spill] sm:$0xff] %v8306_v28  ;;  %vm1130_vm2 = vcmp.eq.f32.partialorder %v8234_v49, inf  ;;  %v8316_v45 = vmul.f32 6.2831855, %v8211_v52  ;;  %v8319_v27 = vmul.f32 6.2831855, %v8213_v5  ;;  %v7261_v38 = vpop.eup %7260  ;;  %7278 = vrsqrt.f32 %v8310_v21 }
 0x106   : > { %v8321_v41 = vmul.f32 -2.0, %v1063_v22  ;;  %v8326_v43 = vmul.f32 6.2831855, %v8217_v13  ;;  %v1073_v30 = vmul.f32 0.6931472, %v7243_v39  ;;  %v8328_v36 = vmul.f32 -2.0, %v1065_v16  ;;  %v7263_v5 = vpop.eup %7262 }
 0x107   : > { %12631 = vst [vmem:[#allocation35_spill] sm:$0xff] %v8316_v45  ;;  %12632 = vst [vmem:[#allocation36_spill] sm:$0xff] %v8319_v27  ;;  %v1075_v31 = vmul.f32 0.6931472, %v7245_v6  ;;  %vm1118_vm3 = vcmp.eq.f32.partialorder %v8228_v37, 0.0  ;;  %v8332_v35 = vmul.f32 -2.0, %v1067_v58  ;;  %v7265_v13 = vpop.eup %7264 }
 0x108   : > { %12633 = vst [vmem:[#allocation37_spill] sm:$0xff] %v8326_v43  ;;  %v1077_v4 = vmul.f32 0.6931472, %v7247_v10  ;;  %v8334_v3 = vmul.f32 -2.0, %v1069_v53  ;;  %v8336_v22 = vmul.f32 -2.0, %v1071_v8  ;;  %vm1125_vm4 = vcmp.eq.f32.partialorder %v8231_v59, 0.0  ;;  %v7267_v16 = vpop.eup %7266 }
 0x109   : > { %vm1132_vm5 = vcmp.eq.f32.partialorder %v8234_v49, 0.0  ;;  %vm1137_vm6 = vcmp.eq.f32.partialorder %v8241_v15, inf  ;;  %v1079_v39 = vmul.f32 0.6931472, %v7249_v63  ;;  %v1081_v6 = vmul.f32 0.6931472, %v7251_v62  ;;  %v7269_v52 = vpop.eup %7268 }
 0x10a   : > { %vm1144_vm7 = vcmp.eq.f32.partialorder %v8257_v1, inf  ;;  %vm1151_vm8 = vcmp.eq.f32.partialorder %v8264_v55, inf  ;;  %v1083_v58 = vmul.f32 0.6931472, %v7253_v50  ;;  %v1085_v53 = vmul.f32 0.6931472, %v7255_v24  ;;  %v7271_v62 = vpop.eup %7270 }
 0x10b   : > { %v1087_v8 = vmul.f32 0.6931472, %v7257_v0  ;;  %vm1158_vm9 = vcmp.eq.f32.partialorder %v8270_v51, inf  ;;  %v8346_v7 = vmul.f32 -2.0, %v1073_v30  ;;  %v8348_v2 = vmul.f32 -2.0, %v1075_v31  ;;  %v7273_v30 = vpop.eup %7272 }
 0x10c   : > { %v1115_v63 = vmul.f32 %v7261_v38, %v8228_v37  ;;  %vm1165_vm11 = vcmp.eq.f32.partialorder %v8279_v44, inf  ;;  %v8353_v10 = vmul.f32 -2.0, %v1077_v4  ;;  %v1122_v50 = vmul.f32 %v7263_v5, %v8231_v59  ;;  %v7275_v5 = vpop.eup %7274 }
 0x10d   : > { %v1129_v24 = vmul.f32 %v7265_v13, %v8234_v49  ;;  %vm1146_vm12 = vcmp.eq.f32.partialorder %v8257_v1, 0.0  ;;  %vm1153_vm13 = vcmp.eq.f32.partialorder %v8264_v55, 0.0  ;;  %v1168_v0 = vand.u32 2147483648, %v8279_v44 }
 0x10e   : > { %v1089_v31 = vmul.f32 0.6931472, %v7259_v20  ;;  %v8360_v38 = vmul.f32 -2.0, %v1079_v39  ;;  %v8362_v46 = vmul.f32 -2.0, %v1081_v6  ;;  %vm1172_vm10 = vcmp.eq.f32.partialorder %v8295_v34, inf }
 0x10f   : > { %v8367_v4 = vmul.f32 -2.0, %v1083_v58  ;;  %v8369_v13 = vmul.f32 -2.0, %v1085_v53  ;;  %v8371_v54 = vmul.f32 -2.0, %v1087_v8  ;;  %v1175_v25 = vand.u32 2147483648, %v8295_v34  ;;  %v7277_v58 = vpop.eup %7276 }
 0x110   : > { %v1117_v20 = vsel %vm1116_vm0, %v8228_v37, %v1115_v63  ;;  %v1136_v39 = vmul.f32 %v7267_v16, %v8241_v15  ;;  %vm1174_vm14 = vcmp.eq.f32.partialorder %v8295_v34, 0.0  ;;  %vm1179_vm15 = vcmp.eq.f32.partialorder %v8310_v21, inf }
 0x111   : > { %7280 = vrsqrt.f32 %v8321_v41  ;;  %v1124_v53 = vsel %vm1123_vm1, %v8231_v59, %v1122_v50  ;;  %v1131_v8 = vsel %vm1130_vm2, %v8234_v49, %v1129_v24  ;;  %v1143_v63 = vmul.f32 %v7269_v52, %v8257_v1 }
 0x112   : > { %v1150_v16 = vmul.f32 %v7271_v62, %v8264_v55  ;;  %v8390_v43 = vmul.f32 -2.0, %v1089_v31  ;;  %v1157_v27 = vmul.f32 %v7273_v30, %v8270_v51  ;;  %v1164_v6 = vmul.f32 %v7275_v5, %v8279_v44  ;;  %v7279_v62 = vpop.eup %7278 }
 0x113   : > { %v12249_v45 = vand.u32 2147483647, %v8236_v56  ;;  %v12634_v28 = vand.u32 2147483648, %v8228_v37  ;;  %7282 = vrsqrt.f32 %v8328_v36  ;;  %v1333_v52 = vand.u32 2139095040, %v8236_v56 }
 0x114   : > { %v12635_v31 = vand.u32 2147483648, %v8231_v59  ;;  %v12636_v5 = vand.u32 2147483648, %v8234_v49  ;;  %v1145_v24 = vsel %vm1144_vm7, %v8257_v1, %v1143_v63  ;;  %v1152_v59 = vsel %vm1151_vm8, %v8264_v55, %v1150_v16 }
 0x115   : > { %v8399_v50 = vsel %vm1118_vm3, %v12634_v28, %v1117_v20  ;;  %v1138_v28 = vsel %vm1137_vm6, %v8241_v15, %v1136_v39  ;;  %v1171_v20 = vmul.f32 %v7277_v58, %v8295_v34  ;;  %v1159_v49 = vsel %vm1158_vm9, %v8270_v51, %v1157_v27 }
 0x116   : > { %v8408_v30 = vsel %vm1125_vm4, %v12635_v31, %v1124_v53  ;;  %v8414_v37 = vsel %vm1132_vm5, %v12636_v5, %v1131_v8  ;;  %v1334_v31 = vshrl.u32 %v1333_v52, 23  ;;  %v1166_v39 = vsel %vm1165_vm11, %v8279_v44, %v1164_v6 }
 0x117   : > { %v1337_v58 = vand.u32 8388607, %v12249_v45  ;;  %v1436_v8 = vand.u32 2139095040, %v8238_v17  ;;  %v12637_v63 = vand.u32 2147483648, %v8241_v15  ;;  %vm12638_vm0 = vcmp.eq.f32.partialorder %v8241_v15, 0.0 }
 0x118   : > { %v1178_v52 = vmul.f32 %v7279_v62, %v8310_v21  ;;  %7284 = vrsqrt.f32 %v8332_v35  ;;  %v6843_v27 = vadd.s32 4294967169, %v1334_v31  ;;  %v12639_v5 = vand.u32 2147483648, %v8257_v1 }
 0x119   : > { %v8440_v16 = vsel %vm12638_vm0, %v12637_v63, %v1138_v28  ;;  %v12640_v45 = vand.u32 2147483648, %v8264_v55  ;;  %v1173_v15 = vsel %vm1172_vm10, %v8295_v34, %v1171_v20  ;;  %v1437_v62 = vshrl.u32 %v1436_v8, 23 }
 0x11a   : > { %v8448_v6 = vsel %vm1146_vm12, %v12639_v5, %v1145_v24  ;;  %v12641_v28 = vand.u32 2147483648, %v8270_v51  ;;  %vm12642_vm1 = vcmp.eq.f32.partialorder %v8270_v51, 0.0  ;;  %vm12643_vm2 = vcmp.eq.f32.partialorder %v8279_v44, 0.0 }
 0x11b   : > { %v8454_v53 = vsel %vm1153_vm13, %v12640_v45, %v1152_v59  ;;  %v8467_v1 = vsel %vm12643_vm2, %v1168_v0, %v1166_v39  ;;  %v1340_v55 = vadd.s32 1, %v6843_v27  ;;  %v7281_v45 = vpop.eup %7280  ;;  %7286 = vrsqrt.f32 %v8334_v3 }
 0x11c   : > { %v8463_v31 = vsel %vm12642_vm1, %v12641_v28, %v1159_v49  ;;  %v1338_v59 = vor.u32 8388608, %v1337_v58  ;;  %v6847_v63 = vadd.s32 4294967169, %v1437_v62  ;;  %v1539_v20 = vand.u32 2139095040, %v8248_v40 }
 0x11d   : > { %v8474_v8 = vsel %vm1174_vm14, %v1175_v25, %v1173_v15  ;;  %v1180_v51 = vsel %vm1179_vm15, %v8310_v21, %v1178_v52  ;;  %vm1341_vm3 = vcmp.gt.s32.totalorder %v1340_v55, 0  ;;  %vm1181_vm4 = vcmp.eq.f32.partialorder %v8310_v21, 0.0  ;;  %v8480_v49 = vpop.eup %7282 }
 0x11e   : > { %v1342_v44 = vsel %vm1341_vm3, %v1340_v55, 0  ;;  %v1443_v0 = vadd.s32 1, %v6847_v63  ;;  %vm1186_vm5 = vcmp.eq.f32.partialorder %v8321_v41, inf  ;;  %v1185_v27 = vmul.f32 %v7281_v45, %v8321_v41 }
 0x11f   : > { %v1343_v39 = vshrl.u32 %v1342_v44, 5  ;;  %v1344_v58 = vand.u32 31, %v1342_v44  ;;  %v8484_v34 = vshll.u32 %v1338_v59, 8  ;;  %v1540_v25 = vshrl.u32 %v1539_v20, 23 }
 0x120   : > { %v12260_v15 = vmov 683565275   ;;  %v12263_v62 = vmov 2475754826   ;;  %v12265_v55 = vmov 2131351028   ;;  %7288 = vrsqrt.f32 %v8336_v22 }
 0x121   : > { %v1345_v5 = vsub.s32 32, %v1344_v58  ;;  %v1347_v52 = vshll.u32 %v12260_v15, %v1344_v58  ;;  %v1350_v28 = vshll.u32 %v12263_v62, %v1344_v58  ;;  %v1353_v63 = vshll.u32 %v12265_v55, %v1344_v58 }
 0x122   : > { %v12274_v24 = vmov 2102212464   ;;  %v12267_v47 = vmov 920167782   ;;  %vm1362_vm6 = vcmp.lt.s32.totalorder %v1343_v39, 1  ;;  %vm1444_vm7 = vcmp.gt.s32.totalorder %v1443_v0, 0  ;;  %v8491_v45 = vpop.eup %7284 }
 0x123   : > { %v1356_v18 = vshll.u32 %v12274_v24, %v1344_v58  ;;  %v1359_v44 = vshll.u32 %v12267_v47, %v1344_v58  ;;  %v1346_v59 = vshrl.u32 %v12260_v15, %v1345_v5  ;;  %v1348_v20 = vshrl.u32 %v12263_v62, %v1345_v5 }
 0x124   : > { %v1351_v61 = vshrl.u32 %v12265_v55, %v1345_v5  ;;  %v1354_v14 = vshrl.u32 %v12274_v24, %v1345_v5  ;;  %v1357_v11 = vshrl.u32 %v12267_v47, %v1345_v5  ;;  %v12269_v48 = vmov 1326507024  }
 0x125   : > { %v1360_v9 = vshrl.u32 %v12269_v48, %v1345_v5  ;;  %vm1363_vm8 = vcmp.lt.s32.totalorder %v1343_v39, 2  ;;  %vm1365_vm9 = vcmp.lt.s32.totalorder %v1343_v39, 4  ;;  %v1349_v58 = vor.u32 %v1348_v20, %v1347_v52  ;;  %v8499_v12 = vpop.eup %7286 }
 0x126   : > { %v1352_v42 = vor.u32 %v1351_v61, %v1350_v28  ;;  %v1355_v23 = vor.u32 %v1354_v14, %v1353_v63  ;;  %v1445_v32 = vsel %vm1444_vm7, %v1443_v0, 0  ;;  %v1358_v15 = vor.u32 %v1357_v11, %v1356_v18 }
 0x127   : > { %v1361_v60 = vor.u32 %v1360_v9, %v1359_v44  ;;  %vm1364_vm10 = vcmp.lt.s32.totalorder %v1343_v39, 3  ;;  %v1447_v62 = vand.u32 31, %v1445_v32  ;;  %vm1188_vm11 = vcmp.eq.f32.partialorder %v8321_v41, 0.0 }
 0x128   : > { %v1366_v55 = vsel %vm1362_vm6, %v1346_v59, %v1349_v58  ;;  %v1367_v47 = vsel %vm1365_vm9, %v1355_v23, 2102212464  ;;  %v1370_v5 = vsel %vm1362_vm6, %v1349_v58, %v1352_v42  ;;  %v1374_v48 = vsel %vm1362_vm6, %v1352_v42, %v1355_v23 }
 0x129   : > { %v1368_v52 = vsel %vm1364_vm10, %v1352_v42, %v1367_v47  ;;  %v1371_v14 = vsel %vm1365_vm9, %v1358_v15, 920167782  ;;  %v1375_v61 = vsel %vm1365_vm9, %v1361_v60, 1326507024  ;;  %v6851_v0 = vadd.s32 4294967169, %v1540_v25 }
 0x12a   : > { %v12644_v9 = vand.u32 2147483648, %v8310_v21  ;;  %v1372_v18 = vsel %vm1364_vm10, %v1355_v23, %v1371_v14  ;;  %v1376_v28 = vsel %vm1364_vm10, %v1358_v15, %v1375_v61  ;;  %v8514_v63 = vsub.s32 32, %v1447_v62 }
 0x12b   : > { %v1187_v44 = vsel %vm1186_vm5, %v8321_v41, %v1185_v27  ;;  %vm1193_vm12 = vcmp.eq.f32.partialorder %v8328_v36, inf  ;;  %v1369_v42 = vsel %vm1363_vm8, %v1366_v55, %v1368_v52  ;;  %v1373_v60 = vsel %vm1363_vm8, %v1370_v5, %v1372_v18 }
 0x12c   : > { %v8512_v11 = vsel %vm1181_vm4, %v12644_v9, %v1180_v51  ;;  %v1377_v47 = vsel %vm1363_vm8, %v1374_v48, %v1376_v28  ;;  %vm1200_vm13 = vcmp.eq.f32.partialorder %v8332_v35, inf  ;;  %v8534_v15 = vshrl.u32 %v1445_v32, 5 }
 0x12d   : > { %v8525_v21 = vmul.u32.u64.low %v8484_v34, %v1377_v47  ;;  %v8526_v23 = vmul.u32.u64.high %v8484_v34, %v1377_v47, %v8525_v21  ;;  %v8529_v51 = vmul.u32.u64.low %v8484_v34, %v1373_v60  ;;  %v8530_v25 = vmul.u32.u64.high %v8484_v34, %v1373_v60, %v8529_v51 }
 0x12e   : > { %v12647_v55 = vmov 683565275   ;;  %v1546_v20 = vadd.s32 1, %v6851_v0  ;;  %vm1195_vm14 = vcmp.eq.f32.partialorder %v8328_v36, 0.0  ;;  %v1385_v48 = vmul.u32 %v8484_v34, %v1369_v42 }
 0x12f   : > { %12645 = vst [vmem:[#allocation38_spill] sm:$0xff] %v8526_v23  ;;  %12646 = vst [vmem:[#allocation39_spill] sm:$0xff] %v8529_v51  ;;  %v1450_v59 = vshll.u32 %v12647_v55, %v1447_v62  ;;  %v1459_v39 = vshll.u32 %v12274_v24, %v1447_v62  ;;  %v12648_v58 = vmov 920167782   ;;  %v12649_v14 = vmov 2475754826  }
 0x130   : > { %v1460_v5 = vshrl.u32 %v12648_v58, %v8514_v63  ;;  %v1462_v52 = vshll.u32 %v12648_v58, %v1447_v62  ;;  %v1451_v61 = vshrl.u32 %v12649_v14, %v8514_v63  ;;  %v1453_v32 = vshll.u32 %v12649_v14, %v1447_v62 }
 0x131   : > { %v12650_v9 = vmov 2131351028   ;;  %v12651_v0 = vmov 1326507024   ;;  %vm1202_vm15 = vcmp.eq.f32.partialorder %v8332_v35, 0.0  ;;  %vm1387_vm0 = vc.u32 %v8526_v23, %v8529_v51 }
 0x132   : > { %v1454_v18 = vshrl.u32 %v12650_v9, %v8514_v63  ;;  %v1463_v28 = vshrl.u32 %v12651_v0, %v8514_v63  ;;  %v1388_v34 = vadd.s32 1, %v8530_v25  ;;  %v1456_v42 = vshll.u32 %v12650_v9, %v1447_v62 }
 0x133   : > { %v1457_v60 = vshrl.u32 %v12274_v24, %v8514_v63  ;;  %v1192_v47 = vmul.f32 %v8480_v49, %v8328_v36  ;;  %v1461_v27 = vor.u32 %v1460_v5, %v1459_v39  ;;  %v12652_v57 = vand.u32 2147483647, %v8238_v17 }
 0x134   : > { %v1389_v19 = vsel %vm1387_vm0, %v1388_v34, %v8530_v25  ;;  %v1464_v29 = vor.u32 %v1463_v28, %v1462_v52  ;;  %vm1468_vm1 = vcmp.lt.s32.totalorder %v8534_v15, 4  ;;  %v12653_v62 = vand.u32 2147483648, %v8321_v41 }
 0x135   : > { %v1440_v56 = vand.u32 8388607, %v12652_v57  ;;  %v1199_v49 = vmul.f32 %v8491_v45, %v8332_v35  ;;  %v8574_v39 = vor.u32 %v1451_v61, %v1450_v59  ;;  %v8576_v25 = vadd.s32 %v1389_v19, %v1385_v48 }
 0x136   : > { %v8569_v24 = vsel %vm1188_vm11, %v12653_v62, %v1187_v44  ;;  %v8578_v5 = vor.u32 %v1454_v18, %v1453_v32  ;;  %v1458_v57 = vor.u32 %v1457_v60, %v1456_v42  ;;  %vm1547_vm2 = vcmp.gt.s32.totalorder %v1546_v20, 0 }
 0x137   : > { %12654 = vst [vmem:[#allocation40_spill] sm:$0xff] %v8569_v24  ;;  %7290 = vrsqrt.f32 %v8346_v7  ;;  %vm1465_vm3 = vcmp.lt.s32.totalorder %v8534_v15, 1  ;;  %vm1467_vm4 = vcmp.lt.s32.totalorder %v8534_v15, 3  ;;  %v1474_v41 = vsel %vm1468_vm1, %v1461_v27, 920167782 }
 0x138   : > { %v1194_v45 = vsel %vm1193_vm12, %v8328_v36, %v1192_v47  ;;  %v1441_v44 = vor.u32 8388608, %v1440_v56  ;;  %v1478_v59 = vsel %vm1468_vm1, %v1464_v29, 1326507024  ;;  %v1201_v48 = vsel %vm1200_vm13, %v8332_v35, %v1199_v49 }
 0x139   : > { %vm1207_vm5 = vcmp.eq.f32.partialorder %v8334_v3, inf  ;;  %7292 = vrsqrt.f32 %v8348_v2  ;;  %vm1466_vm6 = vcmp.lt.s32.totalorder %v8534_v15, 2  ;;  %v1548_v52 = vsel %vm1547_vm2, %v1546_v20, 0 }
 0x13a   : > { %v1391_v61 = vadd.s32 536870912, %v8576_v25  ;;  %v1473_v56 = vsel %vm1465_vm3, %v8574_v39, %v8578_v5  ;;  %v1475_v29 = vsel %vm1467_vm4, %v1458_v57, %v1474_v41  ;;  %v1550_v32 = vand.u32 31, %v1548_v52 }
 0x13b   : > { %v12655_v18 = vand.u32 2147483648, %v8328_v36  ;;  %7294 = vrsqrt.f32 %v8353_v10  ;;  %v1477_v20 = vsel %vm1465_vm3, %v8578_v5, %v1458_v57  ;;  %v1479_v34 = vsel %vm1467_vm4, %v1461_v27, %v1478_v59  ;;  %v7289_v36 = vpop.eup %7288 }
 0x13c   : > { %7296 = vrsqrt.f32 %v8360_v38  ;;  %v8619_v47 = vshll.u32 %v1441_v44, 8  ;;  %v12657_v62 = vand.u32 2147483648, %v8332_v35  ;;  %v1476_v27 = vsel %vm1466_vm6, %v1473_v56, %v1475_v29 }
 0x13d   : > { %v8608_v28 = vsel %vm1195_vm14, %v12655_v18, %v1194_v45  ;;  %7298 = vrsqrt.f32 %v8362_v46  ;;  %vm1209_vm7 = vcmp.eq.f32.partialorder %v8334_v3, 0.0  ;;  %v8633_v44 = vshrl.u32 %v1391_v61, 30 }
 0x13e   : > { %12656 = vst [vmem:[#allocation41_spill] sm:$0xff] %v8608_v28  ;;  %v8625_v49 = vsel %vm1202_vm15, %v12657_v62, %v1201_v48  ;;  %v1480_v59 = vsel %vm1466_vm6, %v1477_v20, %v1479_v34  ;;  %v8637_v18 = vsub.s32 32, %v1550_v32  ;;  %v1206_v35 = vmul.f32 %v8499_v12, %v8334_v3 }
 0x13f   : > { %12658 = vst [vmem:[#allocation42_spill] sm:$0xff] %v8625_v49  ;;  %12659 = vst [vmem:[#allocation43_spill] sm:$0xff] %v8633_v44  ;;  %7300 = vrsqrt.f32 %v8367_v4  ;;  %v1449_v29 = vshrl.u32 %v12647_v55, %v8514_v63  ;;  %v1470_v61 = vsel %vm1468_vm1, %v1458_v57, 2102212464  ;;  %vm1214_vm8 = vcmp.eq.f32.partialorder %v8336_v22, inf }
 0x140   : > { %v8649_v62 = vmul.u32.u64.low %v8619_v47, %v1476_v27  ;;  %v8650_v20 = vmul.u32.u64.high %v8619_v47, %v1476_v27, %v8649_v62  ;;  %v8657_v12 = vmul.u32.u64.low %v8619_v47, %v1480_v59  ;;  %v8658_v48 = vmul.u32.u64.high %v8619_v47, %v1480_v59, %v8657_v12 }
 0x141   : > { %v8653_v34 = vpop.eup %7290  ;;  %v8660_v45 = vshrl.u32 %v1548_v52, 5  ;;  %v12660_v41 = vmov 2102212464   ;;  %v1393_v60 = vshll.u32 %v8633_v44, 30  ;;  %v1556_v57 = vshll.u32 %v12649_v14, %v1550_v32 }
 0x142   : > { %v1562_v63 = vshll.u32 %v12660_v41, %v1550_v32  ;;  %v1557_v27 = vshrl.u32 %v12650_v9, %v8637_v18  ;;  %v1563_v42 = vshrl.u32 %v12648_v58, %v8637_v18  ;;  %v1559_v21 = vshll.u32 %v12650_v9, %v1550_v32 }
 0x143   : > { %v8669_v19 = vpop.eup %7292  ;;  %v1560_v52 = vshrl.u32 %v12660_v41, %v8637_v18  ;;  %v1565_v59 = vshll.u32 %v12648_v58, %v1550_v32  ;;  %v1566_v12 = vshrl.u32 %v12651_v0, %v8637_v18  ;;  %v1208_v56 = vsel %vm1207_vm5, %v8334_v3, %v1206_v35 }
 0x144   : > { %vm1216_vm9 = vcmp.eq.f32.partialorder %v8336_v22, 0.0  ;;  %7302 = vrsqrt.f32 %v8369_v13  ;;  %v1553_v17 = vshll.u32 %v12647_v55, %v1550_v32  ;;  %v1554_v44 = vshrl.u32 %v12649_v14, %v8637_v18 }
 0x145   : > { %v7295_v49 = vpop.eup %7294  ;;  %v1469_v51 = vsel %vm1465_vm3, %v1449_v29, %v8574_v39  ;;  %v12661_v23 = vand.u32 2147483647, %v8248_v40  ;;  %v1564_v26 = vor.u32 %v1563_v42, %v1562_v63  ;;  %v1642_v35 = vand.u32 2139095040, %v8250_v33 }
 0x146   : > { %v8691_v0 = vpop.eup %7296  ;;  %vm1221_vm10 = vcmp.eq.f32.partialorder %v8346_v7, inf  ;;  %v8695_v32 = vsub.s32 %v8576_v25, %v1393_v60  ;;  %v1471_v58 = vsel %vm1467_vm4, %v8578_v5, %v1470_v61  ;;  %v1567_v24 = vor.u32 %v1566_v12, %v1565_v59 }
 0x147   : > { %v1543_v28 = vand.u32 8388607, %v12661_v23  ;;  %vm1571_vm11 = vcmp.lt.s32.totalorder %v8660_v45, 4  ;;  %v8701_v39 = vpop.eup %7298  ;;  %7304 = vrsqrt.f32 %v8371_v54  ;;  %v8705_v42 = vor.u32 %v1557_v27, %v1556_v57 }
 0x148   : > { %v1561_v29 = vor.u32 %v1560_v52, %v1559_v21  ;;  %v1213_v63 = vmul.f32 %v7289_v36, %v8336_v22  ;;  %vm1228_vm12 = vcmp.eq.f32.partialorder %v8348_v2, inf  ;;  %v8709_v25 = vor.u32 %v1554_v44, %v1553_v17 }
 0x149   : > { %vm1568_vm13 = vcmp.lt.s32.totalorder %v8660_v45, 1  ;;  %vm1570_vm14 = vcmp.lt.s32.totalorder %v8660_v45, 3  ;;  %v8713_v5 = vpop.eup %7300  ;;  %v12662_v60 = vand.u32 2147483648, %v8334_v3  ;;  %vm1235_vm15 = vcmp.eq.f32.partialorder %v8353_v10, inf }
 0x14a   : > { %v1472_v21 = vsel %vm1466_vm6, %v1469_v51, %v1471_v58  ;;  %v1544_v36 = vor.u32 8388608, %v1543_v28  ;;  %v1577_v17 = vsel %vm1571_vm11, %v1564_v26, 920167782  ;;  %vm1223_vm0 = vcmp.eq.f32.partialorder %v8346_v7, 0.0 }
 0x14b   : > { %v8719_v61 = vsel %vm1209_vm7, %v12662_v60, %v1208_v56  ;;  %v1396_v44 = vsub.s32 0, %v8695_v32  ;;  %v1491_v57 = vadd.s32 1, %v8650_v20  ;;  %v1581_v3 = vsel %vm1571_vm11, %v1567_v24, 1326507024 }
 0x14c   : > { %v1643_v56 = vshrl.u32 %v1642_v35, 23  ;;  %vm1230_vm1 = vcmp.eq.f32.partialorder %v8348_v2, 0.0  ;;  %vm1490_vm2 = vc.u32 %v8658_v48, %v8649_v62  ;;  %vm1569_vm3 = vcmp.lt.s32.totalorder %v8660_v45, 2 }
 0x14d   : > { %v1580_v51 = vsel %vm1568_vm13, %v8705_v42, %v1561_v29  ;;  %v1582_v15 = vsel %vm1570_vm14, %v1564_v26, %v1581_v3  ;;  %v1215_v58 = vsel %vm1214_vm8, %v8336_v22, %v1213_v63  ;;  %vm1237_vm4 = vcmp.eq.f32.partialorder %v8353_v10, 0.0 }
 0x14e   : > { %v1576_v28 = vsel %vm1568_vm13, %v8709_v25, %v8705_v42  ;;  %v1578_v27 = vsel %vm1570_vm14, %v1561_v29, %v1577_v17  ;;  %v1220_v52 = vmul.f32 %v8653_v34, %v8346_v7  ;;  %vm1242_vm5 = vcmp.eq.f32.partialorder %v8360_v38, inf  ;;  %v8758_v12 = vpop.eup %7302 }
 0x14f   : > { %7306 = vrsqrt.f32 %v8390_v43  ;;  %v1488_v26 = vmul.u32 %v8619_v47, %v1472_v21  ;;  %v8756_v59 = vshll.u32 %v1544_v36, 8  ;;  %v6844_v35 = vmin.u32 %v1396_v44, %v8695_v32 }
 0x150   : > { %v1492_v63 = vsel %vm1490_vm2, %v1491_v57, %v8650_v20  ;;  %v1583_v34 = vsel %vm1569_vm3, %v1580_v51, %v1582_v15  ;;  %v6855_v60 = vadd.s32 4294967169, %v1643_v56  ;;  %v12663_v17 = vand.u32 2147483648, %v8336_v22 }
 0x151   : > { %v1227_v21 = vmul.f32 %v8669_v19, %v8348_v2  ;;  %v1579_v44 = vsel %vm1569_vm3, %v1576_v28, %v1578_v27  ;;  %v1234_v20 = vmul.f32 %v7295_v49, %v8353_v10  ;;  %v8780_v57 = vmul.f32 0.7, %v8399_v50  ;;  %v8785_v22 = vpop.eup %7304 }
 0x152   : > { %v8771_v47 = vsel %vm1216_vm9, %v12663_v17, %v1215_v58  ;;  %v8783_v3 = vmul.f32 0.7, %v8408_v30  ;;  %v1649_v56 = vadd.s32 1, %v6855_v60  ;;  %v1222_v19 = vsel %vm1221_vm10, %v8346_v7, %v1220_v52 }
 0x153   : > { %12664 = vst [vmem:[#allocation44_spill] sm:$0xff] %v8780_v57  ;;  %v8790_v51 = vadd.s32 %v1492_v63, %v1488_v26  ;;  %v8793_v15 = vmul.u32.u64.low %v8756_v59, %v1583_v34  ;;  %v8794_v58 = vmul.u32.u64.high %v8756_v59, %v1583_v34, %v8793_v15  ;;  %vm1249_vm6 = vcmp.eq.f32.partialorder %v8362_v46, inf }
 0x154   : > { %12665 = vst [vmem:[#allocation45_spill] sm:$0xff] %v8783_v3  ;;  %v1398_v50 = vclz %v6844_v35  ;;  %v8798_v49 = vmul.u32.u64.low %v8756_v59, %v1579_v44  ;;  %v8799_v30 = vmul.u32.u64.high %v8756_v59, %v1579_v44, %v8798_v49  ;;  %vm1650_vm7 = vcmp.gt.s32.totalorder %v1649_v56, 0 }
 0x155   : > { %v1229_v28 = vsel %vm1228_vm12, %v8348_v2, %v1227_v21  ;;  %v8806_v27 = vmul.f32 0.7, %v8414_v37  ;;  %v1552_v52 = vshrl.u32 %v12647_v55, %v8637_v18  ;;  %v1651_v26 = vsel %vm1650_vm7, %v1649_v56, 0 }
 0x156   : > { %v1236_v35 = vsel %vm1235_vm15, %v8353_v10, %v1234_v20  ;;  %v1241_v63 = vmul.f32 %v8691_v0, %v8360_v38  ;;  %v8816_v34 = vmul.f32 0.7, %v8440_v16  ;;  %v1573_v60 = vsel %vm1571_vm11, %v1561_v29, 2102212464 }
 0x157   : > { %12666 = vst [vmem:[#allocation14_spill] sm:$0xff] %v8806_v27  ;;  %v12668_v37 = vand.u32 2147483648, %v8346_v7  ;;  %v8827_v18 = vmul.f32 0.7, %v8448_v6  ;;  %v1494_v21 = vadd.s32 536870912, %v8790_v51  ;;  %v1653_v44 = vand.u32 31, %v1651_v26 }
 0x158   : > { %12667 = vst [vmem:[#allocation46_spill] sm:$0xff] %v8816_v34  ;;  %v12670_v0 = vand.u32 2147483648, %v8348_v2  ;;  %vm1244_vm8 = vcmp.eq.f32.partialorder %v8360_v38, 0.0  ;;  %v8838_v29 = vmul.f32 0.7, %v8454_v53  ;;  %v6845_v20 = vadd.s32 4294967294, %v1398_v50 }
 0x159   : > { %v8824_v17 = vsel %vm1223_vm0, %v12668_v37, %v1222_v19  ;;  %12669 = vst [vmem:[#allocation15_spill] sm:$0xff] %v8827_v18  ;;  %v8841_v7 = vmul.f32 0.7, %v8463_v31  ;;  %v8843_v6 = vpop.eup %7306  ;;  %v12673_v56 = vand.u32 2147483648, %v8353_v10  ;;  %v1572_v2 = vsel %vm1568_vm13, %v1552_v52, %v8709_v25 }
 0x15a   : > { %v8834_v16 = vsel %vm1230_vm1, %v12670_v0, %v1229_v28  ;;  %12671 = vst [vmem:[#allocation47_spill] sm:$0xff] %v8838_v29  ;;  %v1574_v53 = vsel %vm1570_vm14, %v8705_v42, %v1573_v60  ;;  %v8857_v15 = vsub.s32 32, %v1653_v44  ;;  %v1243_v31 = vsel %vm1242_vm5, %v8360_v38, %v1241_v63  ;;  %v12677_v0 = vld [vmem:[#allocation40_spill] sm:$0xff] }
 0x15b   : > { %12672 = vst [vmem:[#allocation48_spill] sm:$0xff] %v8841_v7  ;;  %v8849_v19 = vsel %vm1237_vm4, %v12673_v56, %v1236_v35  ;;  %v1248_v50 = vmul.f32 %v8701_v39, %v8362_v46  ;;  %vm1251_vm9 = vcmp.eq.f32.partialorder %v8362_v46, 0.0  ;;  %v8866_v10 = vmul.f32 0.7, %v8467_v1 }
 0x15c   : > { %v8869_v25 = vmul.f32 0.7, %v8474_v8  ;;  %v1255_v42 = vmul.f32 %v8713_v5, %v8367_v4  ;;  %v8874_v28 = vmul.f32 0.7, %v8512_v11  ;;  %v8876_v52 = vshrl.u32 %v1494_v21, 30 }
 0x15d   : > { %12674 = vst [vmem:[#allocation49_spill] sm:$0xff] %v8866_v10  ;;  %v12287_v35 = vand.u32 2147483647, %v8250_v33  ;;  %vm1256_vm10 = vcmp.eq.f32.partialorder %v8367_v4, inf  ;;  %vm6846_vm11 = vcmp.lt.s32.totalorder %v6845_v20, 0  ;;  %v1575_v1 = vsel %vm1569_vm3, %v1572_v2, %v1574_v53  ;;  %v12681_v10 = vld [vmem:[#allocation23_spill] sm:$0xff] }
 0x15e   : > { %12675 = vst [vmem:[#allocation13_spill] sm:$0xff] %v8869_v25  ;;  %12676 = vst [vmem:[#allocation29_spill] sm:$0xff] %v8874_v28  ;;  %vm1593_vm12 = vc.u32 %v8794_v58, %v8798_v49  ;;  %v1594_v8 = vadd.s32 1, %v8799_v30  ;;  %v8885_v39 = vshrl.u32 %v1651_v26, 5  ;;  %v1656_v11 = vshll.u32 %v12647_v55, %v1653_v44 }
 0x15f   : > { %v1657_v5 = vshrl.u32 %v12649_v14, %v8857_v15  ;;  %v1659_v63 = vshll.u32 %v12649_v14, %v1653_v44  ;;  %v1660_v60 = vshrl.u32 %v12650_v9, %v8857_v15  ;;  %v1662_v45 = vshll.u32 %v12650_v9, %v1653_v44 }
 0x160   : > { %v1663_v37 = vshrl.u32 %v12660_v41, %v8857_v15  ;;  %v1665_v21 = vshll.u32 %v12660_v41, %v1653_v44  ;;  %v1250_v26 = vsel %vm1249_vm6, %v8362_v46, %v1248_v50  ;;  %vm1258_vm13 = vcmp.eq.f32.partialorder %v8367_v4, 0.0 }
 0x161   : > { %v8902_v56 = vmul.f32 0.7, %v12677_v0  ;;  %v1646_v2 = vand.u32 8388607, %v12287_v35  ;;  %v12679_v53 = vmov 920167782   ;;  %v1591_v0 = vmul.u32 %v8756_v59, %v1575_v1 }
 0x162   : > { %v1666_v36 = vshrl.u32 %v12679_v53, %v8857_v15  ;;  %vm1263_vm14 = vcmp.eq.f32.partialorder %v8369_v13, inf  ;;  %v8910_v24 = vsel %vm6846_vm11, 0, %v6845_v20  ;;  %v1496_v23 = vshll.u32 %v8876_v52, 30 }
 0x163   : > { %12678 = vst [vmem:[#allocation50_spill] sm:$0xff] %v8902_v56  ;;  %v1668_v50 = vshll.u32 %v12679_v53, %v1653_v44  ;;  %v12680_v28 = vmov 1326507024   ;;  %v1595_v35 = vsel %vm1593_vm12, %v1594_v8, %v8799_v30  ;;  %v1745_v7 = vand.u32 2139095040, %v12681_v10 }
 0x164   : > { %v1669_v25 = vshrl.u32 %v12680_v28, %v8857_v15  ;;  %v1667_v56 = vor.u32 %v1666_v36, %v1665_v21  ;;  %v8922_v29 = vor.u32 %v1657_v5, %v1656_v11  ;;  %v8924_v20 = vor.u32 %v1660_v60, %v1659_v63  ;;  %v12684_v63 = vld [vmem:[#allocation41_spill] sm:$0xff] }
 0x165   : > { %v1664_v18 = vor.u32 %v1663_v37, %v1662_v45  ;;  %vm1674_vm15 = vcmp.lt.s32.totalorder %v8885_v39, 4  ;;  %v12682_v44 = vand.u32 2147483648, %v8360_v38  ;;  %vm1265_vm0 = vcmp.eq.f32.partialorder %v8369_v13, 0.0 }
 0x166   : > { %vm1270_vm1 = vcmp.eq.f32.partialorder %v8371_v54, inf  ;;  %vm1671_vm2 = vcmp.lt.s32.totalorder %v8885_v39, 1  ;;  %vm1673_vm3 = vcmp.lt.s32.totalorder %v8885_v39, 3  ;;  %v1680_v36 = vsel %vm1674_vm15, %v1667_v56, 920167782 }
 0x167   : > { %v8931_v59 = vsel %vm1244_vm8, %v12682_v44, %v1243_v31  ;;  %v1406_v30 = vsub.s32 4294967266, %v8910_v24  ;;  %v8941_v1 = vsub.s32 %v8790_v51, %v1496_v23  ;;  %v1647_v8 = vor.u32 8388608, %v1646_v2 }
 0x168   : > { %v1670_v38 = vor.u32 %v1669_v25, %v1668_v50  ;;  %v12683_v31 = vand.u32 2147483648, %v8362_v46  ;;  %v1262_v5 = vmul.f32 %v8758_v12, %v8369_v13  ;;  %v8950_v60 = vmul.f32 0.7, %v12684_v63  ;;  %v12686_v25 = vld [vmem:[#allocation38_spill] sm:$0xff] }
 0x169   : > { %v8952_v45 = vadd.s32 %v1595_v35, %v1591_v0  ;;  %vm1272_vm4 = vcmp.eq.f32.partialorder %v8371_v54, 0.0  ;;  %vm1672_vm5 = vcmp.lt.s32.totalorder %v8885_v39, 2  ;;  %v1679_v23 = vsel %vm1671_vm2, %v8922_v29, %v8924_v20  ;;  %v12687_v35 = vld [vmem:[#allocation39_spill] sm:$0xff] }
 0x16a   : > { %v1253_v11 = vsel %vm1251_vm9, %v12683_v31, %v1250_v26  ;;  %12685 = vst [vmem:[#allocation51_spill] sm:$0xff] %v8950_v60  ;;  %v1681_v46 = vsel %vm1673_vm3, %v1664_v18, %v1680_v36  ;;  %v1746_v51 = vshrl.u32 %v1745_v7, 23  ;;  %v1257_v12 = vsel %vm1256_vm10, %v8367_v4, %v1255_v42 }
 0x16b   : > { %v1386_v37 = vadd.s32 %v12687_v35, %v12686_v25  ;;  %v1402_v21 = vsub.s32 32, %v8910_v24  ;;  %v1683_v26 = vsel %vm1671_vm2, %v8924_v20, %v1664_v18  ;;  %vm1277_vm6 = vcmp.eq.f32.partialorder %v8390_v43, inf }
 0x16c   : > { %v1407_v2 = vadd.s32 127, %v1406_v30  ;;  %v1499_v50 = vsub.s32 0, %v8941_v1  ;;  %v1684_v7 = vsel %vm1674_vm15, %v1670_v38, 1326507024  ;;  %v8975_v0 = vshll.u32 %v1647_v8, 8  ;;  %v12689_v38 = vld [vmem:[#allocation42_spill] sm:$0xff] }
 0x16d   : > { %v1269_v42 = vmul.f32 %v8785_v22, %v8371_v54  ;;  %v1597_v44 = vadd.s32 536870912, %v8952_v45  ;;  %v1682_v36 = vsel %vm1672_vm5, %v1679_v23, %v1681_v46  ;;  %v1685_v31 = vsel %vm1673_vm3, %v1667_v56, %v1684_v7 }
 0x16e   : > { %v12688_v30 = vand.u32 2147483648, %v8367_v4  ;;  %v8991_v8 = vmul.f32 0.7, %v12689_v38  ;;  %v1686_v22 = vsel %vm1672_vm5, %v1683_v26, %v1685_v31  ;;  %v6859_v25 = vadd.s32 4294967169, %v1746_v51 }
 0x16f   : > { %v1264_v23 = vsel %vm1263_vm14, %v8369_v13, %v1262_v5  ;;  %v8999_v46 = vmul.f32 0.7, %v8719_v61  ;;  %v1403_v56 = vshll.u32 %v8695_v32, %v8910_v24  ;;  %v1404_v4 = vshrl.u32 %v1386_v37, %v1402_v21 }
 0x170   : > { %v8988_v63 = vsel %vm1258_vm13, %v12688_v30, %v1257_v12  ;;  %12690 = vst [vmem:[#allocation52_spill] sm:$0xff] %v8991_v8  ;;  %v1408_v12 = vshll.u32 %v1407_v2, 23  ;;  %v6848_v35 = vmin.u32 %v1499_v50, %v8941_v1  ;;  %v9009_v51 = vshrl.u32 %v1597_v44, 30 }
 0x171   : > { %12691 = vst [vmem:[#allocation53_spill] sm:$0xff] %v8999_v46  ;;  %v9005_v7 = vmul.u32.u64.low %v8975_v0, %v1682_v36  ;;  %v9006_v30 = vmul.u32.u64.high %v8975_v0, %v1682_v36, %v9005_v7  ;;  %v9012_v26 = vmul.u32.u64.low %v8975_v0, %v1686_v22  ;;  %v9013_v5 = vmul.u32.u64.high %v8975_v0, %v1686_v22, %v9012_v26 }
 0x172   : > { %v1752_v61 = vadd.s32 1, %v6859_v25  ;;  %v12692_v31 = vand.u32 2147483648, %v8369_v13  ;;  %v1271_v24 = vsel %vm1270_vm1, %v8371_v54, %v1269_v42  ;;  %v9025_v37 = vmul.f32 0.7, %v8771_v47 }
 0x173   : > { %v1655_v21 = vshrl.u32 %v12647_v55, %v8857_v15  ;;  %v1276_v2 = vmul.f32 %v8843_v6, %v8390_v43  ;;  %v1676_v50 = vsel %vm1674_vm15, %v1664_v18, 2102212464  ;;  %v12293_v13 = vand.u32 2147483647, %v12681_v10 }
 0x174   : > { %v9019_v32 = vsel %vm1265_vm0, %v12692_v31, %v1264_v23  ;;  %12693 = vst [vmem:[#allocation54_spill] sm:$0xff] %v9025_v37  ;;  %vm1753_vm7 = vcmp.gt.s32.totalorder %v1752_v61, 0  ;;  %v1405_v44 = vor.u32 %v1404_v4, %v1403_v56  ;;  %v1409_v36 = vor.u32 4788187, %v1408_v12 }
 0x175   : > { %v1501_v38 = vclz %v6848_v35  ;;  %v1754_v22 = vsel %vm1753_vm7, %v1752_v61, 0  ;;  %v12694_v42 = vand.u32 2147483648, %v8371_v54  ;;  %v9041_v15 = vmul.f32 0.7, %v8824_v17 }
 0x176   : > { %v1599_v6 = vshll.u32 %v9009_v51, 30  ;;  %v1756_v25 = vand.u32 31, %v1754_v22  ;;  %v9045_v18 = vmul.f32 0.7, %v8834_v16  ;;  %v9048_v23 = vmul.f32 0.7, %v8849_v19 }
 0x177   : > { %v9038_v47 = vsel %vm1272_vm4, %v12694_v42, %v1271_v24  ;;  %12695 = vst [vmem:[#allocation40_spill] sm:$0xff] %v9041_v15  ;;  %v1675_v56 = vsel %vm1671_vm2, %v1655_v21, %v8922_v29  ;;  %v1677_v54 = vsel %vm1673_vm3, %v8924_v20, %v1676_v50  ;;  %v9059_v17 = vsel %vm1277_vm6, %v8390_v43, %v1276_v2 }
 0x178   : > { %12696 = vst [vmem:[#allocation41_spill] sm:$0xff] %v9045_v18  ;;  %12697 = vst [vmem:[#allocation38_spill] sm:$0xff] %v9048_v23  ;;  %v9062_v4 = vmul.f32 0.7, %v8931_v59  ;;  %v9064_v16 = vmul.f32 0.7, %v1253_v11  ;;  %v1412_v35 = vcvt.s32.f32 %v1405_v44  ;;  %v9069_v61 = vsub.s32 %v8952_v45, %v1599_v6 }
 0x179   : > { %v1757_v19 = vsub.s32 32, %v1756_v25  ;;  %v1410_v12 = vand.u32 2147483647, %v1409_v36  ;;  %v6849_v26 = vadd.s32 4294967294, %v1501_v38  ;;  %v1749_v29 = vand.u32 8388607, %v12293_v13 }
 0x17a   : > { %12698 = vst [vmem:[#allocation39_spill] sm:$0xff] %v9062_v4  ;;  %12699 = vst [vmem:[#allocation42_spill] sm:$0xff] %v9064_v16  ;;  %v1678_v20 = vsel %vm1672_vm5, %v1675_v56, %v1677_v54  ;;  %vm1696_vm8 = vc.u32 %v9013_v5, %v9005_v7  ;;  %v1697_v59 = vadd.s32 1, %v9006_v30  ;;  %v1759_v11 = vshll.u32 %v12647_v55, %v1756_v25  ;;  %v12700_v38 = vld [vmem:[#allocation24_spill] sm:$0xff] }
 0x17b   : > { %v1760_v31 = vshrl.u32 %v12649_v14, %v1757_v19  ;;  %v1762_v24 = vshll.u32 %v12649_v14, %v1756_v25  ;;  %v1763_v21 = vshrl.u32 %v12650_v9, %v1757_v19  ;;  %v1755_v2 = vshrl.u32 %v1754_v22, 5 }
 0x17c   : > { %v1765_v45 = vshll.u32 %v12650_v9, %v1756_v25  ;;  %v1766_v50 = vshrl.u32 %v12660_v41, %v1757_v19  ;;  %v1768_v39 = vshll.u32 %v12660_v41, %v1756_v25  ;;  %vm6850_vm9 = vcmp.lt.s32.totalorder %v6849_v26, 0 }
 0x17d   : > { %v1694_v44 = vmul.u32 %v8975_v0, %v1678_v20  ;;  %v1769_v36 = vshrl.u32 %v12679_v53, %v1757_v19  ;;  %v1848_v42 = vand.u32 2139095040, %v12700_v38  ;;  %v1602_v6 = vsub.s32 0, %v9069_v61 }
 0x17e   : > { %v1698_v56 = vsel %vm1696_vm8, %v1697_v59, %v9006_v30  ;;  %v1771_v54 = vshll.u32 %v12679_v53, %v1756_v25  ;;  %v1772_v22 = vshrl.u32 %v12680_v28, %v1757_v19  ;;  %vm1279_vm10 = vcmp.eq.f32.partialorder %v8390_v43, 0.0 }
 0x17f   : > { %v1489_v13 = vadd.s32 %v8649_v62, %v8658_v48  ;;  %v1750_v16 = vor.u32 8388608, %v1749_v29  ;;  %v1761_v4 = vor.u32 %v1760_v31, %v1759_v11  ;;  %v1764_v0 = vor.u32 %v1763_v21, %v1762_v24 }
 0x180   : > { %v9093_v20 = vsel %vm6850_vm9, 0, %v6849_v26  ;;  %v1767_v23 = vor.u32 %v1766_v50, %v1765_v45  ;;  %v1770_v18 = vor.u32 %v1769_v36, %v1768_v39  ;;  %vm1774_vm11 = vcmp.lt.s32.totalorder %v1755_v2, 1 }
 0x181   : > { %v9095_v15 = vadd.s32 %v1698_v56, %v1694_v44  ;;  %v1773_v30 = vor.u32 %v1772_v22, %v1771_v54  ;;  %vm1777_vm12 = vcmp.lt.s32.totalorder %v1755_v2, 4  ;;  %v1849_v25 = vshrl.u32 %v1848_v42, 23 }
 0x182   : > { %v1413_v59 = vmul.f32 %v1412_v35, %v1410_v12  ;;  %v6852_v37 = vmin.u32 %v1602_v6, %v9069_v61  ;;  %v1758_v46 = vshrl.u32 %v12647_v55, %v1757_v19  ;;  %vm1776_vm13 = vcmp.lt.s32.totalorder %v1755_v2, 3 }
 0x183   : > { %v1505_v48 = vsub.s32 32, %v9093_v20  ;;  %vm1775_vm14 = vcmp.lt.s32.totalorder %v1755_v2, 2  ;;  %v1782_v62 = vsel %vm1774_vm11, %v1761_v4, %v1764_v0  ;;  %v1790_v26 = vshll.u32 %v1750_v16, 8 }
 0x184   : > { %v1509_v29 = vsub.s32 4294967266, %v9093_v20  ;;  %v1779_v11 = vsel %vm1777_vm12, %v1767_v23, 2102212464  ;;  %v1783_v31 = vsel %vm1777_vm12, %v1770_v18, 920167782  ;;  %v1786_v24 = vsel %vm1774_vm11, %v1764_v0, %v1767_v23 }
 0x185   : > { %v1700_v12 = vadd.s32 536870912, %v9095_v15  ;;  %v1784_v35 = vsel %vm1776_vm13, %v1767_v23, %v1783_v31  ;;  %v1787_v19 = vsel %vm1777_vm12, %v1773_v30, 1326507024  ;;  %v6863_v21 = vadd.s32 4294967169, %v1849_v25 }
 0x186   : > { %v1604_v45 = vclz %v6852_v37  ;;  %v1778_v50 = vsel %vm1774_vm11, %v1758_v46, %v1761_v4  ;;  %v1785_v16 = vsel %vm1775_vm14, %v1782_v62, %v1784_v35  ;;  %v1788_v39 = vsel %vm1776_vm13, %v1770_v18, %v1787_v19  ;;  %v12703_v18 = vld [vmem:[#allocation19_spill] sm:$0xff] }
 0x187   : > { %v1780_v44 = vsel %vm1776_vm13, %v1764_v0, %v1779_v11  ;;  %v1789_v36 = vsel %vm1775_vm14, %v1786_v24, %v1788_v39  ;;  %v9113_v42 = vmul.u32.u64.low %v1790_v26, %v1785_v16  ;;  %v9114_v6 = vmul.u32.u64.high %v1790_v26, %v1785_v16, %v9113_v42  ;;  %v12712_v16 = vld [vmem:[#allocation43_spill] sm:$0xff] }
 0x188   : > { %v1414_v56 = vxor.u32 2147483648, %v1413_v59  ;;  %v9117_v23 = vmul.u32.u64.low %v1790_v26, %v1789_v36  ;;  %v9118_v54 = vmul.u32.u64.high %v1790_v26, %v1789_v36, %v9117_v23  ;;  %v1855_v22 = vadd.s32 1, %v6863_v21 }
 0x189   : > { %v9121_v37 = vmul.f32 0.7, %v8988_v63  ;;  %v9124_v46 = vmul.f32 0.7, %v9019_v32  ;;  %vm1332_vm15 = vcmp.lt.s32.totalorder %v12703_v18, 0  ;;  %v9127_v4 = vshrl.u32 %v1700_v12, 30 }
 0x18a   : > { %v12704_v0 = vand.u32 2147483648, %v8390_v43  ;;  %v6853_v25 = vadd.s32 4294967294, %v1604_v45  ;;  %v1781_v62 = vsel %vm1775_vm14, %v1778_v50, %v1780_v44  ;;  %vm1856_vm0 = vcmp.gt.s32.totalorder %v1855_v22, 0  ;;  %v12709_v45 = vld [vmem:[#allocation16_spill] sm:$0xff] }
 0x18b   : > { %12701 = vst [vmem:[#allocation55_spill] sm:$0xff] %v9121_v37  ;;  %12702 = vst [vmem:[#allocation56_spill] sm:$0xff] %v9124_v46  ;;  %v12705_v63 = vand.u32 2147483647, %v12703_v18  ;;  %v1510_v32 = vadd.s32 127, %v1509_v29  ;;  %v1800_v31 = vadd.s32 1, %v9114_v6  ;;  %v1415_v12 = vsel %vm1332_vm15, %v1414_v56, %v1413_v59 }
 0x18c   : > { %v1281_v30 = vsel %vm1279_vm10, %v12704_v0, %v9059_v17  ;;  %v1857_v24 = vsel %vm1856_vm0, %v1855_v22, 0  ;;  %v1506_v43 = vshll.u32 %v8941_v1, %v9093_v20  ;;  %v1507_v17 = vshrl.u32 %v1489_v13, %v1505_v48  ;;  %v12711_v13 = vld [vmem:[#allocation17_spill] sm:$0xff] }
 0x18d   : > { %vm9137_vm1 = vcmp.le.f32.partialorder %v12705_v63, 0.7853982  ;;  %v12301_v2 = vand.u32 2147483647, %v12700_v38  ;;  %v1702_v35 = vshll.u32 %v9127_v4, 30  ;;  %v1797_v19 = vmul.u32 %v1790_v26, %v1781_v62 }
 0x18e   : > { %vm1799_vm2 = vc.u32 %v9118_v54, %v9113_v42  ;;  %v1859_v21 = vand.u32 31, %v1857_v24  ;;  %v9151_v29 = vmul.f32 0.7, %v9038_v47  ;;  %v9154_v50 = vmul.f32 6.2831855, %v12709_v45 }
 0x18f   : > { %vm6854_vm3 = vcmp.lt.s32.totalorder %v6853_v25, 0  ;;  %v1801_v59 = vsel %vm1799_vm2, %v1800_v31, %v9114_v6  ;;  %v9157_v1 = vmul.f32 0.7, %v1281_v30  ;;  %v9160_v20 = vmul.f32 6.2831855, %v12711_v13 }
 0x190   : > { %12708 = vst [vmem:[#allocation57_spill] sm:$0xff] %v9151_v29  ;;  %v1511_v48 = vshll.u32 %v1510_v32, 23  ;;  %v1860_v26 = vsub.s32 32, %v1859_v21  ;;  %v1418_v47 = vsel %vm9137_vm1, %v12703_v18, %v1415_v12  ;;  %v1508_v44 = vor.u32 %v1507_v17, %v1506_v43 }
 0x191   : > { %12710 = vst [vmem:[#allocation16_spill] sm:$0xff] %v9157_v1  ;;  %v1592_v36 = vadd.s32 %v8798_v49, %v8794_v58  ;;  %v1607_v56 = vsel %vm6854_vm3, 0, %v6853_v25  ;;  %v9169_v6 = vsub.s32 %v9095_v15, %v1702_v35  ;;  %v1802_v23 = vadd.s32 %v1801_v59, %v1797_v19 }
 0x192   : > { %v1852_v22 = vand.u32 8388607, %v12301_v2  ;;  %v1862_v0 = vshll.u32 %v12647_v55, %v1859_v21  ;;  %v1863_v30 = vshrl.u32 %v12649_v14, %v1860_v26  ;;  %v1865_v62 = vshll.u32 %v12649_v14, %v1859_v21 }
 0x193   : > { %v1866_v63 = vshrl.u32 %v12650_v9, %v1860_v26  ;;  %v1512_v32 = vor.u32 4788187, %v1511_v48  ;;  %v9177_v31 = vshrl.u32 %v1857_v24, 5  ;;  %v1871_v58 = vshll.u32 %v12660_v41, %v1859_v21 }
 0x194   : > { %v1872_v49 = vshrl.u32 %v12679_v53, %v1860_v26  ;;  %v1612_v15 = vsub.s32 4294967266, %v1607_v56  ;;  %v1868_v25 = vshll.u32 %v12650_v9, %v1859_v21  ;;  %v1869_v12 = vshrl.u32 %v12660_v41, %v1860_v26 }
 0x195   : > { %v1874_v43 = vshll.u32 %v12679_v53, %v1859_v21  ;;  %v1515_v17 = vcvt.s32.f32 %v1508_v44  ;;  %v1705_v35 = vsub.s32 0, %v9169_v6  ;;  %v1803_v19 = vadd.s32 536870912, %v1802_v23 }
 0x196   : > { %v1875_v45 = vshrl.u32 %v12680_v28, %v1860_v26  ;;  %v1853_v59 = vor.u32 8388608, %v1852_v22  ;;  %v1864_v24 = vor.u32 %v1863_v30, %v1862_v0  ;;  %v1867_v13 = vor.u32 %v1866_v63, %v1865_v62 }
 0x197   : > { %v1873_v48 = vor.u32 %v1872_v49, %v1871_v58  ;;  %v1513_v2 = vand.u32 2147483647, %v1512_v32  ;;  %v1608_v39 = vsub.s32 32, %v1607_v56  ;;  %vm1877_vm4 = vcmp.lt.s32.totalorder %v9177_v31, 1 }
 0x198   : > { %vm1880_vm5 = vcmp.lt.s32.totalorder %v9177_v31, 4  ;;  %v1519_v1 = vsub.s32 4, %v8876_v52  ;;  %v1613_v29 = vadd.s32 127, %v1612_v15  ;;  %v1870_v21 = vor.u32 %v1869_v12, %v1868_v25 }
 0x199   : > { %v1876_v44 = vor.u32 %v1875_v45, %v1874_v43  ;;  %7308 = vcosq.f32 %v1418_v47  ;;  %v6856_v46 = vmin.u32 %v1705_v35, %v9169_v6  ;;  %v9190_v37 = vshrl.u32 %v1803_v19, 30  ;;  %v12713_v35 = vld [vmem:[#allocation25_spill] sm:$0xff]  ;;  %v12714_v45 = vld [vmem:[#allocation18_spill] sm:$0xff] }
 0x19a   : > { %vm1879_vm6 = vcmp.lt.s32.totalorder %v9177_v31, 3  ;;  %vm1878_vm7 = vcmp.lt.s32.totalorder %v9177_v31, 2  ;;  %v1885_v22 = vsel %vm1877_vm4, %v1864_v24, %v1867_v13  ;;  %v1886_v0 = vsel %vm1880_vm5, %v1873_v48, 920167782 }
 0x19b   : > { %v9198_v30 = vshll.u32 %v1853_v59, 8  ;;  %7310 = vsinq.f32 %v1418_v47  ;;  %v1516_v62 = vmul.f32 %v1515_v17, %v1513_v2  ;;  %v1609_v63 = vshll.u32 %v9069_v61, %v1607_v56 }
 0x19c   : > { %v1610_v32 = vshrl.u32 %v1592_v36, %v1608_v39  ;;  %v1614_v58 = vshll.u32 %v1613_v29, 23  ;;  %v1887_v49 = vsel %vm1879_vm6, %v1870_v21, %v1886_v0  ;;  %v1889_v15 = vsel %vm1877_vm4, %v1867_v13, %v1870_v21 }
 0x19d   : > { %v1890_v25 = vsel %vm1880_vm5, %v1876_v44, 1326507024  ;;  %v1707_v12 = vclz %v6856_v46  ;;  %v1805_v43 = vshll.u32 %v9190_v37, 30  ;;  %v1888_v47 = vsel %vm1878_vm7, %v1885_v22, %v1887_v49 }
 0x19e   : > { %v1891_v61 = vsel %vm1879_vm6, %v1873_v48, %v1890_v25  ;;  %v1861_v2 = vshrl.u32 %v12647_v55, %v1860_v26  ;;  %v9216_v39 = vmul.u32.u64.low %v9198_v30, %v1888_v47  ;;  %v9217_v36 = vmul.u32.u64.high %v9198_v30, %v1888_v47, %v9216_v39  ;;  %v12716_v26 = vld [vmem:[#allocation20_spill] sm:$0xff] }
 0x19f   : > { %v1892_v29 = vsel %vm1878_vm7, %v1889_v15, %v1891_v61  ;;  %v1882_v46 = vsel %vm1880_vm5, %v1870_v21, 2102212464  ;;  %v1951_v19 = vand.u32 2139095040, %v12713_v35  ;;  %v9228_v59 = vmul.f32 6.2831855, %v12714_v45 }
 0x1a0   : > { %v9223_v56 = vmul.u32.u64.low %v9198_v30, %v1892_v29  ;;  %v9224_v17 = vmul.u32.u64.high %v9198_v30, %v1892_v29, %v9223_v56  ;;  %vm1435_vm8 = vcmp.lt.s32.totalorder %v12716_v26, 0  ;;  %v1517_v48 = vxor.u32 2147483648, %v1516_v62 }
 0x1a1   : > { %12715 = vst [vmem:[#allocation17_spill] sm:$0xff] %v9228_v59  ;;  %v1611_v44 = vor.u32 %v1610_v32, %v1609_v63  ;;  %v12717_v22 = vsub.s32 4, %v12712_v16  ;;  %v1615_v21 = vor.u32 4788187, %v1614_v58  ;;  %v9236_v49 = vsub.s32 %v1802_v23, %v1805_v43 }
 0x1a2   : > { %v1952_v15 = vshrl.u32 %v1951_v19, 23  ;;  %v12718_v25 = vand.u32 2147483647, %v12716_v26  ;;  %vm1538_vm10 = vcmp.lt.s32.totalorder %v8248_v40, 0  ;;  %v1881_v63 = vsel %vm1877_vm4, %v1861_v2, %v1864_v24 }
 0x1a3   : > { %v1417_v0 = vsel %vm1332_vm15, %v12717_v22, %v12712_v16  ;;  %v1883_v32 = vsel %vm1879_vm6, %v1867_v13, %v1882_v46  ;;  %v9249_v61 = vpop.eup %7308  ;;  %v1520_v16 = vsel %vm1435_vm8, %v1519_v1, %v8876_v52  ;;  %v12722_v23 = vand.u32 2147483647, %v8248_v40 }
 0x1a4   : > { %vm9240_vm9 = vcmp.le.f32.partialorder %v12718_v25, 0.7853982  ;;  %12721 = vst [vmem:[#allocation43_spill] sm:$0xff] %v9249_v61  ;;  %v1622_v43 = vsub.s32 4, %v9009_v51  ;;  %v6857_v29 = vadd.s32 4294967294, %v1707_v12  ;;  %v9263_v24 = vsel %vm9137_vm1, 0, %v1417_v0 }
 0x1a5   : > { %vm9256_vm11 = vcmp.le.f32.partialorder %v12722_v23, 0.7853982  ;;  %12725 = vst [vmem:[#allocation18_spill] sm:$0xff] %v9263_v24  ;;  %v1518_v13 = vsel %vm1435_vm8, %v1517_v48, %v1516_v62  ;;  %v1618_v2 = vcvt.s32.f32 %v1611_v44  ;;  %v6867_v46 = vadd.s32 4294967169, %v1952_v15  ;;  %v9267_v56 = vpop.eup %7310 }
 0x1a6   : > { %12726 = vst [vmem:[#allocation58_spill] sm:$0xff] %v9267_v56  ;;  %v1616_v52 = vand.u32 2147483647, %v1615_v21  ;;  %v1808_v1 = vsub.s32 0, %v9236_v49  ;;  %v1884_v19 = vsel %vm1878_vm7, %v1881_v63, %v1883_v32  ;;  %v1903_v45 = vadd.s32 1, %v9217_v36  ;;  %v12728_v21 = vld [vmem:[#allocation26_spill] sm:$0xff] }
 0x1a7   : > { %v9275_v11 = vsel %vm9240_vm9, 0, %v1520_v16  ;;  %vm1902_vm12 = vc.u32 %v9224_v17, %v9216_v39  ;;  %v12306_v62 = vand.u32 2147483647, %v12713_v35  ;;  %v1958_v12 = vadd.s32 1, %v6867_v46 }
 0x1a8   : > { %12727 = vst [vmem:[#allocation59_spill] sm:$0xff] %v9275_v11  ;;  %v9281_v48 = vand.u32 3, %v9263_v24  ;;  %v9284_v44 = vand.u32 3, %v9275_v11  ;;  %v1623_v31 = vsel %vm1538_vm10, %v1622_v43, %v9009_v51  ;;  %vm6858_vm13 = vcmp.lt.s32.totalorder %v6857_v29, 0 }
 0x1a9   : > { %v1521_v22 = vsel %vm9240_vm9, %v12716_v26, %v1518_v13  ;;  %v1900_v0 = vmul.u32 %v9198_v30, %v1884_v19  ;;  %vm1959_vm14 = vcmp.gt.s32.totalorder %v1958_v12, 0  ;;  %v2054_v15 = vand.u32 2139095040, %v12728_v21 }
 0x1aa   : > { %v1619_v25 = vmul.f32 %v1618_v2, %v1616_v52  ;;  %v6860_v63 = vmin.u32 %v1808_v1, %v9236_v49  ;;  %v1904_v32 = vsel %vm1902_vm12, %v1903_v45, %v9217_v36  ;;  %v1960_v16 = vsel %vm1959_vm14, %v1958_v12, 0 }
 0x1ab   : > { %v9298_v23 = vsel %vm9256_vm11, 0, %v1623_v31  ;;  %v9300_v51 = vsel %vm6858_vm13, 0, %v6857_v29  ;;  %v1955_v47 = vand.u32 8388607, %v12306_v62  ;;  %v1962_v43 = vand.u32 31, %v1960_v16 }
 0x1ac   : > { %12729 = vst [vmem:[#allocation60_spill] sm:$0xff] %v9298_v23  ;;  %7312 = vcosq.f32 %v1521_v22  ;;  %v9307_v2 = vand.u32 3, %v9298_v23  ;;  %v9309_v36 = vadd.s32 %v1904_v32, %v1900_v0  ;;  %v2055_v52 = vshrl.u32 %v2054_v15, 23 }
 0x1ad   : > { %7314 = vsinq.f32 %v1521_v22  ;;  %v1963_v46 = vsub.s32 32, %v1962_v43  ;;  %v1620_v1 = vxor.u32 2147483648, %v1619_v25  ;;  %v1695_v29 = vadd.s32 %v9005_v7, %v9013_v5 }
 0x1ae   : > { %v1715_v19 = vsub.s32 4294967266, %v9300_v51  ;;  %v1810_v45 = vclz %v6860_v63  ;;  %v1956_v12 = vor.u32 8388608, %v1955_v47  ;;  %v1965_v31 = vshll.u32 %v12647_v55, %v1962_v43 }
 0x1af   : > { %v1966_v62 = vshrl.u32 %v12649_v14, %v1963_v46  ;;  %v1968_v30 = vshll.u32 %v12649_v14, %v1962_v43  ;;  %vm1428_vm15 = vcmp.eq.s32.totalorder %v9281_v48, 2  ;;  %v1969_v22 = vshrl.u32 %v12650_v9, %v1963_v46 }
 0x1b0   : > { %v1971_v0 = vshll.u32 %v12650_v9, %v1962_v43  ;;  %v1972_v15 = vshrl.u32 %v12660_v41, %v1963_v46  ;;  %v1974_v7 = vshll.u32 %v12660_v41, %v1962_v43  ;;  %v1906_v5 = vadd.s32 536870912, %v9309_v36 }
 0x1b1   : > { %v1961_v63 = vshrl.u32 %v1960_v16, 5  ;;  %v1975_v32 = vshrl.u32 %v12679_v53, %v1963_v46  ;;  %v6871_v47 = vadd.s32 4294967169, %v2055_v52  ;;  %v1621_v13 = vsel %vm1538_vm10, %v1620_v1, %v1619_v25 }
 0x1b2   : > { %v1711_v23 = vsub.s32 32, %v9300_v51  ;;  %v1712_v11 = vshll.u32 %v9169_v6, %v9300_v51  ;;  %v1977_v24 = vshll.u32 %v12679_v53, %v1962_v43  ;;  %v1716_v8 = vadd.s32 127, %v1715_v19 }
 0x1b3   : > { %v1964_v60 = vshrl.u32 %v12647_v55, %v1963_v46  ;;  %v1967_v34 = vor.u32 %v1966_v62, %v1965_v31  ;;  %v1970_v27 = vor.u32 %v1969_v22, %v1968_v30  ;;  %vm1425_vm0 = vcmp.eq.s32.totalorder %v9281_v48, 0 }
 0x1b4   : > { %v6861_v16 = vadd.s32 4294967294, %v1810_v45  ;;  %v1973_v3 = vor.u32 %v1972_v15, %v1971_v0  ;;  %v1976_v52 = vor.u32 %v1975_v32, %v1974_v7  ;;  %v1978_v57 = vshrl.u32 %v12680_v28, %v1963_v46 }
 0x1b5   : > { %v9333_v25 = vshrl.u32 %v1906_v5, 30  ;;  %vm1980_vm1 = vcmp.lt.s32.totalorder %v1961_v63, 1  ;;  %v1996_v1 = vshll.u32 %v1956_v12, 8  ;;  %v2061_v59 = vadd.s32 1, %v6871_v47 }
 0x1b6   : > { %v9335_v6 = vpop.eup %7312  ;;  %vm1531_vm2 = vcmp.eq.s32.totalorder %v9284_v44, 2  ;;  %v1979_v51 = vor.u32 %v1978_v57, %v1977_v24  ;;  %vm1981_vm3 = vcmp.lt.s32.totalorder %v1961_v63, 2  ;;  %vm1982_vm4 = vcmp.lt.s32.totalorder %v1961_v63, 3 }
 0x1b7   : > { %12730 = vst [vmem:[#allocation61_spill] sm:$0xff] %v9335_v6  ;;  %vm1983_vm5 = vcmp.lt.s32.totalorder %v1961_v63, 4  ;;  %v9338_v62 = vpop.eup %7314  ;;  %v1984_v43 = vsel %vm1980_vm1, %v1964_v60, %v1967_v34  ;;  %v1988_v46 = vsel %vm1980_vm1, %v1967_v34, %v1970_v27  ;;  %v1992_v12 = vsel %vm1980_vm1, %v1970_v27, %v1973_v3 }
 0x1b8   : > { %12731 = vst [vmem:[#allocation62_spill] sm:$0xff] %v9338_v62  ;;  %v1985_v30 = vsel %vm1983_vm5, %v1973_v3, 2102212464  ;;  %v1989_v19 = vsel %vm1983_vm5, %v1976_v52, 920167782  ;;  %vm6862_vm6 = vcmp.lt.s32.totalorder %v6861_v16, 0  ;;  %v1713_v24 = vshrl.u32 %v1695_v29, %v1711_v23 }
 0x1b9   : > { %v1986_v45 = vsel %vm1982_vm4, %v1970_v27, %v1985_v30  ;;  %v1990_v31 = vsel %vm1982_vm4, %v1973_v3, %v1989_v19  ;;  %v1993_v22 = vsel %vm1983_vm5, %v1979_v51, 1326507024  ;;  %vm2062_vm7 = vcmp.gt.s32.totalorder %v2061_v59, 0 }
 0x1ba   : > { %v1991_v0 = vsel %vm1981_vm3, %v1988_v46, %v1990_v31  ;;  %v1994_v57 = vsel %vm1982_vm4, %v1976_v52, %v1993_v22  ;;  %v12732_v34 = vxor.u32 2147483648, %v9249_v61  ;;  %v12317_v3 = vxor.u32 2147483648, %v9335_v6 }
 0x1bb   : > { %v1995_v15 = vsel %vm1981_vm3, %v1992_v12, %v1994_v57  ;;  %v9345_v7 = vmul.u32.u64.low %v1996_v1, %v1991_v0  ;;  %v9346_v5 = vmul.u32.u64.high %v1996_v1, %v1991_v0, %v9345_v7  ;;  %v1908_v27 = vshll.u32 %v9333_v25, 30 }
 0x1bc   : > { %v9354_v60 = vsel %vm1428_vm15, %v12732_v34, %v9267_v56  ;;  %v1987_v32 = vsel %vm1981_vm3, %v1984_v43, %v1986_v45  ;;  %v1813_v23 = vsel %vm6862_vm6, 0, %v6861_v16  ;;  %v2063_v52 = vsel %vm2062_vm7, %v2061_v59, 0 }
 0x1bd   : > { %v9359_v29 = vmul.u32.u64.low %v1996_v1, %v1995_v15  ;;  %v9360_v47 = vmul.u32.u64.high %v1996_v1, %v1995_v15, %v9359_v29  ;;  %v1624_v51 = vsel %vm9256_vm11, %v8248_v40, %v1621_v13  ;;  %v1717_v30 = vshll.u32 %v1716_v8, 23 }
 0x1be   : > { %v1798_v46 = vadd.s32 %v9113_v42, %v9118_v54  ;;  %v2065_v19 = vand.u32 31, %v2063_v52  ;;  %v9367_v31 = vor.u32 %v1713_v24, %v1712_v11  ;;  %v1814_v12 = vsub.s32 32, %v1813_v23 }
 0x1bf   : > { %v2003_v22 = vmul.u32 %v1996_v1, %v1987_v32  ;;  %v2006_v63 = vadd.s32 1, %v9346_v5  ;;  %v12733_v16 = vxor.u32 2147483648, %v9267_v56  ;;  %v1818_v58 = vsub.s32 4294967266, %v1813_v23 }
 0x1c0   : > { %v9378_v8 = vsub.s32 %v9309_v36, %v1908_v27  ;;  %v12318_v42 = vand.u32 2147483647, %v12728_v21  ;;  %7316 = vcosq.f32 %v1624_v51  ;;  %vm2005_vm8 = vc.u32 %v9360_v47, %v9345_v7 }
 0x1c1   : > { %v9375_v59 = vsel %vm1425_vm0, %v9249_v61, %v12733_v16  ;;  %v2066_v11 = vsub.s32 32, %v2065_v19  ;;  %v9389_v13 = vsel %vm1531_vm2, %v12317_v3, %v9338_v62  ;;  %7318 = vsinq.f32 %v1624_v51 }
 0x1c2   : > { %v1718_v1 = vor.u32 4788187, %v1717_v30  ;;  %v2007_v36 = vsel %vm2005_vm8, %v2006_v63, %v9346_v5  ;;  %v1721_v43 = vcvt.s32.f32 %v9367_v31  ;;  %v1815_v45 = vshll.u32 %v9236_v49, %v1813_v23 }
 0x1c3   : > { %v1816_v0 = vshrl.u32 %v1798_v46, %v1814_v12  ;;  %v2008_v57 = vadd.s32 %v2007_v36, %v2003_v22  ;;  %vm1528_vm9 = vcmp.eq.s32.totalorder %v9284_v44, 0  ;;  %v1819_v24 = vadd.s32 127, %v1818_v58 }
 0x1c4   : > { %v1911_v15 = vsub.s32 0, %v9378_v8  ;;  %v2058_v34 = vand.u32 8388607, %v12318_v42  ;;  %v9398_v27 = vshrl.u32 %v2063_v52, 5  ;;  %v2068_v29 = vshll.u32 %v12647_v55, %v2065_v19 }
 0x1c5   : > { %v2009_v32 = vadd.s32 536870912, %v2008_v57  ;;  %v2069_v5 = vshrl.u32 %v12649_v14, %v2066_v11  ;;  %v2074_v51 = vshll.u32 %v12650_v9, %v2065_v19  ;;  %v2071_v49 = vshll.u32 %v12649_v14, %v2065_v19 }
 0x1c6   : > { %v2072_v23 = vshrl.u32 %v12650_v9, %v2066_v11  ;;  %v2075_v30 = vshrl.u32 %v12660_v41, %v2066_v11  ;;  %v2077_v46 = vshll.u32 %v12660_v41, %v2065_v19  ;;  %v2078_v52 = vshrl.u32 %v12679_v53, %v2066_v11 }
 0x1c7   : > { %v9407_v31 = vshrl.u32 %v2009_v32, 30  ;;  %v2080_v12 = vshll.u32 %v12679_v53, %v2065_v19  ;;  %v2081_v22 = vshrl.u32 %v12680_v28, %v2066_v11  ;;  %v1719_v63 = vand.u32 2147483647, %v1718_v1 }
 0x1c8   : > { %v9412_v16 = vor.u32 %v1816_v0, %v1815_v45  ;;  %v1820_v58 = vshll.u32 %v1819_v24, 23  ;;  %v2059_v36 = vor.u32 8388608, %v2058_v34  ;;  %vm1424_vm10 = vcmp.lt.s32.totalorder %v9281_v48, 2 }
 0x1c9   : > { %vm1527_vm11 = vcmp.lt.s32.totalorder %v9284_v44, 2  ;;  %v2011_v3 = vshll.u32 %v9407_v31, 30  ;;  %v2067_v32 = vshrl.u32 %v12647_v55, %v2066_v11  ;;  %v2070_v42 = vor.u32 %v2069_v5, %v2068_v29 }
 0x1ca   : > { %v2076_v54 = vor.u32 %v2075_v30, %v2074_v51  ;;  %v2073_v61 = vor.u32 %v2072_v23, %v2071_v49  ;;  %v2079_v56 = vor.u32 %v2078_v52, %v2077_v46  ;;  %v2082_v19 = vor.u32 %v2081_v22, %v2080_v12  ;;  %v9419_v1 = vpop.eup %7316 }
 0x1cb   : > { %vm2086_vm12 = vcmp.lt.s32.totalorder %v9398_v27, 4  ;;  %12734 = vst [vmem:[#allocation63_spill] sm:$0xff] %v9419_v1  ;;  %v6864_v45 = vmin.u32 %v1911_v15, %v9378_v8  ;;  %v9422_v0 = vsub.s32 %v2008_v57, %v2011_v3  ;;  %vm2083_vm13 = vcmp.lt.s32.totalorder %v9398_v27, 1  ;;  %v9427_v34 = vpop.eup %7318  ;;  %v12736_v15 = vld [vmem:[#allocation27_spill] sm:$0xff] }
 0x1cc   : > { %v2088_v24 = vsel %vm2086_vm12, %v2076_v54, 2102212464  ;;  %12735 = vst [vmem:[#allocation64_spill] sm:$0xff] %v9427_v34  ;;  %vm1422_vm14 = vweird.f32 %v12703_v18  ;;  %vm1525_vm15 = vweird.f32 %v12716_v26  ;;  %vm1641_vm0 = vcmp.lt.s32.totalorder %v8250_v33, 0 }
 0x1cd   : > { %v1821_v11 = vor.u32 4788187, %v1820_v58  ;;  %vm2085_vm1 = vcmp.lt.s32.totalorder %v9398_v27, 3  ;;  %v2099_v29 = vshll.u32 %v2059_v36, 8  ;;  %v2157_v3 = vand.u32 2139095040, %v12736_v15 }
 0x1ce   : > { %v2014_v57 = vsub.s32 0, %v9422_v0  ;;  %vm2084_vm2 = vcmp.lt.s32.totalorder %v9398_v27, 2  ;;  %v2087_v5 = vsel %vm2083_vm13, %v2067_v32, %v2070_v42  ;;  %v2089_v51 = vsel %vm2085_vm1, %v2073_v61, %v2088_v24 }
 0x1cf   : > { %v2091_v49 = vsel %vm2083_vm13, %v2070_v42, %v2073_v61  ;;  %v2092_v23 = vsel %vm2086_vm12, %v2079_v56, 920167782  ;;  %v2095_v30 = vsel %vm2083_vm13, %v2073_v61, %v2076_v54  ;;  %v2096_v46 = vsel %vm2086_vm12, %v2082_v19, 1326507024 }
 0x1d0   : > { %v12737_v52 = vxor.u32 2147483648, %v9338_v62  ;;  %v12738_v22 = vand.u32 2147483647, %v8250_v33  ;;  %v1722_v42 = vmul.f32 %v1721_v43, %v1719_v63  ;;  %v1824_v36 = vcvt.s32.f32 %v9412_v16 }
 0x1d1   : > { %v1913_v32 = vclz %v6864_v45  ;;  %v6868_v61 = vmin.u32 %v2014_v57, %v9422_v0  ;;  %v2093_v19 = vsel %vm2085_vm1, %v2076_v54, %v2092_v23  ;;  %v2097_v24 = vsel %vm2085_vm1, %v2079_v56, %v2096_v46 }
 0x1d2   : > { %v1530_v12 = vsel %vm1528_vm9, %v9335_v6, %v12737_v52  ;;  %vm9455_vm3 = vcmp.le.f32.partialorder %v12738_v22, 0.7853982  ;;  %v2158_v62 = vshrl.u32 %v2157_v3, 23  ;;  %vm1630_vm4 = vcmp.lt.s32.totalorder %v9307_v2, 2 }
 0x1d3   : > { %v1822_v52 = vand.u32 2147483647, %v1821_v11  ;;  %v2090_v22 = vsel %vm2084_vm2, %v2087_v5, %v2089_v51  ;;  %v2094_v43 = vsel %vm2084_vm2, %v2091_v49, %v2093_v19  ;;  %v2098_v63 = vsel %vm2084_vm2, %v2095_v30, %v2097_v24 }
 0x1d4   : > { %v9472_v16 = vmul.u32.u64.low %v2099_v29, %v2098_v63  ;;  %v9473_v45 = vmul.u32.u64.high %v2099_v29, %v2098_v63, %v9472_v16  ;;  %v9475_v54 = vmul.u32.u64.low %v2099_v29, %v2094_v43  ;;  %v9476_v57 = vmul.u32.u64.high %v2099_v29, %v2094_v43, %v9475_v54  ;;  %v12746_v63 = vld [vmem:[#allocation28_spill] sm:$0xff] }
 0x1d5   : > { %vm1631_vm5 = vcmp.eq.s32.totalorder %v9307_v2, 0  ;;  %v1723_v56 = vxor.u32 2147483648, %v1722_v42  ;;  %v1725_v11 = vsub.s32 4, %v9127_v4  ;;  %vm1744_vm6 = vcmp.lt.s32.totalorder %v12681_v10, 0 }
 0x1d6   : > { %v6875_v3 = vadd.s32 4294967169, %v2158_v62  ;;  %v1431_v27 = vsel %vm1424_vm10, %v9375_v59, %v9354_v60  ;;  %v1534_v5 = vsel %vm1527_vm11, %v1530_v12, %v9389_v13  ;;  %v6865_v51 = vadd.s32 4294967294, %v1913_v32 }
 0x1d7   : > { %v2016_v49 = vclz %v6868_v61  ;;  %v12326_v23 = vxor.u32 2147483648, %v9427_v34  ;;  %v12325_v30 = vxor.u32 2147483648, %v9419_v1  ;;  %v2106_v46 = vmul.u32 %v2099_v29, %v2090_v22 }
 0x1d8   : > { %v2164_v19 = vadd.s32 1, %v6875_v3  ;;  %vm1634_vm7 = vcmp.eq.s32.totalorder %v9307_v2, 2  ;;  %v1825_v62 = vmul.f32 %v1824_v36, %v1822_v52  ;;  %vm2108_vm8 = vc.u32 %v9473_v45, %v9475_v54 }
 0x1d9   : > { %v2109_v48 = vadd.s32 1, %v9476_v57  ;;  %v9497_v44 = vsel %vm1422_vm14, nan, %v1431_v27  ;;  %v9501_v60 = vsel %vm1525_vm15, nan, %v1534_v5  ;;  %v1724_v59 = vsel %vm1641_vm0, %v1723_v56, %v1722_v42 }
 0x1da   : > { %12741 = vst [vmem:[#allocation65_spill] sm:$0xff] %v9497_v44  ;;  %12742 = vst [vmem:[#allocation66_spill] sm:$0xff] %v9501_v60  ;;  %v1726_v13 = vsel %vm1641_vm0, %v1725_v11, %v9127_v4  ;;  %v12743_v29 = vand.u32 2147483647, %v12681_v10  ;;  %vm6866_vm10 = vcmp.lt.s32.totalorder %v6865_v51, 0  ;;  %v6869_v36 = vadd.s32 4294967294, %v2016_v49 }
 0x1db   : > { %v2110_v32 = vsel %vm2108_vm8, %v2109_v48, %v9476_v57  ;;  %vm2165_vm11 = vcmp.gt.s32.totalorder %v2164_v19, 0  ;;  %v1633_v42 = vsel %vm1631_vm5, %v9419_v1, %v12326_v23  ;;  %v1636_v4 = vsel %vm1634_vm7, %v12325_v30, %v9427_v34 }
 0x1dc   : > { %vm9510_vm9 = vcmp.le.f32.partialorder %v12743_v29, 0.7853982  ;;  %v1828_v61 = vsub.s32 4, %v9190_v37  ;;  %v2111_v24 = vadd.s32 %v2110_v32, %v2106_v46  ;;  %v9527_v52 = vsel %vm9455_vm3, %v8250_v33, %v1724_v59 }
 0x1dd   : > { %v1826_v22 = vxor.u32 2147483648, %v1825_v62  ;;  %v2166_v43 = vsel %vm2165_vm11, %v2164_v19, 0  ;;  %v2260_v16 = vand.u32 2139095040, %v12746_v63  ;;  %v9532_v57 = vsel %vm9455_vm3, 0, %v1726_v13 }
 0x1de   : > { %12747 = vst [vmem:[#allocation67_spill] sm:$0xff] %v9532_v57  ;;  %v9534_v56 = vsel %vm6866_vm10, 0, %v6865_v51  ;;  %v2112_v11 = vadd.s32 536870912, %v2111_v24  ;;  %v12327_v3 = vand.u32 2147483647, %v12736_v15  ;;  %v9539_v27 = vsel %vm1630_vm4, %v1633_v42, %v1636_v4 }
 0x1df   : > { %v9542_v5 = vand.u32 3, %v9532_v57  ;;  %vm6870_vm12 = vcmp.lt.s32.totalorder %v6869_v36, 0  ;;  %v2168_v49 = vand.u32 31, %v2166_v43  ;;  %7320 = vcosq.f32 %v9527_v52 }
 0x1e0   : > { %v9548_v58 = vsel %vm1744_vm6, %v1828_v61, %v9190_v37  ;;  %v1901_v51 = vadd.s32 %v9216_v39, %v9224_v17  ;;  %v9552_v46 = vshrl.u32 %v2112_v11, 30  ;;  %v1827_v2 = vsel %vm1744_vm6, %v1826_v22, %v1825_v62 }
 0x1e1   : > { %v1921_v19 = vsub.s32 4294967266, %v9534_v56  ;;  %v2169_v48 = vsub.s32 32, %v2168_v49  ;;  %v2261_v59 = vshrl.u32 %v2260_v16, 23  ;;  %v9557_v13 = vsel %vm6870_vm12, 0, %v6869_v36 }
 0x1e2   : > { %v2161_v29 = vand.u32 8388607, %v12327_v3  ;;  %v2167_v32 = vshrl.u32 %v2166_v43, 5  ;;  %v2171_v37 = vshll.u32 %v12647_v55, %v2168_v49  ;;  %v2174_v39 = vshll.u32 %v12649_v14, %v2168_v49 }
 0x1e3   : > { %v2172_v42 = vshrl.u32 %v12649_v14, %v2169_v48  ;;  %v2175_v17 = vshrl.u32 %v12650_v9, %v2169_v48  ;;  %v2180_v62 = vshll.u32 %v12660_v41, %v2168_v49  ;;  %v2114_v4 = vshll.u32 %v9552_v46, 30 }
 0x1e4   : > { %v2177_v61 = vshll.u32 %v12650_v9, %v2168_v49  ;;  %v2178_v36 = vshrl.u32 %v12660_v41, %v2169_v48  ;;  %v2181_v22 = vshrl.u32 %v12679_v53, %v2169_v48  ;;  %v1830_v43 = vsel %vm9510_vm9, %v12681_v10, %v1827_v2 }
 0x1e5   : > { %v1917_v16 = vsub.s32 32, %v9534_v56  ;;  %v1918_v11 = vshll.u32 %v9378_v8, %v9534_v56  ;;  %v6879_v30 = vadd.s32 4294967169, %v2261_v59  ;;  %v1922_v23 = vadd.s32 127, %v1921_v19 }
 0x1e6   : > { %v2024_v3 = vsub.s32 4294967266, %v9557_v13  ;;  %v2162_v1 = vor.u32 8388608, %v2161_v29  ;;  %v2173_v34 = vor.u32 %v2172_v42, %v2171_v37  ;;  %vm1628_vm13 = vweird.f32 %v8248_v40 }
 0x1e7   : > { %v2176_v26 = vor.u32 %v2175_v17, %v2174_v39  ;;  %v2182_v18 = vor.u32 %v2181_v22, %v2180_v62  ;;  %v2183_v57 = vshll.u32 %v12679_v53, %v2168_v49  ;;  %v2184_v6 = vshrl.u32 %v12680_v28, %v2169_v48 }
 0x1e8   : > { %v9580_v2 = vsub.s32 %v2111_v24, %v2114_v4  ;;  %v2170_v60 = vshrl.u32 %v12647_v55, %v2169_v48  ;;  %v2179_v44 = vor.u32 %v2178_v36, %v2177_v61  ;;  %vm2186_vm0 = vcmp.lt.s32.totalorder %v2167_v32, 1 }
 0x1e9   : > { %v2004_v8 = vadd.s32 %v9345_v7, %v9360_v47  ;;  %v2185_v56 = vor.u32 %v2184_v6, %v2183_v57  ;;  %vm2188_vm1 = vcmp.lt.s32.totalorder %v2167_v32, 3  ;;  %v2267_v19 = vadd.s32 1, %v6879_v30  ;;  %v9585_v59 = vpop.eup %7320 }
 0x1ea   : > { %12748 = vst [vmem:[#allocation68_spill] sm:$0xff] %v9585_v59  ;;  %v2020_v29 = vsub.s32 32, %v9557_v13  ;;  %vm2187_vm2 = vcmp.lt.s32.totalorder %v2167_v32, 2  ;;  %vm2189_vm3 = vcmp.lt.s32.totalorder %v2167_v32, 4  ;;  %v2202_v49 = vshll.u32 %v2162_v1, 8 }
 0x1eb   : > { %v2025_v37 = vadd.s32 127, %v2024_v3  ;;  %v2191_v24 = vsel %vm2189_vm3, %v2179_v44, 2102212464  ;;  %v2194_v42 = vsel %vm2186_vm0, %v2173_v34, %v2176_v26  ;;  %v2195_v48 = vsel %vm2189_vm3, %v2182_v18, 920167782 }
 0x1ec   : > { %v2117_v39 = vsub.s32 0, %v9580_v2  ;;  %v2190_v17 = vsel %vm2186_vm0, %v2170_v60, %v2173_v34  ;;  %v2196_v6 = vsel %vm2188_vm1, %v2179_v44, %v2195_v48  ;;  %v2198_v7 = vsel %vm2186_vm0, %v2176_v26, %v2179_v44 }
 0x1ed   : > { %v2192_v47 = vsel %vm2188_vm1, %v2176_v26, %v2191_v24  ;;  %v2197_v30 = vsel %vm2187_vm2, %v2194_v42, %v2196_v6  ;;  %v2199_v57 = vsel %vm2189_vm3, %v2185_v56, 1326507024  ;;  %vm2268_vm4 = vcmp.gt.s32.totalorder %v2267_v19, 0 }
 0x1ee   : > { %v1919_v1 = vshrl.u32 %v1901_v51, %v1917_v16  ;;  %v2200_v3 = vsel %vm2188_vm1, %v2182_v18, %v2199_v57  ;;  %v9596_v62 = vmul.u32.u64.low %v2202_v49, %v2197_v30  ;;  %v9597_v4 = vmul.u32.u64.high %v2202_v49, %v2197_v30, %v9596_v62 }
 0x1ef   : > { %v1923_v61 = vshll.u32 %v1922_v23, 23  ;;  %v2201_v34 = vsel %vm2187_vm2, %v2198_v7, %v2200_v3  ;;  %v12342_v60 = vand.u32 2147483647, %v12746_v63  ;;  %v2269_v36 = vsel %vm2268_vm4, %v2267_v19, 0 }
 0x1f0   : > { %v2021_v26 = vshll.u32 %v9422_v0, %v9557_v13  ;;  %v2022_v44 = vshrl.u32 %v2004_v8, %v2020_v29  ;;  %v6872_v22 = vmin.u32 %v2117_v39, %v9580_v2  ;;  %v2193_v51 = vsel %vm2187_vm2, %v2190_v17, %v2192_v47 }
 0x1f1   : > { %v2026_v16 = vshll.u32 %v2025_v37, 23  ;;  %v9606_v18 = vmul.u32.u64.low %v2202_v49, %v2201_v34  ;;  %v9607_v56 = vmul.u32.u64.high %v2202_v49, %v2201_v34, %v9606_v18  ;;  %v2271_v24 = vand.u32 31, %v2269_v36 }
 0x1f2   : > { %v9612_v23 = vsel %vm1628_vm13, nan, %v9539_v27  ;;  %7322 = vsinq.f32 %v9527_v52  ;;  %v9618_v0 = vsel %vm9510_vm9, 0, %v9548_v58  ;;  %v2212_v13 = vadd.s32 1, %v9597_v4 }
 0x1f3   : > { %12749 = vst [vmem:[#allocation69_spill] sm:$0xff] %v9618_v0  ;;  %v12337_v32 = vxor.u32 2147483648, %v9585_v59  ;;  %7324 = vcosq.f32 %v1830_v43  ;;  %v2209_v8 = vmul.u32 %v2202_v49, %v2193_v51  ;;  %v2272_v19 = vsub.s32 32, %v2271_v24 }
 0x1f4   : > { %7326 = vsinq.f32 %v1830_v43  ;;  %v1920_v29 = vor.u32 %v1919_v1, %v1918_v11  ;;  %v1924_v37 = vor.u32 4788187, %v1923_v61  ;;  %v2119_v42 = vclz %v6872_v22 }
 0x1f5   : > { %v2023_v27 = vor.u32 %v2022_v44, %v2021_v26  ;;  %v2027_v48 = vor.u32 4788187, %v2026_v16  ;;  %vm2211_vm5 = vc.u32 %v9607_v56, %v9596_v62  ;;  %v2264_v12 = vand.u32 8388607, %v12342_v60 }
 0x1f6   : > { %v2213_v52 = vsel %vm2211_vm5, %v2212_v13, %v9597_v4  ;;  %v2274_v58 = vshll.u32 %v12647_v55, %v2271_v24  ;;  %v2277_v39 = vshll.u32 %v12649_v14, %v2271_v24  ;;  %v2283_v49 = vshll.u32 %v12660_v41, %v2271_v24 }
 0x1f7   : > { %v2214_v43 = vadd.s32 %v2213_v52, %v2209_v8  ;;  %v9630_v11 = vshrl.u32 %v2269_v36, 5  ;;  %v2275_v17 = vshrl.u32 %v12649_v14, %v2272_v19  ;;  %v2278_v6 = vshrl.u32 %v12650_v9, %v2272_v19 }
 0x1f8   : > { %vm1734_vm6 = vcmp.eq.s32.totalorder %v9542_v5, 0  ;;  %vm1737_vm7 = vcmp.eq.s32.totalorder %v9542_v5, 2  ;;  %v6873_v7 = vadd.s32 4294967294, %v2119_v42  ;;  %v2280_v47 = vshll.u32 %v12650_v9, %v2271_v24 }
 0x1f9   : > { %v2281_v30 = vshrl.u32 %v12660_v41, %v2272_v19  ;;  %v2284_v57 = vshrl.u32 %v12679_v53, %v2272_v19  ;;  %v1925_v1 = vand.u32 2147483647, %v1924_v37  ;;  %v1927_v3 = vcvt.s32.f32 %v1920_v29 }
 0x1fa   : > { %v2215_v4 = vadd.s32 536870912, %v2214_v43  ;;  %v2286_v61 = vshll.u32 %v12679_v53, %v2271_v24  ;;  %v2265_v34 = vor.u32 8388608, %v2264_v12  ;;  %v2276_v36 = vor.u32 %v2275_v17, %v2274_v58 }
 0x1fb   : > { %v2279_v26 = vor.u32 %v2278_v6, %v2277_v39  ;;  %v2285_v44 = vor.u32 %v2284_v57, %v2283_v49  ;;  %v2030_v22 = vcvt.s32.f32 %v2023_v27  ;;  %v2287_v16 = vshrl.u32 %v12680_v28, %v2272_v19 }
 0x1fc   : > { %v9640_v51 = vshrl.u32 %v2215_v4, 30  ;;  %vm2289_vm8 = vcmp.lt.s32.totalorder %v9630_v11, 1  ;;  %v9644_v18 = vpop.eup %7322  ;;  %vm1733_vm9 = vcmp.lt.s32.totalorder %v9542_v5, 2  ;;  %v2028_v13 = vand.u32 2147483647, %v2027_v48 }
 0x1fd   : > { %12750 = vst [vmem:[#allocation70_spill] sm:$0xff] %v9644_v18  ;;  %vm6874_vm10 = vcmp.lt.s32.totalorder %v6873_v7, 0  ;;  %v2282_v8 = vor.u32 %v2281_v30, %v2280_v47  ;;  %vm2292_vm11 = vcmp.lt.s32.totalorder %v9630_v11, 4  ;;  %v9648_v24 = vpop.eup %7324  ;;  %vm1847_vm12 = vcmp.lt.s32.totalorder %v12700_v38, 0 }
 0x1fe   : > { %12751 = vst [vmem:[#allocation71_spill] sm:$0xff] %v9648_v24  ;;  %v2217_v29 = vshll.u32 %v9640_v51, 30  ;;  %v2273_v37 = vshrl.u32 %v12647_v55, %v2272_v19  ;;  %v2288_v42 = vor.u32 %v2287_v16, %v2286_v61  ;;  %vm2291_vm0 = vcmp.lt.s32.totalorder %v9630_v11, 3  ;;  %v9654_v27 = vpop.eup %7326 }
 0x1ff   : > { %12752 = vst [vmem:[#allocation72_spill] sm:$0xff] %v9654_v27  ;;  %vm2290_vm1 = vcmp.lt.s32.totalorder %v9630_v11, 2  ;;  %v2297_v48 = vsel %vm2289_vm8, %v2276_v36, %v2279_v26  ;;  %v2298_v12 = vsel %vm2292_vm11, %v2285_v44, 920167782  ;;  %v2305_v52 = vshll.u32 %v2265_v34, 8 }
 0x200   : > { %vm1731_vm2 = vweird.f32 %v8250_v33  ;;  %v12340_v58 = vxor.u32 2147483648, %v9644_v18  ;;  %v1928_v39 = vmul.f32 %v1927_v3, %v1925_v1  ;;  %v9663_v19 = vsub.s32 %v2214_v43, %v2217_v29 }
 0x201   : > { %v2294_v49 = vsel %vm2292_vm11, %v2282_v8, 2102212464  ;;  %v12753_v17 = vand.u32 2147483647, %v12700_v38  ;;  %v2031_v47 = vmul.f32 %v2030_v22, %v2028_v13  ;;  %v9674_v30 = vsel %vm6874_vm10, 0, %v6873_v7 }
 0x202   : > { %v2299_v57 = vsel %vm2291_vm0, %v2282_v8, %v2298_v12  ;;  %v2302_v43 = vsel %vm2292_vm11, %v2288_v42, 1326507024  ;;  %v12756_v1 = vand.u32 2147483647, %v12713_v35  ;;  %v2220_v4 = vsub.s32 0, %v9663_v19  ;;  %v12759_v12 = vld [vmem:[#allocation30_spill] sm:$0xff] }
 0x203   : > { %vm9669_vm3 = vcmp.le.f32.partialorder %v12753_v17, 0.7853982  ;;  %v2293_v61 = vsel %vm2289_vm8, %v2273_v37, %v2276_v36  ;;  %v2300_v7 = vsel %vm2290_vm1, %v2297_v48, %v2299_v57  ;;  %v2301_v34 = vsel %vm2289_vm8, %v2279_v26, %v2282_v8 }
 0x204   : > { %vm9682_vm4 = vcmp.le.f32.partialorder %v12756_v1, 0.7853982  ;;  %v2295_v22 = vsel %vm2291_vm0, %v2279_v26, %v2294_v49  ;;  %v2303_v16 = vsel %vm2291_vm0, %v2285_v44, %v2302_v43  ;;  %v1736_v36 = vsel %vm1734_vm6, %v9585_v59, %v12340_v58 }
 0x205   : > { %v9697_v13 = vmul.u32.u64.low %v2305_v52, %v2300_v7  ;;  %v9698_v29 = vmul.u32.u64.high %v2305_v52, %v2300_v7, %v9697_v13  ;;  %v1739_v8 = vsel %vm1737_vm7, %v12337_v32, %v9644_v18  ;;  %v9712_v26 = vand.u32 3, %v9618_v0 }
 0x206   : > { %v6876_v44 = vmin.u32 %v2220_v4, %v9663_v19  ;;  %v1929_v37 = vxor.u32 2147483648, %v1928_v39  ;;  %v2032_v42 = vxor.u32 2147483648, %v2031_v47  ;;  %v2304_v48 = vsel %vm2290_vm1, %v2301_v34, %v2303_v16 }
 0x207   : > { %v2363_v49 = vand.u32 2139095040, %v12759_v12  ;;  %v2127_v17 = vsub.s32 4294967266, %v9674_v30  ;;  %v2296_v57 = vsel %vm2290_vm1, %v2293_v61, %v2295_v22  ;;  %v1931_v7 = vsub.s32 4, %v9333_v25 }
 0x208   : > { %v9721_v43 = vmul.u32.u64.low %v2305_v52, %v2304_v48  ;;  %v9722_v1 = vmul.u32.u64.high %v2305_v52, %v2304_v48, %v9721_v43  ;;  %vm1950_vm5 = vcmp.lt.s32.totalorder %v12713_v35, 0  ;;  %v2315_v4 = vadd.s32 1, %v9698_v29 }
 0x209   : > { %v2364_v32 = vshrl.u32 %v2363_v49, 23  ;;  %v1740_v34 = vsel %vm1733_vm9, %v1736_v36, %v1739_v8  ;;  %vm1837_vm6 = vcmp.eq.s32.totalorder %v9712_v26, 0  ;;  %vm1840_vm7 = vcmp.eq.s32.totalorder %v9712_v26, 2 }
 0x20a   : > { %v2222_v16 = vclz %v6876_v44  ;;  %v1930_v11 = vsel %vm1847_vm12, %v1929_v37, %v1928_v39  ;;  %v2107_v61 = vadd.s32 %v9475_v54, %v9473_v45  ;;  %v2312_v22 = vmul.u32 %v2305_v52, %v2296_v57 }
 0x20b   : > { %v6883_v48 = vadd.s32 4294967169, %v2364_v32  ;;  %v2033_v43 = vsel %vm1950_vm5, %v2032_v42, %v2031_v47  ;;  %v2123_v49 = vsub.s32 32, %v9674_v30  ;;  %v2128_v5 = vadd.s32 127, %v2127_v17 }
 0x20c   : > { %vm2314_vm8 = vc.u32 %v9722_v1, %v9697_v13  ;;  %v9742_v36 = vsel %vm1731_vm2, nan, %v1740_v34  ;;  %v1932_v39 = vsel %vm1847_vm12, %v1931_v7, %v9333_v25  ;;  %v12339_v32 = vxor.u32 2147483648, %v9654_v27 }
 0x20d   : > { %12760 = vst [vmem:[#allocation30_spill] sm:$0xff] %v9742_v36  ;;  %v2316_v45 = vsel %vm2314_vm8, %v2315_v4, %v9698_v29  ;;  %v2370_v54 = vadd.s32 1, %v6883_v48  ;;  %v12338_v52 = vxor.u32 2147483648, %v9648_v24  ;;  %v1933_v47 = vsel %vm9669_vm3, %v12700_v38, %v1930_v11 }
 0x20e   : > { %v6877_v8 = vadd.s32 4294967294, %v2222_v16  ;;  %v2036_v44 = vsel %vm9682_vm4, %v12713_v35, %v2033_v43  ;;  %v2317_v37 = vadd.s32 %v2316_v45, %v2312_v22  ;;  %v12341_v42 = vand.u32 2147483647, %v12759_v12  ;;  %v12762_v43 = vld [vmem:[#allocation31_spill] sm:$0xff] }
 0x20f   : > { %vm2371_vm9 = vcmp.gt.s32.totalorder %v2370_v54, 0  ;;  %v2124_v25 = vshll.u32 %v9580_v2, %v9674_v30  ;;  %v2125_v29 = vshrl.u32 %v2107_v61, %v2123_v49  ;;  %v2129_v17 = vshll.u32 %v2128_v5, 23 }
 0x210   : > { %v2372_v57 = vsel %vm2371_vm9, %v2370_v54, 0  ;;  %v9761_v7 = vsel %vm9669_vm3, 0, %v1932_v39  ;;  %7328 = vcosq.f32 %v1933_v47  ;;  %v2318_v4 = vadd.s32 536870912, %v2317_v37 }
 0x211   : > { %12761 = vst [vmem:[#allocation73_spill] sm:$0xff] %v9761_v7  ;;  %v2374_v34 = vand.u32 31, %v2372_v57  ;;  %v9768_v16 = vsel %vm1840_vm7, %v12338_v52, %v9654_v27  ;;  %7330 = vsinq.f32 %v1933_v47  ;;  %v9771_v2 = vand.u32 3, %v9761_v7 }
 0x212   : > { %vm6878_vm10 = vcmp.lt.s32.totalorder %v6877_v8, 0  ;;  %v9778_v6 = vsel %vm1837_vm6, %v9648_v24, %v12339_v32  ;;  %7332 = vcosq.f32 %v2036_v44  ;;  %v9780_v30 = vshrl.u32 %v2318_v4, 30 }
 0x213   : > { %v2375_v11 = vsub.s32 32, %v2374_v34  ;;  %v2126_v61 = vor.u32 %v2125_v29, %v2124_v25  ;;  %v2130_v22 = vor.u32 4788187, %v2129_v17  ;;  %v2367_v48 = vand.u32 8388607, %v12341_v42 }
 0x214   : > { %v2466_v49 = vand.u32 2139095040, %v12762_v43  ;;  %v9785_v5 = vsel %vm6878_vm10, 0, %v6877_v8  ;;  %v2320_v39 = vshll.u32 %v9780_v30, 30  ;;  %v9788_v45 = vshrl.u32 %v2372_v57, 5 }
 0x215   : > { %v2377_v54 = vshll.u32 %v12647_v55, %v2374_v34  ;;  %v2378_v47 = vshrl.u32 %v12649_v14, %v2375_v11  ;;  %v2380_v4 = vshll.u32 %v12649_v14, %v2374_v34  ;;  %v2381_v25 = vshrl.u32 %v12650_v9, %v2375_v11 }
 0x216   : > { %v2386_v29 = vshll.u32 %v12660_v41, %v2374_v34  ;;  %v9795_v17 = vsub.s32 %v2317_v37, %v2320_v39  ;;  %v2383_v52 = vshll.u32 %v12650_v9, %v2374_v34  ;;  %v2384_v8 = vshrl.u32 %v12660_v41, %v2375_v11 }
 0x217   : > { %v2387_v32 = vshrl.u32 %v12679_v53, %v2375_v11  ;;  %v2034_v57 = vsub.s32 4, %v9407_v31  ;;  %7334 = vsinq.f32 %v2036_v44  ;;  %v2131_v58 = vand.u32 2147483647, %v2130_v22 }
 0x218   : > { %v2133_v42 = vcvt.s32.f32 %v2126_v61  ;;  %v2230_v60 = vsub.s32 4294967266, %v9785_v5  ;;  %v2368_v24 = vor.u32 8388608, %v2367_v48  ;;  %v2389_v27 = vshll.u32 %v12679_v53, %v2374_v34 }
 0x219   : > { %v2467_v33 = vshrl.u32 %v2466_v49, 23  ;;  %v2379_v59 = vor.u32 %v2378_v47, %v2377_v54  ;;  %v2382_v37 = vor.u32 %v2381_v25, %v2380_v4  ;;  %v2388_v39 = vor.u32 %v2387_v32, %v2386_v29 }
 0x21a   : > { %v2390_v18 = vshrl.u32 %v12680_v28, %v2375_v11  ;;  %v9804_v40 = vpop.eup %7328  ;;  %vm1836_vm11 = vcmp.lt.s32.totalorder %v9712_v26, 2  ;;  %v2323_v7 = vsub.s32 0, %v9795_v17  ;;  %v2376_v44 = vshrl.u32 %v12647_v55, %v2375_v11 }
 0x21b   : > { %12763 = vst [vmem:[#allocation74_spill] sm:$0xff] %v9804_v40  ;;  %v2385_v61 = vor.u32 %v2384_v8, %v2383_v52  ;;  %vm2392_vm12 = vcmp.lt.s32.totalorder %v9788_v45, 1  ;;  %v9810_v22 = vpop.eup %7330  ;;  %v2210_v34 = vadd.s32 %v9596_v62, %v9607_v56  ;;  %vm2394_vm0 = vcmp.lt.s32.totalorder %v9788_v45, 3 }
 0x21c   : > { %12764 = vst [vmem:[#allocation75_spill] sm:$0xff] %v9810_v22  ;;  %v2391_v48 = vor.u32 %v2390_v18, %v2389_v27  ;;  %vm2395_vm1 = vcmp.lt.s32.totalorder %v9788_v45, 4  ;;  %v9816_v32 = vpop.eup %7332  ;;  %vm2053_vm3 = vcmp.lt.s32.totalorder %v12728_v21, 0  ;;  %v2134_v49 = vmul.f32 %v2133_v42, %v2131_v58 }
 0x21d   : > { %12765 = vst [vmem:[#allocation76_spill] sm:$0xff] %v9816_v32  ;;  %vm2393_vm6 = vcmp.lt.s32.totalorder %v9788_v45, 2  ;;  %v2397_v52 = vsel %vm2395_vm1, %v2385_v61, 2102212464  ;;  %v2408_v11 = vshll.u32 %v2368_v24, 8  ;;  %vm1940_vm7 = vcmp.eq.s32.totalorder %v9771_v2, 0 }
 0x21e   : > { %vm1943_vm8 = vcmp.eq.s32.totalorder %v9771_v2, 2  ;;  %v2226_v62 = vsub.s32 32, %v9785_v5  ;;  %v2400_v56 = vsel %vm2392_vm12, %v2379_v59, %v2382_v37  ;;  %v2401_v18 = vsel %vm2395_vm1, %v2388_v39, 920167782 }
 0x21f   : > { %v6887_v27 = vadd.s32 4294967169, %v2467_v33  ;;  %v2231_v58 = vadd.s32 127, %v2230_v60  ;;  %v6880_v42 = vmin.u32 %v2323_v7, %v9795_v17  ;;  %v2396_v54 = vsel %vm2392_vm12, %v2376_v44, %v2379_v59 }
 0x220   : > { %v2402_v24 = vsel %vm2394_vm0, %v2385_v61, %v2401_v18  ;;  %v12766_v47 = vand.u32 2147483647, %v12728_v21  ;;  %v2398_v25 = vsel %vm2394_vm0, %v2382_v37, %v2397_v52  ;;  %v2404_v60 = vsel %vm2392_vm12, %v2382_v37, %v2385_v61 }
 0x221   : > { %v2403_v33 = vsel %vm2393_vm6, %v2400_v56, %v2402_v24  ;;  %v2405_v59 = vsel %vm2395_vm1, %v2391_v48, 1326507024  ;;  %v2035_v7 = vsel %vm1950_vm5, %v2034_v57, %v9407_v31  ;;  %v9857_v52 = vpop.eup %7334  ;;  %v2135_v56 = vxor.u32 2147483648, %v2134_v49 }
 0x222   : > { %vm9836_vm9 = vcmp.le.f32.partialorder %v12766_v47, 0.7853982  ;;  %v2406_v29 = vsel %vm2394_vm0, %v2388_v39, %v2405_v59  ;;  %v9853_v8 = vmul.u32.u64.low %v2408_v11, %v2403_v33  ;;  %v9854_v44 = vmul.u32.u64.high %v2408_v11, %v2403_v33, %v9853_v8  ;;  %12769 = vst [vmem:[#allocation77_spill] sm:$0xff] %v9857_v52 }
 0x223   : > { %v2137_v18 = vsub.s32 4, %v9552_v46  ;;  %v2407_v37 = vsel %vm2393_vm6, %v2404_v60, %v2406_v29  ;;  %v2473_v61 = vadd.s32 1, %v6887_v27  ;;  %v2227_v48 = vshll.u32 %v9663_v19, %v9785_v5 }
 0x224   : > { %v2228_v31 = vshrl.u32 %v2210_v34, %v2226_v62  ;;  %v2232_v57 = vshll.u32 %v2231_v58, 23  ;;  %v2399_v39 = vsel %vm2393_vm6, %v2396_v54, %v2398_v25  ;;  %v2325_v24 = vclz %v6880_v42 }
 0x225   : > { %v9866_v47 = vmul.u32.u64.low %v2408_v11, %v2407_v37  ;;  %v9867_v33 = vmul.u32.u64.high %v2408_v11, %v2407_v37, %v9866_v47  ;;  %vm2474_vm5 = vcmp.gt.s32.totalorder %v2473_v61, 0  ;;  %v12356_v59 = vxor.u32 2147483648, %v9810_v22 }
 0x226   : > { %v12355_v0 = vxor.u32 2147483648, %v9804_v40  ;;  %v2418_v60 = vadd.s32 1, %v9854_v44  ;;  %v2475_v27 = vsel %vm2474_vm5, %v2473_v61, 0  ;;  %v9876_v19 = vsel %vm1836_vm11, %v9778_v6, %v9768_v16 }
 0x227   : > { %v9880_v5 = vsel %vm9682_vm4, 0, %v2035_v7  ;;  %v2415_v45 = vmul.u32 %v2408_v11, %v2399_v39  ;;  %v2477_v34 = vand.u32 31, %v2475_v27  ;;  %v2138_v62 = vsel %vm2053_vm3, %v2137_v18, %v9552_v46 }
 0x228   : > { %12770 = vst [vmem:[#allocation78_spill] sm:$0xff] %v9880_v5  ;;  %v2229_v58 = vor.u32 %v2228_v31, %v2227_v48  ;;  %v2233_v42 = vor.u32 4788187, %v2232_v57  ;;  %v12357_v54 = vand.u32 2147483647, %v12762_v43  ;;  %v9887_v25 = vand.u32 3, %v9880_v5 }
 0x229   : > { %v2136_v26 = vsel %vm2053_vm3, %v2135_v56, %v2134_v49  ;;  %v6881_v16 = vadd.s32 4294967294, %v2325_v24  ;;  %vm2417_vm4 = vc.u32 %v9867_v33, %v9853_v8  ;;  %v9898_v46 = vsel %vm1940_vm7, %v9804_v40, %v12356_v59 }
 0x22a   : > { %v9905_v3 = vsel %vm1943_vm8, %v12355_v0, %v9810_v22  ;;  %v2419_v6 = vsel %vm2417_vm4, %v2418_v60, %v9854_v44  ;;  %v2478_v49 = vsub.s32 32, %v2477_v34  ;;  %v9912_v29 = vsel %vm9836_vm9, 0, %v2138_v62 }
 0x22b   : > { %12771 = vst [vmem:[#allocation79_spill] sm:$0xff] %v9912_v29  ;;  %v2420_v56 = vadd.s32 %v2419_v6, %v2415_v45  ;;  %v9917_v18 = vsel %vm9836_vm9, %v12728_v21, %v2136_v26  ;;  %v2234_v37 = vand.u32 2147483647, %v2233_v42  ;;  %v2236_v61 = vcvt.s32.f32 %v2229_v58 }
 0x22c   : > { %v2470_v44 = vand.u32 8388607, %v12357_v54  ;;  %vm6882_vm10 = vcmp.lt.s32.totalorder %v6881_v16, 0  ;;  %v9921_v31 = vshrl.u32 %v2475_v27, 5  ;;  %v2480_v57 = vshll.u32 %v12647_v55, %v2477_v34 }
 0x22d   : > { %v2421_v48 = vadd.s32 536870912, %v2420_v56  ;;  %v2481_v39 = vshrl.u32 %v12649_v14, %v2478_v49  ;;  %v2483_v24 = vshll.u32 %v12649_v14, %v2477_v34  ;;  %v2484_v47 = vshrl.u32 %v12650_v9, %v2478_v49 }
 0x22e   : > { %v2486_v4 = vshll.u32 %v12650_v9, %v2477_v34  ;;  %v2487_v45 = vshrl.u32 %v12660_v41, %v2478_v49  ;;  %v2489_v62 = vshll.u32 %v12660_v41, %v2477_v34  ;;  %v2490_v58 = vshrl.u32 %v12679_v53, %v2478_v49 }
 0x22f   : > { %v9928_v60 = vshrl.u32 %v2421_v48, 30  ;;  %v2237_v27 = vmul.f32 %v2236_v61, %v2234_v37  ;;  %v2492_v26 = vshll.u32 %v12679_v53, %v2477_v34  ;;  %v2493_v6 = vshrl.u32 %v12680_v28, %v2478_v49 }
 0x230   : > { %7336 = vcosq.f32 %v9917_v18  ;;  %vm2156_vm11 = vcmp.lt.s32.totalorder %v12736_v15, 0  ;;  %v9939_v48 = vsel %vm6882_vm10, 0, %v6881_v16  ;;  %v2471_v59 = vor.u32 8388608, %v2470_v44 }
 0x231   : > { %v2423_v0 = vshll.u32 %v9928_v60, 30  ;;  %vm1939_vm12 = vcmp.lt.s32.totalorder %v9771_v2, 2  ;;  %v2479_v37 = vshrl.u32 %v12647_v55, %v2478_v49  ;;  %v2482_v61 = vor.u32 %v2481_v39, %v2480_v57  ;;  %v12775_v57 = vld [vmem:[#allocation32_spill] sm:$0xff] }
 0x232   : > { %v2485_v54 = vor.u32 %v2484_v47, %v2483_v24  ;;  %v2491_v42 = vor.u32 %v2490_v58, %v2489_v62  ;;  %v2488_v7 = vor.u32 %v2487_v45, %v2486_v4  ;;  %vm2495_vm0 = vcmp.lt.s32.totalorder %v9921_v31, 1 }
 0x233   : > { %v9944_v34 = vsub.s32 %v2420_v56, %v2423_v0  ;;  %vm2498_vm1 = vcmp.lt.s32.totalorder %v9921_v31, 4  ;;  %vm2043_vm3 = vcmp.eq.s32.totalorder %v9887_v25, 0  ;;  %vm2046_vm6 = vcmp.eq.s32.totalorder %v9887_v25, 2 }
 0x234   : > { %v12772_v16 = vand.u32 2147483647, %v12736_v15  ;;  %v2238_v49 = vxor.u32 2147483648, %v2237_v27  ;;  %v2313_v0 = vadd.s32 %v9697_v13, %v9722_v1  ;;  %v2494_v56 = vor.u32 %v2493_v6, %v2492_v26 }
 0x235   : > { %v2569_v39 = vand.u32 2139095040, %v12775_v57  ;;  %v2333_v24 = vsub.s32 4294967266, %v9939_v48  ;;  %v2426_v47 = vsub.s32 0, %v9944_v34  ;;  %vm2497_vm8 = vcmp.lt.s32.totalorder %v9921_v31, 3 }
 0x236   : > { %vm9952_vm7 = vcmp.le.f32.partialorder %v12772_v16, 0.7853982  ;;  %v2500_v4 = vsel %vm2498_vm1, %v2488_v7, 2102212464  ;;  %vm12368_vm9 = vweird.f32 %v12681_v10  ;;  %vm12367_vm5 = vweird.f32 %v12700_v38 }
 0x237   : > { %vm2496_vm4 = vcmp.lt.s32.totalorder %v9921_v31, 2  ;;  %v2503_v13 = vsel %vm2495_vm0, %v2482_v61, %v2485_v54  ;;  %v2504_v1 = vsel %vm2498_vm1, %v2491_v42, 920167782  ;;  %v2511_v45 = vshll.u32 %v2471_v59, 8 }
 0x238   : > { %v2329_v62 = vsub.s32 32, %v9939_v48  ;;  %v6884_v58 = vmin.u32 %v2426_v47, %v9944_v34  ;;  %v2499_v26 = vsel %vm2495_vm0, %v2479_v37, %v2482_v61  ;;  %v2507_v6 = vsel %vm2495_vm0, %v2485_v54, %v2488_v7 }
 0x239   : > { %v2501_v16 = vsel %vm2497_vm8, %v2485_v54, %v2500_v4  ;;  %v2505_v11 = vsel %vm2497_vm8, %v2488_v7, %v2504_v1  ;;  %v2508_v40 = vsel %vm2498_vm1, %v2494_v56, 1326507024  ;;  %v2570_v59 = vshrl.u32 %v2569_v39, 23 }
 0x23a   : > { %v2334_v22 = vadd.s32 127, %v2333_v24  ;;  %v2428_v5 = vclz %v6884_v58  ;;  %v2506_v47 = vsel %vm2496_vm4, %v2503_v13, %v2505_v11  ;;  %v2509_v37 = vsel %vm2497_vm8, %v2491_v42, %v2508_v40  ;;  %v9993_v4 = vpop.eup %7336 }
 0x23b   : > { %v2510_v61 = vsel %vm2496_vm4, %v2507_v6, %v2509_v37  ;;  %v9989_v36 = vmul.u32.u64.low %v2511_v45, %v2506_v47  ;;  %v9990_v54 = vmul.u32.u64.high %v2511_v45, %v2506_v47, %v9989_v36  ;;  %v6891_v7 = vadd.s32 4294967169, %v2570_v59  ;;  %12776 = vst [vmem:[#allocation80_spill] sm:$0xff] %v9993_v4 }
 0x23c   : > { %7338 = vsinq.f32 %v9917_v18  ;;  %v2502_v56 = vsel %vm2496_vm4, %v2499_v26, %v2501_v16  ;;  %v9998_v39 = vmul.u32.u64.low %v2511_v45, %v2510_v61  ;;  %v9999_v11 = vmul.u32.u64.high %v2511_v45, %v2510_v61, %v9998_v39 }
 0x23d   : > { %v2239_v40 = vsel %vm2156_vm11, %v2238_v49, %v2237_v27  ;;  %v2330_v42 = vshll.u32 %v9795_v17, %v9939_v48  ;;  %v2331_v24 = vshrl.u32 %v2313_v0, %v2329_v62  ;;  %v2576_v13 = vadd.s32 1, %v6891_v7 }
 0x23e   : > { %v1946_v1 = vsel %vm1939_vm12, %v9898_v46, %v9905_v3  ;;  %vm2042_vm10 = vcmp.lt.s32.totalorder %v9887_v25, 2  ;;  %v10011_v18 = vand.u32 3, %v9912_v29  ;;  %v2335_v31 = vshll.u32 %v2334_v22, 23 }
 0x23f   : > { %v6885_v58 = vadd.s32 4294967294, %v2428_v5  ;;  %v2518_v26 = vmul.u32 %v2511_v45, %v2502_v56  ;;  %v2521_v27 = vadd.s32 1, %v9990_v54  ;;  %vm2577_vm0 = vcmp.gt.s32.totalorder %v2576_v13, 0 }
 0x240   : > { %v12777_v17 = vxor.u32 2147483648, %v9857_v52  ;;  %v12778_v2 = vxor.u32 2147483648, %v9816_v32  ;;  %v12779_v22 = vsub.s32 4, %v9640_v51  ;;  %v2242_v3 = vsel %vm9952_vm7, %v12736_v15, %v2239_v40 }
 0x241   : > { %v2332_v49 = vor.u32 %v2331_v24, %v2330_v42  ;;  %vm2520_vm12 = vc.u32 %v9999_v11, %v9989_v36  ;;  %v12363_v0 = vand.u32 2147483647, %v12775_v57  ;;  %v2578_v45 = vsel %vm2577_vm0, %v2576_v13, 0 }
 0x242   : > { %v2045_v48 = vsel %vm2043_vm3, %v9816_v32, %v12777_v17  ;;  %v2048_v46 = vsel %vm2046_vm6, %v12778_v2, %v9857_v52  ;;  %v2241_v5 = vsel %vm2156_vm11, %v12779_v22, %v9640_v51  ;;  %v10038_v62 = vsel %vm12368_vm9, nan, %v9876_v19 }
 0x243   : > { %v10042_v6 = vsel %vm12367_vm5, nan, %v1946_v1  ;;  %v2336_v51 = vor.u32 4788187, %v2335_v31  ;;  %v2522_v16 = vsel %vm2520_vm12, %v2521_v27, %v9990_v54  ;;  %v10047_v59 = vsel %vm9952_vm7, 0, %v2241_v5 }
 0x244   : > { %12780 = vst [vmem:[#allocation81_spill] sm:$0xff] %v10047_v59  ;;  %vm6886_vm11 = vcmp.lt.s32.totalorder %v6885_v58, 0  ;;  %v2523_v47 = vadd.s32 %v2522_v16, %v2518_v26  ;;  %v2580_v37 = vand.u32 31, %v2578_v45  ;;  %v10051_v61 = vsel %vm2042_vm10, %v2045_v48, %v2048_v46 }
 0x245   : > { %vm2149_vm1 = vcmp.eq.s32.totalorder %v10011_v18, 2  ;;  %7340 = vcosq.f32 %v2242_v3  ;;  %v10055_v19 = vand.u32 3, %v10047_v59  ;;  %v2339_v7 = vcvt.s32.f32 %v2332_v49 }
 0x246   : > { %v2524_v56 = vadd.s32 536870912, %v2523_v47  ;;  %v2573_v44 = vand.u32 8388607, %v12363_v0  ;;  %v2581_v54 = vsub.s32 32, %v2580_v37  ;;  %v10059_v39 = vpop.eup %7338  ;;  %v2337_v40 = vand.u32 2147483647, %v2336_v51 }
 0x247   : > { %12781 = vst [vmem:[#allocation82_spill] sm:$0xff] %v10059_v39  ;;  %v10061_v42 = vsel %vm6886_vm11, 0, %v6885_v58  ;;  %v10063_v25 = vshrl.u32 %v2578_v45, 5  ;;  %v2583_v24 = vshll.u32 %v12647_v55, %v2580_v37  ;;  %v2586_v31 = vshll.u32 %v12649_v14, %v2580_v37  ;;  %v12782_v51 = vld [vmem:[#allocation33_spill] sm:$0xff] }
 0x248   : > { %v10066_v13 = vshrl.u32 %v2524_v56, 30  ;;  %v2584_v1 = vshrl.u32 %v12649_v14, %v2581_v54  ;;  %v2587_v26 = vshrl.u32 %v12650_v9, %v2581_v54  ;;  %v2589_v27 = vshll.u32 %v12650_v9, %v2580_v37 }
 0x249   : > { %v2590_v17 = vshrl.u32 %v12660_v41, %v2581_v54  ;;  %v2592_v48 = vshll.u32 %v12660_v41, %v2580_v37  ;;  %v2593_v58 = vshrl.u32 %v12679_v53, %v2581_v54  ;;  %7342 = vsinq.f32 %v2242_v3 }
 0x24a   : > { %v2526_v22 = vshll.u32 %v10066_v13, 30  ;;  %v2340_v5 = vmul.f32 %v2339_v7, %v2337_v40  ;;  %v2574_v49 = vor.u32 8388608, %v2573_v44  ;;  %v2595_v45 = vshll.u32 %v12679_v53, %v2580_v37 }
 0x24b   : > { %v2672_v16 = vand.u32 2139095040, %v12782_v51  ;;  %vm2146_vm3 = vcmp.eq.s32.totalorder %v10011_v18, 0  ;;  %vm2259_vm6 = vcmp.lt.s32.totalorder %v12746_v63, 0  ;;  %v2436_v56 = vsub.s32 4294967266, %v10061_v42 }
 0x24c   : > { %v2585_v0 = vor.u32 %v2584_v1, %v2583_v24  ;;  %v2588_v59 = vor.u32 %v2587_v26, %v2586_v31  ;;  %v2596_v2 = vshrl.u32 %v12680_v28, %v2581_v54  ;;  %v10084_v46 = vsub.s32 %v2523_v47, %v2526_v22 }
 0x24d   : > { %v2591_v3 = vor.u32 %v2590_v17, %v2589_v27  ;;  %v2594_v32 = vor.u32 %v2593_v58, %v2592_v48  ;;  %vm2598_vm7 = vcmp.lt.s32.totalorder %v10063_v25, 1  ;;  %vm12427_vm8 = vweird.f32 %v12713_v35 }
 0x24e   : > { %v12783_v37 = vxor.u32 2147483648, %v9993_v4  ;;  %v2416_v44 = vadd.s32 %v9853_v8, %v9867_v33  ;;  %v2582_v40 = vshrl.u32 %v12647_v55, %v2581_v54  ;;  %vm2601_vm4 = vcmp.lt.s32.totalorder %v10063_v25, 4 }
 0x24f   : > { %v10097_v47 = vpop.eup %7340  ;;  %vm2145_vm10 = vcmp.lt.s32.totalorder %v10011_v18, 2  ;;  %vm2252_vm0 = vcmp.eq.s32.totalorder %v10055_v19, 2  ;;  %v2432_v24 = vsub.s32 32, %v10061_v42  ;;  %v2597_v1 = vor.u32 %v2596_v2, %v2595_v45 }
 0x250   : > { %v2151_v7 = vsel %vm2149_vm1, %v12783_v37, %v10059_v39  ;;  %12784 = vst [vmem:[#allocation83_spill] sm:$0xff] %v10097_v47  ;;  %vm2600_vm12 = vcmp.lt.s32.totalorder %v10063_v25, 3  ;;  %v2603_v31 = vsel %vm2601_vm4, %v2591_v3, 2102212464  ;;  %vm2249_vm11 = vcmp.eq.s32.totalorder %v10055_v19, 0 }
 0x251   : > { %v12785_v8 = vand.u32 2147483647, %v12746_v63  ;;  %v2437_v54 = vadd.s32 127, %v2436_v56  ;;  %vm2599_vm5 = vcmp.lt.s32.totalorder %v10063_v25, 2  ;;  %v2606_v26 = vsel %vm2598_vm7, %v2585_v0, %v2588_v59 }
 0x252   : > { %v2614_v27 = vshll.u32 %v2574_v49, 8  ;;  %v2341_v17 = vxor.u32 2147483648, %v2340_v5  ;;  %v2529_v48 = vsub.s32 0, %v10084_v46  ;;  %v2607_v58 = vsel %vm2601_vm4, %v2594_v32, 920167782 }
 0x253   : > { %vm10108_vm1 = vcmp.le.f32.partialorder %v12785_v8, 0.7853982  ;;  %v2673_v2 = vshrl.u32 %v2672_v16, 23  ;;  %v2433_v22 = vshll.u32 %v9944_v34, %v10061_v42  ;;  %v2602_v45 = vsel %vm2598_vm7, %v2582_v40, %v2585_v0  ;;  %v10133_v42 = vpop.eup %7342 }
 0x254   : > { %v2604_v56 = vsel %vm2600_vm12, %v2588_v59, %v2603_v31  ;;  %v2608_v37 = vsel %vm2600_vm12, %v2591_v3, %v2607_v58  ;;  %vm12407_vm9 = vweird.f32 %v12728_v21  ;;  %v2434_v49 = vshrl.u32 %v2416_v44, %v2432_v24  ;;  %12788 = vst [vmem:[#allocation84_spill] sm:$0xff] %v10133_v42 }
 0x255   : > { %v2609_v8 = vsel %vm2599_vm5, %v2606_v26, %v2608_v37  ;;  %v2610_v16 = vsel %vm2598_vm7, %v2588_v59, %v2591_v3  ;;  %v2611_v34 = vsel %vm2601_vm4, %v2597_v1, 1326507024  ;;  %v2438_v0 = vshll.u32 %v2437_v54, 23 }
 0x256   : > { %v2612_v40 = vsel %vm2600_vm12, %v2594_v32, %v2611_v34  ;;  %v10137_v31 = vmul.u32.u64.low %v2614_v27, %v2609_v8  ;;  %v10138_v58 = vmul.u32.u64.high %v2614_v27, %v2609_v8, %v10137_v31  ;;  %v6888_v44 = vmin.u32 %v2529_v48, %v10084_v46 }
 0x257   : > { %v2605_v24 = vsel %vm2599_vm5, %v2602_v45, %v2604_v56  ;;  %v2613_v59 = vsel %vm2599_vm5, %v2610_v16, %v2612_v40  ;;  %v6895_v3 = vadd.s32 4294967169, %v2673_v2  ;;  %v12369_v1 = vxor.u32 2147483648, %v10097_v47 }
 0x258   : > { %v2343_v54 = vsub.s32 4, %v9780_v30  ;;  %v10148_v26 = vmul.u32.u64.low %v2614_v27, %v2613_v59  ;;  %v10149_v37 = vmul.u32.u64.high %v2614_v27, %v2613_v59, %v10148_v26  ;;  %v12789_v32 = vxor.u32 2147483648, %v10059_v39 }
 0x259   : > { %v12370_v8 = vxor.u32 2147483648, %v10133_v42  ;;  %v2342_v25 = vsel %vm2259_vm6, %v2341_v17, %v2340_v5  ;;  %v2679_v45 = vadd.s32 1, %v6895_v3  ;;  %v2435_v2 = vor.u32 %v2434_v49, %v2433_v22 }
 0x25a   : > { %v2148_v48 = vsel %vm2146_vm3, %v9993_v4, %v12789_v32  ;;  %v2439_v56 = vor.u32 4788187, %v2438_v0  ;;  %v2621_v16 = vmul.u32 %v2614_v27, %v2605_v24  ;;  %v2624_v34 = vadd.s32 1, %v10138_v58 }
 0x25b   : > { %v10163_v40 = vsel %vm12427_vm8, nan, %v10051_v61  ;;  %vm2248_vm5 = vcmp.lt.s32.totalorder %v10055_v19, 2  ;;  %v2531_v59 = vclz %v6888_v44  ;;  %vm2680_vm3 = vcmp.gt.s32.totalorder %v2679_v45, 0 }
 0x25c   : > { %v2152_v26 = vsel %vm2145_vm10, %v2148_v48, %v2151_v7  ;;  %v2254_v5 = vsel %vm2252_vm0, %v12369_v1, %v10133_v42  ;;  %v2344_v27 = vsel %vm2259_vm6, %v2343_v54, %v9780_v30  ;;  %vm2623_vm7 = vc.u32 %v10149_v37, %v10137_v31  ;;  %v12791_v54 = vld [vmem:[#allocation34_spill] sm:$0xff] }
 0x25d   : > { %v2251_v18 = vsel %vm2249_vm11, %v10097_v47, %v12370_v8  ;;  %v2345_v61 = vsel %vm10108_vm1, %v12746_v63, %v2342_v25  ;;  %v2625_v7 = vsel %vm2623_vm7, %v2624_v34, %v10138_v58  ;;  %v2681_v17 = vsel %vm2680_vm3, %v2679_v45, 0 }
 0x25e   : > { %v2440_v22 = vand.u32 2147483647, %v2439_v56  ;;  %v2442_v49 = vcvt.s32.f32 %v2435_v2  ;;  %v2626_v0 = vadd.s32 %v2625_v7, %v2621_v16  ;;  %v12371_v30 = vand.u32 2147483647, %v12782_v51 }
 0x25f   : > { %v10190_v44 = vsel %vm10108_vm1, 0, %v2344_v27  ;;  %v6889_v24 = vadd.s32 4294967294, %v2531_v59  ;;  %v2683_v3 = vand.u32 31, %v2681_v17  ;;  %v2775_v32 = vand.u32 2139095040, %v12791_v54 }
 0x260   : > { %12790 = vst [vmem:[#allocation85_spill] sm:$0xff] %v10190_v44  ;;  %v10195_v48 = vsel %vm12407_vm9, nan, %v2152_v26  ;;  %7344 = vcosq.f32 %v2345_v61  ;;  %v10198_v58 = vand.u32 3, %v10190_v44  ;;  %v2627_v25 = vadd.s32 536870912, %v2626_v0 }
 0x261   : > { %v10202_v45 = vsel %vm2248_vm5, %v2251_v18, %v2254_v5  ;;  %7346 = vsinq.f32 %v2345_v61  ;;  %v2684_v2 = vsub.s32 32, %v2683_v3  ;;  %v2443_v56 = vmul.f32 %v2442_v49, %v2440_v22 }
 0x262   : > { %v10205_v16 = vshrl.u32 %v2627_v25, 30  ;;  %v2676_v34 = vand.u32 8388607, %v12371_v30  ;;  %vm2362_vm6 = vcmp.lt.s32.totalorder %v12759_v12, 0  ;;  %vm6890_vm4 = vcmp.lt.s32.totalorder %v6889_v24, 0 }
 0x263   : > { %v2682_v26 = vshrl.u32 %v2681_v17, 5  ;;  %v2686_v19 = vshll.u32 %v12647_v55, %v2683_v3  ;;  %v2776_v5 = vshrl.u32 %v2775_v32, 23  ;;  %v2687_v18 = vshrl.u32 %v12649_v14, %v2684_v2 }
 0x264   : > { %v2629_v27 = vshll.u32 %v10205_v16, 30  ;;  %v2689_v61 = vshll.u32 %v12649_v14, %v2683_v3  ;;  %v2690_v7 = vshrl.u32 %v12650_v9, %v2684_v2  ;;  %v2692_v22 = vshll.u32 %v12650_v9, %v2683_v3 }
 0x265   : > { %v2693_v49 = vshrl.u32 %v12660_v41, %v2684_v2  ;;  %v2695_v25 = vshll.u32 %v12660_v41, %v2683_v3  ;;  %v2696_v1 = vshrl.u32 %v12679_v53, %v2684_v2  ;;  %vm12394_vm10 = vweird.f32 %v12736_v15 }
 0x266   : > { %v2519_v17 = vadd.s32 %v9989_v36, %v9999_v11  ;;  %v10223_v32 = vsel %vm6890_vm4, 0, %v6889_v24  ;;  %v10225_v8 = vsub.s32 %v2626_v0, %v2629_v27  ;;  %v2677_v30 = vor.u32 8388608, %v2676_v34 }
 0x267   : > { %v2685_v59 = vshrl.u32 %v12647_v55, %v2684_v2  ;;  %v2698_v33 = vshll.u32 %v12679_v53, %v2683_v3  ;;  %v2699_v47 = vshrl.u32 %v12680_v28, %v2684_v2  ;;  %v6899_v42 = vadd.s32 4294967169, %v2776_v5 }
 0x268   : > { %v12792_v21 = vand.u32 2147483647, %v12759_v12  ;;  %v2632_v36 = vsub.s32 0, %v10225_v8  ;;  %v2688_v11 = vor.u32 %v2687_v18, %v2686_v19  ;;  %v2691_v24 = vor.u32 %v2690_v7, %v2689_v61 }
 0x269   : > { %v2697_v0 = vor.u32 %v2696_v1, %v2695_v25  ;;  %v2444_v27 = vxor.u32 2147483648, %v2443_v56  ;;  %v2694_v34 = vor.u32 %v2693_v49, %v2692_v22  ;;  %v2700_v4 = vor.u32 %v2699_v47, %v2698_v33 }
 0x26a   : > { %vm10232_vm0 = vcmp.le.f32.partialorder %v12792_v21, 0.7853982  ;;  %vm2701_vm12 = vcmp.lt.s32.totalorder %v2682_v26, 1  ;;  %v10237_v39 = vpop.eup %7344  ;;  %v2539_v3 = vsub.s32 4294967266, %v10223_v32  ;;  %v6892_v2 = vmin.u32 %v2632_v36, %v10225_v8 }
 0x26b   : > { %12795 = vst [vmem:[#allocation86_spill] sm:$0xff] %v10237_v39  ;;  %vm2703_vm11 = vcmp.lt.s32.totalorder %v2682_v26, 3  ;;  %v2717_v21 = vshll.u32 %v2677_v30, 8  ;;  %v10241_v5 = vpop.eup %7346  ;;  %vm2702_vm1 = vcmp.lt.s32.totalorder %v2682_v26, 2  ;;  %vm2704_vm5 = vcmp.lt.s32.totalorder %v2682_v26, 4 }
 0x26c   : > { %12796 = vst [vmem:[#allocation87_spill] sm:$0xff] %v10241_v5  ;;  %v2705_v19 = vsel %vm2701_vm12, %v2685_v59, %v2688_v11  ;;  %v2782_v18 = vadd.s32 1, %v6899_v42  ;;  %vm2352_vm3 = vcmp.eq.s32.totalorder %v10198_v58, 0  ;;  %v2634_v1 = vclz %v6892_v2 }
 0x26d   : > { %v2706_v47 = vsel %vm2704_vm5, %v2694_v34, 2102212464  ;;  %v2709_v33 = vsel %vm2701_vm12, %v2688_v11, %v2691_v24  ;;  %v2710_v61 = vsel %vm2704_vm5, %v2697_v0, 920167782  ;;  %v2713_v30 = vsel %vm2701_vm12, %v2691_v24, %v2694_v34 }
 0x26e   : > { %v2707_v7 = vsel %vm2703_vm11, %v2691_v24, %v2706_v47  ;;  %v2711_v22 = vsel %vm2703_vm11, %v2694_v34, %v2710_v61  ;;  %v2714_v49 = vsel %vm2704_vm5, %v2700_v4, 1326507024  ;;  %v2445_v25 = vsel %vm2362_vm6, %v2444_v27, %v2443_v56 }
 0x26f   : > { %v2535_v59 = vsub.s32 32, %v10223_v32  ;;  %v2712_v42 = vsel %vm2702_vm1, %v2709_v33, %v2711_v22  ;;  %v2715_v36 = vsel %vm2703_vm11, %v2697_v0, %v2714_v49  ;;  %v2708_v2 = vsel %vm2702_vm1, %v2705_v19, %v2707_v7 }
 0x270   : > { %v2716_v11 = vsel %vm2702_vm1, %v2713_v30, %v2715_v36  ;;  %v10256_v35 = vmul.u32.u64.low %v2717_v21, %v2712_v42  ;;  %v10257_v47 = vmul.u32.u64.high %v2717_v21, %v2712_v42, %v10256_v35  ;;  %v2540_v61 = vadd.s32 127, %v2539_v3 }
 0x271   : > { %v10260_v24 = vmul.u32.u64.low %v2717_v21, %v2716_v11  ;;  %v10261_v4 = vmul.u32.u64.high %v2717_v21, %v2716_v11, %v10260_v24  ;;  %vm2783_vm7 = vcmp.gt.s32.totalorder %v2782_v18, 0  ;;  %v10266_v56 = vsel %vm12394_vm10, nan, %v10202_v45 }
 0x272   : > { %vm2355_vm4 = vcmp.eq.s32.totalorder %v10198_v58, 2  ;;  %v6893_v0 = vadd.s32 4294967294, %v2634_v1  ;;  %v2784_v27 = vsel %vm2783_vm7, %v2782_v18, 0  ;;  %v12384_v26 = vxor.u32 2147483648, %v10241_v5 }
 0x273   : > { %v12383_v34 = vxor.u32 2147483648, %v10237_v39  ;;  %v12797_v3 = vsub.s32 4, %v9928_v60  ;;  %v2724_v33 = vmul.u32 %v2717_v21, %v2708_v2  ;;  %v2448_v45 = vsel %vm10232_vm0, %v12759_v12, %v2445_v25 }
 0x274   : > { %v2727_v7 = vadd.s32 1, %v10257_v47  ;;  %v12798_v1 = vand.u32 2147483647, %v12791_v54  ;;  %v2786_v22 = vand.u32 31, %v2784_v27  ;;  %v2536_v30 = vshll.u32 %v10084_v46, %v10223_v32 }
 0x275   : > { %v2447_v19 = vsel %vm2362_vm6, %v12797_v3, %v9928_v60  ;;  %v2537_v49 = vshrl.u32 %v2519_v17, %v2535_v59  ;;  %v2541_v42 = vshll.u32 %v2540_v61, 23  ;;  %vm2726_vm12 = vc.u32 %v10261_v4, %v10256_v35 }
 0x276   : > { %v2779_v18 = vand.u32 8388607, %v12798_v1  ;;  %v10288_v60 = vsel %vm10232_vm0, 0, %v2447_v19  ;;  %vm6894_vm6 = vcmp.lt.s32.totalorder %v6893_v0, 0  ;;  %v2728_v21 = vsel %vm2726_vm12, %v2727_v7, %v10257_v47 }
 0x277   : > { %12799 = vst [vmem:[#allocation88_spill] sm:$0xff] %v10288_v60  ;;  %v2787_v25 = vsub.s32 32, %v2786_v22  ;;  %v10296_v36 = vsel %vm2355_vm4, %v12383_v34, %v10241_v5  ;;  %7348 = vcosq.f32 %v2448_v45  ;;  %v10299_v46 = vand.u32 3, %v10288_v60 }
 0x278   : > { %v2729_v17 = vadd.s32 %v2728_v21, %v2724_v33  ;;  %v10306_v44 = vsel %vm2352_vm3, %v10237_v39, %v12384_v26  ;;  %7350 = vsinq.f32 %v2448_v45  ;;  %v2549_v32 = vsub.s32 4, %v10066_v13 }
 0x279   : > { %v2780_v59 = vor.u32 8388608, %v2779_v18  ;;  %v2538_v2 = vor.u32 %v2537_v49, %v2536_v30  ;;  %v2542_v11 = vor.u32 4788187, %v2541_v42  ;;  %v10309_v47 = vsel %vm6894_vm6, 0, %v6893_v0 }
 0x27a   : > { %v2730_v61 = vadd.s32 536870912, %v2729_v17  ;;  %vm2465_vm0 = vcmp.lt.s32.totalorder %v12762_v43, 0  ;;  %v2789_v24 = vshll.u32 %v12647_v55, %v2786_v22  ;;  %v2790_v3 = vshrl.u32 %v12649_v14, %v2787_v25 }
 0x27b   : > { %v2792_v19 = vshll.u32 %v12649_v14, %v2786_v22  ;;  %v2793_v33 = vshrl.u32 %v12650_v9, %v2787_v25  ;;  %v2785_v45 = vshrl.u32 %v2784_v27, 5  ;;  %v2795_v1 = vshll.u32 %v12650_v9, %v2786_v22 }
 0x27c   : > { %v10316_v7 = vshrl.u32 %v2730_v61, 30  ;;  %v2796_v18 = vshrl.u32 %v12660_v41, %v2787_v25  ;;  %v2622_v0 = vadd.s32 %v10137_v31, %v10149_v37  ;;  %v2642_v30 = vsub.s32 4294967266, %v10309_v47 }
 0x27d   : > { %v2798_v49 = vshll.u32 %v12660_v41, %v2786_v22  ;;  %v2799_v42 = vshrl.u32 %v12679_v53, %v2787_v25  ;;  %v2543_v21 = vand.u32 2147483647, %v2542_v11  ;;  %v2545_v34 = vcvt.s32.f32 %v2538_v2 }
 0x27e   : > { %v2732_v26 = vshll.u32 %v10316_v7, 30  ;;  %v2801_v61 = vshll.u32 %v12679_v53, %v2786_v22  ;;  %v2791_v27 = vor.u32 %v2790_v3, %v2789_v24  ;;  %v2794_v39 = vor.u32 %v2793_v33, %v2792_v19 }
 0x27f   : > { %v2800_v5 = vor.u32 %v2799_v42, %v2798_v49  ;;  %v2802_v15 = vshrl.u32 %v12680_v28, %v2787_v25  ;;  %v2638_v60 = vsub.s32 32, %v10309_v47  ;;  %v2797_v37 = vor.u32 %v2796_v18, %v2795_v1 }
 0x280   : > { %v10329_v31 = vsub.s32 %v2729_v17, %v2732_v26  ;;  %vm2804_vm11 = vcmp.lt.s32.totalorder %v2785_v45, 1  ;;  %vm2351_vm1 = vcmp.lt.s32.totalorder %v10198_v58, 2  ;;  %v2643_v52 = vadd.s32 127, %v2642_v30 }
 0x281   : > { %v2788_v2 = vshrl.u32 %v12647_v55, %v2787_v25  ;;  %vm2807_vm5 = vcmp.lt.s32.totalorder %v2785_v45, 4  ;;  %v10333_v11 = vshll.u32 %v2780_v59, 8  ;;  %v10335_v22 = vpop.eup %7348  ;;  %v2803_v3 = vor.u32 %v2802_v15, %v2801_v61 }
 0x282   : > { %12800 = vst [vmem:[#allocation89_spill] sm:$0xff] %v10335_v22  ;;  %v2735_v24 = vsub.s32 0, %v10329_v31  ;;  %vm2806_vm3 = vcmp.lt.s32.totalorder %v2785_v45, 3  ;;  %v2809_v19 = vsel %vm2807_vm5, %v2797_v37, 2102212464  ;;  %v10339_v26 = vpop.eup %7350  ;;  %v2546_v25 = vmul.f32 %v2545_v34, %v2543_v21 }
 0x283   : > { %12801 = vst [vmem:[#allocation90_spill] sm:$0xff] %v10339_v26  ;;  %v12802_v17 = vand.u32 2147483647, %v12762_v43  ;;  %vm2805_vm4 = vcmp.lt.s32.totalorder %v2785_v45, 2  ;;  %v2812_v59 = vsel %vm2804_vm11, %v2791_v27, %v2794_v39  ;;  %v2813_v1 = vsel %vm2807_vm5, %v2800_v5, 920167782 }
 0x284   : > { %v2550_v15 = vsel %vm2465_vm0, %v2549_v32, %v10066_v13  ;;  %v2639_v18 = vshll.u32 %v10225_v8, %v10309_v47  ;;  %v2640_v30 = vshrl.u32 %v2622_v0, %v2638_v60  ;;  %v6896_v49 = vmin.u32 %v2735_v24, %v10329_v31  ;;  %v12805_v24 = vld [vmem:[#allocation10_spill] sm:$0xff] }
 0x285   : > { %vm10343_vm7 = vcmp.le.f32.partialorder %v12802_v17, 0.7853982  ;;  %v2644_v42 = vshll.u32 %v2643_v52, 23  ;;  %v2808_v61 = vsel %vm2804_vm11, %v2788_v2, %v2791_v27  ;;  %v2810_v34 = vsel %vm2806_vm3, %v2794_v39, %v2809_v19 }
 0x286   : > { %v2814_v21 = vsel %vm2806_vm3, %v2797_v37, %v2813_v1  ;;  %vm2568_vm12 = vcmp.lt.s32.totalorder %v12775_v57, 0  ;;  %v2737_v17 = vclz %v6896_v49  ;;  %v2816_v13 = vsel %vm2804_vm11, %v2794_v39, %v2797_v37 }
 0x287   : > { %v2815_v38 = vsel %vm2805_vm4, %v2812_v59, %v2814_v21  ;;  %v2817_v32 = vsel %vm2807_vm5, %v2803_v3, 1326507024  ;;  %vm12406_vm6 = vweird.f32 %v12746_v63  ;;  %v2547_v8 = vxor.u32 2147483648, %v2546_v25 }
 0x288   : > { %v2818_v52 = vsel %vm2806_vm3, %v2800_v5, %v2817_v32  ;;  %v10365_v60 = vmul.u32.u64.low %v10333_v11, %v2815_v38  ;;  %v10366_v47 = vmul.u32.u64.high %v10333_v11, %v2815_v38, %v10365_v60  ;;  %v6897_v0 = vadd.s32 4294967294, %v2737_v17 }
 0x289   : > { %v2811_v27 = vsel %vm2805_vm4, %v2808_v61, %v2810_v34  ;;  %v2819_v2 = vsel %vm2805_vm4, %v2816_v13, %v2818_v52  ;;  %v2878_v19 = vand.u32 2139095040, %v12805_v24  ;;  %v2641_v39 = vor.u32 %v2640_v30, %v2639_v18 }
 0x28a   : > { %v2645_v37 = vor.u32 4788187, %v2644_v42  ;;  %v10373_v3 = vmul.u32.u64.low %v10333_v11, %v2819_v2  ;;  %v10374_v59 = vmul.u32.u64.high %v10333_v11, %v2819_v2, %v10373_v3  ;;  %vm2455_vm11 = vcmp.eq.s32.totalorder %v10299_v46, 0 }
 0x28b   : > { %vm2458_vm5 = vcmp.eq.s32.totalorder %v10299_v46, 2  ;;  %vm6898_vm3 = vcmp.lt.s32.totalorder %v6897_v0, 0  ;;  %v2879_v38 = vshrl.u32 %v2878_v19, 23  ;;  %v12806_v5 = vand.u32 2147483647, %v12775_v57 }
 0x28c   : > { %v2652_v45 = vsub.s32 4, %v10205_v16  ;;  %v2740_v18 = vsel %vm6898_vm3, 0, %v6897_v0  ;;  %v2827_v30 = vmul.u32 %v10333_v11, %v2811_v27  ;;  %v2830_v49 = vadd.s32 1, %v10366_v47 }
 0x28d   : > { %vm10380_vm10 = vcmp.le.f32.partialorder %v12806_v5, 0.7853982  ;;  %v2358_v42 = vsel %vm2351_vm1, %v10306_v44, %v10296_v36  ;;  %v2548_v61 = vsel %vm2465_vm0, %v2547_v8, %v2546_v25  ;;  %v10395_v34 = vsel %vm10343_vm7, 0, %v2550_v15  ;;  %v12810_v36 = vld [vmem:[#allocation11_spill] sm:$0xff] }
 0x28e   : > { %12809 = vst [vmem:[#allocation91_spill] sm:$0xff] %v10395_v34  ;;  %v6903_v21 = vadd.s32 4294967169, %v2879_v38  ;;  %v2646_v17 = vand.u32 2147483647, %v2645_v37  ;;  %v2648_v13 = vcvt.s32.f32 %v2641_v39  ;;  %v2745_v32 = vsub.s32 4294967266, %v2740_v18 }
 0x28f   : > { %vm2829_vm4 = vc.u32 %v10374_v59, %v10365_v60  ;;  %v12397_v52 = vand.u32 2147483647, %v12805_v24  ;;  %v2981_v44 = vand.u32 2139095040, %v12810_v36  ;;  %v12396_v25 = vxor.u32 2147483648, %v10339_v26 }
 0x290   : > { %v2831_v11 = vsel %vm2829_vm4, %v2830_v49, %v10366_v47  ;;  %v2885_v58 = vadd.s32 1, %v6903_v21  ;;  %v12395_v8 = vxor.u32 2147483648, %v10335_v22  ;;  %v2653_v15 = vsel %vm2568_vm12, %v2652_v45, %v10205_v16 }
 0x291   : > { %v2832_v0 = vadd.s32 %v2831_v11, %v2827_v30  ;;  %v10410_v27 = vsel %vm10343_vm7, %v12762_v43, %v2548_v61  ;;  %v2725_v47 = vadd.s32 %v10256_v35, %v10261_v4  ;;  %v2741_v2 = vsub.s32 32, %v2740_v18 }
 0x292   : > { %vm2886_vm0 = vcmp.gt.s32.totalorder %v2885_v58, 0  ;;  %v2649_v19 = vmul.f32 %v2648_v13, %v2646_v17  ;;  %v2746_v39 = vadd.s32 127, %v2745_v32  ;;  %v10416_v38 = vsel %vm12406_vm6, nan, %v2358_v42 }
 0x293   : > { %v2833_v37 = vadd.s32 536870912, %v2832_v0  ;;  %v2887_v3 = vsel %vm2886_vm0, %v2885_v58, 0  ;;  %v10419_v16 = vand.u32 3, %v10395_v34  ;;  %v2882_v33 = vand.u32 8388607, %v12397_v52 }
 0x294   : > { %v2982_v5 = vshrl.u32 %v2981_v44, 23  ;;  %v10428_v35 = vsel %vm2455_vm11, %v10335_v22, %v12396_v25  ;;  %v10435_v4 = vsel %vm2458_vm5, %v12395_v8, %v10339_v26  ;;  %v2889_v30 = vand.u32 31, %v2887_v3 }
 0x295   : > { %v10437_v45 = vshrl.u32 %v2833_v37, 30  ;;  %7352 = vcosq.f32 %v10410_v27  ;;  %v10442_v49 = vsel %vm10380_vm10, 0, %v2653_v15  ;;  %v2742_v42 = vshll.u32 %v10329_v31, %v2740_v18 }
 0x296   : > { %12811 = vst [vmem:[#allocation92_spill] sm:$0xff] %v10442_v49  ;;  %v2743_v61 = vshrl.u32 %v2725_v47, %v2741_v2  ;;  %v2650_v21 = vxor.u32 2147483648, %v2649_v19  ;;  %v2747_v17 = vshll.u32 %v2746_v39, 23  ;;  %v2890_v32 = vsub.s32 32, %v2889_v30 }
 0x297   : > { %v2835_v13 = vshll.u32 %v10437_v45, 30  ;;  %v2883_v11 = vor.u32 8388608, %v2882_v33  ;;  %v2892_v58 = vshll.u32 %v12647_v55, %v2889_v30  ;;  %v2895_v44 = vshll.u32 %v12649_v14, %v2889_v30 }
 0x298   : > { %v6907_v37 = vadd.s32 4294967169, %v2982_v5  ;;  %v2888_v25 = vshrl.u32 %v2887_v3, 5  ;;  %v2893_v15 = vshrl.u32 %v12649_v14, %v2890_v32  ;;  %v2898_v52 = vshll.u32 %v12650_v9, %v2889_v30 }
 0x299   : > { %v10448_v8 = vsub.s32 %v2832_v0, %v2835_v13  ;;  %v2744_v31 = vor.u32 %v2743_v61, %v2742_v42  ;;  %v2896_v18 = vshrl.u32 %v12650_v9, %v2890_v32  ;;  %v2899_v47 = vshrl.u32 %v12660_v41, %v2890_v32 }
 0x29a   : > { %v2901_v2 = vshll.u32 %v12660_v41, %v2889_v30  ;;  %v2651_v39 = vsel %vm2568_vm12, %v2650_v21, %v2649_v19  ;;  %v2748_v33 = vor.u32 4788187, %v2747_v17  ;;  %v2902_v0 = vshrl.u32 %v12679_v53, %v2890_v32 }
 0x29b   : > { %v2838_v5 = vsub.s32 0, %v10448_v8  ;;  %vm2454_vm1 = vcmp.lt.s32.totalorder %v10299_v46, 2  ;;  %v2894_v3 = vor.u32 %v2893_v15, %v2892_v58  ;;  %v2897_v13 = vor.u32 %v2896_v18, %v2895_v44 }
 0x29c   : > { %v2904_v42 = vshll.u32 %v12679_v53, %v2889_v30  ;;  %v10461_v61 = vshll.u32 %v2883_v11, 8  ;;  %v2891_v22 = vshrl.u32 %v12647_v55, %v2890_v32  ;;  %v2900_v26 = vor.u32 %v2899_v47, %v2898_v52 }
 0x29d   : > { %v6900_v63 = vmin.u32 %v2838_v5, %v10448_v8  ;;  %vm2907_vm7 = vcmp.lt.s32.totalorder %v2888_v25, 1  ;;  %v2751_v19 = vcvt.s32.f32 %v2744_v31  ;;  %v2903_v21 = vor.u32 %v2902_v0, %v2901_v2 }
 0x29e   : > { %v2905_v17 = vshrl.u32 %v12680_v28, %v2890_v32  ;;  %v2988_v34 = vadd.s32 1, %v6907_v37  ;;  %v2749_v10 = vand.u32 2147483647, %v2748_v33  ;;  %vm2909_vm12 = vcmp.lt.s32.totalorder %v2888_v25, 3 }
 0x29f   : > { %v2840_v29 = vclz %v6900_v63  ;;  %vm2910_vm11 = vcmp.lt.s32.totalorder %v2888_v25, 4  ;;  %v10466_v58 = vpop.eup %7352  ;;  %vm2908_vm5 = vcmp.lt.s32.totalorder %v2888_v25, 2  ;;  %v2915_v44 = vsel %vm2907_vm7, %v2894_v3, %v2897_v13 }
 0x2a0   : > { %12812 = vst [vmem:[#allocation93_spill] sm:$0xff] %v10466_v58  ;;  %v2906_v30 = vor.u32 %v2905_v17, %v2904_v42  ;;  %v2912_v11 = vsel %vm2910_vm11, %v2900_v26, 2102212464  ;;  %v2911_v52 = vsel %vm2907_vm7, %v2891_v22, %v2894_v3  ;;  %v2916_v18 = vsel %vm2910_vm11, %v2903_v21, 920167782 }
 0x2a1   : > { %v6901_v15 = vadd.s32 4294967294, %v2840_v29  ;;  %v2919_v31 = vsel %vm2907_vm7, %v2897_v13, %v2900_v26  ;;  %vm2671_vm3 = vcmp.lt.s32.totalorder %v12782_v51, 0  ;;  %v2913_v32 = vsel %vm2909_vm12, %v2897_v13, %v2912_v11 }
 0x2a2   : > { %v2917_v63 = vsel %vm2909_vm12, %v2900_v26, %v2916_v18  ;;  %v2920_v37 = vsel %vm2910_vm11, %v2906_v30, 1326507024  ;;  %vm2989_vm4 = vcmp.gt.s32.totalorder %v2988_v34, 0  ;;  %v12410_v29 = vand.u32 2147483647, %v12810_v36 }
 0x2a3   : > { %vm6902_vm0 = vcmp.lt.s32.totalorder %v6901_v15, 0  ;;  %v2918_v47 = vsel %vm2908_vm5, %v2915_v44, %v2917_v63  ;;  %v2921_v2 = vsel %vm2909_vm12, %v2903_v21, %v2920_v37  ;;  %v2654_v26 = vsel %vm10380_vm10, %v12775_v57, %v2651_v39 }
 0x2a4   : > { %v2843_v33 = vsel %vm6902_vm0, 0, %v6901_v15  ;;  %v2922_v22 = vsel %vm2908_vm5, %v2919_v31, %v2921_v2  ;;  %v10479_v5 = vmul.u32.u64.low %v10461_v61, %v2918_v47  ;;  %v10480_v0 = vmul.u32.u64.high %v10461_v61, %v2918_v47, %v10479_v5 }
 0x2a5   : > { %v12813_v3 = vand.u32 2147483647, %v12782_v51  ;;  %v2752_v42 = vmul.f32 %v2751_v19, %v2749_v10  ;;  %v2914_v21 = vsel %vm2908_vm5, %v2911_v52, %v2913_v32  ;;  %v2990_v17 = vsel %vm2989_vm4, %v2988_v34, 0 }
 0x2a6   : > { %v2848_v30 = vsub.s32 4294967266, %v2843_v33  ;;  %v10494_v11 = vmul.u32.u64.low %v10461_v61, %v2922_v22  ;;  %v10495_v44 = vmul.u32.u64.high %v10461_v61, %v2922_v22, %v10494_v11  ;;  %v2992_v15 = vand.u32 31, %v2990_v17 }
 0x2a7   : > { %vm10488_vm7 = vcmp.le.f32.partialorder %v12813_v3, 0.7853982  ;;  %v10501_v1 = vsel %vm2454_vm1, %v10428_v35, %v10435_v4  ;;  %7354 = vsinq.f32 %v10410_v27  ;;  %v10505_v39 = vand.u32 3, %v10442_v49 }
 0x2a8   : > { %v2985_v10 = vand.u32 8388607, %v12410_v29  ;;  %7356 = vcosq.f32 %v2654_v26  ;;  %v2930_v34 = vmul.u32 %v10461_v61, %v2914_v21  ;;  %v2933_v25 = vadd.s32 1, %v10480_v0 }
 0x2a9   : > { %v2993_v19 = vsub.s32 32, %v2992_v15  ;;  %v12408_v52 = vxor.u32 2147483648, %v10466_v58  ;;  %7358 = vsinq.f32 %v2654_v26  ;;  %v2753_v46 = vxor.u32 2147483648, %v2752_v42 }
 0x2aa   : > { %v2755_v35 = vsub.s32 4, %v10316_v7  ;;  %v2828_v27 = vadd.s32 %v10365_v60, %v10374_v59  ;;  %v2844_v4 = vsub.s32 32, %v2843_v33  ;;  %v2849_v18 = vadd.s32 127, %v2848_v30 }
 0x2ab   : > { %vm2932_vm10 = vc.u32 %v10495_v44, %v10479_v5  ;;  %v2986_v61 = vor.u32 8388608, %v2985_v10  ;;  %v2995_v32 = vshll.u32 %v12647_v55, %v2992_v15  ;;  %v2998_v63 = vshll.u32 %v12649_v14, %v2992_v15 }
 0x2ac   : > { %v2934_v31 = vsel %vm2932_vm10, %v2933_v25, %v10480_v0  ;;  %v10520_v47 = vshrl.u32 %v2990_v17, 5  ;;  %v2996_v2 = vshrl.u32 %v12649_v14, %v2993_v19  ;;  %v2999_v22 = vshrl.u32 %v12650_v9, %v2993_v19 }
 0x2ad   : > { %v2935_v37 = vadd.s32 %v2934_v31, %v2930_v34  ;;  %v2754_v60 = vsel %vm2671_vm3, %v2753_v46, %v2752_v42  ;;  %v3001_v59 = vshll.u32 %v12650_v9, %v2992_v15  ;;  %v3002_v26 = vshrl.u32 %v12660_v41, %v2993_v19 }
 0x2ae   : > { %v3004_v0 = vshll.u32 %v12660_v41, %v2992_v15  ;;  %v2845_v3 = vshll.u32 %v10448_v8, %v2843_v33  ;;  %v2846_v21 = vshrl.u32 %v2828_v27, %v2844_v4  ;;  %v2850_v30 = vshll.u32 %v2849_v18, 23 }
 0x2af   : > { %v2936_v11 = vadd.s32 536870912, %v2935_v37  ;;  %vm2561_vm1 = vcmp.eq.s32.totalorder %v10419_v16, 2  ;;  %v2997_v17 = vor.u32 %v2996_v2, %v2995_v32  ;;  %v3000_v10 = vor.u32 %v2999_v22, %v2998_v63 }
 0x2b0   : > { %v3005_v34 = vshrl.u32 %v12679_v53, %v2993_v19  ;;  %v3007_v25 = vshll.u32 %v12679_v53, %v2992_v15  ;;  %v2757_v42 = vsel %vm10488_vm7, %v12782_v51, %v2754_v60  ;;  %v3008_v31 = vshrl.u32 %v12680_v28, %v2993_v19 }
 0x2b1   : > { %v10536_v46 = vshrl.u32 %v2936_v11, 30  ;;  %vm3010_vm12 = vcmp.lt.s32.totalorder %v10520_v47, 1  ;;  %v10540_v8 = vpop.eup %7354  ;;  %vm2558_vm11 = vcmp.eq.s32.totalorder %v10419_v16, 0  ;;  %v3003_v33 = vor.u32 %v3002_v26, %v3001_v59 }
 0x2b2   : > { %12816 = vst [vmem:[#allocation94_spill] sm:$0xff] %v10540_v8  ;;  %v3006_v27 = vor.u32 %v3005_v34, %v3004_v0  ;;  %vm3013_vm5 = vcmp.lt.s32.totalorder %v10520_v47, 4  ;;  %v10544_v4 = vshll.u32 %v2986_v61, 8  ;;  %v10546_v15 = vpop.eup %7356  ;;  %v2847_v18 = vor.u32 %v2846_v21, %v2845_v3 }
 0x2b3   : > { %12817 = vst [vmem:[#allocation95_spill] sm:$0xff] %v10546_v15  ;;  %v2851_v32 = vor.u32 4788187, %v2850_v30  ;;  %v2938_v63 = vshll.u32 %v10536_v46, 30  ;;  %vm3012_vm4 = vcmp.lt.s32.totalorder %v10520_v47, 3  ;;  %v10550_v2 = vpop.eup %7358  ;;  %v3009_v22 = vor.u32 %v3008_v31, %v3007_v25 }
 0x2b4   : > { %12818 = vst [vmem:[#allocation96_spill] sm:$0xff] %v10550_v2  ;;  %vm3011_vm0 = vcmp.lt.s32.totalorder %v10520_v47, 2  ;;  %v3018_v60 = vsel %vm3010_vm12, %v2997_v17, %v3000_v10  ;;  %v3019_v61 = vsel %vm3013_vm5, %v3006_v27, 920167782  ;;  %v12409_v59 = vxor.u32 2147483648, %v10540_v8 }
 0x2b5   : > { %7360 = vcosq.f32 %v2757_v42  ;;  %v10558_v26 = vsub.s32 %v2935_v37, %v2938_v63  ;;  %v2994_v0 = vshrl.u32 %v12647_v55, %v2993_v19  ;;  %v2756_v3 = vsel %vm2671_vm3, %v2755_v35, %v10316_v7 }
 0x2b6   : > { %7362 = vsinq.f32 %v2757_v42  ;;  %v3015_v21 = vsel %vm3013_vm5, %v3003_v33, 2102212464  ;;  %v3020_v30 = vsel %vm3012_vm4, %v3003_v33, %v3019_v61  ;;  %v2852_v11 = vand.u32 2147483647, %v2851_v32 }
 0x2b7   : > { %v2854_v34 = vcvt.s32.f32 %v2847_v18  ;;  %v2941_v25 = vsub.s32 0, %v10558_v26  ;;  %v3021_v37 = vsel %vm3011_vm0, %v3018_v60, %v3020_v30  ;;  %v3022_v19 = vsel %vm3010_vm12, %v3000_v10, %v3003_v33  ;;  %v12820_v60 = vld [vmem:[#allocation12_spill] sm:$0xff] }
 0x2b8   : > { %v3023_v7 = vsel %vm3013_vm5, %v3009_v22, 1326507024  ;;  %v10576_v35 = vmul.u32.u64.low %v10544_v4, %v3021_v37  ;;  %v10577_v42 = vmul.u32.u64.high %v10544_v4, %v3021_v37, %v10576_v35  ;;  %v10582_v31 = vsel %vm10488_vm7, 0, %v2756_v3 }
 0x2b9   : > { %12819 = vst [vmem:[#allocation97_spill] sm:$0xff] %v10582_v31  ;;  %vm2774_vm3 = vcmp.lt.s32.totalorder %v12791_v54, 0  ;;  %v6904_v18 = vmin.u32 %v2941_v25, %v10558_v26  ;;  %v3014_v32 = vsel %vm3010_vm12, %v2994_v0, %v2997_v17  ;;  %v3016_v33 = vsel %vm3012_vm4, %v3000_v10, %v3015_v21 }
 0x2ba   : > { %vm2661_vm10 = vcmp.eq.s32.totalorder %v10505_v39, 0  ;;  %vm2664_vm5 = vcmp.eq.s32.totalorder %v10505_v39, 2  ;;  %v10593_v63 = vand.u32 3, %v10582_v31  ;;  %v3024_v13 = vsel %vm3012_vm4, %v3006_v27, %v3023_v7 }
 0x2bb   : > { %vm12426_vm7 = vweird.f32 %v12759_v12  ;;  %vm2557_vm6 = vcmp.lt.s32.totalorder %v10419_v16, 2  ;;  %v2563_v17 = vsel %vm2561_vm1, %v12408_v52, %v10540_v8  ;;  %v2943_v10 = vclz %v6904_v18  ;;  %v12826_v52 = vld [vmem:[#allocation35_spill] sm:$0xff] }
 0x2bc   : > { %v3025_v22 = vsel %vm3011_vm0, %v3022_v19, %v3024_v13  ;;  %v3084_v61 = vand.u32 2139095040, %v12820_v60  ;;  %vm2660_vm12 = vcmp.lt.s32.totalorder %v10505_v39, 2  ;;  %v12821_v27 = vand.u32 2147483647, %v12791_v54 }
 0x2bd   : > { %v2855_v3 = vmul.f32 %v2854_v34, %v2852_v11  ;;  %v3017_v21 = vsel %vm3011_vm0, %v3014_v32, %v3016_v33  ;;  %v10617_v30 = vmul.u32.u64.low %v10544_v4, %v3025_v22  ;;  %v10618_v25 = vmul.u32.u64.high %v10544_v4, %v3025_v22, %v10617_v30 }
 0x2be   : > { %vm10610_vm4 = vcmp.le.f32.partialorder %v12821_v27, 0.7853982  ;;  %v2560_v37 = vsel %vm2558_vm11, %v10466_v58, %v12409_v59  ;;  %v12411_v19 = vxor.u32 2147483648, %v10546_v15  ;;  %v6905_v7 = vadd.s32 4294967294, %v2943_v10 }
 0x2bf   : > { %v3085_v18 = vshrl.u32 %v3084_v61, 23  ;;  %v12420_v13 = vxor.u32 2147483648, %v10550_v2  ;;  %vm2764_vm1 = vcmp.eq.s32.totalorder %v10593_v63, 0  ;;  %v2858_v47 = vsub.s32 4, %v10437_v45  ;;  %v10630_v34 = vpop.eup %7360 }
 0x2c0   : > { %v3036_v11 = vadd.s32 1, %v10577_v42  ;;  %12824 = vst [vmem:[#allocation98_spill] sm:$0xff] %v10630_v34  ;;  %v2931_v32 = vadd.s32 %v10479_v5, %v10495_v44  ;;  %vm6906_vm0 = vcmp.lt.s32.totalorder %v6905_v7, 0  ;;  %v3033_v33 = vmul.u32 %v10544_v4, %v3017_v21  ;;  %v10635_v27 = vpop.eup %7362 }
 0x2c1   : > { %v6911_v22 = vadd.s32 4294967169, %v3085_v18  ;;  %12825 = vst [vmem:[#allocation99_spill] sm:$0xff] %v10635_v27  ;;  %vm2767_vm11 = vcmp.eq.s32.totalorder %v10593_v63, 2  ;;  %v2856_v10 = vxor.u32 2147483648, %v2855_v3  ;;  %v2946_v61 = vsel %vm6906_vm0, 0, %v6905_v7 }
 0x2c2   : > { %vm3035_vm9 = vc.u32 %v10618_v25, %v10576_v35  ;;  %v2666_v30 = vsel %vm2664_vm5, %v12411_v19, %v10550_v2  ;;  %v2947_v5 = vsub.s32 32, %v2946_v61  ;;  %v2951_v44 = vsub.s32 4294967266, %v2946_v61 }
 0x2c3   : > { %v3187_v4 = vand.u32 2139095040, %v12826_v52  ;;  %v2663_v21 = vsel %vm2661_vm10, %v10546_v15, %v12420_v13  ;;  %v2948_v7 = vshll.u32 %v10558_v26, %v2946_v61  ;;  %v3037_v18 = vsel %vm3035_vm9, %v3036_v11, %v10577_v42 }
 0x2c4   : > { %v3091_v59 = vadd.s32 1, %v6911_v22  ;;  %v2859_v29 = vsel %vm2774_vm3, %v2858_v47, %v10437_v45  ;;  %v2949_v19 = vshrl.u32 %v2931_v32, %v2947_v5  ;;  %v2952_v31 = vadd.s32 127, %v2951_v44 }
 0x2c5   : > { %v3038_v58 = vadd.s32 %v3037_v18, %v3033_v33  ;;  %v12422_v8 = vxor.u32 2147483648, %v10635_v27  ;;  %v12421_v2 = vxor.u32 2147483648, %v10630_v34  ;;  %v2857_v49 = vsel %vm2774_vm3, %v2856_v10, %v2855_v3 }
 0x2c6   : > { %vm3092_vm10 = vcmp.gt.s32.totalorder %v3091_v59, 0  ;;  %v2953_v13 = vshll.u32 %v2952_v31, 23  ;;  %v12423_v42 = vand.u32 2147483647, %v12820_v60  ;;  %v3188_v11 = vshrl.u32 %v3187_v4, 23 }
 0x2c7   : > { %v3039_v26 = vadd.s32 536870912, %v3038_v58  ;;  %v10664_v45 = vsel %vm12426_vm7, nan, %v10501_v1  ;;  %v10668_v47 = vsel %vm2557_vm6, %v2560_v37, %v2563_v17  ;;  %v2950_v32 = vor.u32 %v2949_v19, %v2948_v7 }
 0x2c8   : > { %v3093_v33 = vsel %vm3092_vm10, %v3091_v59, 0  ;;  %v10672_v3 = vsel %vm2660_vm12, %v2663_v21, %v2666_v30  ;;  %v2860_v31 = vsel %vm10610_vm4, %v12791_v54, %v2857_v49  ;;  %v2954_v22 = vor.u32 4788187, %v2953_v13 }
 0x2c9   : > { %v10677_v10 = vshrl.u32 %v3039_v26, 30  ;;  %v10684_v16 = vsel %vm2764_vm1, %v10630_v34, %v12422_v8  ;;  %v10691_v1 = vsel %vm2767_vm11, %v12421_v2, %v10635_v27  ;;  %v10695_v49 = vsel %vm10610_vm4, 0, %v2859_v29 }
 0x2ca   : > { %12827 = vst [vmem:[#allocation100_spill] sm:$0xff] %v10695_v49  ;;  %v3095_v39 = vand.u32 31, %v3093_v33  ;;  %v3088_v37 = vand.u32 8388607, %v12423_v42  ;;  %v6915_v19 = vadd.s32 4294967169, %v3188_v11  ;;  %7364 = vcosq.f32 %v2860_v31 }
 0x2cb   : > { %v3041_v17 = vshll.u32 %v10677_v10, 30  ;;  %v2957_v13 = vcvt.s32.f32 %v2950_v32  ;;  %v3094_v61 = vshrl.u32 %v3093_v33, 5  ;;  %v2955_v5 = vand.u32 2147483647, %v2954_v22 }
 0x2cc   : > { %v3096_v30 = vsub.s32 32, %v3095_v39  ;;  %v3098_v0 = vshll.u32 %v12647_v55, %v3095_v39  ;;  %v3101_v29 = vshll.u32 %v12649_v14, %v3095_v39  ;;  %v3104_v7 = vshll.u32 %v12650_v9, %v3095_v39 }
 0x2cd   : > { %v10701_v44 = vsub.s32 %v3038_v58, %v3041_v17  ;;  %v3107_v18 = vshll.u32 %v12660_v41, %v3095_v39  ;;  %v3089_v11 = vor.u32 8388608, %v3088_v37  ;;  %v3194_v33 = vadd.s32 1, %v6915_v19 }
 0x2ce   : > { %v3099_v4 = vshrl.u32 %v12649_v14, %v3096_v30  ;;  %v3102_v21 = vshrl.u32 %v12650_v9, %v3096_v30  ;;  %v3105_v32 = vshrl.u32 %v12660_v41, %v3096_v30  ;;  %7366 = vsinq.f32 %v2860_v31 }
 0x2cf   : > { %v3044_v26 = vsub.s32 0, %v10701_v44  ;;  %v3034_v58 = vadd.s32 %v10576_v35, %v10618_v25  ;;  %v3097_v22 = vshrl.u32 %v12647_v55, %v3096_v30  ;;  %v3108_v17 = vshrl.u32 %v12679_v53, %v3096_v30 }
 0x2d0   : > { %vm12452_vm9 = vweird.f32 %v12762_v43  ;;  %vm12451_vm6 = vweird.f32 %v12775_v57  ;;  %vm2763_vm3 = vcmp.lt.s32.totalorder %v10593_v63, 2  ;;  %v3100_v37 = vor.u32 %v3099_v4, %v3098_v0 }
 0x2d1   : > { %v6908_v2 = vmin.u32 %v3044_v26, %v10701_v44  ;;  %v3103_v8 = vor.u32 %v3102_v21, %v3101_v29  ;;  %v3110_v19 = vshll.u32 %v12679_v53, %v3095_v39  ;;  %vm2877_vm5 = vcmp.lt.s32.totalorder %v12805_v24, 0 }
 0x2d2   : > { %v2958_v31 = vmul.f32 %v2957_v13, %v2955_v5  ;;  %v3106_v35 = vor.u32 %v3105_v32, %v3104_v7  ;;  %v3109_v25 = vor.u32 %v3108_v17, %v3107_v18  ;;  %vm3113_vm12 = vcmp.lt.s32.totalorder %v3094_v61, 1 }
 0x2d3   : > { %v3046_v42 = vclz %v6908_v2  ;;  %v3111_v59 = vshrl.u32 %v12680_v28, %v3096_v30  ;;  %v3129_v34 = vshll.u32 %v3089_v11, 8  ;;  %vm3195_vm4 = vcmp.gt.s32.totalorder %v3194_v33, 0 }
 0x2d4   : > { %vm12446_vm1 = vweird.f32 %v12782_v51  ;;  %vm3114_vm0 = vcmp.lt.s32.totalorder %v3094_v61, 2  ;;  %vm3115_vm11 = vcmp.lt.s32.totalorder %v3094_v61, 3  ;;  %vm3116_vm10 = vcmp.lt.s32.totalorder %v3094_v61, 4  ;;  %v10731_v4 = vpop.eup %7364 }
 0x2d5   : > { %v3117_v0 = vsel %vm3113_vm12, %v3097_v22, %v3100_v37  ;;  %v12828_v39 = vand.u32 2147483647, %v12805_v24  ;;  %v6909_v13 = vadd.s32 4294967294, %v3046_v42  ;;  %v3112_v5 = vor.u32 %v3111_v59, %v3110_v19  ;;  %12831 = vst [vmem:[#allocation101_spill] sm:$0xff] %v10731_v4 }
 0x2d6   : > { %v3118_v2 = vsel %vm3116_vm10, %v3106_v35, 2102212464  ;;  %v3121_v30 = vsel %vm3113_vm12, %v3100_v37, %v3103_v8  ;;  %v2959_v21 = vxor.u32 2147483648, %v2958_v31  ;;  %v3122_v18 = vsel %vm3116_vm10, %v3109_v25, 920167782 }
 0x2d7   : > { %vm10726_vm7 = vcmp.le.f32.partialorder %v12828_v39, 0.7853982  ;;  %v3119_v7 = vsel %vm3115_vm11, %v3103_v8, %v3118_v2  ;;  %v3125_v26 = vsel %vm3113_vm12, %v3103_v8, %v3106_v35  ;;  %vm6910_vm8 = vcmp.lt.s32.totalorder %v6909_v13, 0 }
 0x2d8   : > { %v3123_v11 = vsel %vm3115_vm11, %v3106_v35, %v3122_v18  ;;  %v3126_v32 = vsel %vm3116_vm10, %v3112_v5, 1326507024  ;;  %v3196_v22 = vsel %vm3195_vm4, %v3194_v33, 0  ;;  %v3049_v17 = vsel %vm6910_vm8, 0, %v6909_v13  ;;  %v10742_v8 = vpop.eup %7366 }
 0x2d9   : > { %v3120_v42 = vsel %vm3114_vm0, %v3117_v0, %v3119_v7  ;;  %v3124_v59 = vsel %vm3114_vm0, %v3121_v30, %v3123_v11  ;;  %v3127_v37 = vsel %vm3115_vm11, %v3109_v25, %v3126_v32  ;;  %v3050_v19 = vsub.s32 32, %v3049_v17  ;;  %12832 = vst [vmem:[#allocation102_spill] sm:$0xff] %v10742_v8 }
 0x2da   : > { %v3051_v39 = vshll.u32 %v10701_v44, %v3049_v17  ;;  %v3054_v2 = vsub.s32 4294967266, %v3049_v17  ;;  %v3128_v27 = vsel %vm3114_vm0, %v3125_v26, %v3127_v37  ;;  %v10752_v0 = vand.u32 3, %v10695_v49 }
 0x2db   : > { %v10744_v15 = vmul.u32.u64.low %v3129_v34, %v3128_v27  ;;  %v10745_v35 = vmul.u32.u64.high %v3129_v34, %v3128_v27, %v10744_v15  ;;  %v10747_v5 = vmul.u32.u64.low %v3129_v34, %v3124_v59  ;;  %v10748_v33 = vmul.u32.u64.high %v3129_v34, %v3124_v59, %v10747_v5 }
 0x2dc   : > { %v3052_v13 = vshrl.u32 %v3034_v58, %v3050_v19  ;;  %v3055_v25 = vadd.s32 127, %v3054_v2  ;;  %v3198_v30 = vand.u32 31, %v3196_v22  ;;  %v10757_v61 = vsel %vm12452_vm9, nan, %v10668_v47 }
 0x2dd   : > { %v10762_v27 = vsel %vm12451_vm6, nan, %v10672_v3  ;;  %v2770_v15 = vsel %vm2763_vm3, %v10684_v16, %v10691_v1  ;;  %v12833_v44 = vsub.s32 4, %v10536_v46  ;;  %v2960_v47 = vsel %vm2877_vm5, %v2959_v21, %v2958_v31 }
 0x2de   : > { %v3056_v7 = vshll.u32 %v3055_v25, 23  ;;  %v3136_v18 = vmul.u32 %v3129_v34, %v3120_v42  ;;  %v3199_v26 = vsub.s32 32, %v3198_v30  ;;  %v3053_v11 = vor.u32 %v3052_v13, %v3051_v39 }
 0x2df   : > { %v2962_v58 = vsel %vm2877_vm5, %v12833_v44, %v10536_v46  ;;  %vm3138_vm8 = vc.u32 %v10745_v35, %v10747_v5  ;;  %v3139_v3 = vadd.s32 1, %v10748_v33  ;;  %v12432_v63 = vand.u32 2147483647, %v12826_v52 }
 0x2e0   : > { %v10781_v16 = vsel %vm12446_vm1, nan, %v2770_v15  ;;  %vm2870_vm3 = vcmp.eq.s32.totalorder %v10752_v0, 2  ;;  %v10786_v46 = vsel %vm10726_vm7, 0, %v2962_v58  ;;  %v3057_v34 = vor.u32 4788187, %v3056_v7 }
 0x2e1   : > { %12834 = vst [vmem:[#allocation103_spill] sm:$0xff] %v10786_v46  ;;  %vm2867_vm5 = vcmp.eq.s32.totalorder %v10752_v0, 0  ;;  %v2963_v31 = vsel %vm10726_vm7, %v12805_v24, %v2960_v47  ;;  %v3140_v21 = vsel %vm3138_vm8, %v3139_v3, %v10748_v33  ;;  %v3201_v32 = vshll.u32 %v12647_v55, %v3198_v30 }
 0x2e2   : > { %v3141_v17 = vadd.s32 %v3140_v21, %v3136_v18  ;;  %v3202_v42 = vshrl.u32 %v12649_v14, %v3199_v26  ;;  %v3204_v59 = vshll.u32 %v12649_v14, %v3198_v30  ;;  %v3205_v37 = vshrl.u32 %v12650_v9, %v3199_v26 }
 0x2e3   : > { %v3060_v39 = vcvt.s32.f32 %v3053_v11  ;;  %v3191_v2 = vand.u32 8388607, %v12432_v63  ;;  %v3197_v13 = vshrl.u32 %v3196_v22, 5  ;;  %v3058_v29 = vand.u32 2147483647, %v3057_v34 }
 0x2e4   : > { %v3142_v25 = vadd.s32 536870912, %v3141_v17  ;;  %v3207_v33 = vshll.u32 %v12650_v9, %v3198_v30  ;;  %v3208_v15 = vshrl.u32 %v12660_v41, %v3199_v26  ;;  %7368 = vcosq.f32 %v2963_v31 }
 0x2e5   : > { %vm2980_vm7 = vcmp.lt.s32.totalorder %v12810_v36, 0  ;;  %v3210_v44 = vshll.u32 %v12660_v41, %v3198_v30  ;;  %v3211_v58 = vshrl.u32 %v12679_v53, %v3199_v26  ;;  %v3213_v47 = vshll.u32 %v12679_v53, %v3198_v30 }
 0x2e6   : > { %v10807_v7 = vshrl.u32 %v3142_v25, 30  ;;  %v3203_v18 = vor.u32 %v3202_v42, %v3201_v32  ;;  %v3206_v11 = vor.u32 %v3205_v37, %v3204_v59  ;;  %v3214_v22 = vshrl.u32 %v12680_v28, %v3199_v26 }
 0x2e7   : > { %vm2866_vm12 = vcmp.lt.s32.totalorder %v10752_v0, 2  ;;  %7370 = vsinq.f32 %v2963_v31  ;;  %v3192_v3 = vor.u32 8388608, %v3191_v2  ;;  %v3212_v34 = vor.u32 %v3211_v58, %v3210_v44  ;;  %v12838_v31 = vld [vmem:[#allocation36_spill] sm:$0xff] }
 0x2e8   : > { %vm3216_vm4 = vcmp.lt.s32.totalorder %v3197_v13, 1  ;;  %v3061_v21 = vmul.f32 %v3060_v39, %v3058_v29  ;;  %v3144_v63 = vshll.u32 %v10807_v7, 30  ;;  %v3209_v19 = vor.u32 %v3208_v15, %v3207_v33 }
 0x2e9   : > { %vm3219_vm0 = vcmp.lt.s32.totalorder %v3197_v13, 4  ;;  %v10813_v1 = vand.u32 3, %v10786_v46  ;;  %v12835_v30 = vand.u32 2147483647, %v12810_v36  ;;  %v3215_v42 = vor.u32 %v3214_v22, %v3213_v47 }
 0x2ea   : > { %vm3218_vm10 = vcmp.lt.s32.totalorder %v3197_v13, 3  ;;  %v3290_v59 = vand.u32 2139095040, %v12838_v31  ;;  %v10822_v37 = vsub.s32 %v3141_v17, %v3144_v63  ;;  %v3200_v39 = vshrl.u32 %v12647_v55, %v3199_v26 }
 0x2eb   : > { %vm10817_vm11 = vcmp.le.f32.partialorder %v12835_v30, 0.7853982  ;;  %vm3217_vm8 = vcmp.lt.s32.totalorder %v3197_v13, 2  ;;  %v3224_v2 = vsel %vm3216_vm4, %v3203_v18, %v3206_v11  ;;  %v12839_v29 = vxor.u32 2147483648, %v10731_v4 }
 0x2ec   : > { %v3221_v33 = vsel %vm3219_vm0, %v3209_v19, 2102212464  ;;  %v3225_v15 = vsel %vm3219_vm0, %v3212_v34, 920167782  ;;  %v3232_v44 = vshll.u32 %v3192_v3, 8  ;;  %v12840_v58 = vxor.u32 2147483648, %v10742_v8 }
 0x2ed   : > { %v2872_v25 = vsel %vm2870_vm3, %v12839_v29, %v10742_v8  ;;  %v3062_v63 = vxor.u32 2147483648, %v3061_v21  ;;  %v3147_v17 = vsub.s32 0, %v10822_v37  ;;  %v3226_v47 = vsel %vm3218_vm10, %v3209_v19, %v3225_v15 }
 0x2ee   : > { %v2869_v26 = vsel %vm2867_vm5, %v10731_v4, %v12840_v58  ;;  %v3227_v22 = vsel %vm3217_vm8, %v3224_v2, %v3226_v47  ;;  %v3228_v30 = vsel %vm3216_vm4, %v3206_v11, %v3209_v19  ;;  %v3229_v29 = vsel %vm3219_vm0, %v3215_v42, 1326507024  ;;  %v10847_v4 = vpop.eup %7368 }
 0x2ef   : > { %v3291_v51 = vshrl.u32 %v3290_v59, 23  ;;  %v3064_v3 = vsub.s32 4, %v10677_v10  ;;  %v6912_v8 = vmin.u32 %v3147_v17, %v10822_v37  ;;  %v3220_v57 = vsel %vm3216_vm4, %v3200_v39, %v3203_v18  ;;  %12841 = vst [vmem:[#allocation104_spill] sm:$0xff] %v10847_v4 }
 0x2f0   : > { %v3222_v58 = vsel %vm3218_vm10, %v3206_v11, %v3221_v33  ;;  %v3230_v46 = vsel %vm3218_vm10, %v3212_v34, %v3229_v29  ;;  %v10850_v15 = vmul.u32.u64.low %v3232_v44, %v3227_v22  ;;  %v10851_v43 = vmul.u32.u64.high %v3232_v44, %v3227_v22, %v10850_v15 }
 0x2f1   : > { %v6919_v19 = vadd.s32 4294967169, %v3291_v51  ;;  %vm2970_vm3 = vcmp.eq.s32.totalorder %v10813_v1, 0  ;;  %v3063_v42 = vsel %vm2980_vm7, %v3062_v63, %v3061_v21  ;;  %v3149_v59 = vclz %v6912_v8  ;;  %v10858_v18 = vpop.eup %7370 }
 0x2f2   : > { %v3231_v2 = vsel %vm3217_vm8, %v3228_v30, %v3230_v46  ;;  %12842 = vst [vmem:[#allocation105_spill] sm:$0xff] %v10858_v18  ;;  %v3223_v11 = vsel %vm3217_vm8, %v3220_v57, %v3222_v58  ;;  %v10866_v17 = vsel %vm2866_vm12, %v2869_v26, %v2872_v25  ;;  %vm2973_vm5 = vcmp.eq.s32.totalorder %v10813_v1, 2 }
 0x2f3   : > { %v10861_v39 = vmul.u32.u64.low %v3232_v44, %v3231_v2  ;;  %v10862_v33 = vmul.u32.u64.high %v3232_v44, %v3231_v2, %v10861_v39  ;;  %v3297_v34 = vadd.s32 1, %v6919_v19  ;;  %v6913_v51 = vadd.s32 4294967294, %v3149_v59 }
 0x2f4   : > { %v12443_v21 = vand.u32 2147483647, %v12838_v31  ;;  %vm2969_vm4 = vcmp.lt.s32.totalorder %v10813_v1, 2  ;;  %v3065_v8 = vsel %vm2980_vm7, %v3064_v3, %v10677_v10  ;;  %v3137_v57 = vadd.s32 %v10747_v5, %v10745_v35 }
 0x2f5   : > { %v3242_v46 = vadd.s32 1, %v10851_v43  ;;  %vm3298_vm0 = vcmp.gt.s32.totalorder %v3297_v34, 0  ;;  %v3066_v0 = vsel %vm10817_vm11, %v12810_v36, %v3063_v42  ;;  %vm6914_vm12 = vcmp.lt.s32.totalorder %v6913_v51, 0 }
 0x2f6   : > { %v3239_v13 = vmul.u32 %v3232_v44, %v3223_v11  ;;  %v3299_v25 = vsel %vm3298_vm0, %v3297_v34, 0  ;;  %v12442_v26 = vxor.u32 2147483648, %v10858_v18  ;;  %v12441_v63 = vxor.u32 2147483648, %v10847_v4 }
 0x2f7   : > { %v3152_v47 = vsel %vm6914_vm12, 0, %v6913_v51  ;;  %vm3241_vm7 = vc.u32 %v10862_v33, %v10850_v15  ;;  %v10886_v10 = vsel %vm10817_vm11, 0, %v3065_v8  ;;  %7372 = vcosq.f32 %v3066_v0 }
 0x2f8   : > { %12843 = vst [vmem:[#allocation106_spill] sm:$0xff] %v10886_v10  ;;  %v3153_v35 = vsub.s32 32, %v3152_v47  ;;  %v3154_v5 = vshll.u32 %v10822_v37, %v3152_v47  ;;  %v3157_v22 = vsub.s32 4294967266, %v3152_v47  ;;  %v3243_v44 = vsel %vm3241_vm7, %v3242_v46, %v10851_v43 }
 0x2f9   : > { %v3294_v30 = vand.u32 8388607, %v12443_v21  ;;  %v3301_v29 = vand.u32 31, %v3299_v25  ;;  %7374 = vsinq.f32 %v3066_v0  ;;  %v3244_v19 = vadd.s32 %v3243_v44, %v3239_v13 }
 0x2fa   : > { %v3155_v3 = vshrl.u32 %v3137_v57, %v3153_v35  ;;  %v3158_v58 = vadd.s32 127, %v3157_v22  ;;  %v2972_v32 = vsel %vm2970_vm3, %v10847_v4, %v12442_v26  ;;  %v2975_v43 = vsel %vm2973_vm5, %v12441_v63, %v10858_v18 }
 0x2fb   : > { %v10903_v37 = vand.u32 3, %v10886_v10  ;;  %v3302_v42 = vsub.s32 32, %v3301_v29  ;;  %v3245_v11 = vadd.s32 536870912, %v3244_v19  ;;  %v3304_v39 = vshll.u32 %v12647_v55, %v3301_v29 }
 0x2fc   : > { %v3156_v59 = vor.u32 %v3155_v3, %v3154_v5  ;;  %v3159_v2 = vshll.u32 %v3158_v58, 23  ;;  %v3295_v34 = vor.u32 8388608, %v3294_v30  ;;  %v3307_v8 = vshll.u32 %v12649_v14, %v3301_v29 }
 0x2fd   : > { %v3305_v51 = vshrl.u32 %v12649_v14, %v3302_v42  ;;  %v3308_v57 = vshrl.u32 %v12650_v9, %v3302_v42  ;;  %vm3083_vm11 = vcmp.lt.s32.totalorder %v12820_v60, 0  ;;  %v10910_v13 = vshrl.u32 %v3245_v11, 30 }
 0x2fe   : > { %v3160_v46 = vor.u32 4788187, %v3159_v2  ;;  %v3163_v0 = vcvt.s32.f32 %v3156_v59  ;;  %v3300_v47 = vshrl.u32 %v3299_v25, 5  ;;  %v3310_v35 = vshll.u32 %v12650_v9, %v3301_v29 }
 0x2ff   : > { %v3311_v5 = vshrl.u32 %v12660_v41, %v3302_v42  ;;  %v3313_v22 = vshll.u32 %v12660_v41, %v3301_v29  ;;  %v3314_v44 = vshrl.u32 %v12679_v53, %v3302_v42  ;;  %v10918_v30 = vsel %vm2969_vm4, %v2972_v32, %v2975_v43 }
 0x300   : > { %vm3073_vm10 = vcmp.eq.s32.totalorder %v10903_v37, 0  ;;  %vm3076_vm8 = vcmp.eq.s32.totalorder %v10903_v37, 2  ;;  %v3161_v3 = vand.u32 2147483647, %v3160_v46  ;;  %v3247_v58 = vshll.u32 %v10910_v13, 30  ;;  %v12847_v46 = vld [vmem:[#allocation37_spill] sm:$0xff] }
 0x301   : > { %v3306_v25 = vor.u32 %v3305_v51, %v3304_v39  ;;  %v3309_v59 = vor.u32 %v3308_v57, %v3307_v8  ;;  %v3315_v2 = vor.u32 %v3314_v44, %v3313_v22  ;;  %v3316_v11 = vshll.u32 %v12679_v53, %v3301_v29  ;;  %v10934_v4 = vpop.eup %7372 }
 0x302   : > { %v3317_v63 = vshrl.u32 %v12680_v28, %v3302_v42  ;;  %v12844_v26 = vand.u32 2147483647, %v12820_v60  ;;  %v3164_v32 = vmul.f32 %v3163_v0, %v3161_v3  ;;  %v10931_v43 = vsub.s32 %v3244_v19, %v3247_v58  ;;  %12848 = vst [vmem:[#allocation37_spill] sm:$0xff] %v10934_v4 }
 0x303   : > { %vm3319_vm5 = vcmp.lt.s32.totalorder %v3300_v47, 1  ;;  %v3393_v21 = vand.u32 2139095040, %v12847_v46  ;;  %v3303_v39 = vshrl.u32 %v12647_v55, %v3302_v42  ;;  %v3312_v51 = vor.u32 %v3311_v5, %v3310_v35  ;;  %v10939_v8 = vpop.eup %7374 }
 0x304   : > { %vm10927_vm3 = vcmp.le.f32.partialorder %v12844_v26, 0.7853982  ;;  %vm3322_vm4 = vcmp.lt.s32.totalorder %v3300_v47, 4  ;;  %v10937_v29 = vshll.u32 %v3295_v34, 8  ;;  %12849 = vst [vmem:[#allocation107_spill] sm:$0xff] %v10939_v8  ;;  %vm3072_vm0 = vcmp.lt.s32.totalorder %v10903_v37, 2 }
 0x305   : > { %v3250_v26 = vsub.s32 0, %v10931_v43  ;;  %v3318_v57 = vor.u32 %v3317_v63, %v3316_v11  ;;  %vm3320_vm12 = vcmp.lt.s32.totalorder %v3300_v47, 2  ;;  %vm3321_vm7 = vcmp.lt.s32.totalorder %v3300_v47, 3 }
 0x306   : > { %v3165_v19 = vxor.u32 2147483648, %v3164_v32  ;;  %v3324_v0 = vsel %vm3322_vm4, %v3312_v51, 2102212464  ;;  %v3327_v22 = vsel %vm3319_vm5, %v3306_v25, %v3309_v59  ;;  %v3328_v42 = vsel %vm3322_vm4, %v3315_v2, 920167782 }
 0x307   : > { %v3167_v34 = vsub.s32 4, %v10807_v7  ;;  %v6916_v5 = vmin.u32 %v3250_v26, %v10931_v43  ;;  %v3394_v44 = vshrl.u32 %v3393_v21, 23  ;;  %v12453_v3 = vxor.u32 2147483648, %v10939_v8 }
 0x308   : > { %v3323_v63 = vsel %vm3319_vm5, %v3303_v39, %v3306_v25  ;;  %v3325_v58 = vsel %vm3321_vm7, %v3309_v59, %v3324_v0  ;;  %v3329_v11 = vsel %vm3321_vm7, %v3312_v51, %v3328_v42  ;;  %vm2864_vm1 = vweird.f32 %v12791_v54 }
 0x309   : > { %v3252_v18 = vclz %v6916_v5  ;;  %v3330_v10 = vsel %vm3320_vm12, %v3327_v22, %v3329_v11  ;;  %v3331_v35 = vsel %vm3319_vm5, %v3309_v59, %v3312_v51  ;;  %v12454_v49 = vand.u32 2147483647, %v12847_v46 }
 0x30a   : > { %vm2967_vm6 = vweird.f32 %v12805_v24  ;;  %v3166_v21 = vsel %vm3083_vm11, %v3165_v19, %v3164_v32  ;;  %v3332_v25 = vsel %vm3322_vm4, %v3318_v57, 1326507024  ;;  %vm12463_vm9 = vweird.f32 %v12810_v36 }
 0x30b   : > { %v10962_v39 = vmul.u32.u64.low %v10937_v29, %v3330_v10  ;;  %v10963_v26 = vmul.u32.u64.high %v10937_v29, %v3330_v10, %v10962_v39  ;;  %v6917_v0 = vadd.s32 4294967294, %v3252_v18  ;;  %v3326_v22 = vsel %vm3320_vm12, %v3323_v63, %v3325_v58 }
 0x30c   : > { %v3333_v59 = vsel %vm3321_vm7, %v3315_v2, %v3332_v25  ;;  %v6923_v51 = vadd.s32 4294967169, %v3394_v44  ;;  %v3075_v32 = vsel %vm3073_vm10, %v10934_v4, %v12453_v3  ;;  %v12850_v57 = vxor.u32 2147483648, %v10934_v4 }
 0x30d   : > { %v3240_v18 = vadd.s32 %v10850_v15, %v10862_v33  ;;  %v3334_v19 = vsel %vm3320_vm12, %v3331_v35, %v3333_v59  ;;  %vm6918_vm5 = vcmp.lt.s32.totalorder %v6917_v0, 0  ;;  %v3169_v44 = vsel %vm10927_vm3, %v12820_v60, %v3166_v21 }
 0x30e   : > { %v3078_v10 = vsel %vm3076_vm8, %v12850_v57, %v10939_v8  ;;  %v10983_v2 = vmul.u32.u64.low %v10937_v29, %v3334_v19  ;;  %v10984_v42 = vmul.u32.u64.high %v10937_v29, %v3334_v19, %v10983_v2  ;;  %v3400_v5 = vadd.s32 1, %v6923_v51 }
 0x30f   : > { %v3255_v63 = vsel %vm6918_vm5, 0, %v6917_v0  ;;  %v3342_v58 = vmul.u32 %v10937_v29, %v3326_v22  ;;  %v3345_v11 = vadd.s32 1, %v10963_v26  ;;  %v3079_v47 = vsel %vm3072_vm0, %v3075_v32, %v3078_v10 }
 0x310   : > { %v3256_v25 = vsub.s32 32, %v3255_v63  ;;  %v3257_v15 = vshll.u32 %v10931_v43, %v3255_v63  ;;  %v3260_v33 = vsub.s32 4294967266, %v3255_v63  ;;  %vm3401_vm10 = vcmp.gt.s32.totalorder %v3400_v5, 0 }
 0x311   : > { %v3168_v35 = vsel %vm3083_vm11, %v3167_v34, %v10807_v7  ;;  %v3397_v21 = vand.u32 8388607, %v12454_v49  ;;  %v3402_v0 = vsel %vm3401_vm10, %v3400_v5, 0  ;;  %7376 = vcosq.f32 %v3169_v44 }
 0x312   : > { %v3258_v29 = vshrl.u32 %v3240_v18, %v3256_v25  ;;  %v3261_v22 = vadd.s32 127, %v3260_v33  ;;  %vm3344_vm8 = vc.u32 %v10984_v42, %v10962_v39  ;;  %7378 = vsinq.f32 %v3169_v44 }
 0x313   : > { %v3270_v43 = vsub.s32 4, %v10910_v13  ;;  %v3346_v37 = vsel %vm3344_vm8, %v3345_v11, %v10963_v26  ;;  %v3404_v59 = vand.u32 31, %v3402_v0  ;;  %v3496_v7 = vand.u32 2139095040, %v9154_v50 }
 0x314   : > { %v3259_v51 = vor.u32 %v3258_v29, %v3257_v15  ;;  %v3262_v32 = vshll.u32 %v3261_v22, 23  ;;  %v3347_v57 = vadd.s32 %v3346_v37, %v3342_v58  ;;  %v11007_v34 = vsel %vm2864_vm1, nan, %v10866_v17 }
 0x315   : > { %v11011_v10 = vsel %vm10927_vm3, 0, %v3168_v35  ;;  %vm3186_vm11 = vcmp.lt.s32.totalorder %v12826_v52, 0  ;;  %v3405_v18 = vsub.s32 32, %v3404_v59  ;;  %v11017_v26 = vsel %vm2967_vm6, nan, %v10918_v30 }
 0x316   : > { %v11020_v19 = vand.u32 3, %v11011_v10  ;;  %v3263_v2 = vor.u32 4788187, %v3262_v32  ;;  %v3348_v5 = vadd.s32 536870912, %v3347_v57  ;;  %v11024_v17 = vsel %vm12463_vm9, nan, %v3079_v47 }
 0x317   : > { %v3266_v1 = vcvt.s32.f32 %v3259_v51  ;;  %v11029_v44 = vsel %vm3186_vm11, %v3270_v43, %v10910_v13  ;;  %v12458_v63 = vand.u32 2147483647, %v9154_v50  ;;  %v3398_v11 = vor.u32 8388608, %v3397_v21 }
 0x318   : > { %v3264_v58 = vand.u32 2147483647, %v3263_v2  ;;  %v11032_v30 = vshrl.u32 %v3348_v5, 30  ;;  %v3497_v25 = vshrl.u32 %v3496_v7, 23  ;;  %v3407_v15 = vshll.u32 %v12647_v55, %v3404_v59 }
 0x319   : > { %v3408_v33 = vshrl.u32 %v12649_v14, %v3405_v18  ;;  %v3410_v47 = vshll.u32 %v12649_v14, %v3404_v59  ;;  %v3411_v35 = vshrl.u32 %v12650_v9, %v3405_v18  ;;  %v3403_v22 = vshrl.u32 %v3402_v0, 5 }
 0x31a   : > { %v3350_v29 = vshll.u32 %v11032_v30, 30  ;;  %v3413_v13 = vshll.u32 %v12650_v9, %v3404_v59  ;;  %v3414_v43 = vshrl.u32 %v12660_v41, %v3405_v18  ;;  %v3267_v37 = vmul.f32 %v3266_v1, %v3264_v58 }
 0x31b   : > { %v3416_v51 = vshll.u32 %v12660_v41, %v3404_v59  ;;  %v3417_v21 = vshrl.u32 %v12679_v53, %v3405_v18  ;;  %v3419_v32 = vshll.u32 %v12679_v53, %v3404_v59  ;;  %v11044_v7 = vpop.eup %7376  ;;  %vm3176_vm3 = vcmp.eq.s32.totalorder %v11020_v19, 0 }
 0x31c   : > { %12851 = vst [vmem:[#allocation108_spill] sm:$0xff] %v11044_v7  ;;  %vm3179_vm4 = vcmp.eq.s32.totalorder %v11020_v19, 2  ;;  %v11048_v2 = vsub.s32 %v3347_v57, %v3350_v29  ;;  %v3420_v0 = vshrl.u32 %v12680_v28, %v3405_v18  ;;  %v11051_v5 = vshll.u32 %v3398_v11, 8  ;;  %v11057_v58 = vpop.eup %7378 }
 0x31d   : > { %v11055_v1 = vand.u32 8388607, %v12458_v63  ;;  %12852 = vst [vmem:[#allocation109_spill] sm:$0xff] %v11057_v58  ;;  %v3343_v59 = vadd.s32 %v10962_v39, %v10984_v42  ;;  %v3406_v3 = vshrl.u32 %v12647_v55, %v3405_v18  ;;  %v3409_v49 = vor.u32 %v3408_v33, %v3407_v15 }
 0x31e   : > { %v3412_v36 = vor.u32 %v3411_v35, %v3410_v47  ;;  %v12853_v57 = vand.u32 2147483647, %v12826_v52  ;;  %v3353_v11 = vsub.s32 0, %v11048_v2  ;;  %v3415_v4 = vor.u32 %v3414_v43, %v3413_v13 }
 0x31f   : > { %v3418_v63 = vor.u32 %v3417_v21, %v3416_v51  ;;  %vm3422_vm12 = vcmp.lt.s32.totalorder %v3403_v22, 1  ;;  %v3268_v8 = vxor.u32 2147483648, %v3267_v37  ;;  %v3421_v24 = vor.u32 %v3420_v0, %v3419_v32 }
 0x320   : > { %vm11064_vm0 = vcmp.le.f32.partialorder %v12853_v57, 0.7853982  ;;  %vm3425_vm7 = vcmp.lt.s32.totalorder %v3403_v22, 4  ;;  %v6927_v54 = vadd.s32 4294967169, %v3497_v25  ;;  %vm3175_vm5 = vcmp.lt.s32.totalorder %v11020_v19, 2 }
 0x321   : > { %v12465_v39 = vxor.u32 2147483648, %v11057_v58  ;;  %v12464_v42 = vxor.u32 2147483648, %v11044_v7  ;;  %v6920_v18 = vmin.u32 %v3353_v11, %v11048_v2  ;;  %vm3424_vm10 = vcmp.lt.s32.totalorder %v3403_v22, 3 }
 0x322   : > { %vm3423_vm8 = vcmp.lt.s32.totalorder %v3403_v22, 2  ;;  %v3426_v15 = vsel %vm3422_vm12, %v3406_v3, %v3409_v49  ;;  %v3427_v33 = vsel %vm3425_vm7, %v3415_v4, 2102212464  ;;  %v3430_v47 = vsel %vm3422_vm12, %v3409_v49, %v3412_v36 }
 0x323   : > { %v3355_v35 = vclz %v6920_v18  ;;  %v3428_v13 = vsel %vm3424_vm10, %v3412_v36, %v3427_v33  ;;  %v3431_v25 = vsel %vm3425_vm7, %v3418_v63, 920167782  ;;  %v3434_v43 = vsel %vm3422_vm12, %v3412_v36, %v3415_v4 }
 0x324   : > { %v3269_v51 = vsel %vm3186_vm11, %v3268_v8, %v3267_v37  ;;  %v3432_v21 = vsel %vm3424_vm10, %v3415_v4, %v3431_v25  ;;  %v3435_v32 = vsel %vm3425_vm7, %v3421_v24, 1326507024  ;;  %v3503_v0 = vadd.s32 1, %v6927_v54 }
 0x325   : > { %v6921_v3 = vadd.s32 4294967294, %v3355_v35  ;;  %v3429_v57 = vsel %vm3423_vm8, %v3426_v15, %v3428_v13  ;;  %v3433_v49 = vsel %vm3423_vm8, %v3430_v47, %v3432_v21  ;;  %v3436_v11 = vsel %vm3424_vm10, %v3418_v63, %v3435_v32 }
 0x326   : > { %vm12466_vm9 = vweird.f32 %v12820_v60  ;;  %v3437_v18 = vsel %vm3423_vm8, %v3434_v43, %v3436_v11  ;;  %v11089_v36 = vmul.u32.u64.low %v11051_v5, %v3433_v49  ;;  %v11090_v33 = vmul.u32.u64.high %v11051_v5, %v3433_v49, %v11089_v36 }
 0x327   : > { %vm3504_vm11 = vcmp.gt.s32.totalorder %v3503_v0, 0  ;;  %vm6922_vm12 = vcmp.lt.s32.totalorder %v6921_v3, 0  ;;  %v11094_v54 = vmul.u32.u64.low %v11051_v5, %v3437_v18  ;;  %v11095_v24 = vmul.u32.u64.high %v11051_v5, %v3437_v18, %v11094_v54 }
 0x328   : > { %v3505_v4 = vsel %vm3504_vm11, %v3503_v0, 0  ;;  %v3178_v8 = vsel %vm3176_vm3, %v11044_v7, %v12465_v39  ;;  %v3181_v63 = vsel %vm3179_vm4, %v12464_v42, %v11057_v58  ;;  %v3358_v22 = vsel %vm6922_vm12, 0, %v6921_v3 }
 0x329   : > { %v3507_v37 = vand.u32 31, %v3505_v4  ;;  %vm3289_vm7 = vcmp.lt.s32.totalorder %v12838_v31, 0  ;;  %v3359_v15 = vsub.s32 32, %v3358_v22  ;;  %v3360_v47 = vshll.u32 %v11048_v2, %v3358_v22 }
 0x32a   : > { %v3363_v35 = vsub.s32 4294967266, %v3358_v22  ;;  %v3445_v13 = vmul.u32 %v11051_v5, %v3429_v57  ;;  %v3272_v25 = vsel %vm11064_vm0, %v12826_v52, %v3269_v51  ;;  %v11116_v43 = vsel %vm11064_vm0, 0, %v11029_v44 }
 0x32b   : > { %v3448_v21 = vadd.s32 1, %v11090_v33  ;;  %v3508_v32 = vsub.s32 32, %v3507_v37  ;;  %v11120_v0 = vand.u32 3, %v11116_v43  ;;  %v3361_v3 = vshrl.u32 %v3343_v59, %v3359_v15 }
 0x32c   : > { %v3364_v2 = vadd.s32 127, %v3363_v35  ;;  %vm3447_vm3 = vc.u32 %v11095_v24, %v11089_v36  ;;  %v3182_v5 = vsel %vm3175_vm5, %v3178_v8, %v3181_v63  ;;  %v12856_v51 = vand.u32 2147483647, %v12838_v31 }
 0x32d   : > { %v3373_v44 = vsub.s32 4, %v11032_v30  ;;  %v3449_v57 = vsel %vm3447_vm3, %v3448_v21, %v11090_v33  ;;  %v3501_v49 = vor.u32 8388608, %v11055_v1  ;;  %7380 = vcosq.f32 %v3272_v25 }
 0x32e   : > { %vm11128_vm4 = vcmp.le.f32.partialorder %v12856_v51, 0.7853982  ;;  %v3362_v59 = vor.u32 %v3361_v3, %v3360_v47  ;;  %v3365_v11 = vshll.u32 %v3364_v2, 23  ;;  %v3450_v18 = vadd.s32 %v3449_v57, %v3445_v13 }
 0x32f   : > { %7382 = vsinq.f32 %v3272_v25  ;;  %v3510_v19 = vshll.u32 %v12647_v55, %v3507_v37  ;;  %v3511_v54 = vshrl.u32 %v12649_v14, %v3508_v32  ;;  %v3513_v8 = vshll.u32 %v12649_v14, %v3507_v37 }
 0x330   : > { %v3366_v63 = vor.u32 4788187, %v3365_v11  ;;  %v3369_v22 = vcvt.s32.f32 %v3362_v59  ;;  %v3451_v15 = vadd.s32 536870912, %v3450_v18  ;;  %v3514_v35 = vshrl.u32 %v12650_v9, %v3508_v32 }
 0x331   : > { %v3506_v51 = vshrl.u32 %v3505_v4, 5  ;;  %v3516_v33 = vshll.u32 %v12650_v9, %v3507_v37  ;;  %v3517_v1 = vshrl.u32 %v12660_v41, %v3508_v32  ;;  %v3519_v47 = vshll.u32 %v12660_v41, %v3507_v37 }
 0x332   : > { %v11144_v13 = vsel %vm12466_vm9, nan, %v3182_v5  ;;  %v3367_v25 = vand.u32 2147483647, %v3366_v63  ;;  %v11146_v21 = vshrl.u32 %v3451_v15, 30  ;;  %v3520_v3 = vshrl.u32 %v12679_v53, %v3508_v32 }
 0x333   : > { %v3374_v2 = vsel %vm3289_vm7, %v3373_v44, %v11032_v30  ;;  %v3512_v4 = vor.u32 %v3511_v54, %v3510_v19  ;;  %v3522_v57 = vshll.u32 %v12679_v53, %v3507_v37  ;;  %v3523_v59 = vshrl.u32 %v12680_v28, %v3508_v32 }
 0x334   : > { %v3370_v11 = vmul.f32 %v3369_v22, %v3367_v25  ;;  %v3453_v42 = vshll.u32 %v11146_v21, 30  ;;  %v3515_v39 = vor.u32 %v3514_v35, %v3513_v8  ;;  %v3521_v5 = vor.u32 %v3520_v3, %v3519_v47 }
 0x335   : > { %v3509_v63 = vshrl.u32 %v12647_v55, %v3508_v32  ;;  %v3518_v15 = vor.u32 %v3517_v1, %v3516_v33  ;;  %vm3525_vm0 = vcmp.lt.s32.totalorder %v3506_v51, 1  ;;  %vm3528_vm5 = vcmp.lt.s32.totalorder %v3506_v51, 4 }
 0x336   : > { %vm3279_vm10 = vcmp.eq.s32.totalorder %v11120_v0, 0  ;;  %vm3282_vm8 = vcmp.eq.s32.totalorder %v11120_v0, 2  ;;  %v3371_v30 = vxor.u32 2147483648, %v3370_v11  ;;  %v11160_v37 = vsel %vm11128_vm4, 0, %v3374_v2 }
 0x337   : > { %12859 = vst [vmem:[#allocation110_spill] sm:$0xff] %v11160_v37  ;;  %v11162_v44 = vsub.s32 %v3450_v18, %v3453_v42  ;;  %vm3527_vm11 = vcmp.lt.s32.totalorder %v3506_v51, 3  ;;  %v3524_v19 = vor.u32 %v3523_v59, %v3522_v57  ;;  %v3530_v54 = vsel %vm3528_vm5, %v3518_v15, 2102212464  ;;  %v11168_v22 = vpop.eup %7380 }
 0x338   : > { %v3534_v32 = vsel %vm3528_vm5, %v3521_v5, 920167782  ;;  %v11166_v8 = vshll.u32 %v3501_v49, 8  ;;  %12860 = vst [vmem:[#allocation111_spill] sm:$0xff] %v11168_v22  ;;  %v3372_v35 = vsel %vm3289_vm7, %v3371_v30, %v3370_v11  ;;  %vm3526_vm12 = vcmp.lt.s32.totalorder %v3506_v51, 2 }
 0x339   : > { %v3456_v33 = vsub.s32 0, %v11162_v44  ;;  %v3533_v1 = vsel %vm3525_vm0, %v3512_v4, %v3515_v39  ;;  %v11174_v42 = vpop.eup %7382  ;;  %v3375_v18 = vsel %vm11128_vm4, %v12838_v31, %v3372_v35  ;;  %v11180_v47 = vand.u32 3, %v11160_v37 }
 0x33a   : > { %12861 = vst [vmem:[#allocation112_spill] sm:$0xff] %v11174_v42  ;;  %vm3392_vm3 = vcmp.lt.s32.totalorder %v12847_v46, 0  ;;  %v3529_v49 = vsel %vm3525_vm0, %v3509_v63, %v3512_v4  ;;  %v3535_v25 = vsel %vm3527_vm11, %v3518_v15, %v3534_v32  ;;  %vm3278_vm7 = vcmp.lt.s32.totalorder %v11120_v0, 2 }
 0x33b   : > { %7384 = vcosq.f32 %v3375_v18  ;;  %v6924_v3 = vmin.u32 %v3456_v33, %v11162_v44  ;;  %v3531_v2 = vsel %vm3527_vm11, %v3515_v39, %v3530_v54  ;;  %v3537_v57 = vsel %vm3525_vm0, %v3515_v39, %v3518_v15 }
 0x33c   : > { %v12468_v29 = vxor.u32 2147483648, %v11168_v22  ;;  %7386 = vsinq.f32 %v3375_v18  ;;  %v3536_v59 = vsel %vm3526_vm12, %v3533_v1, %v3535_v25  ;;  %v3538_v11 = vsel %vm3528_vm5, %v3524_v19, 1326507024 }
 0x33d   : > { %v3458_v30 = vclz %v6924_v3  ;;  %v3539_v4 = vsel %vm3527_vm11, %v3521_v5, %v3538_v11  ;;  %v11194_v63 = vmul.u32.u64.low %v11166_v8, %v3536_v59  ;;  %v11195_v32 = vmul.u32.u64.high %v11166_v8, %v3536_v59, %v11194_v63 }
 0x33e   : > { %v12467_v35 = vxor.u32 2147483648, %v11174_v42  ;;  %v12862_v54 = vand.u32 2147483647, %v12847_v46  ;;  %v3476_v15 = vsub.s32 4, %v11146_v21  ;;  %v3532_v33 = vsel %vm3526_vm12, %v3529_v49, %v3531_v2 }
 0x33f   : > { %v3540_v19 = vsel %vm3526_vm12, %v3537_v57, %v3539_v4  ;;  %v6925_v1 = vadd.s32 4294967294, %v3458_v30  ;;  %v3599_v25 = vand.u32 2139095040, %v9160_v20  ;;  %vm12488_vm0 = vweird.f32 %v12826_v52  ;;  %v12865_v57 = vld [vmem:[#allocation17_spill] sm:$0xff] }
 0x340   : > { %vm11200_vm4 = vcmp.le.f32.partialorder %v12862_v54, 0.7853982  ;;  %v11208_v5 = vmul.u32.u64.low %v11166_v8, %v3540_v19  ;;  %v11209_v18 = vmul.u32.u64.high %v11166_v8, %v3540_v19, %v11208_v5  ;;  %vm3382_vm5 = vcmp.eq.s32.totalorder %v11180_v47, 0 }
 0x341   : > { %vm3385_vm11 = vcmp.eq.s32.totalorder %v11180_v47, 2  ;;  %v3446_v3 = vadd.s32 %v11089_v36, %v11095_v24  ;;  %v12473_v49 = vand.u32 2147483647, %v9160_v20  ;;  %vm6926_vm9 = vcmp.lt.s32.totalorder %v6925_v1, 0 }
 0x342   : > { %v3551_v51 = vadd.s32 1, %v11195_v32  ;;  %v3600_v2 = vshrl.u32 %v3599_v25, 23  ;;  %v3702_v59 = vand.u32 2139095040, %v12865_v57  ;;  %v3281_v11 = vsel %vm3279_vm10, %v11168_v22, %v12467_v35 }
 0x343   : > { %v3284_v36 = vsel %vm3282_vm8, %v12468_v29, %v11174_v42  ;;  %vm3381_vm12 = vcmp.lt.s32.totalorder %v11180_v47, 2  ;;  %v3461_v24 = vsel %vm6926_vm9, 0, %v6925_v1  ;;  %v3548_v30 = vmul.u32 %v11166_v8, %v3532_v33 }
 0x344   : > { %v3462_v4 = vsub.s32 32, %v3461_v24  ;;  %v3463_v54 = vshll.u32 %v11162_v44, %v3461_v24  ;;  %v3466_v19 = vsub.s32 4294967266, %v3461_v24  ;;  %v3477_v5 = vsel %vm3392_vm3, %v3476_v15, %v11146_v21 }
 0x345   : > { %vm3550_vm10 = vc.u32 %v11209_v18, %v11194_v63  ;;  %v6931_v25 = vadd.s32 4294967169, %v3600_v2  ;;  %v3603_v35 = vand.u32 8388607, %v12473_v49  ;;  %v3703_v29 = vshrl.u32 %v3702_v59, 23  ;;  %v11239_v22 = vpop.eup %7384 }
 0x346   : > { %12866 = vst [vmem:[#allocation17_spill] sm:$0xff] %v11239_v22  ;;  %v3464_v1 = vshrl.u32 %v3446_v3, %v3462_v4  ;;  %v3467_v42 = vadd.s32 127, %v3466_v19  ;;  %v3552_v8 = vsel %vm3550_vm10, %v3551_v51, %v11195_v32  ;;  %v11243_v33 = vpop.eup %7386  ;;  %v3285_v21 = vsel %vm3278_vm7, %v3281_v11, %v3284_v36 }
 0x347   : > { %12867 = vst [vmem:[#allocation113_spill] sm:$0xff] %v11243_v33  ;;  %v12475_v15 = vxor.u32 2147483648, %v11239_v22  ;;  %v3553_v2 = vadd.s32 %v3552_v8, %v3548_v30  ;;  %v3606_v24 = vadd.s32 1, %v6931_v25  ;;  %v12476_v49 = vxor.u32 2147483648, %v11243_v33 }
 0x348   : > { %v3465_v59 = vor.u32 %v3464_v1, %v3463_v54  ;;  %v3468_v60 = vshll.u32 %v3467_v42, 23  ;;  %v11251_v3 = vsel %vm11200_vm4, 0, %v3477_v5  ;;  %v3604_v51 = vor.u32 8388608, %v3603_v35 }
 0x349   : > { %12868 = vst [vmem:[#allocation114_spill] sm:$0xff] %v11251_v3  ;;  %v3554_v32 = vadd.s32 536870912, %v3553_v2  ;;  %vm3607_vm9 = vcmp.gt.s32.totalorder %v3606_v24, 0  ;;  %v6935_v4 = vadd.s32 4294967169, %v3703_v29  ;;  %v12869_v11 = vand.u32 2147483647, %v12865_v57 }
 0x34a   : > { %v3469_v19 = vor.u32 4788187, %v3468_v60  ;;  %v3472_v44 = vcvt.s32.f32 %v3465_v59  ;;  %v3608_v0 = vsel %vm3607_vm9, %v3606_v24, 0  ;;  %v3384_v42 = vsel %vm3382_vm5, %v11239_v22, %v12476_v49 }
 0x34b   : > { %v11255_v36 = vand.u32 8388607, %v12869_v11  ;;  %v3387_v35 = vsel %vm3385_vm11, %v12475_v15, %v11243_v33  ;;  %v3555_v29 = vshrl.u32 %v3554_v32, 30  ;;  %v3610_v60 = vand.u32 31, %v3608_v0 }
 0x34c   : > { %v11269_v30 = vsel %vm12488_vm0, nan, %v3285_v21  ;;  %v3470_v54 = vand.u32 2147483647, %v3469_v19  ;;  %v11272_v5 = vand.u32 3, %v11251_v3  ;;  %v11275_v25 = vadd.s32 %v11194_v63, %v11209_v18 }
 0x34d   : > { %v3556_v1 = vshll.u32 %v3555_v29, 30  ;;  %v3611_v8 = vsub.s32 32, %v3610_v60  ;;  %v11277_v24 = vshll.u32 %v3604_v51, 8  ;;  %v11279_v59 = vadd.s32 1, %v6935_v4 }
 0x34e   : > { %v11283_v32 = vsel %vm3381_vm12, %v3384_v42, %v3387_v35  ;;  %v3473_v11 = vmul.f32 %v3472_v44, %v3470_v54  ;;  %v3613_v21 = vshll.u32 %v12647_v55, %v3610_v60  ;;  %v3707_v19 = vor.u32 8388608, %v11255_v36 }
 0x34f   : > { %v11287_v15 = vsub.s32 %v3553_v2, %v3556_v1  ;;  %v3614_v63 = vshrl.u32 %v12649_v14, %v3611_v8  ;;  %v3616_v18 = vshll.u32 %v12649_v14, %v3610_v60  ;;  %v3619_v51 = vshll.u32 %v12650_v9, %v3610_v60 }
 0x350   : > { %v3474_v49 = vxor.u32 2147483648, %v3473_v11  ;;  %vm3495_vm8 = vcmp.lt.s32.totalorder %v9154_v50, 0  ;;  %v3617_v47 = vshrl.u32 %v12650_v9, %v3611_v8  ;;  %v3620_v4 = vshrl.u32 %v12660_v41, %v3611_v8 }
 0x351   : > { %v3622_v44 = vshll.u32 %v12660_v41, %v3610_v60  ;;  %v3559_v42 = vsub.s32 0, %v11287_v15  ;;  %v3609_v36 = vshrl.u32 %v3608_v0, 5  ;;  %v3623_v2 = vshrl.u32 %v12679_v53, %v3611_v8 }
 0x352   : > { %vm3710_vm7 = vcmp.gt.s32.totalorder %v11279_v59, 0  ;;  %v3475_v35 = vsel %vm3392_vm3, %v3474_v49, %v3473_v11  ;;  %v3579_v54 = vsub.s32 4, %v3555_v29  ;;  %v3612_v1 = vshrl.u32 %v12647_v55, %v3611_v8 }
 0x353   : > { %v3625_v22 = vshll.u32 %v12679_v53, %v3610_v60  ;;  %vm12495_vm5 = vweird.f32 %v12838_v31  ;;  %v3478_v33 = vsel %vm11200_vm4, %v12847_v46, %v3475_v35  ;;  %v6928_v0 = vmin.u32 %v3559_v42, %v11287_v15 }
 0x354   : > { %v3615_v52 = vor.u32 %v3614_v63, %v3613_v21  ;;  %v3618_v3 = vor.u32 %v3617_v47, %v3616_v18  ;;  %7388 = vcosq.f32 %v3478_v33  ;;  %v3621_v37 = vor.u32 %v3620_v4, %v3619_v51 }
 0x355   : > { %v3624_v7 = vor.u32 %v3623_v2, %v3622_v44  ;;  %v3626_v49 = vshrl.u32 %v12680_v28, %v3611_v8  ;;  %7390 = vsinq.f32 %v3478_v33  ;;  %v12870_v11 = vand.u32 2147483647, %v9154_v50 }
 0x356   : > { %v3561_v58 = vclz %v6928_v0  ;;  %vm3628_vm11 = vcmp.lt.s32.totalorder %v3609_v36, 1  ;;  %vm3629_vm12 = vcmp.lt.s32.totalorder %v3609_v36, 2  ;;  %vm3630_vm4 = vcmp.lt.s32.totalorder %v3609_v36, 3 }
 0x357   : > { %vm11311_vm3 = vcmp.le.f32.partialorder %v12870_v11, 0.7853982  ;;  %v3627_v39 = vor.u32 %v3626_v49, %v3625_v22  ;;  %vm3631_vm10 = vcmp.lt.s32.totalorder %v3609_v36, 4  ;;  %v3632_v21 = vsel %vm3628_vm11, %v3612_v1, %v3615_v52 }
 0x358   : > { %v6929_v63 = vadd.s32 4294967294, %v3561_v58  ;;  %v3633_v18 = vsel %vm3631_vm10, %v3621_v37, 2102212464  ;;  %v3636_v51 = vsel %vm3628_vm11, %v3615_v52, %v3618_v3  ;;  %v3637_v47 = vsel %vm3631_vm10, %v3624_v7, 920167782 }
 0x359   : > { %v3634_v4 = vsel %vm3630_vm4, %v3618_v3, %v3633_v18  ;;  %v3638_v8 = vsel %vm3630_vm4, %v3621_v37, %v3637_v47  ;;  %v3640_v33 = vsel %vm3628_vm11, %v3618_v3, %v3621_v37  ;;  %v3641_v44 = vsel %vm3631_vm10, %v3627_v39, 1326507024 }
 0x35a   : > { %vm3485_vm9 = vcmp.eq.s32.totalorder %v11272_v5, 0  ;;  %vm6930_vm0 = vcmp.lt.s32.totalorder %v6929_v63, 0  ;;  %v3580_v42 = vsel %vm3495_vm8, %v3579_v54, %v3555_v29  ;;  %v3639_v2 = vsel %vm3629_vm12, %v3636_v51, %v3638_v8 }
 0x35b   : > { %v3642_v22 = vsel %vm3630_vm4, %v3624_v7, %v3641_v44  ;;  %v3564_v35 = vsel %vm6930_vm0, 0, %v6929_v63  ;;  %v11321_v58 = vmul.u32.u64.low %v11277_v24, %v3639_v2  ;;  %v11322_v52 = vmul.u32.u64.high %v11277_v24, %v3639_v2, %v11321_v58  ;;  %v12874_v44 = vld [vmem:[#allocation65_spill] sm:$0xff] }
 0x35c   : > { %v3643_v1 = vsel %vm3629_vm12, %v3640_v33, %v3642_v22  ;;  %v3565_v0 = vsub.s32 32, %v3564_v35  ;;  %v3566_v37 = vshll.u32 %v11287_v15, %v3564_v35  ;;  %v3569_v3 = vsub.s32 4294967266, %v3564_v35 }
 0x35d   : > { %v3635_v49 = vsel %vm3629_vm12, %v3632_v21, %v3634_v4  ;;  %vm3488_vm11 = vcmp.eq.s32.totalorder %v11272_v5, 2  ;;  %v11329_v29 = vmul.u32.u64.low %v11277_v24, %v3643_v1  ;;  %v11330_v54 = vmul.u32.u64.high %v11277_v24, %v3643_v1, %v11329_v29 }
 0x35e   : > { %v3711_v7 = vsel %vm3710_vm7, %v11279_v59, 0  ;;  %v3567_v11 = vshrl.u32 %v11275_v25, %v3565_v0  ;;  %v3570_v39 = vadd.s32 127, %v3569_v3  ;;  %v11336_v18 = vshll.u32 %v3707_v19, 8  ;;  %v11338_v15 = vpop.eup %7388  ;;  %v12876_v3 = vld [vmem:[#allocation45_spill] sm:$0xff] }
 0x35f   : > { %v3713_v63 = vand.u32 31, %v3711_v7  ;;  %v11343_v36 = vsel %vm12495_vm5, nan, %v11283_v32  ;;  %v11347_v21 = vsel %vm11311_vm3, 0, %v3580_v42  ;;  %v3651_v51 = vmul.u32 %v11277_v24, %v3635_v49  ;;  %v11351_v25 = vpop.eup %7390  ;;  %v12873_v24 = vld [vmem:[#allocation44_spill] sm:$0xff]  ;;  %v12877_v49 = vld [vmem:[#allocation66_spill] sm:$0xff] }
 0x360   : > { %v3654_v59 = vadd.s32 1, %v11322_v52  ;;  %v3568_v47 = vor.u32 %v3567_v11, %v3566_v37  ;;  %v3571_v19 = vshll.u32 %v3570_v39, 23  ;;  %v11354_v4 = vand.u32 3, %v11347_v21  ;;  %v12879_v11 = vld [vmem:[#allocation14_spill] sm:$0xff] }
 0x361   : > { %v3714_v8 = vsub.s32 32, %v3713_v63  ;;  %vm3484_vm0 = vcmp.lt.s32.totalorder %v11272_v5, 2  ;;  %v12489_v32 = vxor.u32 2147483648, %v11351_v25  ;;  %v12490_v33 = vxor.u32 2147483648, %v11338_v15 }
 0x362   : > { %vm3653_vm7 = vc.u32 %v11330_v54, %v11321_v58  ;;  %v11363_v42 = vmul.f32 %v12874_v44, %v12873_v24  ;;  %v3572_v2 = vor.u32 4788187, %v3571_v19  ;;  %v3575_v22 = vcvt.s32.f32 %v3568_v47 }
 0x363   : > { %v3655_v35 = vsel %vm3653_vm7, %v3654_v59, %v11322_v52  ;;  %v11366_v1 = vshrl.u32 %v3711_v7, 5  ;;  %vm3598_vm12 = vcmp.lt.s32.totalorder %v9160_v20, 0  ;;  %v3716_v37 = vshll.u32 %v12647_v55, %v3713_v63 }
 0x364   : > { %12875 = vst [vmem:[#allocation65_spill] sm:$0xff] %v11363_v42  ;;  %v3656_v0 = vadd.s32 %v3655_v35, %v3651_v51  ;;  %v11372_v29 = vmul.f32 %v12877_v49, %v12876_v3  ;;  %v11376_v39 = vmul.f32 %v9612_v23, %v12879_v11  ;;  %v3573_v44 = vand.u32 2147483647, %v3572_v2 }
 0x365   : > { %v3717_v47 = vshrl.u32 %v12649_v14, %v3714_v8  ;;  %v3719_v52 = vshll.u32 %v12649_v14, %v3713_v63  ;;  %v3720_v7 = vshrl.u32 %v12650_v9, %v3714_v8  ;;  %vm12494_vm4 = vweird.f32 %v12847_v46 }
 0x366   : > { %12878 = vst [vmem:[#allocation66_spill] sm:$0xff] %v11372_v29  ;;  %12880 = vst [vmem:[#allocation115_spill] sm:$0xff] %v11376_v39  ;;  %v3487_v51 = vsel %vm3485_vm9, %v11338_v15, %v12489_v32  ;;  %v3490_v23 = vsel %vm3488_vm11, %v12490_v33, %v11351_v25  ;;  %v3657_v59 = vadd.s32 536870912, %v3656_v0  ;;  %v3722_v19 = vshll.u32 %v12650_v9, %v3713_v63 }
 0x367   : > { %v3576_v14 = vmul.f32 %v3575_v22, %v3573_v44  ;;  %v12881_v2 = vand.u32 2147483647, %v9160_v20  ;;  %v3715_v49 = vshrl.u32 %v12647_v55, %v3714_v8  ;;  %v3723_v32 = vshrl.u32 %v12660_v41, %v3714_v8 }
 0x368   : > { %v3725_v39 = vshll.u32 %v12660_v41, %v3713_v63  ;;  %v3658_v29 = vshrl.u32 %v3657_v59, 30  ;;  %v3726_v42 = vshrl.u32 %v12679_v53, %v3714_v8  ;;  %v3728_v33 = vshll.u32 %v12679_v53, %v3713_v63 }
 0x369   : > { %vm11395_vm10 = vcmp.le.f32.partialorder %v12881_v2, 0.7853982  ;;  %v3729_v9 = vshrl.u32 %v12680_v28, %v3714_v8  ;;  %v3577_v22 = vxor.u32 2147483648, %v3576_v14  ;;  %v3718_v44 = vor.u32 %v3717_v47, %v3716_v37 }
 0x36a   : > { %v3721_v11 = vor.u32 %v3720_v7, %v3719_v52  ;;  %v3724_v2 = vor.u32 %v3723_v32, %v3722_v19  ;;  %v3659_v3 = vshll.u32 %v3658_v29, 30  ;;  %v3682_v24 = vsub.s32 4, %v3658_v29  ;;  %v12884_v52 = vld [vmem:[#allocation46_spill] sm:$0xff] }
 0x36b   : > { %v3727_v31 = vor.u32 %v3726_v42, %v3725_v39  ;;  %vm3731_vm9 = vcmp.lt.s32.totalorder %v11366_v1, 1  ;;  %v3578_v55 = vsel %vm3495_vm8, %v3577_v22, %v3576_v14  ;;  %v3730_v41 = vor.u32 %v3729_v9, %v3728_v33  ;;  %v12885_v7 = vld [vmem:[#allocation30_spill] sm:$0xff] }
 0x36c   : > { %vm3733_vm11 = vcmp.lt.s32.totalorder %v11366_v1, 3  ;;  %vm3734_vm7 = vcmp.lt.s32.totalorder %v11366_v1, 4  ;;  %v3581_v28 = vsel %vm11311_vm3, %v9154_v50, %v3578_v55  ;;  %v11413_v53 = vsub.s32 %v3656_v0, %v3659_v3  ;;  %v12887_v55 = vld [vmem:[#allocation15_spill] sm:$0xff] }
 0x36d   : > { %v3735_v63 = vsel %vm3731_vm9, %v3715_v49, %v3718_v44  ;;  %v3736_v8 = vsel %vm3734_vm7, %v3724_v2, 2102212464  ;;  %v3491_v32 = vsel %vm3484_vm0, %v3487_v51, %v3490_v23  ;;  %7392 = vcosq.f32 %v3581_v28 }
 0x36e   : > { %v3683_v33 = vsel %vm3598_vm12, %v3682_v24, %v3658_v29  ;;  %v3737_v42 = vsel %vm3733_vm11, %v3721_v11, %v3736_v8  ;;  %7394 = vsinq.f32 %v3581_v28  ;;  %v3662_v60 = vsub.s32 0, %v11413_v53  ;;  %v12889_v28 = vld [vmem:[#allocation47_spill] sm:$0xff] }
 0x36f   : > { %vm3732_vm8 = vcmp.lt.s32.totalorder %v11366_v1, 2  ;;  %v3739_v0 = vsel %vm3731_vm9, %v3718_v44, %v3721_v11  ;;  %vm3591_vm3 = vcmp.eq.s32.totalorder %v11354_v4, 2  ;;  %v3740_v37 = vsel %vm3734_vm7, %v3727_v31, 920167782  ;;  %v12891_v1 = vld [vmem:[#allocation48_spill] sm:$0xff] }
 0x370   : > { %v3738_v5 = vsel %vm3732_vm8, %v3735_v63, %v3737_v42  ;;  %v3743_v24 = vsel %vm3731_vm9, %v3721_v11, %v3724_v2  ;;  %v3744_v3 = vsel %vm3734_vm7, %v3730_v41, 1326507024  ;;  %vm3588_vm0 = vcmp.eq.s32.totalorder %v11354_v4, 0  ;;  %v12895_v42 = vld [vmem:[#allocation13_spill] sm:$0xff] }
 0x371   : > { %v3652_v29 = vadd.s32 %v11321_v58, %v11330_v54  ;;  %v6932_v39 = vmin.u32 %v3662_v60, %v11413_v53  ;;  %v11444_v47 = vsel %vm11395_vm10, 0, %v3683_v33  ;;  %v11448_v51 = vmul.f32 %v12885_v7, %v12884_v52  ;;  %v12897_v60 = vld [vmem:[#allocation29_spill] sm:$0xff] }
 0x372   : > { %v11452_v11 = vsel %vm12494_vm4, nan, %v3491_v32  ;;  %vm3587_vm9 = vcmp.lt.s32.totalorder %v11354_v4, 2  ;;  %v11456_v23 = vand.u32 3, %v11444_v47  ;;  %v3741_v58 = vsel %vm3733_vm11, %v3724_v2, %v3740_v37  ;;  %v12893_v32 = vld [vmem:[#allocation49_spill] sm:$0xff]  ;;  %v12903_v37 = vld [vmem:[#allocation52_spill] sm:$0xff] }
 0x373   : > { %12886 = vst [vmem:[#allocation46_spill] sm:$0xff] %v11448_v51  ;;  %v3745_v54 = vsel %vm3733_vm11, %v3727_v31, %v3744_v3  ;;  %vm12493_vm7 = vweird.f32 %v9154_v50  ;;  %v3664_v59 = vclz %v6932_v39  ;;  %v3742_v19 = vsel %vm3732_vm8, %v3739_v0, %v3741_v58  ;;  %v12899_v0 = vld [vmem:[#allocation50_spill] sm:$0xff] }
 0x374   : > { %v3746_v14 = vsel %vm3732_vm8, %v3743_v24, %v3745_v54  ;;  %v3754_v49 = vmul.u32 %v11336_v18, %v3738_v5  ;;  %v11473_v44 = vmul.u32.u64.low %v11336_v18, %v3742_v19  ;;  %v11474_v2 = vmul.u32.u64.high %v11336_v18, %v3742_v19, %v11473_v44  ;;  %v12901_v5 = vld [vmem:[#allocation51_spill] sm:$0xff]  ;;  %v12905_v24 = vld [vmem:[#allocation53_spill] sm:$0xff]  ;;  %v12907_v39 = vld [vmem:[#allocation54_spill] sm:$0xff] }
 0x375   : > { %v11469_v9 = vmul.u32.u64.low %v11336_v18, %v3746_v14  ;;  %v11470_v22 = vmul.u32.u64.high %v11336_v18, %v3746_v14, %v11469_v9  ;;  %v6933_v31 = vadd.s32 4294967294, %v3664_v59  ;;  %v11478_v41 = vmul.f32 %v10038_v62, %v12887_v55  ;;  %v12909_v14 = vld [vmem:[#allocation40_spill] sm:$0xff] }
 0x376   : > { %v11482_v63 = vmul.f32 %v10042_v6, %v12889_v28  ;;  %v11486_v8 = vmul.f32 %v10163_v40, %v12891_v1  ;;  %v11490_v33 = vmul.f32 %v10195_v48, %v12893_v32  ;;  %v11494_v18 = vmul.f32 %v10266_v56, %v12895_v42 }
 0x377   : > { %12888 = vst [vmem:[#allocation30_spill] sm:$0xff] %v11478_v41  ;;  %v11498_v62 = vmul.f32 %v10416_v38, %v12897_v60  ;;  %v11502_v6 = vmul.f32 %v10664_v45, %v12899_v0  ;;  %vm6934_vm11 = vcmp.lt.s32.totalorder %v6933_v31, 0  ;;  %v11506_v40 = vmul.f32 %v10757_v61, %v12901_v5  ;;  %v11516_v3 = vpop.eup %7392 }
 0x378   : > { %12890 = vst [vmem:[#allocation15_spill] sm:$0xff] %v11482_v63  ;;  %12892 = vst [vmem:[#allocation47_spill] sm:$0xff] %v11486_v8  ;;  %v11510_v48 = vmul.f32 %v10762_v27, %v12903_v37  ;;  %v11514_v56 = vmul.f32 %v10781_v16, %v12905_v24  ;;  %v3667_v38 = vsel %vm6934_vm11, 0, %v6933_v31  ;;  %vm3756_vm8 = vc.u32 %v11470_v22, %v11473_v44  ;;  %v11524_v61 = vpop.eup %7394 }
 0x379   : > { %12894 = vst [vmem:[#allocation48_spill] sm:$0xff] %v11490_v33  ;;  %12896 = vst [vmem:[#allocation49_spill] sm:$0xff] %v11494_v18  ;;  %v3757_v45 = vadd.s32 1, %v11474_v2  ;;  %v11522_v7 = vmul.f32 %v11007_v34, %v12907_v39  ;;  %v12492_v27 = vxor.u32 2147483648, %v11516_v3  ;;  %v3668_v58 = vsub.s32 32, %v3667_v38  ;;  %v12911_v34 = vld [vmem:[#allocation41_spill] sm:$0xff] }
 0x37a   : > { %12898 = vst [vmem:[#allocation13_spill] sm:$0xff] %v11498_v62  ;;  %12900 = vst [vmem:[#allocation29_spill] sm:$0xff] %v11502_v6  ;;  %v3669_v54 = vshll.u32 %v11413_v53, %v3667_v38  ;;  %v3672_v16 = vsub.s32 4294967266, %v3667_v38  ;;  %vm3701_vm11 = vcmp.lt.s32.totalorder %v12865_v57, 0  ;;  %v11533_v9 = vmul.f32 %v11017_v26, %v12909_v14  ;;  %v12926_v62 = vld [vmem:[#allocation43_spill] sm:$0xff]  ;;  %v12947_v18 = vld [vmem:[#allocation78_spill] sm:$0xff] }
 0x37b   : > { %12902 = vst [vmem:[#allocation50_spill] sm:$0xff] %v11506_v40  ;;  %12904 = vst [vmem:[#allocation51_spill] sm:$0xff] %v11510_v48  ;;  %v3758_v19 = vsel %vm3756_vm8, %v3757_v45, %v11474_v2  ;;  %v11537_v31 = vmul.f32 %v11024_v17, %v12911_v34  ;;  %v3593_v53 = vsel %vm3591_vm3, %v12492_v27, %v11524_v61  ;;  %v12914_v17 = vld [vmem:[#allocation38_spill] sm:$0xff]  ;;  %v12922_v27 = vld [vmem:[#allocation59_spill] sm:$0xff] }
 0x37c   : > { %12906 = vst [vmem:[#allocation52_spill] sm:$0xff] %v11514_v56  ;;  %12908 = vst [vmem:[#allocation53_spill] sm:$0xff] %v11522_v7  ;;  %v3670_v38 = vshrl.u32 %v3652_v29, %v3668_v58  ;;  %v3673_v59 = vadd.s32 127, %v3672_v16  ;;  %v3759_v7 = vadd.s32 %v3758_v19, %v3754_v49  ;;  %v12913_v56 = vxor.u32 2147483648, %v11524_v61 }
 0x37d   : > { %12910 = vst [vmem:[#allocation54_spill] sm:$0xff] %v11533_v9  ;;  %12912 = vst [vmem:[#allocation40_spill] sm:$0xff] %v11537_v31  ;;  %v11550_v2 = vadd.s32 %v11473_v44, %v11470_v22  ;;  %v11554_v45 = vmul.f32 %v11144_v13, %v12914_v17  ;;  %v12916_v31 = vld [vmem:[#allocation18_spill] sm:$0xff]  ;;  %v12917_v16 = vand.u32 2147483647, %v12865_v57  ;;  %v12920_v44 = vld [vmem:[#allocation39_spill] sm:$0xff] }
 0x37e   : > { %v3590_v26 = vsel %vm3588_vm0, %v11516_v3, %v12913_v56  ;;  %v3919_v9 = vadd.s32 3, %v12916_v31  ;;  %v3671_v58 = vor.u32 %v3670_v38, %v3669_v54  ;;  %v3674_v49 = vshll.u32 %v3673_v59, 23  ;;  %v12923_v38 = vld [vmem:[#allocation60_spill] sm:$0xff] }
 0x37f   : > { %12915 = vst [vmem:[#allocation41_spill] sm:$0xff] %v11554_v45  ;;  %v3594_v29 = vsel %vm3587_vm9, %v3590_v26, %v3593_v53  ;;  %vm11561_vm3 = vcmp.le.f32.partialorder %v12917_v16, 0.7853982  ;;  %v3760_v56 = vadd.s32 536870912, %v3759_v7  ;;  %v11569_v13 = vmul.f32 %v11269_v30, %v12920_v44 }
 0x380   : > { %v3595_v22 = vsel %vm12493_vm7, nan, %v3594_v29  ;;  %v3920_v31 = vand.u32 3, %v3919_v9  ;;  %v4023_v4 = vadd.s32 3, %v12922_v27  ;;  %v3675_v53 = vor.u32 4788187, %v3674_v49  ;;  %v12924_v29 = vld [vmem:[#allocation58_spill] sm:$0xff] }
 0x381   : > { %12921 = vst [vmem:[#allocation18_spill] sm:$0xff] %v11569_v13  ;;  %v3678_v54 = vcvt.s32.f32 %v3671_v58  ;;  %v3761_v59 = vshrl.u32 %v3760_v56, 30  ;;  %v4127_v26 = vadd.s32 3, %v12923_v38  ;;  %v12925_v6 = vxor.u32 2147483648, %v12924_v29  ;;  %v12930_v38 = vld [vmem:[#allocation55_spill] sm:$0xff]  ;;  %v12934_v13 = vld [vmem:[#allocation61_spill] sm:$0xff] }
 0x382   : > { %vm3921_vm0 = vcmp.lt.s32.totalorder %v3920_v31, 2  ;;  %vm3922_vm9 = vcmp.eq.s32.totalorder %v3920_v31, 0  ;;  %vm3925_vm8 = vcmp.eq.s32.totalorder %v3920_v31, 2  ;;  %v4024_v16 = vand.u32 3, %v4023_v4  ;;  %v12928_v4 = vld [vmem:[#allocation42_spill] sm:$0xff] }
 0x383   : > { %v3676_v45 = vand.u32 2147483647, %v3675_v53  ;;  %v3762_v48 = vshll.u32 %v3761_v59, 30  ;;  %v3785_v40 = vsub.s32 4, %v3761_v59  ;;  %v3924_v30 = vsel %vm3922_vm9, %v12926_v62, %v12925_v6 }
 0x384   : > { %v12927_v9 = vxor.u32 2147483648, %v12926_v62  ;;  %vm4025_vm7 = vcmp.lt.s32.totalorder %v4024_v16, 2  ;;  %vm4026_vm4 = vcmp.eq.s32.totalorder %v4024_v16, 0  ;;  %vm4029_vm5 = vcmp.eq.s32.totalorder %v4024_v16, 2 }
 0x385   : > { %v3679_v58 = vmul.f32 %v3678_v54, %v3676_v45  ;;  %v11579_v49 = vsub.s32 %v3759_v7, %v3762_v48  ;;  %v3786_v56 = vsel %vm3701_vm11, %v3785_v40, %v3761_v59  ;;  %v11585_v53 = vmul.f32 %v11343_v36, %v12928_v4  ;;  %v12936_v54 = vld [vmem:[#allocation56_spill] sm:$0xff] }
 0x386   : > { %v3927_v27 = vsel %vm3925_vm8, %v12927_v9, %v12924_v29  ;;  %v11589_v6 = vmul.f32 %v11452_v11, %v12930_v38  ;;  %v12932_v29 = vld [vmem:[#allocation62_spill] sm:$0xff]  ;;  %v12935_v48 = vxor.u32 2147483648, %v12934_v13  ;;  %v11600_v36 = vmul.f32 %v3595_v22, %v12936_v54 }
 0x387   : > { %12929 = vst [vmem:[#allocation59_spill] sm:$0xff] %v11585_v53  ;;  %v3928_v62 = vsel %vm3921_vm0, %v3924_v30, %v3927_v27  ;;  %v12933_v9 = vxor.u32 2147483648, %v12932_v29  ;;  %v3680_v45 = vxor.u32 2147483648, %v3679_v58  ;;  %v3765_v40 = vsub.s32 0, %v11579_v49  ;;  %v12938_v30 = vld [vmem:[#allocation67_spill] sm:$0xff] }
 0x388   : > { %12931 = vst [vmem:[#allocation60_spill] sm:$0xff] %v11589_v6  ;;  %v4031_v7 = vsel %vm4029_vm5, %v12935_v48, %v12932_v29  ;;  %12937 = vst [vmem:[#allocation58_spill] sm:$0xff] %v11600_v36  ;;  %v11604_v11 = vsel %vm11561_vm3, 0, %v3786_v56  ;;  %v4128_v31 = vand.u32 3, %v4127_v26  ;;  %v4231_v27 = vadd.s32 3, %v12938_v30  ;;  %v12939_v6 = vld [vmem:[#allocation69_spill] sm:$0xff] }
 0x389   : > { %v4028_v16 = vsel %vm4026_vm4, %v12934_v13, %v12933_v9  ;;  %v4335_v9 = vadd.s32 3, %v12939_v6  ;;  %v3681_v13 = vsel %vm3598_vm12, %v3680_v45, %v3679_v58  ;;  %v6936_v29 = vmin.u32 %v3765_v40, %v11579_v49  ;;  %v12942_v6 = vld [vmem:[#allocation64_spill] sm:$0xff]  ;;  %v12944_v40 = vld [vmem:[#allocation63_spill] sm:$0xff]  ;;  %v12946_v36 = vld [vmem:[#allocation73_spill] sm:$0xff] }
 0x38a   : > { %v4032_v59 = vsel %vm4025_vm7, %v4028_v16, %v4031_v7  ;;  %v11612_v48 = vand.u32 3, %v11604_v11  ;;  %v11616_v16 = vsel %vm1422_vm14, nan, %v3928_v62  ;;  %v3684_v26 = vsel %vm11395_vm10, %v9160_v20, %v3681_v13 }
 0x38b   : > { %v11623_v7 = vsel %vm1525_vm15, nan, %v4032_v59  ;;  %vm4129_vm5 = vcmp.lt.s32.totalorder %v4128_v31, 2  ;;  %vm4130_vm4 = vcmp.eq.s32.totalorder %v4128_v31, 0  ;;  %7396 = vcosq.f32 %v3684_v26 }
 0x38c   : > { %v3767_v58 = vclz %v6936_v29  ;;  %v12943_v45 = vxor.u32 2147483648, %v12942_v6  ;;  %vm4133_vm12 = vcmp.eq.s32.totalorder %v4128_v31, 2  ;;  %7398 = vsinq.f32 %v3684_v26  ;;  %v12951_v26 = vld [vmem:[#allocation68_spill] sm:$0xff] }
 0x38d   : > { %v12945_v62 = vxor.u32 2147483648, %v12944_v40  ;;  %v4232_v35 = vand.u32 3, %v4231_v27  ;;  %v4336_v13 = vand.u32 3, %v4335_v9  ;;  %vm3694_vm14 = vcmp.eq.s32.totalorder %v11456_v23, 2  ;;  %v12949_v27 = vld [vmem:[#allocation70_spill] sm:$0xff] }
 0x38e   : > { %v4132_v30 = vsel %vm4130_vm4, %v12944_v40, %v12943_v45  ;;  %v6937_v59 = vadd.s32 4294967294, %v3767_v58  ;;  %v4439_v53 = vadd.s32 3, %v12946_v36  ;;  %v4543_v29 = vadd.s32 3, %v12947_v18 }
 0x38f   : > { %v4135_v22 = vsel %vm4133_vm12, %v12945_v62, %v12942_v6  ;;  %vm3691_vm15 = vcmp.eq.s32.totalorder %v11456_v23, 0  ;;  %vm4233_vm10 = vcmp.lt.s32.totalorder %v4232_v35, 2  ;;  %vm4234_vm7 = vcmp.eq.s32.totalorder %v4232_v35, 0  ;;  %v12959_v62 = vld [vmem:[#allocation23_spill] sm:$0xff] }
 0x390   : > { %v4136_v56 = vsel %vm4129_vm5, %v4132_v30, %v4135_v22  ;;  %vm4237_vm0 = vcmp.eq.s32.totalorder %v4232_v35, 2  ;;  %vm3690_vm9 = vcmp.lt.s32.totalorder %v11456_v23, 2  ;;  %vm6938_vm8 = vcmp.lt.s32.totalorder %v6937_v59, 0  ;;  %v12954_v35 = vld [vmem:[#allocation72_spill] sm:$0xff] }
 0x391   : > { %v11637_v31 = vsel %vm1628_vm13, nan, %v4136_v56  ;;  %v12950_v9 = vxor.u32 2147483648, %v12949_v27  ;;  %v12952_v36 = vxor.u32 2147483648, %v12951_v26  ;;  %vm4337_vm5 = vcmp.lt.s32.totalorder %v4336_v13, 2 }
 0x392   : > { %vm3688_vm4 = vweird.f32 %v9160_v20  ;;  %v3770_v33 = vsel %vm6938_vm8, 0, %v6937_v59  ;;  %vm4338_vm13 = vcmp.eq.s32.totalorder %v4336_v13, 0  ;;  %vm4341_vm12 = vcmp.eq.s32.totalorder %v4336_v13, 2 }
 0x393   : > { %v4236_v58 = vsel %vm4234_vm7, %v12951_v26, %v12950_v9  ;;  %v4239_v18 = vsel %vm4237_vm0, %v12952_v36, %v12949_v27  ;;  %v3771_v45 = vsub.s32 32, %v3770_v33  ;;  %v3772_v40 = vshll.u32 %v11579_v49, %v3770_v33  ;;  %v12956_v9 = vld [vmem:[#allocation71_spill] sm:$0xff] }
 0x394   : > { %v4240_v6 = vsel %vm4233_vm10, %v4236_v58, %v4239_v18  ;;  %v3775_v30 = vsub.s32 4294967266, %v3770_v33  ;;  %v12955_v56 = vxor.u32 2147483648, %v12954_v35  ;;  %v12957_v27 = vxor.u32 2147483648, %v12956_v9  ;;  %v12958_v33 = vld [vmem:[#allocation79_spill] sm:$0xff] }
 0x395   : > { %v11650_v22 = vsel %vm1731_vm2, nan, %v4240_v6  ;;  %v4440_v59 = vand.u32 3, %v4439_v53  ;;  %v4544_v58 = vand.u32 3, %v4543_v29  ;;  %v3773_v18 = vshrl.u32 %v11550_v2, %v3771_v45  ;;  %v12961_v53 = vld [vmem:[#allocation75_spill] sm:$0xff] }
 0x396   : > { %v4340_v26 = vsel %vm4338_vm13, %v12956_v9, %v12955_v56  ;;  %v4343_v36 = vsel %vm4341_vm12, %v12957_v27, %v12954_v35  ;;  %v3776_v8 = vadd.s32 127, %v3775_v30  ;;  %v4647_v63 = vadd.s32 3, %v12958_v33  ;;  %v11665_v56 = vpop.eup %7396  ;;  %v12963_v27 = vld [vmem:[#allocation74_spill] sm:$0xff] }
 0x397   : > { %v4344_v49 = vsel %vm4337_vm5, %v4340_v26, %v4343_v36  ;;  %vm12960_vm2 = vweird.f32 %v12959_v62  ;;  %vm4441_vm10 = vcmp.lt.s32.totalorder %v4440_v59, 2  ;;  %vm4442_vm7 = vcmp.eq.s32.totalorder %v4440_v59, 0  ;;  %v11673_v30 = vpop.eup %7398  ;;  %v12967_v62 = vld [vmem:[#allocation77_spill] sm:$0xff] }
 0x398   : > { %v11663_v6 = vsel %vm12960_vm2, nan, %v4344_v49  ;;  %vm4445_vm0 = vcmp.eq.s32.totalorder %v4440_v59, 2  ;;  %v3774_v9 = vor.u32 %v3773_v18, %v3772_v40  ;;  %v3777_v35 = vshll.u32 %v3776_v8, 23  ;;  %v12965_v8 = vld [vmem:[#allocation24_spill] sm:$0xff] }
 0x399   : > { %v12962_v29 = vxor.u32 2147483648, %v12961_v53  ;;  %v12964_v13 = vxor.u32 2147483648, %v12963_v27  ;;  %v12496_v26 = vxor.u32 2147483648, %v11665_v56  ;;  %vm4545_vm8 = vcmp.lt.s32.totalorder %v4544_v58, 2 }
 0x39a   : > { %vm4546_vm5 = vcmp.eq.s32.totalorder %v4544_v58, 0  ;;  %v12497_v59 = vxor.u32 2147483648, %v11673_v30  ;;  %v3778_v49 = vor.u32 4788187, %v3777_v35  ;;  %v3781_v40 = vcvt.s32.f32 %v3774_v9 }
 0x39b   : > { %v4444_v2 = vsel %vm4442_vm7, %v12963_v27, %v12962_v29  ;;  %v4447_v45 = vsel %vm4445_vm0, %v12964_v13, %v12961_v53  ;;  %vm12966_vm13 = vweird.f32 %v12965_v8  ;;  %v3696_v33 = vsel %vm3694_vm14, %v12496_v26, %v11673_v30  ;;  %v12969_v29 = vld [vmem:[#allocation76_spill] sm:$0xff] }
 0x39c   : > { %v4448_v36 = vsel %vm4441_vm10, %v4444_v2, %v4447_v45  ;;  %v12968_v53 = vxor.u32 2147483648, %v12967_v62  ;;  %vm4549_vm12 = vcmp.eq.s32.totalorder %v4544_v58, 2  ;;  %v4648_v2 = vand.u32 3, %v4647_v63 }
 0x39d   : > { %v11679_v18 = vsel %vm12966_vm13, nan, %v4448_v36  ;;  %v3693_v9 = vsel %vm3691_vm15, %v11665_v56, %v12497_v59  ;;  %v3779_v35 = vand.u32 2147483647, %v3778_v49  ;;  %v12970_v13 = vxor.u32 2147483648, %v12969_v29  ;;  %v12971_v36 = vld [vmem:[#allocation81_spill] sm:$0xff]  ;;  %v12974_v49 = vld [vmem:[#allocation82_spill] sm:$0xff] }
 0x39e   : > { %v4548_v27 = vsel %vm4546_vm5, %v12969_v29, %v12968_v53  ;;  %v4751_v8 = vadd.s32 3, %v12971_v36  ;;  %v3697_v26 = vsel %vm3690_vm9, %v3693_v9, %v3696_v33  ;;  %vm4649_vm14 = vcmp.lt.s32.totalorder %v4648_v2, 2  ;;  %v12972_v53 = vld [vmem:[#allocation25_spill] sm:$0xff]  ;;  %v12976_v29 = vld [vmem:[#allocation80_spill] sm:$0xff] }
 0x39f   : > { %v4551_v45 = vsel %vm4549_vm12, %v12970_v13, %v12967_v62  ;;  %vm4650_vm2 = vcmp.eq.s32.totalorder %v4648_v2, 0  ;;  %v3698_v63 = vsel %vm3688_vm4, nan, %v3697_v26  ;;  %v3782_v58 = vmul.f32 %v3781_v40, %v3779_v35  ;;  %v12977_v13 = vld [vmem:[#allocation57_spill] sm:$0xff]  ;;  %v12981_v35 = vld [vmem:[#allocation88_spill] sm:$0xff] }
 0x3a0   : > { %v4552_v41 = vsel %vm4545_vm8, %v4548_v27, %v4551_v45  ;;  %vm12973_vm10 = vweird.f32 %v12972_v53  ;;  %v12975_v51 = vxor.u32 2147483648, %v12974_v49  ;;  %v11710_v36 = vmul.f32 %v3698_v63, %v12977_v13  ;;  %v12979_v33 = vld [vmem:[#allocation85_spill] sm:$0xff]  ;;  %v12985_v63 = vld [vmem:[#allocation84_spill] sm:$0xff] }
 0x3a1   : > { %v11704_v59 = vsel %vm12973_vm10, nan, %v4552_v41  ;;  %vm4653_vm15 = vcmp.eq.s32.totalorder %v4648_v2, 2  ;;  %v4752_v23 = vand.u32 3, %v4751_v8  ;;  %v4855_v27 = vadd.s32 3, %v12979_v33  ;;  %v12982_v41 = vld [vmem:[#allocation91_spill] sm:$0xff]  ;;  %v12983_v2 = vld [vmem:[#allocation26_spill] sm:$0xff] }
 0x3a2   : > { %v4652_v62 = vsel %vm4650_vm2, %v12976_v29, %v12975_v51  ;;  %12978 = vst [vmem:[#allocation43_spill] sm:$0xff] %v11710_v36  ;;  %v3783_v9 = vxor.u32 2147483648, %v3782_v58  ;;  %v12980_v26 = vxor.u32 2147483648, %v12976_v29  ;;  %v4959_v45 = vadd.s32 3, %v12981_v35  ;;  %v12987_v36 = vld [vmem:[#allocation83_spill] sm:$0xff] }
 0x3a3   : > { %v5063_v53 = vadd.s32 3, %v12982_v41  ;;  %vm4753_vm9 = vcmp.lt.s32.totalorder %v4752_v23, 2  ;;  %vm4754_vm7 = vcmp.eq.s32.totalorder %v4752_v23, 0  ;;  %vm4757_vm0 = vcmp.eq.s32.totalorder %v4752_v23, 2  ;;  %v12991_v41 = vld [vmem:[#allocation92_spill] sm:$0xff] }
 0x3a4   : > { %v4655_v40 = vsel %vm4653_vm15, %v12980_v26, %v12974_v49  ;;  %v3784_v51 = vsel %vm3701_vm11, %v3783_v9, %v3782_v58  ;;  %vm12984_vm8 = vweird.f32 %v12983_v2  ;;  %v12986_v33 = vxor.u32 2147483648, %v12985_v63  ;;  %v12989_v58 = vld [vmem:[#allocation27_spill] sm:$0xff] }
 0x3a5   : > { %v4656_v54 = vsel %vm4649_vm14, %v4652_v62, %v4655_v40  ;;  %v12988_v49 = vxor.u32 2147483648, %v12987_v36  ;;  %v3787_v62 = vsel %vm11561_vm3, %v12865_v57, %v3784_v51  ;;  %v4856_v40 = vand.u32 3, %v4855_v27  ;;  %v12994_v51 = vld [vmem:[#allocation86_spill] sm:$0xff] }
 0x3a6   : > { %v11722_v8 = vsel %vm12984_vm8, nan, %v4656_v54  ;;  %v4756_v29 = vsel %vm4754_vm7, %v12987_v36, %v12986_v33  ;;  %v4960_v35 = vand.u32 3, %v4959_v45  ;;  %7400 = vcosq.f32 %v3787_v62  ;;  %v12992_v36 = vld [vmem:[#allocation87_spill] sm:$0xff]  ;;  %v12996_v33 = vld [vmem:[#allocation90_spill] sm:$0xff] }
 0x3a7   : > { %v4759_v26 = vsel %vm4757_vm0, %v12988_v49, %v12985_v63  ;;  %vm12990_vm11 = vweird.f32 %v12989_v58  ;;  %v5064_v9 = vand.u32 3, %v5063_v53  ;;  %v5167_v2 = vadd.s32 3, %v12991_v41  ;;  %v12998_v49 = vld [vmem:[#allocation89_spill] sm:$0xff] }
 0x3a8   : > { %v4760_v23 = vsel %vm4753_vm9, %v4756_v29, %v4759_v26  ;;  %7402 = vsinq.f32 %v3787_v62  ;;  %vm4857_vm5 = vcmp.lt.s32.totalorder %v4856_v40, 2  ;;  %vm4858_vm13 = vcmp.eq.s32.totalorder %v4856_v40, 0  ;;  %v12999_v62 = vld [vmem:[#allocation28_spill] sm:$0xff] }
 0x3a9   : > { %v11735_v54 = vsel %vm12990_vm11, nan, %v4760_v23  ;;  %vm4861_vm12 = vcmp.eq.s32.totalorder %v4856_v40, 2  ;;  %vm3797_vm14 = vcmp.eq.s32.totalorder %v11612_v48, 2  ;;  %v12993_v19 = vxor.u32 2147483648, %v12992_v36 }
 0x3aa   : > { %v12995_v27 = vxor.u32 2147483648, %v12994_v51  ;;  %vm4961_vm3 = vcmp.lt.s32.totalorder %v4960_v35, 2  ;;  %vm4962_vm2 = vcmp.eq.s32.totalorder %v4960_v35, 0  ;;  %vm3794_vm10 = vcmp.eq.s32.totalorder %v11612_v48, 0 }
 0x3ab   : > { %v4860_v63 = vsel %vm4858_vm13, %v12994_v51, %v12993_v19  ;;  %v12997_v29 = vxor.u32 2147483648, %v12996_v33  ;;  %vm4965_vm15 = vcmp.eq.s32.totalorder %v4960_v35, 2  ;;  %vm5065_vm9 = vcmp.lt.s32.totalorder %v5064_v9, 2  ;;  %v13004_v51 = vld [vmem:[#allocation93_spill] sm:$0xff] }
 0x3ac   : > { %v4863_v45 = vsel %vm4861_vm12, %v12995_v27, %v12992_v36  ;;  %vm3793_vm7 = vcmp.lt.s32.totalorder %v11612_v48, 2  ;;  %vm13000_vm0 = vweird.f32 %v12999_v62  ;;  %v13001_v40 = vxor.u32 2147483648, %v12998_v49  ;;  %v13002_v36 = vld [vmem:[#allocation94_spill] sm:$0xff]  ;;  %v13034_v48 = vld [vmem:[#allocation104_spill] sm:$0xff] }
 0x3ad   : > { %v4864_v53 = vsel %vm4857_vm5, %v4860_v63, %v4863_v45  ;;  %v4964_v26 = vsel %vm4962_vm2, %v12998_v49, %v12997_v29  ;;  %vm5066_vm8 = vcmp.eq.s32.totalorder %v5064_v9, 0  ;;  %vm5069_vm11 = vcmp.eq.s32.totalorder %v5064_v9, 2  ;;  %v13008_v9 = vld [vmem:[#allocation100_spill] sm:$0xff] }
 0x3ae   : > { %v11752_v23 = vsel %vm13000_vm0, nan, %v4864_v53  ;;  %v4967_v58 = vsel %vm4965_vm15, %v13001_v40, %v12996_v33  ;;  %vm3791_vm5 = vweird.f32 %v12865_v57  ;;  %v13003_v19 = vxor.u32 2147483648, %v13002_v36  ;;  %v13007_v33 = vld [vmem:[#allocation97_spill] sm:$0xff]  ;;  %v13009_v40 = vld [vmem:[#allocation31_spill] sm:$0xff] }
 0x3af   : > { %v4968_v41 = vsel %vm4961_vm3, %v4964_v26, %v4967_v58  ;;  %v13005_v63 = vxor.u32 2147483648, %v13004_v51  ;;  %v5168_v45 = vand.u32 3, %v5167_v2  ;;  %vm13006_vm13 = vweird.f32 %v12759_v12  ;;  %v13011_v58 = vld [vmem:[#allocation96_spill] sm:$0xff] }
 0x3b0   : > { %v5068_v35 = vsel %vm5066_vm8, %v13004_v51, %v13003_v19  ;;  %v11766_v53 = vsel %vm13006_vm13, nan, %v4968_v41  ;;  %v5271_v49 = vadd.s32 3, %v13007_v33  ;;  %v5375_v62 = vadd.s32 3, %v13008_v9  ;;  %v13016_v9 = vld [vmem:[#allocation106_spill] sm:$0xff]  ;;  %v11783_v13 = vpop.eup %7400 }
 0x3b1   : > { %v5071_v27 = vsel %vm5069_vm11, %v13005_v63, %v13002_v36  ;;  %vm13010_vm12 = vweird.f32 %v13009_v40  ;;  %vm5169_vm3 = vcmp.lt.s32.totalorder %v5168_v45, 2  ;;  %vm5170_vm2 = vcmp.eq.s32.totalorder %v5168_v45, 0  ;;  %v13013_v36 = vld [vmem:[#allocation95_spill] sm:$0xff] }
 0x3b2   : > { %v5072_v29 = vsel %vm5065_vm9, %v5068_v35, %v5071_v27  ;;  %vm5173_vm15 = vcmp.eq.s32.totalorder %v5168_v45, 2  ;;  %v13012_v19 = vxor.u32 2147483648, %v13011_v58  ;;  %v13014_v12 = vxor.u32 2147483648, %v13013_v36  ;;  %v13015_v27 = vld [vmem:[#allocation103_spill] sm:$0xff]  ;;  %v13017_v45 = vld [vmem:[#allocation32_spill] sm:$0xff] }
 0x3b3   : > { %v11772_v26 = vsel %vm13010_vm12, nan, %v5072_v29  ;;  %v5272_v51 = vand.u32 3, %v5271_v49  ;;  %v5376_v35 = vand.u32 3, %v5375_v62  ;;  %v5479_v33 = vadd.s32 3, %v13015_v27  ;;  %v13019_v62 = vld [vmem:[#allocation99_spill] sm:$0xff]  ;;  %v13023_v27 = vld [vmem:[#allocation33_spill] sm:$0xff] }
 0x3b4   : > { %v5172_v2 = vsel %vm5170_vm2, %v13013_v36, %v13012_v19  ;;  %v5175_v41 = vsel %vm5173_vm15, %v13014_v12, %v13011_v58  ;;  %v5583_v40 = vadd.s32 3, %v13016_v9  ;;  %v5687_v29 = vadd.s32 3, %v11011_v10  ;;  %v11789_v19 = vpop.eup %7402  ;;  %v13021_v36 = vld [vmem:[#allocation98_spill] sm:$0xff] }
 0x3b5   : > { %v5176_v63 = vsel %vm5169_vm3, %v5172_v2, %v5175_v41  ;;  %vm13018_vm9 = vweird.f32 %v13017_v45  ;;  %vm5273_vm0 = vcmp.lt.s32.totalorder %v5272_v51, 2  ;;  %vm5274_vm8 = vcmp.eq.s32.totalorder %v5272_v51, 0  ;;  %v13025_v45 = vld [vmem:[#allocation102_spill] sm:$0xff] }
 0x3b6   : > { %v11787_v38 = vsel %vm13018_vm9, nan, %v5176_v63  ;;  %vm5277_vm11 = vcmp.eq.s32.totalorder %v5272_v51, 2  ;;  %v12498_v49 = vxor.u32 2147483648, %v11783_v13  ;;  %v13020_v58 = vxor.u32 2147483648, %v13019_v62 }
 0x3b7   : > { %v13022_v10 = vxor.u32 2147483648, %v13021_v36  ;;  %vm5377_vm13 = vcmp.lt.s32.totalorder %v5376_v35, 2  ;;  %v12499_v41 = vxor.u32 2147483648, %v11789_v19  ;;  %vm5378_vm12 = vcmp.eq.s32.totalorder %v5376_v35, 0 }
 0x3b8   : > { %v5276_v2 = vsel %vm5274_vm8, %v13021_v36, %v13020_v58  ;;  %vm5381_vm3 = vcmp.eq.s32.totalorder %v5376_v35, 2  ;;  %v3799_v51 = vsel %vm3797_vm14, %v12498_v49, %v11789_v19  ;;  %vm13024_vm2 = vweird.f32 %v13023_v27  ;;  %v13027_v36 = vld [vmem:[#allocation101_spill] sm:$0xff] }
 0x3b9   : > { %v5279_v12 = vsel %vm5277_vm11, %v13022_v10, %v13019_v62  ;;  %v13026_v58 = vxor.u32 2147483648, %v13025_v45  ;;  %v13028_v10 = vxor.u32 2147483648, %v13027_v36  ;;  %v3796_v35 = vsel %vm3794_vm10, %v11783_v13, %v12499_v41  ;;  %v13039_v27 = vld [vmem:[#allocation37_spill] sm:$0xff] }
 0x3ba   : > { %v5280_v63 = vsel %vm5273_vm0, %v5276_v2, %v5279_v12  ;;  %v5480_v49 = vand.u32 3, %v5479_v33  ;;  %v5584_v4 = vand.u32 3, %v5583_v40  ;;  %v13032_v33 = vld [vmem:[#allocation105_spill] sm:$0xff]  ;;  %v11926_v20 = vmul.f32 %v11650_v22, %v12884_v52 }
 0x3bb   : > { %v11806_v9 = vsel %vm13024_vm2, nan, %v5280_v63  ;;  %v5380_v62 = vsel %vm5378_vm12, %v13027_v36, %v13026_v58  ;;  %v5383_v2 = vsel %vm5381_vm3, %v13028_v10, %v13025_v45  ;;  %v3800_v63 = vsel %vm3793_vm7, %v3796_v35, %v3799_v51  ;;  %v13030_v10 = vld [vmem:[#allocation16_spill] sm:$0xff] }
 0x3bc   : > { %v5384_v12 = vsel %vm5377_vm13, %v5380_v62, %v5383_v2  ;;  %v5688_v58 = vand.u32 3, %v5687_v29  ;;  %v5791_v36 = vadd.s32 3, %v11116_v43  ;;  %v3801_v45 = vsel %vm3791_vm5, nan, %v3800_v63 }
 0x3bd   : > { %v11823_v44 = vsel %vm2864_vm1, nan, %v5384_v12  ;;  %vm5481_vm14 = vcmp.lt.s32.totalorder %v5480_v49, 2  ;;  %vm5482_vm15 = vcmp.eq.s32.totalorder %v5480_v49, 0  ;;  %vm5485_vm9 = vcmp.eq.s32.totalorder %v5480_v49, 2  ;;  %v13037_v49 = vld [vmem:[#allocation107_spill] sm:$0xff] }
 0x3be   : > { %v11829_v62 = vmul.f32 %v3801_v45, %v13030_v10  ;;  %v13033_v40 = vxor.u32 2147483648, %v13032_v33  ;;  %v13035_v2 = vxor.u32 2147483648, %v13034_v48  ;;  %vm5585_vm1 = vcmp.lt.s32.totalorder %v5584_v4, 2  ;;  %v13047_v10 = vld [vmem:[#allocation110_spill] sm:$0xff] }
 0x3bf   : > { %vm5586_vm10 = vcmp.eq.s32.totalorder %v5584_v4, 0  ;;  %vm5589_vm7 = vcmp.eq.s32.totalorder %v5584_v4, 2  ;;  %vm5689_vm0 = vcmp.lt.s32.totalorder %v5688_v58, 2  ;;  %v13038_v63 = vxor.u32 2147483648, %v13037_v49 }
 0x3c0   : > { %13031 = vst [vmem:[#allocation62_spill] sm:$0xff] %v11829_v62  ;;  %v5484_v51 = vsel %vm5482_vm15, %v13034_v48, %v13033_v40  ;;  %v5487_v35 = vsel %vm5485_vm9, %v13035_v2, %v13032_v33  ;;  %v13040_v40 = vxor.u32 2147483648, %v13039_v27  ;;  %vm5690_vm8 = vcmp.eq.s32.totalorder %v5688_v58, 0  ;;  %v13041_v33 = vld [vmem:[#allocation109_spill] sm:$0xff]  ;;  %v13044_v62 = vld [vmem:[#allocation11_spill] sm:$0xff] }
 0x3c1   : > { %v5488_v29 = vsel %vm5481_vm14, %v5484_v51, %v5487_v35  ;;  %v5588_v45 = vsel %vm5586_vm10, %v13039_v27, %v13038_v63  ;;  %v13042_v2 = vxor.u32 2147483648, %v13041_v33  ;;  %v13043_v51 = vld [vmem:[#allocation108_spill] sm:$0xff]  ;;  %vm5693_vm11 = vcmp.eq.s32.totalorder %v5688_v58, 2  ;;  %v13048_v27 = vld [vmem:[#allocation114_spill] sm:$0xff] }
 0x3c2   : > { %v11839_v12 = vsel %vm2967_vm6, nan, %v5488_v29  ;;  %v5591_v41 = vsel %vm5589_vm7, %v13040_v40, %v13037_v49  ;;  %v5792_v4 = vand.u32 3, %v5791_v36  ;;  %vm13045_vm13 = vweird.f32 %v13044_v62  ;;  %v13052_v36 = vld [vmem:[#allocation112_spill] sm:$0xff] }
 0x3c3   : > { %v5592_v48 = vsel %vm5585_vm1, %v5588_v45, %v5591_v41  ;;  %v5692_v35 = vsel %vm5690_vm8, %v13043_v51, %v13042_v2  ;;  %v13046_v43 = vxor.u32 2147483648, %v13043_v51  ;;  %v5895_v17 = vadd.s32 3, %v13047_v10  ;;  %v13049_v41 = vld [vmem:[#allocation12_spill] sm:$0xff]  ;;  %v13054_v45 = vld [vmem:[#allocation111_spill] sm:$0xff] }
 0x3c4   : > { %v11852_v29 = vsel %vm13045_vm13, nan, %v5592_v48  ;;  %v5999_v49 = vadd.s32 3, %v13048_v27  ;;  %vm5793_vm6 = vcmp.lt.s32.totalorder %v5792_v4, 2  ;;  %vm5794_vm12 = vcmp.eq.s32.totalorder %v5792_v4, 0 }
 0x3c5   : > { %v5695_v63 = vsel %vm5693_vm11, %v13046_v43, %v13041_v33  ;;  %vm5797_vm3 = vcmp.eq.s32.totalorder %v5792_v4, 2  ;;  %vm13050_vm2 = vweird.f32 %v13049_v41  ;;  %v13053_v62 = vxor.u32 2147483648, %v13052_v36  ;;  %v13056_v4 = vld [vmem:[#allocation35_spill] sm:$0xff] }
 0x3c6   : > { %v5696_v40 = vsel %vm5689_vm0, %v5692_v35, %v5695_v63  ;;  %v13055_v2 = vxor.u32 2147483648, %v13054_v45  ;;  %v5896_v51 = vand.u32 3, %v5895_v17  ;;  %v6000_v43 = vand.u32 3, %v5999_v49 }
 0x3c7   : > { %v11861_v58 = vsel %vm13050_vm2, nan, %v5696_v40  ;;  %v5796_v48 = vsel %vm5794_vm12, %v13054_v45, %v13053_v62  ;;  %v6103_v35 = vadd.s32 3, %v11347_v21  ;;  %v6207_v63 = vadd.s32 3, %v11444_v47  ;;  %v13058_v40 = vld [vmem:[#allocation113_spill] sm:$0xff] }
 0x3c8   : > { %13051 = vst [vmem:[#allocation61_spill] sm:$0xff] %v11861_v58  ;;  %v5799_v33 = vsel %vm5797_vm3, %v13055_v2, %v13052_v36  ;;  %vm13057_vm14 = vweird.f32 %v13056_v4  ;;  %vm5897_vm15 = vcmp.lt.s32.totalorder %v5896_v51, 2  ;;  %vm5898_vm9 = vcmp.eq.s32.totalorder %v5896_v51, 0  ;;  %v13060_v62 = vld [vmem:[#allocation17_spill] sm:$0xff] }
 0x3c9   : > { %v5800_v10 = vsel %vm5793_vm6, %v5796_v48, %v5799_v33  ;;  %vm5901_vm1 = vcmp.eq.s32.totalorder %v5896_v51, 2  ;;  %v13059_v41 = vxor.u32 2147483648, %v13058_v40  ;;  %v13061_v36 = vxor.u32 2147483648, %v13060_v62  ;;  %v13063_v48 = vld [vmem:[#allocation36_spill] sm:$0xff] }
 0x3ca   : > { %v5801_v27 = vsel %vm13057_vm14, nan, %v5800_v10  ;;  %vm6001_vm10 = vcmp.lt.s32.totalorder %v6000_v43, 2  ;;  %vm6002_vm7 = vcmp.eq.s32.totalorder %v6000_v43, 0  ;;  %v13062_v21 = vxor.u32 2147483648, %v11351_v25 }
 0x3cb   : > { %v5900_v58 = vsel %vm5898_vm9, %v13060_v62, %v13059_v41  ;;  %v5903_v17 = vsel %vm5901_vm1, %v13061_v36, %v13058_v40  ;;  %vm6005_vm0 = vcmp.eq.s32.totalorder %v6000_v43, 2  ;;  %v6104_v45 = vand.u32 3, %v6103_v35 }
 0x3cc   : > { %v5904_v49 = vsel %vm5897_vm15, %v5900_v58, %v5903_v17  ;;  %v6004_v47 = vsel %vm6002_vm7, %v11338_v15, %v13062_v21  ;;  %vm13064_vm8 = vweird.f32 %v13063_v48  ;;  %v13065_v33 = vxor.u32 2147483648, %v11338_v15 }
 0x3cd   : > { %v5905_v2 = vsel %vm13064_vm8, nan, %v5904_v49  ;;  %v6208_v10 = vand.u32 3, %v6207_v63  ;;  %v6311_v4 = vadd.s32 3, %v11604_v11  ;;  %vm6105_vm11 = vcmp.lt.s32.totalorder %v6104_v45, 2  ;;  %v13072_v49 = vld [vmem:[#allocation44_spill] sm:$0xff] }
 0x3ce   : > { %v6007_v51 = vsel %vm6005_vm0, %v13065_v33, %v11351_v25  ;;  %vm6106_vm13 = vcmp.eq.s32.totalorder %v6104_v45, 0  ;;  %vm6109_vm6 = vcmp.eq.s32.totalorder %v6104_v45, 2  ;;  %vm13066_vm12 = vweird.f32 %v12847_v46  ;;  %v13076_v33 = vld [vmem:[#allocation14_spill] sm:$0xff] }
 0x3cf   : > { %v6008_v40 = vsel %vm6001_vm10, %v6004_v47, %v6007_v51  ;;  %v13067_v43 = vxor.u32 2147483648, %v11524_v61  ;;  %v13068_v41 = vxor.u32 2147483648, %v11516_v3  ;;  %vm6209_vm3 = vcmp.lt.s32.totalorder %v6208_v10, 2 }
 0x3d0   : > { %v6009_v58 = vsel %vm13066_vm12, nan, %v6008_v40  ;;  %vm6210_vm2 = vcmp.eq.s32.totalorder %v6208_v10, 0  ;;  %vm6213_vm14 = vcmp.eq.s32.totalorder %v6208_v10, 2  ;;  %v6312_v25 = vand.u32 3, %v6311_v4  ;;  %v6346_v40 = vld [vmem:[%s7666_s9] sm:$0xff] }
 0x3d1   : > { %v6108_v35 = vsel %vm6106_vm13, %v11516_v3, %v13067_v43  ;;  %v6111_v62 = vsel %vm6109_vm6, %v13068_v41, %v11524_v61  ;;  %vm13069_vm15 = vweird.f32 %v9154_v50  ;;  %v13070_v63 = vxor.u32 2147483648, %v11673_v30  ;;  %v6348_v43 = vld [vmem:[%s7666_s9 + $0x10] sm:$0xff]  ;;  %v13109_v41 = vld [vmem:[#allocation30_spill] sm:$0xff] }
 0x3d2   : > { %v6112_v15 = vsel %vm6105_vm11, %v6108_v35, %v6111_v62  ;;  %v13071_v36 = vxor.u32 2147483648, %v11665_v56  ;;  %v11906_v3 = vmul.f32 %v11616_v16, %v13072_v49  ;;  %vm6313_vm9 = vcmp.lt.s32.totalorder %v6312_v25, 2  ;;  %v6349_v35 = vld [vmem:[%s7666_s9 + $0x18] sm:$0xff]  ;;  %v6351_v49 = vld [vmem:[%s7666_s9 + $0x28] sm:$0xff] }
 0x3d3   : > { %v6113_v11 = vsel %vm13069_vm15, nan, %v6112_v15  ;;  %v6212_v46 = vsel %vm6210_vm2, %v11665_v56, %v13070_v63  ;;  %vm6314_vm1 = vcmp.eq.s32.totalorder %v6312_v25, 0  ;;  %vm6317_vm10 = vcmp.eq.s32.totalorder %v6312_v25, 2  ;;  %v13110_v15 = vld [vmem:[#allocation15_spill] sm:$0xff] }
 0x3d4   : > { %v6215_v17 = vsel %vm6213_vm14, %v13071_v36, %v11673_v30  ;;  %v13073_v21 = vxor.u32 2147483648, %v11789_v19  ;;  %v13074_v45 = vxor.u32 2147483648, %v11783_v13  ;;  %v13075_v30 = vld [vmem:[#allocation45_spill] sm:$0xff]  ;;  %v11922_v51 = vmul.f32 %v11637_v31, %v13076_v33  ;;  %v13116_v33 = vld [vmem:[#allocation50_spill] sm:$0xff] }
 0x3d5   : > { %v6216_v61 = vsel %vm6209_vm3, %v6212_v46, %v6215_v17  ;;  %v11918_v48 = vmul.f32 %v11623_v7, %v13075_v30  ;;  %v11930_v10 = vmul.f32 %v11663_v6, %v12887_v55  ;;  %v11936_v7 = vmul.f32 %v11679_v18, %v12889_v28  ;;  %v13095_v6 = vld [vmem:[#allocation42_spill] sm:$0xff]  ;;  %v13112_v46 = vld [vmem:[#allocation48_spill] sm:$0xff]  ;;  %v13115_v30 = vld [vmem:[#allocation29_spill] sm:$0xff] }
 0x3d6   : > { %v6217_v50 = vsel %vm3688_vm4, nan, %v6216_v61  ;;  %v6316_v47 = vsel %vm6314_vm1, %v11783_v13, %v13073_v21  ;;  %v6319_v56 = vsel %vm6317_vm10, %v13074_v45, %v11789_v19  ;;  %v11940_v19 = vmul.f32 %v11704_v59, %v12891_v1  ;;  %v6350_v17 = vld [vmem:[%s7666_s9 + $0x20] sm:$0xff]  ;;  %v6352_v61 = vld [vmem:[%s7666_s9 + $0x30] sm:$0xff]  ;;  %v13113_v21 = vld [vmem:[#allocation49_spill] sm:$0xff] }
 0x3d7   : > { %v6320_v16 = vsel %vm6313_vm9, %v6316_v47, %v6319_v56  ;;  %13077 = vst [vmem:[#allocation67_spill] sm:$0xff] %v11930_v10  ;;  %13078 = vst [vmem:[#allocation69_spill] sm:$0xff] %v11936_v7  ;;  %v11944_v31 = vmul.f32 %v11722_v8, %v12893_v32  ;;  %v11948_v52 = vmul.f32 %v11735_v54, %v12895_v42  ;;  %v13101_v8 = vld [vmem:[#allocation57_spill] sm:$0xff]  ;;  %v13103_v54 = vld [vmem:[#allocation16_spill] sm:$0xff]  ;;  %v6398_v62 = vadd.f32 1.0, %v13109_v41 }
 0x3d8   : > { %v6321_v13 = vsel %vm3791_vm5, nan, %v6320_v16  ;;  %13079 = vst [vmem:[#allocation19_spill] sm:$0xff] %v11940_v19  ;;  %v11952_v57 = vmul.f32 %v11752_v23, %v12897_v60  ;;  %v11956_v55 = vmul.f32 %v11766_v53, %v12899_v0  ;;  %v11960_v28 = vmul.f32 %v11772_v26, %v12901_v5  ;;  %v13090_v5 = vld [vmem:[#allocation38_spill] sm:$0xff]  ;;  %v13105_v53 = vld [vmem:[#allocation65_spill] sm:$0xff] }
 0x3d9   : > { %13080 = vst [vmem:[#allocation20_spill] sm:$0xff] %v11944_v31  ;;  %13081 = vst [vmem:[#allocation64_spill] sm:$0xff] %v11948_v52  ;;  %v11964_v1 = vmul.f32 %v11787_v38, %v12903_v37  ;;  %v11968_v32 = vmul.f32 %v11806_v9, %v12905_v24  ;;  %v11972_v42 = vmul.f32 %v11823_v44, %v12907_v39  ;;  %v13091_v37 = vld [vmem:[#allocation61_spill] sm:$0xff]  ;;  %v13093_v24 = vld [vmem:[#allocation39_spill] sm:$0xff]  ;;  %v6394_v26 = vadd.f32 1.0, %v13105_v53 }
 0x3da   : > { %13082 = vst [vmem:[#allocation63_spill] sm:$0xff] %v11952_v57  ;;  %13083 = vst [vmem:[#allocation73_spill] sm:$0xff] %v11956_v55  ;;  %v11976_v60 = vmul.f32 %v11839_v12, %v12909_v14  ;;  %v11980_v0 = vmul.f32 %v11852_v29, %v12911_v34  ;;  %v11984_v38 = vmul.f32 %v13091_v37, %v13090_v5  ;;  %v13097_v44 = vld [vmem:[#allocation55_spill] sm:$0xff]  ;;  %v13099_v14 = vld [vmem:[#allocation56_spill] sm:$0xff]  ;;  %v6399_v25 = vadd.f32 1.0, %v13110_v15 }
 0x3db   : > { %13084 = vst [vmem:[#allocation78_spill] sm:$0xff] %v11960_v28  ;;  %13085 = vst [vmem:[#allocation21_spill] sm:$0xff] %v11964_v1  ;;  %v11987_v22 = vmul.f32 %v5801_v27, %v13093_v24  ;;  %v11990_v39 = vmul.f32 %v5905_v2, %v13095_v6  ;;  %v11993_v59 = vmul.f32 %v6009_v58, %v13097_v44  ;;  %v13106_v9 = vld [vmem:[#allocation66_spill] sm:$0xff]  ;;  %v13107_v29 = vld [vmem:[#allocation115_spill] sm:$0xff]  ;;  %v6401_v36 = vadd.f32 1.0, %v13112_v46 }
 0x3dc   : > { %13086 = vst [vmem:[#allocation70_spill] sm:$0xff] %v11968_v32  ;;  %13087 = vst [vmem:[#allocation68_spill] sm:$0xff] %v11972_v42  ;;  %v11996_v18 = vmul.f32 %v6113_v11, %v13099_v14  ;;  %v11999_v34 = vmul.f32 %v6217_v50, %v13101_v8  ;;  %v12002_v23 = vmul.f32 %v6321_v13, %v13103_v54  ;;  %v6395_v12 = vadd.f32 1.0, %v13106_v9  ;;  %v13108_v2 = vld [vmem:[#allocation46_spill] sm:$0xff]  ;;  %v6347_v58 = vld [vmem:[%s7666_s9 + $0x8] sm:$0xff] }
 0x3dd   : > { %13088 = vst [vmem:[#allocation22_spill] sm:$0xff] %v11976_v60  ;;  %13089 = vst [vmem:[#allocation72_spill] sm:$0xff] %v11980_v0  ;;  %v6396_v27 = vadd.f32 1.0, %v13107_v29  ;;  %v6397_v4 = vadd.f32 1.0, %v13108_v2  ;;  %v13111_v11 = vld [vmem:[#allocation47_spill] sm:$0xff]  ;;  %v6353_v50 = vld [vmem:[%s7666_s9 + $0x38] sm:$0xff]  ;;  %v6418_v0 = vmul.f32 %v6394_v26, %v6346_v40  ;;  %v6422_v28 = vmul.f32 %v6398_v62, %v6350_v17 }
 0x3de   : > { %13092 = vst [vmem:[#allocation71_spill] sm:$0xff] %v11984_v38  ;;  %13094 = vst [vmem:[#allocation79_spill] sm:$0xff] %v11987_v22  ;;  %v6400_v63 = vadd.f32 1.0, %v13111_v11  ;;  %v6402_v47 = vadd.f32 1.0, %v13113_v21  ;;  %v13114_v45 = vld [vmem:[#allocation13_spill] sm:$0xff]  ;;  %v6404_v16 = vadd.f32 1.0, %v13115_v30  ;;  %v6419_v60 = vmul.f32 %v6395_v12, %v6347_v58 }
 0x3df   : > { %13096 = vst [vmem:[#allocation23_spill] sm:$0xff] %v11990_v39  ;;  %13098 = vst [vmem:[#allocation75_spill] sm:$0xff] %v11993_v59  ;;  %v6403_v56 = vadd.f32 1.0, %v13114_v45  ;;  %v6405_v13 = vadd.f32 1.0, %v13116_v33  ;;  %v6354_v5 = vld [vmem:[%s7666_s9 + $0x40] sm:$0xff]  ;;  %v6355_v37 = vld [vmem:[%s7666_s9 + $0x48] sm:$0xff]  ;;  %v6421_v42 = vmul.f32 %v6397_v4, %v6349_v35 }
 0x3e0   : > { %13100 = vst [vmem:[#allocation74_spill] sm:$0xff] %v11996_v18  ;;  %13102 = vst [vmem:[#allocation24_spill] sm:$0xff] %v11999_v34  ;;  %v6356_v24 = vld [vmem:[%s7666_s9 + $0x50] sm:$0xff]  ;;  %v13117_v6 = vld [vmem:[#allocation51_spill] sm:$0xff]  ;;  %v6424_v55 = vmul.f32 %v6400_v63, %v6352_v61  ;;  %v6426_v31 = vmul.f32 %v6402_v47, %v6354_v5 }
 0x3e1   : > { %13104 = vst [vmem:[#allocation77_spill] sm:$0xff] %v12002_v23  ;;  %v6406_v44 = vadd.f32 1.0, %v13117_v6  ;;  %v13118_v14 = vld [vmem:[#allocation52_spill] sm:$0xff]  ;;  %v13119_v54 = vld [vmem:[#allocation53_spill] sm:$0xff]  ;;  %v13120_v9 = vld [vmem:[#allocation54_spill] sm:$0xff]  ;;  %v6427_v19 = vmul.f32 %v6403_v56, %v6355_v37  ;;  %v6428_v7 = vmul.f32 %v6404_v16, %v6356_v24 }
 0x3e2   : > { %v6407_v8 = vadd.f32 1.0, %v13118_v14  ;;  %v6408_v53 = vadd.f32 1.0, %v13119_v54  ;;  %v6409_v29 = vadd.f32 1.0, %v13120_v9  ;;  %v6357_v2 = vld [vmem:[%s7666_s9 + $0x58] sm:$0xff]  ;;  %v6358_v41 = vld [vmem:[%s7666_s9 + $0x60] sm:$0xff]  ;;  %v13121_v15 = vld [vmem:[#allocation40_spill] sm:$0xff]  ;;  %6442 = vst [vmem:[%s12054_s10] sm:$0xff] %v6418_v0 }
 0x3e3   : > { %v6410_v11 = vadd.f32 1.0, %v13121_v15  ;;  %v13122_v46 = vld [vmem:[#allocation41_spill] sm:$0xff]  ;;  %v13123_v45 = vld [vmem:[#allocation18_spill] sm:$0xff]  ;;  %v13124_v33 = vld [vmem:[#allocation59_spill] sm:$0xff]  ;;  %v6429_v10 = vmul.f32 %v6405_v13, %v6357_v2  ;;  %6443 = vst [vmem:[%s12054_s10 + $0x8] sm:$0xff] %v6419_v60  ;;  %v6430_v26 = vmul.f32 %v6406_v44, %v6358_v41 }
 0x3e4   : > { %v6411_v21 = vadd.f32 1.0, %v13122_v46  ;;  %v6412_v30 = vadd.f32 1.0, %v13123_v45  ;;  %v6413_v6 = vadd.f32 1.0, %v13124_v33  ;;  %v6359_v14 = vld [vmem:[%s7666_s9 + $0x68] sm:$0xff]  ;;  %v6360_v23 = vld [vmem:[%s7666_s9 + $0x70] sm:$0xff]  ;;  %v13126_v18 = vld [vmem:[#allocation58_spill] sm:$0xff]  ;;  %v6420_v33 = vmul.f32 %v6396_v27, %v6348_v43 }
 0x3e5   : > { %v13125_v34 = vld [vmem:[#allocation60_spill] sm:$0xff]  ;;  %v6415_v59 = vadd.f32 1.0, %v13126_v18  ;;  %v13127_v9 = vld [vmem:[#allocation43_spill] sm:$0xff]  ;;  %v13128_v22 = vld [vmem:[#allocation62_spill] sm:$0xff]  ;;  %v6423_v18 = vmul.f32 %v6399_v25, %v6351_v49  ;;  %6445 = vst [vmem:[%s12054_s10 + $0x18] sm:$0xff] %v6421_v42  ;;  %v6431_v12 = vmul.f32 %v6407_v8, %v6359_v14  ;;  %v6432_v27 = vmul.f32 %v6408_v53, %v6360_v23 }
 0x3e6   : > { %v6414_v54 = vadd.f32 1.0, %v13125_v34  ;;  %v6416_v39 = vadd.f32 1.0, %v13127_v9  ;;  %v6417_v15 = vadd.f32 1.0, %v13128_v22  ;;  %v6361_v46 = vld [vmem:[%s7666_s9 + $0x78] sm:$0xff]  ;;  %v6362_v38 = vld [vmem:[%s7666_s9 + $0x80] sm:$0xff]  ;;  %v6363_v45 = vld [vmem:[%s7666_s9 + $0x88] sm:$0xff]  ;;  %v6425_v9 = vmul.f32 %v6401_v36, %v6353_v50 }
 0x3e7   : > { %v6364_v32 = vld [vmem:[%s7666_s9 + $0x90] sm:$0xff]  ;;  %v6365_v1 = vld [vmem:[%s7666_s9 + $0x98] sm:$0xff]  ;;  %v6366_v34 = vld [vmem:[%s7666_s9 + $0xa0] sm:$0xff]  ;;  %6444 = vst [vmem:[%s12054_s10 + $0x10] sm:$0xff] %v6420_v33  ;;  %v6433_v4 = vmul.f32 %v6409_v29, %v6361_v46  ;;  %v6434_v0 = vmul.f32 %v6410_v11, %v6362_v38  ;;  %v6435_v60 = vmul.f32 %v6411_v21, %v6363_v45 }
 0x3e8   : > { %v6367_v57 = vld [vmem:[%s7666_s9 + $0xa8] sm:$0xff]  ;;  %v6368_v52 = vld [vmem:[%s7666_s9 + $0xb0] sm:$0xff]  ;;  %v6369_v22 = vld [vmem:[%s7666_s9 + $0xb8] sm:$0xff]  ;;  %6446 = vst [vmem:[%s12054_s10 + $0x20] sm:$0xff] %v6422_v28  ;;  %v6436_v40 = vmul.f32 %v6412_v30, %v6364_v32  ;;  %v6437_v42 = vmul.f32 %v6413_v6, %v6365_v1  ;;  %v6438_v28 = vmul.f32 %v6414_v54, %v6366_v34 }
 0x3e9   : > { %6447 = vst [vmem:[%s12054_s10 + $0x28] sm:$0xff] %v6423_v18  ;;  %6448 = vst [vmem:[%s12054_s10 + $0x30] sm:$0xff] %v6424_v55  ;;  %v6439_v23 = vmul.f32 %v6415_v59, %v6367_v57  ;;  %v6440_v55 = vmul.f32 %v6416_v39, %v6368_v52  ;;  %v6441_v58 = vmul.f32 %v6417_v15, %v6369_v22  ;;  %v6370_v52 = vld [vmem:[%s7666_s9 + $0xc0] sm:$0xff]  ;;  %v6371_v57 = vld [vmem:[%s7666_s9 + $0xc8] sm:$0xff] }
 0x3ea   : > { %6449 = vst [vmem:[%s12054_s10 + $0x38] sm:$0xff] %v6425_v9  ;;  %6450 = vst [vmem:[%s12054_s10 + $0x40] sm:$0xff] %v6426_v31  ;;  %v6469_v31 = vadd.f32 1.0, %v11926_v20  ;;  %v6372_v1 = vld [vmem:[%s7666_s9 + $0xd0] sm:$0xff]  ;;  %v6373_v32 = vld [vmem:[%s7666_s9 + $0xd8] sm:$0xff] }
 0x3eb   : > { %6451 = vst [vmem:[%s12054_s10 + $0x48] sm:$0xff] %v6427_v19  ;;  %6452 = vst [vmem:[%s12054_s10 + $0x50] sm:$0xff] %v6428_v7  ;;  %v6467_v7 = vadd.f32 1.0, %v11918_v48  ;;  %v6468_v19 = vadd.f32 1.0, %v11922_v51  ;;  %v13130_v38 = vld [vmem:[#allocation69_spill] sm:$0xff]  ;;  %v13131_v51 = vld [vmem:[#allocation19_spill] sm:$0xff] }
 0x3ec   : > { %6453 = vst [vmem:[%s12054_s10 + $0x58] sm:$0xff] %v6429_v10  ;;  %6454 = vst [vmem:[%s12054_s10 + $0x60] sm:$0xff] %v6430_v26  ;;  %v6466_v10 = vadd.f32 1.0, %v11906_v3  ;;  %v13129_v3 = vld [vmem:[#allocation67_spill] sm:$0xff]  ;;  %v6471_v39 = vadd.f32 1.0, %v13130_v38  ;;  %v6472_v59 = vadd.f32 1.0, %v13131_v51  ;;  %v6493_v38 = vmul.f32 %v6469_v31, %v6373_v32 }
 0x3ed   : > { %6455 = vst [vmem:[%s12054_s10 + $0x68] sm:$0xff] %v6431_v12  ;;  %6456 = vst [vmem:[%s12054_s10 + $0x70] sm:$0xff] %v6432_v27  ;;  %v6470_v48 = vadd.f32 1.0, %v13129_v3  ;;  %v13132_v43 = vld [vmem:[#allocation20_spill] sm:$0xff]  ;;  %v6374_v35 = vld [vmem:[%s7666_s9 + $0xe0] sm:$0xff]  ;;  %v6492_v3 = vmul.f32 %v6468_v19, %v6372_v1 }
 0x3ee   : > { %6457 = vst [vmem:[%s12054_s10 + $0x78] sm:$0xff] %v6433_v4  ;;  %6458 = vst [vmem:[%s12054_s10 + $0x80] sm:$0xff] %v6434_v0  ;;  %v6473_v20 = vadd.f32 1.0, %v13132_v43  ;;  %v6375_v62 = vld [vmem:[%s7666_s9 + $0xe8] sm:$0xff]  ;;  %v6376_v25 = vld [vmem:[%s7666_s9 + $0xf0] sm:$0xff] }
 0x3ef   : > { %6459 = vst [vmem:[%s12054_s10 + $0x88] sm:$0xff] %v6435_v60  ;;  %6460 = vst [vmem:[%s12054_s10 + $0x90] sm:$0xff] %v6436_v40  ;;  %v6377_v63 = vld [vmem:[%s7666_s9 + $0xf8] sm:$0xff]  ;;  %v13133_v36 = vld [vmem:[#allocation64_spill] sm:$0xff] }
 0x3f0   : > { %6461 = vst [vmem:[%s12054_s10 + $0x98] sm:$0xff] %v6437_v42  ;;  %6462 = vst [vmem:[%s12054_s10 + $0xa0] sm:$0xff] %v6438_v28  ;;  %v6474_v17 = vadd.f32 1.0, %v13133_v36  ;;  %v13134_v49 = vld [vmem:[#allocation63_spill] sm:$0xff]  ;;  %v13135_v50 = vld [vmem:[#allocation73_spill] sm:$0xff] }
 0x3f1   : > { %6463 = vst [vmem:[%s12054_s10 + $0xa8] sm:$0xff] %v6439_v23  ;;  %6464 = vst [vmem:[%s12054_s10 + $0xb0] sm:$0xff] %v6440_v55  ;;  %v6475_v61 = vadd.f32 1.0, %v13134_v49  ;;  %v6476_v47 = vadd.f32 1.0, %v13135_v50  ;;  %v13136_v56 = vld [vmem:[#allocation78_spill] sm:$0xff]  ;;  %v6379_v5 = vld [vmem:[%s7666_s9 + $0x108] sm:$0xff]  ;;  %v6490_v55 = vmul.f32 %v6466_v10, %v6370_v52  ;;  %v6494_v49 = vmul.f32 %v6470_v48, %v6374_v35 }
 0x3f2   : > { %6465 = vst [vmem:[%s12054_s10 + $0xb8] sm:$0xff] %v6441_v58  ;;  %v6477_v16 = vadd.f32 1.0, %v13136_v56  ;;  %v6378_v13 = vld [vmem:[%s7666_s9 + $0x100] sm:$0xff]  ;;  %v6380_v37 = vld [vmem:[%s7666_s9 + $0x110] sm:$0xff]  ;;  %v13137_v24 = vld [vmem:[#allocation21_spill] sm:$0xff]  ;;  %v6491_v58 = vmul.f32 %v6467_v7, %v6371_v57  ;;  %v6495_v50 = vmul.f32 %v6471_v39, %v6375_v62  ;;  %v6496_v56 = vmul.f32 %v6472_v59, %v6376_v25 }
 0x3f3   : > { %v6478_v44 = vadd.f32 1.0, %v13137_v24  ;;  %v13138_v8 = vld [vmem:[#allocation70_spill] sm:$0xff]  ;;  %v13139_v29 = vld [vmem:[#allocation68_spill] sm:$0xff]  ;;  %v6381_v21 = vld [vmem:[%s7666_s9 + $0x118] sm:$0xff]  ;;  %v6497_v24 = vmul.f32 %v6473_v20, %v6377_v63  ;;  %v6498_v19 = vmul.f32 %v6474_v17, %v6378_v13  ;;  %v6499_v31 = vmul.f32 %v6475_v61, %v6379_v5  ;;  %6514 = vst [vmem:[%s12054_s10 + $0xc0] sm:$0xff] %v6490_v55 }
 0x3f4   : > { %v6479_v53 = vadd.f32 1.0, %v13138_v8  ;;  %v6480_v2 = vadd.f32 1.0, %v13139_v29  ;;  %v13140_v41 = vld [vmem:[#allocation22_spill] sm:$0xff]  ;;  %v13141_v6 = vld [vmem:[#allocation72_spill] sm:$0xff]  ;;  %v13142_v54 = vld [vmem:[#allocation71_spill] sm:$0xff]  ;;  %v6500_v52 = vmul.f32 %v6476_v47, %v6380_v37  ;;  %v6501_v57 = vmul.f32 %v6477_v16, %v6381_v21  ;;  %6515 = vst [vmem:[%s12054_s10 + $0xc8] sm:$0xff] %v6491_v58 }
 0x3f5   : > { %v6481_v11 = vadd.f32 1.0, %v13140_v41  ;;  %v6382_v30 = vld [vmem:[%s7666_s9 + $0x120] sm:$0xff]  ;;  %v6482_v14 = vadd.f32 1.0, %v13141_v6  ;;  %v6483_v15 = vadd.f32 1.0, %v13142_v54  ;;  %v13143_v46 = vld [vmem:[#allocation79_spill] sm:$0xff]  ;;  %v6384_v9 = vld [vmem:[%s7666_s9 + $0x130] sm:$0xff] }
 0x3f6   : > { %v6484_v45 = vadd.f32 1.0, %v13143_v46  ;;  %v13144_v33 = vld [vmem:[#allocation23_spill] sm:$0xff]  ;;  %v13146_v12 = vld [vmem:[#allocation74_spill] sm:$0xff]  ;;  %v13147_v4 = vld [vmem:[#allocation24_spill] sm:$0xff]  ;;  %6516 = vst [vmem:[%s12054_s10 + $0xd0] sm:$0xff] %v6492_v3  ;;  %v6502_v1 = vmul.f32 %v6478_v44, %v6382_v30  ;;  %v6504_v48 = vmul.f32 %v6480_v2, %v6384_v9 }
 0x3f7   : > { %v6485_v34 = vadd.f32 1.0, %v13144_v33  ;;  %v6383_v18 = vld [vmem:[%s7666_s9 + $0x128] sm:$0xff]  ;;  %v6487_v27 = vadd.f32 1.0, %v13146_v12  ;;  %v6488_v0 = vadd.f32 1.0, %v13147_v4  ;;  %v13148_v60 = vld [vmem:[#allocation77_spill] sm:$0xff]  ;;  %v6386_v28 = vld [vmem:[%s7666_s9 + $0x140] sm:$0xff] }
 0x3f8   : > { %v13145_v22 = vld [vmem:[#allocation75_spill] sm:$0xff]  ;;  %v6489_v40 = vadd.f32 1.0, %v13148_v60  ;;  %v6385_v42 = vld [vmem:[%s7666_s9 + $0x138] sm:$0xff]  ;;  %v6388_v51 = vld [vmem:[%s7666_s9 + $0x150] sm:$0xff]  ;;  %6517 = vst [vmem:[%s12054_s10 + $0xd8] sm:$0xff] %v6493_v38  ;;  %v6503_v32 = vmul.f32 %v6479_v53, %v6383_v18  ;;  %v6506_v59 = vmul.f32 %v6482_v14, %v6386_v28 }
 0x3f9   : > { %v6486_v26 = vadd.f32 1.0, %v13145_v22  ;;  %v6387_v23 = vld [vmem:[%s7666_s9 + $0x148] sm:$0xff]  ;;  %v6389_v43 = vld [vmem:[%s7666_s9 + $0x158] sm:$0xff]  ;;  %v6390_v36 = vld [vmem:[%s7666_s9 + $0x160] sm:$0xff]  ;;  %v6505_v39 = vmul.f32 %v6481_v11, %v6385_v42  ;;  %6518 = vst [vmem:[%s12054_s10 + $0xe0] sm:$0xff] %v6494_v49  ;;  %v6508_v35 = vmul.f32 %v6484_v45, %v6388_v51 }
 0x3fa   : > { %v6391_v8 = vld [vmem:[%s7666_s9 + $0x168] sm:$0xff]  ;;  %v6392_v10 = vld [vmem:[%s7666_s9 + $0x170] sm:$0xff]  ;;  %v6393_v7 = vld [vmem:[%s7666_s9 + $0x178] sm:$0xff]  ;;  %6519 = vst [vmem:[%s12054_s10 + $0xe8] sm:$0xff] %v6495_v50  ;;  %v6507_v20 = vmul.f32 %v6483_v15, %v6387_v23  ;;  %v6509_v62 = vmul.f32 %v6485_v34, %v6389_v43 }
 0x3fb   : > { %6520 = vst [vmem:[%s12054_s10 + $0xf0] sm:$0xff] %v6496_v56  ;;  %6521 = vst [vmem:[%s12054_s10 + $0xf8] sm:$0xff] %v6497_v24  ;;  %v6510_v25 = vmul.f32 %v6486_v26, %v6390_v36  ;;  %v6511_v63 = vmul.f32 %v6487_v27, %v6391_v8  ;;  %v6512_v17 = vmul.f32 %v6488_v0, %v6392_v10 }
 0x3fc   : > { %6522 = vst [vmem:[%s12054_s10 + $0x100] sm:$0xff] %v6498_v19  ;;  %6523 = vst [vmem:[%s12054_s10 + $0x108] sm:$0xff] %v6499_v31  ;;  %v6513_v61 = vmul.f32 %v6489_v40, %v6393_v7 }
 0x3fd   : > { %6524 = vst [vmem:[%s12054_s10 + $0x110] sm:$0xff] %v6500_v52  ;;  %6525 = vst [vmem:[%s12054_s10 + $0x118] sm:$0xff] %v6501_v57 }
 0x3fe   : > { %6526 = vst [vmem:[%s12054_s10 + $0x120] sm:$0xff] %v6502_v1  ;;  %6527 = vst [vmem:[%s12054_s10 + $0x128] sm:$0xff] %v6503_v32 }
 0x3ff   : > { %6528 = vst [vmem:[%s12054_s10 + $0x130] sm:$0xff] %v6504_v48  ;;  %6529 = vst [vmem:[%s12054_s10 + $0x138] sm:$0xff] %v6505_v39 }
 0x400   : > { %6530 = vst [vmem:[%s12054_s10 + $0x140] sm:$0xff] %v6506_v59  ;;  %6531 = vst [vmem:[%s12054_s10 + $0x148] sm:$0xff] %v6507_v20 }
 0x401   : > { %6532 = vst [vmem:[%s12054_s10 + $0x150] sm:$0xff] %v6508_v35  ;;  %6533 = vst [vmem:[%s12054_s10 + $0x158] sm:$0xff] %v6509_v62 }
 0x402   : > { %6534 = vst [vmem:[%s12054_s10 + $0x160] sm:$0xff] %v6510_v25  ;;  %6535 = vst [vmem:[%s12054_s10 + $0x168] sm:$0xff] %v6511_v63 }
 0x403   : > { %6536 = vst [vmem:[%s12054_s10 + $0x170] sm:$0xff] %v6512_v17  ;;  %6537 = vst [vmem:[%s12054_s10 + $0x178] sm:$0xff] %v6513_v61 }
 0x404   : > { %7447 = shalt.err (!%p7444_p4)
}
 0x405   : > { %s7448_s5 = scalar_lea.hbm %s12147_s21, 6144  ;;  %s7452_s29 = scalar_lea.hbm %s12214_s2, 12288 }
 0x406   : > { %p7449_p6 = scmp.ne.s32.totalorder %s12147_s21, %s7448_s5  ;;  %p7453_p12 = scmp.lt.u32.totalorder %s12147_s21, %s12214_s2 }
 0x407   : > { %p7454_p1 = scmp.lt.u32.totalorder %s7452_s29, %s7448_s5  ;;  %p7456_p8 = scmp.lt.u32.totalorder %s7448_s5, %s12147_s21 }
 0x408   : > { %p7450_p7 = pnand %p7449_p6, %p13149_p9 }
 0x409   : > { %p7455_p3 = por %p7454_p1, %p7453_p12 }
 0x40a   : > { %p7451_p10 = pneg %p7450_p7 }
 0x40b   : > { %p7457_p11 = por %p7456_p8, %p7455_p3 }
 0x40d   : > { %p7458_p0 = pnand %p7457_p11, %p7451_p10 }
 0x40f   : > { %7461 = shalt.err (!%p7458_p0)
}
 0x410   : > { %s7528_s6 = smov 384   ;;  %s7529_s7 = smov 24  }
 0x411   : > { %7142 = dma.vmem_to_hbm [thread:$0]  (%p13149_p9), %s12151_s17, 6144, %s12147_s21, %s6539_s14, %s7528_s6, %s7528_s6, %s7529_s7  }
 0x412 PF: > { %s6570_s10 = sand.u32 1, %s7496_s11   ;;  %p13150_p5 = scmp.ne.s32.totalorder %s12503_s25, 0 }
 0x413   : > { %p13151_p13 = scmp.ge.s32.totalorder %s7516_s16, 2  ;;  %s6571_s0 = scalar_lea.sflag [#allocation6], %s6570_s10 }
 0x415   : > { %p7149_p2 = pnand %p13151_p13, %p13150_p5 }
 0x417   : > { %7491 = dma.done.wait (!%p7149_p2), %s6571_s0, 6144  }
 0x418   : > { %7493 = vsyncadd (!%p7149_p2), %s6571_s0, 4294961152  ;;  %s19_s16 = sadd.s32 1, %s7516_s16   ;;  %s13152_s11 = smov %s7500_s12 }
 0x419   : > { %p16_p4 = scmp.ge.s32.totalorder %s19_s16, 4   ;;  %s13153_s12 = smov %s7504_s13 }
 0x41a   : > { %s13154_s13 = smov %s7604_s24  ;;  %s13155_s14 = smov %s7512_s15 }
 0x41b   : > { %s13156_s15 = smov %s13158_s18  ;;  %18 = sbr.rel (!%p16_p4) target bundleno = 8 (0x8), region = 69 }
 0x422   :  { %6576 = vsyncpa [#allocation5], 1 }
 0x423   :  { %6578 = vsyncpa [#allocation5 + $0x1], 1 }
 0x424   :  { %6579 = vsyncpa [#allocation6], 1 }
 0x425   :  { %6581 = vsyncpa [#allocation6 + $0x1], 1 }

</bundles_post_ra>
